<compile_context>
chip_gen: v5e
topology: v5e:2x2
jax: 0.10.0
libtpu: 0.0.40
codegen_flags: <defaults>
</compile_context>

<pallas_src>
import functools

import jax
import jax.numpy as jnp
import numpy as np
from jax.experimental import pallas as pl
from jax.experimental.pallas import tpu as pltpu

EPS = 1e-5
INV_SQRT2 = np.float32(1.0 / np.sqrt(2.0))


def _gelu_exact(v):
    # nn.GELU() default (erf formulation).
    return 0.5 * v * (1.0 + jax.lax.erf(v * INV_SQRT2))


# ---------------- kernel 1: height MDLayer on the (B*H, W*D) view -----------
def _height_kernel(x_ref, kd_ref, kdt_ref, ln_ref, w1_ref, b1_ref, w2_ref,
                   b2_ref, o_ref, *, n_b, h, d):
    x = x_ref[...].astype(jnp.float32)                     # (n_b*H, W*D)
    inv_d = np.float32(1.0 / d)

    # LayerNorm over d (groups of D lanes) via exact 0/1 selector matmuls.
    kd = kd_ref[...]                                       # (W*D, W)
    kdt = kdt_ref[...]                                     # (W, W*D)
    mean = jnp.dot(jnp.dot(x, kd, preferred_element_type=jnp.float32),
                   kdt, preferred_element_type=jnp.float32) * inv_d
    cen = x - mean
    var = jnp.dot(jnp.dot(cen * cen, kd, preferred_element_type=jnp.float32),
                  kdt, preferred_element_type=jnp.float32) * inv_d
    xn = cen * jax.lax.rsqrt(var + EPS) * ln_ref[0:1, :] + ln_ref[1:2, :]

    mdt = w1_ref.dtype
    w1 = w1_ref[...]                                       # (E_h, H) true weights
    w2 = w2_ref[...]                                       # (H, E_h)
    b1 = b1_ref[...]                                       # (E_h, 1)
    b2 = b2_ref[...]                                       # (H, 1)
    for i in range(n_b):                                   # per batch element
        sl = slice(i * h, (i + 1) * h)
        t1 = jnp.dot(w1, xn[sl, :].astype(mdt),
                     preferred_element_type=jnp.float32) + b1   # (E_h, W*D)
        t1 = _gelu_exact(t1)
        t2 = jnp.dot(w2, t1.astype(mdt),
                     preferred_element_type=jnp.float32) + b2   # (H, W*D)
        o_ref[sl, :] = (x[sl, :] + t2).astype(o_ref.dtype)      # lane-dense store


# -------- kernel 2: width + token MDLayers on the (B*H*W, D) view -----------
def _width_token_kernel(x_ref, w1w_ref, b1w_ref, w2w_ref, b2w_ref,
                        w1d_ref, b1d_ref, w2d_ref, vec_ref, o_ref,
                        *, n_blk, wdim):
    x = x_ref[...].astype(jnp.float32)                     # (n_b*HW, D)
    mdt = w1w_ref.dtype

    def ln(v, g, b):
        mu = jnp.mean(v, axis=-1, keepdims=True)
        var = jnp.mean(jnp.square(v - mu), axis=-1, keepdims=True)
        return (v - mu) * jax.lax.rsqrt(var + EPS) * g + b

    # ---- width MDLayer: per-(batch, h) block of W rows, true weights ----
    xn = ln(x, vec_ref[0:1, :], vec_ref[1:2, :])
    w1w = w1w_ref[...]                                     # (E_w, W)
    w2w = w2w_ref[...]                                     # (W, E_w)
    b1w = b1w_ref[...]                                     # (E_w, 1)
    b2w = b2w_ref[...]                                     # (W, 1)
    blocks = []
    for k in range(n_blk):
        blk = xn[k * wdim:(k + 1) * wdim, :]               # (W, D)
        t1 = jnp.dot(w1w, blk.astype(mdt),
                     preferred_element_type=jnp.float32) + b1w  # (E_w, D)
        t1 = _gelu_exact(t1)
        t2 = jnp.dot(w2w, t1.astype(mdt),
                     preferred_element_type=jnp.float32) + b2w  # (W, D)
        blocks.append(t2)
    x = x + jnp.concatenate(blocks, axis=0)

    # ---- token MDLayer: one lane-dense matmul over the whole tile ----
    xn = ln(x, vec_ref[2:3, :], vec_ref[3:4, :])
    t1 = jnp.dot(xn.astype(mdt), w1d_ref[...],
                 preferred_element_type=jnp.float32) + b1d_ref[...]  # (M, E_d)
    t1 = _gelu_exact(t1)
    t2 = jnp.dot(t1.astype(mdt), w2d_ref[...],
                 preferred_element_type=jnp.float32) + vec_ref[4:5, :]
    o_ref[...] = (x + t2).astype(o_ref.dtype)


# ------------------------------ wrapper --------------------------------------
@functools.partial(jax.jit, static_argnames=("matmul_dtype", "batch_tile"))
def md_block_pallas(x, params, *, matmul_dtype=jnp.bfloat16, batch_tile=None):
    """Full MDBlock forward on x: (B, H, W, D) float32."""
    b, h, w, d = x.shape
    hw = h * w

    if batch_tile is None:
        batch_tile = 1
        for n in (4, 2, 1):                # biggest tile that still leaves >=2 steps
            if b % n == 0 and b // n >= 2:
                batch_tile = n
                break
    n_b = batch_tile
    assert b % n_b == 0
    assert (n_b * h) % 8 == 0 or n_b == b, "n_b*H must be a multiple of 8."
    assert (n_b * hw) % 8 == 0 or n_b == b, "n_b*H*W must be a multiple of 8."

    ph, pw_, pd = params["height"], params["width"], params["token"]
    e_h = ph["w1"].shape[1]
    e_w = pw_["w1"].shape[1]
    e_d = pd["w1"].shape[1]

    f32 = jnp.float32
    grid = (b // n_b,)
    const = lambda i: (0, 0)
    cparams = pltpu.CompilerParams(
        dimension_semantics=("parallel",),
        vmem_limit_bytes=8 * 1024 * 1024)   # actual footprint is ~1-2 MiB

    # --- kernel 1 constants (height layer) ---
    kd = jnp.repeat(jnp.eye(w, dtype=f32), d, axis=0)      # (W*D, W) 0/1 selector
    kdt = kd.T                                             # (W, W*D)
    ln_h = jnp.stack([jnp.tile(ph["gamma"], w),
                      jnp.tile(ph["beta"], w)])            # (2, W*D) packed
    w1h = ph["w1"].T.astype(matmul_dtype)                  # (E_h, H) true weights
    w2h = ph["w2"].T.astype(matmul_dtype)                  # (H, E_h)
    b1h = ph["b1"].reshape(e_h, 1)
    b2h = ph["b2"].reshape(h, 1)

    x1 = x.reshape(b * h, w * d)            # free, layout-identical HBM view
    y1 = pl.pallas_call(
        functools.partial(_height_kernel, n_b=n_b, h=h, d=d),
        out_shape=jax.ShapeDtypeStruct((b * h, w * d), x.dtype),
        grid=grid,
        in_specs=[
            pl.BlockSpec((n_b * h, w * d), lambda i: (i, 0)),
            pl.BlockSpec((w * d, w), const),
            pl.BlockSpec((w, w * d), const),
            pl.BlockSpec((2, w * d), const),
            pl.BlockSpec((e_h, h), const),
            pl.BlockSpec((e_h, 1), const),
            pl.BlockSpec((h, e_h), const),
            pl.BlockSpec((h, 1), const),
        ],
        out_specs=pl.BlockSpec((n_b * h, w * d), lambda i: (i, 0)),
        compiler_params=cparams,
    )(x1, kd, kdt, ln_h, w1h, b1h, w2h, b2h)

    # --- kernel 2 constants (width + token layers) ---
    w1w = pw_["w1"].T.astype(matmul_dtype)                 # (E_w, W) true weights
    w2w = pw_["w2"].T.astype(matmul_dtype)                 # (W, E_w)
    b1w = pw_["b1"].reshape(e_w, 1)
    b2w = pw_["b2"].reshape(w, 1)
    w1d = pd["w1"].astype(matmul_dtype)                    # (D, E_d)
    w2d = pd["w2"].astype(matmul_dtype)                    # (E_d, D)
    b1d = pd["b1"].reshape(1, e_d)
    vecs = jnp.stack([pw_["gamma"], pw_["beta"],
                      pd["gamma"], pd["beta"], pd["b2"]])  # (5, D) packed vectors

    x2 = y1.reshape(b * hw, d)              # same HBM buffer, d-minor view
    y2 = pl.pallas_call(
        functools.partial(_width_token_kernel, n_blk=n_b * h, wdim=w),
        out_shape=jax.ShapeDtypeStruct((b * hw, d), x.dtype),
        grid=grid,
        in_specs=[
            pl.BlockSpec((n_b * hw, d), lambda i: (i, 0)),
            pl.BlockSpec((e_w, w), const),
            pl.BlockSpec((e_w, 1), const),
            pl.BlockSpec((w, e_w), const),
            pl.BlockSpec((w, 1), const),
            pl.BlockSpec((d, e_d), const),
            pl.BlockSpec((1, e_d), const),
            pl.BlockSpec((e_d, d), const),
            pl.BlockSpec((5, d), const),
        ],
        out_specs=pl.BlockSpec((n_b * hw, d), lambda i: (i, 0)),
        input_output_aliases={0: 0},        # y1 is a consumed temp: write in place
        compiler_params=cparams,
    )(x2, w1w, b1w, w2w, b2w, w1d, b1d, w2d, vecs)

    return y2.reshape(b, h, w, d)


# ----------------------- parameters & reference ------------------------------
def init_md_layer_params(key, d, op_dim, expansion_factor=4):
    """Synthetic parameters with the PyTorch module's shapes.

    Linear weights are stored (in, out), so y = x @ W + b == x @ W_pt.T + b_pt.
    """
    k1, k2, k3, k4, k5, k6 = jax.random.split(key, 6)
    e = op_dim * expansion_factor
    s1 = 1.0 / np.sqrt(op_dim)
    s2 = 1.0 / np.sqrt(e)
    return dict(
        gamma=1.0 + 0.1 * jax.random.normal(k1, (d,), jnp.float32),
        beta=0.1 * jax.random.normal(k2, (d,), jnp.float32),
        w1=s1 * jax.random.normal(k3, (op_dim, e), jnp.float32),
        b1=s1 * jax.random.normal(k4, (e,), jnp.float32),
        w2=s2 * jax.random.normal(k5, (e, op_dim), jnp.float32),
        b2=s2 * jax.random.normal(k6, (op_dim,), jnp.float32),
    )


def _md_layer_ref(x, p, perm_fwd, perm_bwd, mdt):
    mean = x.mean(-1, keepdims=True)
    var = ((x - mean) ** 2).mean(-1, keepdims=True)
    xn = (x - mean) / jnp.sqrt(var + EPS) * p["gamma"] + p["beta"]
    xt = jnp.transpose(xn, perm_fwd)
    h1 = jnp.dot(xt.astype(mdt), p["w1"].astype(mdt),
                 preferred_element_type=jnp.float32) + p["b1"]
    h1 = jax.nn.gelu(h1, approximate=False)
    h2 = jnp.dot(h1.astype(mdt), p["w2"].astype(mdt),
                 preferred_element_type=jnp.float32) + p["b2"]
    return x + jnp.transpose(h2, perm_bwd)


def md_block_ref(x, params, matmul_dtype=jnp.float32):
    x = _md_layer_ref(x, params["height"], (0, 2, 3, 1), (0, 3, 1, 2), matmul_dtype)
    x = _md_layer_ref(x, params["width"], (0, 1, 3, 2), (0, 1, 3, 2), matmul_dtype)
    x = _md_layer_ref(x, params["token"], (0, 1, 2, 3), (0, 1, 2, 3), matmul_dtype)
    return x


# --------------------------------- main ---------------------------------------
if __name__ == "__main__":
    B, H, W, D = 2, 8, 16, 32
    EF = 4

    key = jax.random.PRNGKey(0)
    kx, kh, kw, kd = jax.random.split(key, 4)
    x = jax.random.normal(kx, (B, H, W, D), jnp.float32)

    params = {
        "height": init_md_layer_params(kh, D, H, EF),
        "width": init_md_layer_params(kw, D, W, EF),
        "token": init_md_layer_params(kd, D, D, EF),
    }

    # Module-semantics (f32) reference.
    ref_f32 = jax.block_until_ready(md_block_ref(x, params))

    # 1) Exact-precision path: proves the restructured algorithm matches.
    out_f32 = jax.block_until_ready(
        md_block_pallas(x, params, matmul_dtype=jnp.float32))
    np.testing.assert_allclose(np.asarray(out_f32), np.asarray(ref_f32),
                               rtol=1e-3, atol=1e-3)

    # 2) Performance default: bf16 MXU operands / f32 accumulation, compared
    #    like-for-like against a bf16-matmul reference (same rounding model).
    out_bf16 = jax.block_until_ready(md_block_pallas(x, params))
    ref_bf16 = jax.block_until_ready(
        md_block_ref(x, params, matmul_dtype=jnp.bfloat16))
    np.testing.assert_allclose(np.asarray(out_bf16), np.asarray(ref_bf16),
                               rtol=2e-2, atol=2e-2)

    print("KERNEL_OK")
</pallas_src>

<mosaic_0001>
module attributes {stable_mosaic.version = 11 : i64} {
  func.func @_height_kernel(%arg0: i32, %arg1: memref<8x512xf32, #tpu.memory_space<vmem>>, %arg2: memref<512x16xf32, #tpu.memory_space<vmem>>, %arg3: memref<16x512xf32, #tpu.memory_space<vmem>>, %arg4: memref<2x512xf32, #tpu.memory_space<vmem>>, %arg5: memref<32x8xf32, #tpu.memory_space<vmem>>, %arg6: memref<32x1xf32, #tpu.memory_space<vmem>>, %arg7: memref<8x32xf32, #tpu.memory_space<vmem>>, %arg8: memref<8x1xf32, #tpu.memory_space<vmem>>, %arg9: memref<8x512xf32, #tpu.memory_space<vmem>>) attributes {dimension_semantics = [#tpu.dimension_semantics<parallel>], iteration_bounds = array<i64: 2>, scalar_prefetch = 0 : i64, scratch_operands = 0 : i64, tpu.core_type = #tpu.core_type<tc>, window_params = [{transform_indices = @transform_0, window_bounds = array<i64: 8, 512>}, {pipeline_mode = #tpu.pipeline_mode<synchronous>, transform_indices = @transform_1, window_bounds = array<i64: 512, 16>}, {pipeline_mode = #tpu.pipeline_mode<synchronous>, transform_indices = @transform_2, window_bounds = array<i64: 16, 512>}, {pipeline_mode = #tpu.pipeline_mode<synchronous>, transform_indices = @transform_3, window_bounds = array<i64: 2, 512>}, {pipeline_mode = #tpu.pipeline_mode<synchronous>, transform_indices = @transform_4, window_bounds = array<i64: 32, 8>}, {pipeline_mode = #tpu.pipeline_mode<synchronous>, transform_indices = @transform_5, window_bounds = array<i64: 32, 1>}, {pipeline_mode = #tpu.pipeline_mode<synchronous>, transform_indices = @transform_6, window_bounds = array<i64: 8, 32>}, {pipeline_mode = #tpu.pipeline_mode<synchronous>, transform_indices = @transform_7, window_bounds = array<i64: 8, 1>}, {transform_indices = @transform_8, window_bounds = array<i64: 8, 512>}]} {
    %c0 = arith.constant 0 : index
    %c0_0 = arith.constant 0 : index
    %0 = vector.load %arg1[%c0, %c0_0] : memref<8x512xf32, #tpu.memory_space<vmem>>, vector<8x512xf32>
    %c0_1 = arith.constant 0 : index
    %c0_2 = arith.constant 0 : index
    %1 = vector.load %arg2[%c0_1, %c0_2] : memref<512x16xf32, #tpu.memory_space<vmem>>, vector<512x16xf32>
    %c0_3 = arith.constant 0 : index
    %c0_4 = arith.constant 0 : index
    %2 = vector.load %arg3[%c0_3, %c0_4] : memref<16x512xf32, #tpu.memory_space<vmem>>, vector<16x512xf32>
    %cst = arith.constant dense<0.000000e+00> : vector<8x16xf32>
    %3 = tpu.matmul %0, %1, %cst {dimension_numbers = #tpu.dot_dimension_numbers<[1], [0], [0], [1], [0, 0, 1, 1], [], []>} : vector<8x512xf32>, vector<512x16xf32>, vector<8x16xf32> -> vector<8x16xf32>
    %cst_5 = arith.constant dense<0.000000e+00> : vector<8x512xf32>
    %4 = tpu.matmul %3, %2, %cst_5 {dimension_numbers = #tpu.dot_dimension_numbers<[1], [0], [0], [1], [0, 0, 1, 1], [], []>} : vector<8x16xf32>, vector<16x512xf32>, vector<8x512xf32> -> vector<8x512xf32>
    %cst_6 = arith.constant 3.125000e-02 : f32
    %5 = vector.broadcast %cst_6 : f32 to vector<8x512xf32>
    %6 = arith.mulf %4, %5 : vector<8x512xf32>
    %7 = arith.subf %0, %6 : vector<8x512xf32>
    %8 = arith.mulf %7, %7 : vector<8x512xf32>
    %cst_7 = arith.constant dense<0.000000e+00> : vector<8x16xf32>
    %9 = tpu.matmul %8, %1, %cst_7 {dimension_numbers = #tpu.dot_dimension_numbers<[1], [0], [0], [1], [0, 0, 1, 1], [], []>} : vector<8x512xf32>, vector<512x16xf32>, vector<8x16xf32> -> vector<8x16xf32>
    %cst_8 = arith.constant dense<0.000000e+00> : vector<8x512xf32>
    %10 = tpu.matmul %9, %2, %cst_8 {dimension_numbers = #tpu.dot_dimension_numbers<[1], [0], [0], [1], [0, 0, 1, 1], [], []>} : vector<8x16xf32>, vector<16x512xf32>, vector<8x512xf32> -> vector<8x512xf32>
    %cst_9 = arith.constant 3.125000e-02 : f32
    %11 = vector.broadcast %cst_9 : f32 to vector<8x512xf32>
    %12 = arith.mulf %10, %11 : vector<8x512xf32>
    %cst_10 = arith.constant 9.99999974E-6 : f32
    %13 = vector.broadcast %cst_10 : f32 to vector<8x512xf32>
    %14 = arith.addf %12, %13 : vector<8x512xf32>
    %15 = math.rsqrt %14 : vector<8x512xf32>
    %16 = arith.mulf %7, %15 : vector<8x512xf32>
    %c0_11 = arith.constant 0 : index
    %c0_12 = arith.constant 0 : index
    %17 = vector.load %arg4[%c0_11, %c0_12] : memref<2x512xf32, #tpu.memory_space<vmem>>, vector<1x512xf32>
    %18 = vector.broadcast %17 : vector<1x512xf32> to vector<8x512xf32>
    %19 = arith.mulf %16, %18 : vector<8x512xf32>
    %c1 = arith.constant 1 : index
    %c0_13 = arith.constant 0 : index
    %20 = vector.load %arg4[%c1, %c0_13] : memref<2x512xf32, #tpu.memory_space<vmem>>, vector<1x512xf32>
    %21 = vector.broadcast %20 : vector<1x512xf32> to vector<8x512xf32>
    %22 = arith.addf %19, %21 : vector<8x512xf32>
    %c0_14 = arith.constant 0 : index
    %c0_15 = arith.constant 0 : index
    %23 = vector.load %arg5[%c0_14, %c0_15] : memref<32x8xf32, #tpu.memory_space<vmem>>, vector<32x8xf32>
    %c0_16 = arith.constant 0 : index
    %c0_17 = arith.constant 0 : index
    %24 = vector.load %arg7[%c0_16, %c0_17] : memref<8x32xf32, #tpu.memory_space<vmem>>, vector<8x32xf32>
    %c0_18 = arith.constant 0 : index
    %c0_19 = arith.constant 0 : index
    %25 = vector.load %arg6[%c0_18, %c0_19] : memref<32x1xf32, #tpu.memory_space<vmem>>, vector<32x1xf32>
    %c0_20 = arith.constant 0 : index
    %c0_21 = arith.constant 0 : index
    %26 = vector.load %arg8[%c0_20, %c0_21] : memref<8x1xf32, #tpu.memory_space<vmem>>, vector<8x1xf32>
    %cst_22 = arith.constant dense<0.000000e+00> : vector<32x512xf32>
    %27 = tpu.matmul %23, %22, %cst_22 {dimension_numbers = #tpu.dot_dimension_numbers<[1], [0], [0], [1], [0, 0, 1, 1], [], []>} : vector<32x8xf32>, vector<8x512xf32>, vector<32x512xf32> -> vector<32x512xf32>
    %28 = vector.broadcast %25 : vector<32x1xf32> to vector<32x512xf32>
    %29 = arith.addf %27, %28 : vector<32x512xf32>
    %cst_23 = arith.constant 5.000000e-01 : f32
    %30 = vector.broadcast %cst_23 : f32 to vector<32x512xf32>
    %31 = arith.mulf %30, %29 : vector<32x512xf32>
    %cst_24 = arith.constant 0.707106769 : f32
    %32 = vector.broadcast %cst_24 : f32 to vector<32x512xf32>
    %33 = arith.mulf %29, %32 : vector<32x512xf32>
    %34 = math.erf %33 : vector<32x512xf32>
    %cst_25 = arith.constant 1.000000e+00 : f32
    %35 = vector.broadcast %cst_25 : f32 to vector<32x512xf32>
    %36 = arith.addf %35, %34 : vector<32x512xf32>
    %37 = arith.mulf %31, %36 : vector<32x512xf32>
    %cst_26 = arith.constant dense<0.000000e+00> : vector<8x512xf32>
    %38 = tpu.matmul %24, %37, %cst_26 {dimension_numbers = #tpu.dot_dimension_numbers<[1], [0], [0], [1], [0, 0, 1, 1], [], []>} : vector<8x32xf32>, vector<32x512xf32>, vector<8x512xf32> -> vector<8x512xf32>
    %39 = vector.broadcast %26 : vector<8x1xf32> to vector<8x512xf32>
    %40 = arith.addf %38, %39 : vector<8x512xf32>
    %41 = arith.addf %0, %40 : vector<8x512xf32>
    %c0_27 = arith.constant 0 : index
    %c0_28 = arith.constant 0 : index
    %42 = vector.load %arg9[%c0_27, %c0_28] : memref<8x512xf32, #tpu.memory_space<vmem>>, vector<8x512xf32>
    tpu.vector_store %arg9[%c0_27, %c0_28], %41 {strides = array<i32>} : memref<8x512xf32, #tpu.memory_space<vmem>>, vector<8x512xf32>,
    return
  }
  func.func @transform_0(%arg0: i32) -> (i32, i32) {
    %c0_i32 = arith.constant 0 : i32
    %c0_i32_0 = arith.constant 0 : i32
    return %arg0, %c0_i32 : i32, i32
  }
  func.func @transform_1(%arg0: i32) -> (i32, i32) {
    %c0_i32 = arith.constant 0 : i32
    %c0_i32_0 = arith.constant 0 : i32
    %c0_i32_1 = arith.constant 0 : i32
    return %c0_i32, %c0_i32_0 : i32, i32
  }
  func.func @transform_2(%arg0: i32) -> (i32, i32) {
    %c0_i32 = arith.constant 0 : i32
    %c0_i32_0 = arith.constant 0 : i32
    %c0_i32_1 = arith.constant 0 : i32
    return %c0_i32, %c0_i32_0 : i32, i32
  }
  func.func @transform_3(%arg0: i32) -> (i32, i32) {
    %c0_i32 = arith.constant 0 : i32
    %c0_i32_0 = arith.constant 0 : i32
    %c0_i32_1 = arith.constant 0 : i32
    return %c0_i32, %c0_i32_0 : i32, i32
  }
  func.func @transform_4(%arg0: i32) -> (i32, i32) {
    %c0_i32 = arith.constant 0 : i32
    %c0_i32_0 = arith.constant 0 : i32
    %c0_i32_1 = arith.constant 0 : i32
    return %c0_i32, %c0_i32_0 : i32, i32
  }
  func.func @transform_5(%arg0: i32) -> (i32, i32) {
    %c0_i32 = arith.constant 0 : i32
    %c0_i32_0 = arith.constant 0 : i32
    %c0_i32_1 = arith.constant 0 : i32
    return %c0_i32, %c0_i32_0 : i32, i32
  }
  func.func @transform_6(%arg0: i32) -> (i32, i32) {
    %c0_i32 = arith.constant 0 : i32
    %c0_i32_0 = arith.constant 0 : i32
    %c0_i32_1 = arith.constant 0 : i32
    return %c0_i32, %c0_i32_0 : i32, i32
  }
  func.func @transform_7(%arg0: i32) -> (i32, i32) {
    %c0_i32 = arith.constant 0 : i32
    %c0_i32_0 = arith.constant 0 : i32
    %c0_i32_1 = arith.constant 0 : i32
    return %c0_i32, %c0_i32_0 : i32, i32
  }
  func.func @transform_8(%arg0: i32) -> (i32, i32) {
    %c0_i32 = arith.constant 0 : i32
    %c0_i32_0 = arith.constant 0 : i32
    return %arg0, %c0_i32 : i32, i32
  }
}

module attributes {stable_mosaic.version = 11 : i64} {
  func.func @_width_token_kernel(%arg0: i32, %arg1: memref<128x32xf32, #tpu.memory_space<vmem>>, %arg2: memref<64x16xf32, #tpu.memory_space<vmem>>, %arg3: memref<64x1xf32, #tpu.memory_space<vmem>>, %arg4: memref<16x64xf32, #tpu.memory_space<vmem>>, %arg5: memref<16x1xf32, #tpu.memory_space<vmem>>, %arg6: memref<32x128xf32, #tpu.memory_space<vmem>>, %arg7: memref<1x128xf32, #tpu.memory_space<vmem>>, %arg8: memref<128x32xf32, #tpu.memory_space<vmem>>, %arg9: memref<5x32xf32, #tpu.memory_space<vmem>>, %arg10: memref<128x32xf32, #tpu.memory_space<vmem>>) attributes {dimension_semantics = [#tpu.dimension_semantics<parallel>], iteration_bounds = array<i64: 2>, scalar_prefetch = 0 : i64, scratch_operands = 0 : i64, tpu.core_type = #tpu.core_type<tc>, window_params = [{transform_indices = @transform_0, window_bounds = array<i64: 128, 32>}, {pipeline_mode = #tpu.pipeline_mode<synchronous>, transform_indices = @transform_1, window_bounds = array<i64: 64, 16>}, {pipeline_mode = #tpu.pipeline_mode<synchronous>, transform_indices = @transform_2, window_bounds = array<i64: 64, 1>}, {pipeline_mode = #tpu.pipeline_mode<synchronous>, transform_indices = @transform_3, window_bounds = array<i64: 16, 64>}, {pipeline_mode = #tpu.pipeline_mode<synchronous>, transform_indices = @transform_4, window_bounds = array<i64: 16, 1>}, {pipeline_mode = #tpu.pipeline_mode<synchronous>, transform_indices = @transform_5, window_bounds = array<i64: 32, 128>}, {pipeline_mode = #tpu.pipeline_mode<synchronous>, transform_indices = @transform_6, window_bounds = array<i64: 1, 128>}, {pipeline_mode = #tpu.pipeline_mode<synchronous>, transform_indices = @transform_7, window_bounds = array<i64: 128, 32>}, {pipeline_mode = #tpu.pipeline_mode<synchronous>, transform_indices = @transform_8, window_bounds = array<i64: 5, 32>}, {transform_indices = @transform_9, window_bounds = array<i64: 128, 32>}]} {
    %c0 = arith.constant 0 : index
    %c0_0 = arith.constant 0 : index
    %0 = vector.load %arg1[%c0, %c0_0] : memref<128x32xf32, #tpu.memory_space<vmem>>, vector<128x32xf32>
    %c0_1 = arith.constant 0 : index
    %c0_2 = arith.constant 0 : index
    %1 = vector.load %arg9[%c0_1, %c0_2] : memref<5x32xf32, #tpu.memory_space<vmem>>, vector<1x32xf32>
    %c1 = arith.constant 1 : index
    %c0_3 = arith.constant 0 : index
    %2 = vector.load %arg9[%c1, %c0_3] : memref<5x32xf32, #tpu.memory_space<vmem>>, vector<1x32xf32>
    %cst = arith.constant dense<0.000000e+00> : vector<128xf32>
    %3 = vector.multi_reduction <add>, %0, %cst [1] : vector<128x32xf32> to vector<128xf32>
    %4 = vector.shape_cast %3 : vector<128xf32> to vector<128x1xf32>
    %cst_4 = arith.constant 3.200000e+01 : f32
    %5 = vector.broadcast %cst_4 : f32 to vector<128x1xf32>
    %6 = arith.divf %4, %5 : vector<128x1xf32>
    %7 = vector.broadcast %6 : vector<128x1xf32> to vector<128x32xf32>
    %8 = arith.subf %0, %7 : vector<128x32xf32>
    %9 = arith.mulf %8, %8 : vector<128x32xf32>
    %cst_5 = arith.constant dense<0.000000e+00> : vector<128xf32>
    %10 = vector.multi_reduction <add>, %9, %cst_5 [1] : vector<128x32xf32> to vector<128xf32>
    %11 = vector.shape_cast %10 : vector<128xf32> to vector<128x1xf32>
    %cst_6 = arith.constant 3.200000e+01 : f32
    %12 = vector.broadcast %cst_6 : f32 to vector<128x1xf32>
    %13 = arith.divf %11, %12 : vector<128x1xf32>
    %14 = vector.broadcast %6 : vector<128x1xf32> to vector<128x32xf32>
    %15 = arith.subf %0, %14 : vector<128x32xf32>
    %cst_7 = arith.constant 9.99999974E-6 : f32
    %16 = vector.broadcast %cst_7 : f32 to vector<128x1xf32>
    %17 = arith.addf %13, %16 : vector<128x1xf32>
    %18 = math.rsqrt %17 : vector<128x1xf32>
    %19 = vector.broadcast %18 : vector<128x1xf32> to vector<128x32xf32>
    %20 = arith.mulf %15, %19 : vector<128x32xf32>
    %21 = vector.broadcast %1 : vector<1x32xf32> to vector<128x32xf32>
    %22 = arith.mulf %20, %21 : vector<128x32xf32>
    %23 = vector.broadcast %2 : vector<1x32xf32> to vector<128x32xf32>
    %24 = arith.addf %22, %23 : vector<128x32xf32>
    %c0_8 = arith.constant 0 : index
    %c0_9 = arith.constant 0 : index
    %25 = vector.load %arg2[%c0_8, %c0_9] : memref<64x16xf32, #tpu.memory_space<vmem>>, vector<64x16xf32>
    %c0_10 = arith.constant 0 : index
    %c0_11 = arith.constant 0 : index
    %26 = vector.load %arg4[%c0_10, %c0_11] : memref<16x64xf32, #tpu.memory_space<vmem>>, vector<16x64xf32>
    %c0_12 = arith.constant 0 : index
    %c0_13 = arith.constant 0 : index
    %27 = vector.load %arg3[%c0_12, %c0_13] : memref<64x1xf32, #tpu.memory_space<vmem>>, vector<64x1xf32>
    %c0_14 = arith.constant 0 : index
    %c0_15 = arith.constant 0 : index
    %28 = vector.load %arg5[%c0_14, %c0_15] : memref<16x1xf32, #tpu.memory_space<vmem>>, vector<16x1xf32>
    %29 = vector.extract_strided_slice %24 {offsets = [0, 0], sizes = [16, 32], strides = [1, 1]} : vector<128x32xf32> to vector<16x32xf32>
    %cst_16 = arith.constant dense<0.000000e+00> : vector<64x32xf32>
    %30 = tpu.matmul %25, %29, %cst_16 {dimension_numbers = #tpu.dot_dimension_numbers<[1], [0], [0], [1], [0, 0, 1, 1], [], []>} : vector<64x16xf32>, vector<16x32xf32>, vector<64x32xf32> -> vector<64x32xf32>
    %31 = vector.broadcast %27 : vector<64x1xf32> to vector<64x32xf32>
    %32 = arith.addf %30, %31 : vector<64x32xf32>
    %cst_17 = arith.constant 5.000000e-01 : f32
    %33 = vector.broadcast %cst_17 : f32 to vector<64x32xf32>
    %34 = arith.mulf %33, %32 : vector<64x32xf32>
    %cst_18 = arith.constant 0.707106769 : f32
    %35 = vector.broadcast %cst_18 : f32 to vector<64x32xf32>
    %36 = arith.mulf %32, %35 : vector<64x32xf32>
    %37 = math.erf %36 : vector<64x32xf32>
    %cst_19 = arith.constant 1.000000e+00 : f32
    %38 = vector.broadcast %cst_19 : f32 to vector<64x32xf32>
    %39 = arith.addf %38, %37 : vector<64x32xf32>
    %40 = arith.mulf %34, %39 : vector<64x32xf32>
    %cst_20 = arith.constant dense<0.000000e+00> : vector<16x32xf32>
    %41 = tpu.matmul %26, %40, %cst_20 {dimension_numbers = #tpu.dot_dimension_numbers<[1], [0], [0], [1], [0, 0, 1, 1], [], []>} : vector<16x64xf32>, vector<64x32xf32>, vector<16x32xf32> -> vector<16x32xf32>
    %42 = vector.broadcast %28 : vector<16x1xf32> to vector<16x32xf32>
    %43 = arith.addf %41, %42 : vector<16x32xf32>
    %44 = vector.extract_strided_slice %24 {offsets = [16, 0], sizes = [16, 32], strides = [1, 1]} : vector<128x32xf32> to vector<16x32xf32>
    %cst_21 = arith.constant dense<0.000000e+00> : vector<64x32xf32>
    %45 = tpu.matmul %25, %44, %cst_21 {dimension_numbers = #tpu.dot_dimension_numbers<[1], [0], [0], [1], [0, 0, 1, 1], [], []>} : vector<64x16xf32>, vector<16x32xf32>, vector<64x32xf32> -> vector<64x32xf32>
    %46 = vector.broadcast %27 : vector<64x1xf32> to vector<64x32xf32>
    %47 = arith.addf %45, %46 : vector<64x32xf32>
    %cst_22 = arith.constant 5.000000e-01 : f32
    %48 = vector.broadcast %cst_22 : f32 to vector<64x32xf32>
    %49 = arith.mulf %48, %47 : vector<64x32xf32>
    %cst_23 = arith.constant 0.707106769 : f32
    %50 = vector.broadcast %cst_23 : f32 to vector<64x32xf32>
    %51 = arith.mulf %47, %50 : vector<64x32xf32>
    %52 = math.erf %51 : vector<64x32xf32>
    %cst_24 = arith.constant 1.000000e+00 : f32
    %53 = vector.broadcast %cst_24 : f32 to vector<64x32xf32>
    %54 = arith.addf %53, %52 : vector<64x32xf32>
    %55 = arith.mulf %49, %54 : vector<64x32xf32>
    %cst_25 = arith.constant dense<0.000000e+00> : vector<16x32xf32>
    %56 = tpu.matmul %26, %55, %cst_25 {dimension_numbers = #tpu.dot_dimension_numbers<[1], [0], [0], [1], [0, 0, 1, 1], [], []>} : vector<16x64xf32>, vector<64x32xf32>, vector<16x32xf32> -> vector<16x32xf32>
    %57 = vector.broadcast %28 : vector<16x1xf32> to vector<16x32xf32>
    %58 = arith.addf %56, %57 : vector<16x32xf32>
    %59 = vector.extract_strided_slice %24 {offsets = [32, 0], sizes = [16, 32], strides = [1, 1]} : vector<128x32xf32> to vector<16x32xf32>
    %cst_26 = arith.constant dense<0.000000e+00> : vector<64x32xf32>
    %60 = tpu.matmul %25, %59, %cst_26 {dimension_numbers = #tpu.dot_dimension_numbers<[1], [0], [0], [1], [0, 0, 1, 1], [], []>} : vector<64x16xf32>, vector<16x32xf32>, vector<64x32xf32> -> vector<64x32xf32>
    %61 = vector.broadcast %27 : vector<64x1xf32> to vector<64x32xf32>
    %62 = arith.addf %60, %61 : vector<64x32xf32>
    %cst_27 = arith.constant 5.000000e-01 : f32
    %63 = vector.broadcast %cst_27 : f32 to vector<64x32xf32>
    %64 = arith.mulf %63, %62 : vector<64x32xf32>
    %cst_28 = arith.constant 0.707106769 : f32
    %65 = vector.broadcast %cst_28 : f32 to vector<64x32xf32>
    %66 = arith.mulf %62, %65 : vector<64x32xf32>
    %67 = math.erf %66 : vector<64x32xf32>
    %cst_29 = arith.constant 1.000000e+00 : f32
    %68 = vector.broadcast %cst_29 : f32 to vector<64x32xf32>
    %69 = arith.addf %68, %67 : vector<64x32xf32>
    %70 = arith.mulf %64, %69 : vector<64x32xf32>
    %cst_30 = arith.constant dense<0.000000e+00> : vector<16x32xf32>
    %71 = tpu.matmul %26, %70, %cst_30 {dimension_numbers = #tpu.dot_dimension_numbers<[1], [0], [0], [1], [0, 0, 1, 1], [], []>} : vector<16x64xf32>, vector<64x32xf32>, vector<16x32xf32> -> vector<16x32xf32>
    %72 = vector.broadcast %28 : vector<16x1xf32> to vector<16x32xf32>
    %73 = arith.addf %71, %72 : vector<16x32xf32>
    %74 = vector.extract_strided_slice %24 {offsets = [48, 0], sizes = [16, 32], strides = [1, 1]} : vector<128x32xf32> to vector<16x32xf32>
    %cst_31 = arith.constant dense<0.000000e+00> : vector<64x32xf32>
    %75 = tpu.matmul %25, %74, %cst_31 {dimension_numbers = #tpu.dot_dimension_numbers<[1], [0], [0], [1], [0, 0, 1, 1], [], []>} : vector<64x16xf32>, vector<16x32xf32>, vector<64x32xf32> -> vector<64x32xf32>
    %76 = vector.broadcast %27 : vector<64x1xf32> to vector<64x32xf32>
    %77 = arith.addf %75, %76 : vector<64x32xf32>
    %cst_32 = arith.constant 5.000000e-01 : f32
    %78 = vector.broadcast %cst_32 : f32 to vector<64x32xf32>
    %79 = arith.mulf %78, %77 : vector<64x32xf32>
    %cst_33 = arith.constant 0.707106769 : f32
    %80 = vector.broadcast %cst_33 : f32 to vector<64x32xf32>
    %81 = arith.mulf %77, %80 : vector<64x32xf32>
    %82 = math.erf %81 : vector<64x32xf32>
    %cst_34 = arith.constant 1.000000e+00 : f32
    %83 = vector.broadcast %cst_34 : f32 to vector<64x32xf32>
    %84 = arith.addf %83, %82 : vector<64x32xf32>
    %85 = arith.mulf %79, %84 : vector<64x32xf32>
    %cst_35 = arith.constant dense<0.000000e+00> : vector<16x32xf32>
    %86 = tpu.matmul %26, %85, %cst_35 {dimension_numbers = #tpu.dot_dimension_numbers<[1], [0], [0], [1], [0, 0, 1, 1], [], []>} : vector<16x64xf32>, vector<64x32xf32>, vector<16x32xf32> -> vector<16x32xf32>
    %87 = vector.broadcast %28 : vector<16x1xf32> to vector<16x32xf32>
    %88 = arith.addf %86, %87 : vector<16x32xf32>
    %89 = vector.extract_strided_slice %24 {offsets = [64, 0], sizes = [16, 32], strides = [1, 1]} : vector<128x32xf32> to vector<16x32xf32>
    %cst_36 = arith.constant dense<0.000000e+00> : vector<64x32xf32>
    %90 = tpu.matmul %25, %89, %cst_36 {dimension_numbers = #tpu.dot_dimension_numbers<[1], [0], [0], [1], [0, 0, 1, 1], [], []>} : vector<64x16xf32>, vector<16x32xf32>, vector<64x32xf32> -> vector<64x32xf32>
    %91 = vector.broadcast %27 : vector<64x1xf32> to vector<64x32xf32>
    %92 = arith.addf %90, %91 : vector<64x32xf32>
    %cst_37 = arith.constant 5.000000e-01 : f32
    %93 = vector.broadcast %cst_37 : f32 to vector<64x32xf32>
    %94 = arith.mulf %93, %92 : vector<64x32xf32>
    %cst_38 = arith.constant 0.707106769 : f32
    %95 = vector.broadcast %cst_38 : f32 to vector<64x32xf32>
    %96 = arith.mulf %92, %95 : vector<64x32xf32>
    %97 = math.erf %96 : vector<64x32xf32>
    %cst_39 = arith.constant 1.000000e+00 : f32
    %98 = vector.broadcast %cst_39 : f32 to vector<64x32xf32>
    %99 = arith.addf %98, %97 : vector<64x32xf32>
    %100 = arith.mulf %94, %99 : vector<64x32xf32>
    %cst_40 = arith.constant dense<0.000000e+00> : vector<16x32xf32>
    %101 = tpu.matmul %26, %100, %cst_40 {dimension_numbers = #tpu.dot_dimension_numbers<[1], [0], [0], [1], [0, 0, 1, 1], [], []>} : vector<16x64xf32>, vector<64x32xf32>, vector<16x32xf32> -> vector<16x32xf32>
    %102 = vector.broadcast %28 : vector<16x1xf32> to vector<16x32xf32>
    %103 = arith.addf %101, %102 : vector<16x32xf32>
    %104 = vector.extract_strided_slice %24 {offsets = [80, 0], sizes = [16, 32], strides = [1, 1]} : vector<128x32xf32> to vector<16x32xf32>
    %cst_41 = arith.constant dense<0.000000e+00> : vector<64x32xf32>
    %105 = tpu.matmul %25, %104, %cst_41 {dimension_numbers = #tpu.dot_dimension_numbers<[1], [0], [0], [1], [0, 0, 1, 1], [], []>} : vector<64x16xf32>, vector<16x32xf32>, vector<64x32xf32> -> vector<64x32xf32>
    %106 = vector.broadcast %27 : vector<64x1xf32> to vector<64x32xf32>
    %107 = arith.addf %105, %106 : vector<64x32xf32>
    %cst_42 = arith.constant 5.000000e-01 : f32
    %108 = vector.broadcast %cst_42 : f32 to vector<64x32xf32>
    %109 = arith.mulf %108, %107 : vector<64x32xf32>
    %cst_43 = arith.constant 0.707106769 : f32
    %110 = vector.broadcast %cst_43 : f32 to vector<64x32xf32>
    %111 = arith.mulf %107, %110 : vector<64x32xf32>
    %112 = math.erf %111 : vector<64x32xf32>
    %cst_44 = arith.constant 1.000000e+00 : f32
    %113 = vector.broadcast %cst_44 : f32 to vector<64x32xf32>
    %114 = arith.addf %113, %112 : vector<64x32xf32>
    %115 = arith.mulf %109, %114 : vector<64x32xf32>
    %cst_45 = arith.constant dense<0.000000e+00> : vector<16x32xf32>
    %116 = tpu.matmul %26, %115, %cst_45 {dimension_numbers = #tpu.dot_dimension_numbers<[1], [0], [0], [1], [0, 0, 1, 1], [], []>} : vector<16x64xf32>, vector<64x32xf32>, vector<16x32xf32> -> vector<16x32xf32>
    %117 = vector.broadcast %28 : vector<16x1xf32> to vector<16x32xf32>
    %118 = arith.addf %116, %117 : vector<16x32xf32>
    %119 = vector.extract_strided_slice %24 {offsets = [96, 0], sizes = [16, 32], strides = [1, 1]} : vector<128x32xf32> to vector<16x32xf32>
    %cst_46 = arith.constant dense<0.000000e+00> : vector<64x32xf32>
    %120 = tpu.matmul %25, %119, %cst_46 {dimension_numbers = #tpu.dot_dimension_numbers<[1], [0], [0], [1], [0, 0, 1, 1], [], []>} : vector<64x16xf32>, vector<16x32xf32>, vector<64x32xf32> -> vector<64x32xf32>
    %121 = vector.broadcast %27 : vector<64x1xf32> to vector<64x32xf32>
    %122 = arith.addf %120, %121 : vector<64x32xf32>
    %cst_47 = arith.constant 5.000000e-01 : f32
    %123 = vector.broadcast %cst_47 : f32 to vector<64x32xf32>
    %124 = arith.mulf %123, %122 : vector<64x32xf32>
    %cst_48 = arith.constant 0.707106769 : f32
    %125 = vector.broadcast %cst_48 : f32 to vector<64x32xf32>
    %126 = arith.mulf %122, %125 : vector<64x32xf32>
    %127 = math.erf %126 : vector<64x32xf32>
    %cst_49 = arith.constant 1.000000e+00 : f32
    %128 = vector.broadcast %cst_49 : f32 to vector<64x32xf32>
    %129 = arith.addf %128, %127 : vector<64x32xf32>
    %130 = arith.mulf %124, %129 : vector<64x32xf32>
    %cst_50 = arith.constant dense<0.000000e+00> : vector<16x32xf32>
    %131 = tpu.matmul %26, %130, %cst_50 {dimension_numbers = #tpu.dot_dimension_numbers<[1], [0], [0], [1], [0, 0, 1, 1], [], []>} : vector<16x64xf32>, vector<64x32xf32>, vector<16x32xf32> -> vector<16x32xf32>
    %132 = vector.broadcast %28 : vector<16x1xf32> to vector<16x32xf32>
    %133 = arith.addf %131, %132 : vector<16x32xf32>
    %134 = vector.extract_strided_slice %24 {offsets = [112, 0], sizes = [16, 32], strides = [1, 1]} : vector<128x32xf32> to vector<16x32xf32>
    %cst_51 = arith.constant dense<0.000000e+00> : vector<64x32xf32>
    %135 = tpu.matmul %25, %134, %cst_51 {dimension_numbers = #tpu.dot_dimension_numbers<[1], [0], [0], [1], [0, 0, 1, 1], [], []>} : vector<64x16xf32>, vector<16x32xf32>, vector<64x32xf32> -> vector<64x32xf32>
    %136 = vector.broadcast %27 : vector<64x1xf32> to vector<64x32xf32>
    %137 = arith.addf %135, %136 : vector<64x32xf32>
    %cst_52 = arith.constant 5.000000e-01 : f32
    %138 = vector.broadcast %cst_52 : f32 to vector<64x32xf32>
    %139 = arith.mulf %138, %137 : vector<64x32xf32>
    %cst_53 = arith.constant 0.707106769 : f32
    %140 = vector.broadcast %cst_53 : f32 to vector<64x32xf32>
    %141 = arith.mulf %137, %140 : vector<64x32xf32>
    %142 = math.erf %141 : vector<64x32xf32>
    %cst_54 = arith.constant 1.000000e+00 : f32
    %143 = vector.broadcast %cst_54 : f32 to vector<64x32xf32>
    %144 = arith.addf %143, %142 : vector<64x32xf32>
    %145 = arith.mulf %139, %144 : vector<64x32xf32>
    %cst_55 = arith.constant dense<0.000000e+00> : vector<16x32xf32>
    %146 = tpu.matmul %26, %145, %cst_55 {dimension_numbers = #tpu.dot_dimension_numbers<[1], [0], [0], [1], [0, 0, 1, 1], [], []>} : vector<16x64xf32>, vector<64x32xf32>, vector<16x32xf32> -> vector<16x32xf32>
    %147 = vector.broadcast %28 : vector<16x1xf32> to vector<16x32xf32>
    %148 = arith.addf %146, %147 : vector<16x32xf32>
    %149 = tpu.concatenate %43, %58, %73, %88, %103, %118, %133, %148 in 0 : vector<16x32xf32>, vector<16x32xf32>, vector<16x32xf32>, vector<16x32xf32>, vector<16x32xf32>, vector<16x32xf32>, vector<16x32xf32>, vector<16x32xf32> -> vector<128x32xf32>
    %150 = arith.addf %0, %149 : vector<128x32xf32>
    %c2 = arith.constant 2 : index
    %c0_56 = arith.constant 0 : index
    %151 = vector.load %arg9[%c2, %c0_56] : memref<5x32xf32, #tpu.memory_space<vmem>>, vector<1x32xf32>
    %c3 = arith.constant 3 : index
    %c0_57 = arith.constant 0 : index
    %152 = vector.load %arg9[%c3, %c0_57] : memref<5x32xf32, #tpu.memory_space<vmem>>, vector<1x32xf32>
    %cst_58 = arith.constant dense<0.000000e+00> : vector<128xf32>
    %153 = vector.multi_reduction <add>, %150, %cst_58 [1] : vector<128x32xf32> to vector<128xf32>
    %154 = vector.shape_cast %153 : vector<128xf32> to vector<128x1xf32>
    %cst_59 = arith.constant 3.200000e+01 : f32
    %155 = vector.broadcast %cst_59 : f32 to vector<128x1xf32>
    %156 = arith.divf %154, %155 : vector<128x1xf32>
    %157 = vector.broadcast %156 : vector<128x1xf32> to vector<128x32xf32>
    %158 = arith.subf %150, %157 : vector<128x32xf32>
    %159 = arith.mulf %158, %158 : vector<128x32xf32>
    %cst_60 = arith.constant dense<0.000000e+00> : vector<128xf32>
    %160 = vector.multi_reduction <add>, %159, %cst_60 [1] : vector<128x32xf32> to vector<128xf32>
    %161 = vector.shape_cast %160 : vector<128xf32> to vector<128x1xf32>
    %cst_61 = arith.constant 3.200000e+01 : f32
    %162 = vector.broadcast %cst_61 : f32 to vector<128x1xf32>
    %163 = arith.divf %161, %162 : vector<128x1xf32>
    %164 = vector.broadcast %156 : vector<128x1xf32> to vector<128x32xf32>
    %165 = arith.subf %150, %164 : vector<128x32xf32>
    %cst_62 = arith.constant 9.99999974E-6 : f32
    %166 = vector.broadcast %cst_62 : f32 to vector<128x1xf32>
    %167 = arith.addf %163, %166 : vector<128x1xf32>
    %168 = math.rsqrt %167 : vector<128x1xf32>
    %169 = vector.broadcast %168 : vector<128x1xf32> to vector<128x32xf32>
    %170 = arith.mulf %165, %169 : vector<128x32xf32>
    %171 = vector.broadcast %151 : vector<1x32xf32> to vector<128x32xf32>
    %172 = arith.mulf %170, %171 : vector<128x32xf32>
    %173 = vector.broadcast %152 : vector<1x32xf32> to vector<128x32xf32>
    %174 = arith.addf %172, %173 : vector<128x32xf32>
    %c0_63 = arith.constant 0 : index
    %c0_64 = arith.constant 0 : index
    %175 = vector.load %arg6[%c0_63, %c0_64] : memref<32x128xf32, #tpu.memory_space<vmem>>, vector<32x128xf32>
    %cst_65 = arith.constant dense<0.000000e+00> : vector<128x128xf32>
    %176 = tpu.matmul %174, %175, %cst_65 {dimension_numbers = #tpu.dot_dimension_numbers<[1], [0], [0], [1], [0, 0, 1, 1], [], []>} : vector<128x32xf32>, vector<32x128xf32>, vector<128x128xf32> -> vector<128x128xf32>
    %c0_66 = arith.constant 0 : index
    %c0_67 = arith.constant 0 : index
    %177 = vector.load %arg7[%c0_66, %c0_67] : memref<1x128xf32, #tpu.memory_space<vmem>>, vector<1x128xf32>
    %178 = vector.broadcast %177 : vector<1x128xf32> to vector<128x128xf32>
    %179 = arith.addf %176, %178 : vector<128x128xf32>
    %cst_68 = arith.constant 5.000000e-01 : f32
    %180 = vector.broadcast %cst_68 : f32 to vector<128x128xf32>
    %181 = arith.mulf %180, %179 : vector<128x128xf32>
    %cst_69 = arith.constant 0.707106769 : f32
    %182 = vector.broadcast %cst_69 : f32 to vector<128x128xf32>
    %183 = arith.mulf %179, %182 : vector<128x128xf32>
    %184 = math.erf %183 : vector<128x128xf32>
    %cst_70 = arith.constant 1.000000e+00 : f32
    %185 = vector.broadcast %cst_70 : f32 to vector<128x128xf32>
    %186 = arith.addf %185, %184 : vector<128x128xf32>
    %187 = arith.mulf %181, %186 : vector<128x128xf32>
    %c0_71 = arith.constant 0 : index
    %c0_72 = arith.constant 0 : index
    %188 = vector.load %arg8[%c0_71, %c0_72] : memref<128x32xf32, #tpu.memory_space<vmem>>, vector<128x32xf32>
    %cst_73 = arith.constant dense<0.000000e+00> : vector<128x32xf32>
    %189 = tpu.matmul %187, %188, %cst_73 {dimension_numbers = #tpu.dot_dimension_numbers<[1], [0], [0], [1], [0, 0, 1, 1], [], []>} : vector<128x128xf32>, vector<128x32xf32>, vector<128x32xf32> -> vector<128x32xf32>
    %c4 = arith.constant 4 : index
    %c0_74 = arith.constant 0 : index
    %190 = vector.load %arg9[%c4, %c0_74] : memref<5x32xf32, #tpu.memory_space<vmem>>, vector<1x32xf32>
    %191 = vector.broadcast %190 : vector<1x32xf32> to vector<128x32xf32>
    %192 = arith.addf %189, %191 : vector<128x32xf32>
    %193 = arith.addf %150, %192 : vector<128x32xf32>
    %c0_75 = arith.constant 0 : index
    %c0_76 = arith.constant 0 : index
    %194 = vector.load %arg10[%c0_75, %c0_76] : memref<128x32xf32, #tpu.memory_space<vmem>>, vector<128x32xf32>
    tpu.vector_store %arg10[%c0_75, %c0_76], %193 {strides = array<i32>} : memref<128x32xf32, #tpu.memory_space<vmem>>, vector<128x32xf32>,
    return
  }
  func.func @transform_0(%arg0: i32) -> (i32, i32) {
    %c0_i32 = arith.constant 0 : i32
    %c0_i32_0 = arith.constant 0 : i32
    return %arg0, %c0_i32 : i32, i32
  }
  func.func @transform_1(%arg0: i32) -> (i32, i32) {
    %c0_i32 = arith.constant 0 : i32
    %c0_i32_0 = arith.constant 0 : i32
    %c0_i32_1 = arith.constant 0 : i32
    return %c0_i32, %c0_i32_0 : i32, i32
  }
  func.func @transform_2(%arg0: i32) -> (i32, i32) {
    %c0_i32 = arith.constant 0 : i32
    %c0_i32_0 = arith.constant 0 : i32
    %c0_i32_1 = arith.constant 0 : i32
    return %c0_i32, %c0_i32_0 : i32, i32
  }
  func.func @transform_3(%arg0: i32) -> (i32, i32) {
    %c0_i32 = arith.constant 0 : i32
    %c0_i32_0 = arith.constant 0 : i32
    %c0_i32_1 = arith.constant 0 : i32
    return %c0_i32, %c0_i32_0 : i32, i32
  }
  func.func @transform_4(%arg0: i32) -> (i32, i32) {
    %c0_i32 = arith.constant 0 : i32
    %c0_i32_0 = arith.constant 0 : i32
    %c0_i32_1 = arith.constant 0 : i32
    return %c0_i32, %c0_i32_0 : i32, i32
  }
  func.func @transform_5(%arg0: i32) -> (i32, i32) {
    %c0_i32 = arith.constant 0 : i32
    %c0_i32_0 = arith.constant 0 : i32
    %c0_i32_1 = arith.constant 0 : i32
    return %c0_i32, %c0_i32_0 : i32, i32
  }
  func.func @transform_6(%arg0: i32) -> (i32, i32) {
    %c0_i32 = arith.constant 0 : i32
    %c0_i32_0 = arith.constant 0 : i32
    %c0_i32_1 = arith.constant 0 : i32
    return %c0_i32, %c0_i32_0 : i32, i32
  }
  func.func @transform_7(%arg0: i32) -> (i32, i32) {
    %c0_i32 = arith.constant 0 : i32
    %c0_i32_0 = arith.constant 0 : i32
    %c0_i32_1 = arith.constant 0 : i32
    return %c0_i32, %c0_i32_0 : i32, i32
  }
  func.func @transform_8(%arg0: i32) -> (i32, i32) {
    %c0_i32 = arith.constant 0 : i32
    %c0_i32_0 = arith.constant 0 : i32
    %c0_i32_1 = arith.constant 0 : i32
    return %c0_i32, %c0_i32_0 : i32, i32
  }
  func.func @transform_9(%arg0: i32) -> (i32, i32) {
    %c0_i32 = arith.constant 0 : i32
    %c0_i32_0 = arith.constant 0 : i32
    return %arg0, %c0_i32 : i32, i32
  }
}

</mosaic_0001>

<bundles_post_ra>
// kernel: tile.13
= control target key start
LH: loop header
LB: loop body
LE: loop exit
PB: predicated region body
PF: predicated region fallthrough
CT: control target
= control target key end

     0   :  { %s28_s0 = inlined_call_operand.vmem [shape: f32[32], index: 0, kind: input, shape index: {}]   ;;  %s29_s1 = inlined_call_operand.vmem [shape: f32[16,32], index: 1, kind: output, shape index: {}]  }
   0x1   :  { %v4_v0 = vld [vmem:[%s28_s0] ss:$0 sm:$0xff] }
   0x2   :  { %5 = vst [vmem:[%s29_s1] sm:$0xff] %v4_v0 }
   0x3   :  { %8 = vst [vmem:[%s29_s1 + $0x8] sm:$0xff] %v4_v0 }

// kernel: tile.18
= control target key start
LH: loop header
LB: loop body
LE: loop exit
PB: predicated region body
PF: predicated region fallthrough
CT: control target
= control target key end

     0   :  { %s56_s8 = smov 96   ;;  %s57_s11 = smov 32   ;;  %vm3_vm0 = vcmask 261120   ;;  %vm9_vm1 = vcmask 1048320   ;;  %vm15_vm2 = vcmask 785920   ;;  %vm21_vm3 = vcmask 523520   ;;  %s93_s0 = inlined_call_operand.vmem [shape: f32[16,32], index: 0, kind: input, shape index: {}]   ;;  %s94_s1 = inlined_call_operand.vmem [shape: f32[1,512], index: 1, kind: output, shape index: {}]  }
   0x1   :  { %v47_v0 = vld [vmem:[%s93_s0 + $0x3] ss:$4 sm:$0xf]   ;;  %v49_v1 = vld [vmem:[%s93_s0 + $0x1] ss:$4 sm:$0xf]  }
   0x2   :  { %7 = vrot.lane.b32.xlu0 %v47_v0, %s56_s8  ;;  %19 = vrot.lane.b32.xlu1 %v49_v1, %s57_s11  ;;  %v48_v2 = vld [vmem:[%s93_s0 + $0x2] ss:$4 sm:$0xf]   ;;  %s58_s14 = smov 64  }
   0x3   :  { %v2_v3 = vld [vmem:[%s93_s0] ss:$4 sm:$0xf]  }
   0x4   :  { %4 = vst.msk [vmem:[#allocation0] ss:$8 sm:$0xf] %vm3_vm0, %v2_v3  }
   0xa   :  { %13 = vrot.lane.b32.xlu0 %v48_v2, %s58_s14 }
  0x74   :  { %v8_v4 = vpop.permute.xlu0 %7   ;;  %v20_v5 = vpop.permute.xlu1 %19  }
  0x75   :  { %10 = vst.msk [vmem:[#allocation0] ss:$8 sm:$0xf] %vm9_vm1, %v8_v4  }
  0x7c   :  { %v14_v6 = vpop.permute.xlu0 %13  }
  0x7d   :  { %16 = vst.msk [vmem:[#allocation0] ss:$8 sm:$0xf] %vm15_vm2, %v14_v6  }
  0x7e   :  { %22 = vst.msk [vmem:[#allocation0] ss:$8 sm:$0xf] %vm21_vm3, %v20_v5  }
  0x85   :  { %v25_v7 = vld [vmem:[#allocation0] sm:$0x1]  ;;  %v30_v8 = vld [vmem:[#allocation0 + $0x8] sm:$0x1]  ;;  %v36_v9 = vld [vmem:[#allocation0 + $0x10] sm:$0x1] }
  0x86   :  { %28 = vst [vmem:[%s94_s1] sm:$0x1] %v25_v7  ;;  %v42_v10 = vld [vmem:[#allocation0 + $0x18] sm:$0x1] }
  0x87   :  { %50 = vst [vmem:[%s94_s1 + $0x1] sm:$0x1] %v30_v8 }
  0x88   :  { %51 = vst [vmem:[%s94_s1 + $0x2] sm:$0x1] %v36_v9 }
  0x89   :  { %52 = vst [vmem:[%s94_s1 + $0x3] sm:$0x1] %v42_v10 }

// kernel: md_block_pallas.2
= control target key start
LH: loop header
LB: loop body
LE: loop exit
PB: predicated region body
PF: predicated region fallthrough
CT: control target
= control target key end

     0   :  { %s1985_s27 = smov 0   ;;  %s3463_s0 = inlined_call_operand.vmem [shape: f32[16,512], index: 0, kind: input, shape index: {}]   ;;  %s3464_s1 = inlined_call_operand.vmem [shape: f32[512,16], index: 1, kind: input, shape index: {}]   ;;  %s3465_s2 = inlined_call_operand.vmem [shape: f32[16,512], index: 2, kind: input, shape index: {}]   ;;  %s3466_s3 = inlined_call_operand.vmem [shape: f32[2,512], index: 3, kind: input, shape index: {}]   ;;  %s3467_s4 = inlined_call_operand.vmem [shape: f32[32,8], index: 4, kind: input, shape index: {}]   ;;  %s3468_s5 = inlined_call_operand.vmem [shape: f32[32,1], index: 5, kind: input, shape index: {}]   ;;  %s3469_s6 = inlined_call_operand.vmem [shape: f32[8,32], index: 6, kind: input, shape index: {}]   ;;  %s3470_s7 = inlined_call_operand.vmem [shape: f32[8,1], index: 7, kind: input, shape index: {}]   ;;  %s3471_s8 = inlined_call_operand.vmem [shape: f32[16,512], index: 8, kind: output, shape index: {}]  }
   0x1 LB: > { %s1817_s28 = sadd.s32 4294967295, %s1937_s27   ;;  %p1821_p0 = scmp.ge.s32.totalorder %s1937_s27, 1  ;;  %s1937_s27 = sphi %s1985_s27, %s18_s27  }
   0x2   : > { %p262_p1 = scmp.lt.s32.totalorder %s1937_s27, 3 }
   0x4   : > { %p263_p2 = pnand %p1821_p0, %p262_p1 }
   0x6   : > { %266 = sbr.rel (%p263_p2) target bundleno = 1064 (0x428), region = 52 }
   0xb   : > { %v1996_v0 = vld [vmem:[%s3464_s1 + $0x178] sm:$0xff]  ;;  %v2001_v1 = vld [vmem:[%s3464_s1 + $0x170] sm:$0xff]  ;;  %v2023_v5 = vld [vmem:[%s3464_s1 + $0x168] sm:$0xff]  ;;  %p2205_p3 = scmp.lt.s32.totalorder %s1817_s28, 1  ;;  %vm462_vm0 = vcmask 130048   ;;  %vm832_vm10 = vcmask 64512  }
   0xc   : > { %v2006_v2 = vld [vmem:[%s3464_s1 + $0x1f8] sm:$0xff]  ;;  %422 = vmatpush.msra.mxu2 %v1996_v0  ;;  %v2030_v6 = vld [vmem:[%s3464_s1 + $0x1f0] sm:$0xff]  ;;  %v2047_v9 = vld [vmem:[%s3464_s1 + $0x1e8] sm:$0xff] }
   0xd   : > { %442 = vmatpush.msra.mxu3 %v2006_v2  ;;  %v2013_v3 = vld [vmem:[%s3464_s1 + $0x78] sm:$0xff]  ;;  %v2035_v7 = vld [vmem:[%s3464_s1 + $0x70] sm:$0xff]  ;;  %v2052_v10 = vld [vmem:[%s3464_s1 + $0x68] sm:$0xff]  ;;  %s3574_s28 = smov (!%p2205_p3, %s1817_s28), 1 }
   0xe   : > { %v2018_v4 = vld [vmem:[%s3464_s1 + $0xf8] sm:$0xff]  ;;  %382 = vmatpush.msra.mxu0 %v2013_v3  ;;  %v2040_v8 = vld [vmem:[%s3464_s1 + $0xf0] sm:$0xff]  ;;  %423 = vmatpush.msra.mxu2 %v2001_v1  ;;  %v2059_v11 = vld [vmem:[%s3464_s1 + $0x160] sm:$0xff]  ;;  %s1873_s12 = sshll.u32 %s3574_s28, 5 }
   0xf   : > { %402 = vmatpush.msra.mxu1 %v2018_v4  ;;  %443 = vmatpush.msra.mxu3 %v2030_v6  ;;  %v2064_v12 = vld [vmem:[%s3464_s1 + $0xe8] sm:$0xff]  ;;  %v2069_v13 = vld [vmem:[%s3464_s1 + $0x1e0] sm:$0xff]  ;;  %v2088_v16 = vld [vmem:[%s3464_s1 + $0x158] sm:$0xff]  ;;  %s2353_s29 = scalar_lea.vmem %s3463_s0, %s1873_s12  ;;  %s305_s30 = scalar_lea.vmem %s3471_s8, %s1873_s12 }
  0x10   : > { %383 = vmatpush.msra.mxu0 %v2035_v7  ;;  %424 = vmatpush.msra.mxu2 %v2023_v5  ;;  %v2076_v14 = vld [vmem:[%s3464_s1 + $0x60] sm:$0xff]  ;;  %v2093_v17 = vld [vmem:[%s3464_s1 + $0x1d8] sm:$0xff]  ;;  %v2112_v20 = vld [vmem:[%s3464_s1 + $0x150] sm:$0xff] }
  0x11   : > { %403 = vmatpush.msra.mxu1 %v2040_v8  ;;  %444 = vmatpush.msra.mxu3 %v2047_v9  ;;  %v2081_v15 = vld [vmem:[%s3464_s1 + $0xe0] sm:$0xff]  ;;  %v2100_v18 = vld [vmem:[%s3464_s1 + $0x58] sm:$0xff]  ;;  %v2117_v21 = vld [vmem:[%s3464_s1 + $0x1d0] sm:$0xff] }
  0x12   : > { %384 = vmatpush.msra.mxu0 %v2052_v10  ;;  %425 = vmatpush.msra.mxu2 %v2059_v11  ;;  %v2105_v19 = vld [vmem:[%s3464_s1 + $0xd8] sm:$0xff]  ;;  %v2124_v22 = vld [vmem:[%s3464_s1 + $0x50] sm:$0xff]  ;;  %v2136_v24 = vld [vmem:[%s3464_s1 + $0x148] sm:$0xff] }
  0x13   : > { %404 = vmatpush.msra.mxu1 %v2064_v12  ;;  %445 = vmatpush.msra.mxu3 %v2069_v13  ;;  %v2129_v23 = vld [vmem:[%s3464_s1 + $0xd0] sm:$0xff]  ;;  %v2141_v25 = vld [vmem:[%s3464_s1 + $0x1c8] sm:$0xff]  ;;  %v2160_v28 = vld [vmem:[%s3464_s1 + $0x140] sm:$0xff] }
  0x14   : > { %385 = vmatpush.msra.mxu0 %v2076_v14  ;;  %426 = vmatpush.msra.mxu2 %v2088_v16  ;;  %v2148_v26 = vld [vmem:[%s3464_s1 + $0x48] sm:$0xff]  ;;  %v2165_v29 = vld [vmem:[%s3464_s1 + $0x1c0] sm:$0xff]  ;;  %v2184_v32 = vld [vmem:[%s3464_s1 + $0x138] sm:$0xff] }
  0x15   : > { %405 = vmatpush.msra.mxu1 %v2081_v15  ;;  %446 = vmatpush.msra.mxu3 %v2093_v17  ;;  %v2153_v27 = vld [vmem:[%s3464_s1 + $0xc8] sm:$0xff]  ;;  %v2172_v30 = vld [vmem:[%s3464_s1 + $0x40] sm:$0xff]  ;;  %v2189_v33 = vld [vmem:[%s3464_s1 + $0x1b8] sm:$0xff] }
  0x16   : > { %386 = vmatpush.msra.mxu0 %v2100_v18  ;;  %427 = vmatpush.msra.mxu2 %v2112_v20  ;;  %v2177_v31 = vld [vmem:[%s3464_s1 + $0xc0] sm:$0xff]  ;;  %v2196_v34 = vld [vmem:[%s3464_s1 + $0x38] sm:$0xff]  ;;  %v2214_v36 = vld [vmem:[%s3464_s1 + $0x130] sm:$0xff] }
  0x17   : > { %406 = vmatpush.msra.mxu1 %v2105_v19  ;;  %447 = vmatpush.msra.mxu3 %v2117_v21  ;;  %v2201_v35 = vld [vmem:[%s3464_s1 + $0xb8] sm:$0xff]  ;;  %v2219_v37 = vld [vmem:[%s3464_s1 + $0x1b0] sm:$0xff]  ;;  %v2238_v40 = vld [vmem:[%s3464_s1 + $0x128] sm:$0xff] }
  0x18   : > { %387 = vmatpush.msra.mxu0 %v2124_v22  ;;  %428 = vmatpush.msra.mxu2 %v2136_v24  ;;  %v2226_v38 = vld [vmem:[%s3464_s1 + $0x30] sm:$0xff]  ;;  %v2243_v41 = vld [vmem:[%s3464_s1 + $0x1a8] sm:$0xff]  ;;  %v2268_v44 = vld [vmem:[%s3464_s1 + $0x120] sm:$0xff] }
  0x19   : > { %407 = vmatpush.msra.mxu1 %v2129_v23  ;;  %448 = vmatpush.msra.mxu3 %v2141_v25  ;;  %v2231_v39 = vld [vmem:[%s3464_s1 + $0xb0] sm:$0xff]  ;;  %v2250_v42 = vld [vmem:[%s3464_s1 + $0x28] sm:$0xff]  ;;  %v2273_v45 = vld [vmem:[%s3464_s1 + $0x1a0] sm:$0xff] }
  0x1a   : > { %388 = vmatpush.msra.mxu0 %v2148_v26  ;;  %429 = vmatpush.msra.mxu2 %v2160_v28  ;;  %v2255_v43 = vld [vmem:[%s3464_s1 + $0xa8] sm:$0xff]  ;;  %v2280_v46 = vld [vmem:[%s3464_s1 + $0x20] sm:$0xff]  ;;  %v2292_v48 = vld [vmem:[%s3464_s1 + $0x118] sm:$0xff] }
  0x1b   : > { %408 = vmatpush.msra.mxu1 %v2153_v27  ;;  %449 = vmatpush.msra.mxu3 %v2165_v29  ;;  %v2285_v47 = vld [vmem:[%s3464_s1 + $0xa0] sm:$0xff]  ;;  %v2297_v49 = vld [vmem:[%s3464_s1 + $0x198] sm:$0xff]  ;;  %v2317_v52 = vld [vmem:[%s3464_s1 + $0x110] sm:$0xff] }
  0x1c   : > { %389 = vmatpush.msra.mxu0 %v2172_v30  ;;  %430 = vmatpush.msra.mxu2 %v2184_v32  ;;  %v2304_v50 = vld [vmem:[%s3464_s1 + $0x18] sm:$0xff]  ;;  %3490 = vst [vmem:[#allocation2_spill] sm:$0xff] %v2317_v52  ;;  %v2322_v53 = vld [vmem:[%s3464_s1 + $0x190] sm:$0xff]  ;;  %v2341_v56 = vld [vmem:[%s3464_s1 + $0x108] sm:$0xff] }
  0x1d   : > { %409 = vmatpush.msra.mxu1 %v2177_v31  ;;  %450 = vmatpush.msra.mxu3 %v2189_v33  ;;  %v2309_v51 = vld [vmem:[%s3464_s1 + $0x98] sm:$0xff]  ;;  %3491 = vst [vmem:[#allocation3_spill] sm:$0xff] %v2322_v53  ;;  %v2329_v54 = vld [vmem:[%s3464_s1 + $0x10] sm:$0xff]  ;;  %v2346_v57 = vld [vmem:[%s3464_s1 + $0x188] sm:$0xff] }
  0x1e   : > { %390 = vmatpush.msra.mxu0 %v2196_v34  ;;  %431 = vmatpush.msra.mxu2 %v2214_v36  ;;  %v2334_v55 = vld [vmem:[%s3464_s1 + $0x90] sm:$0xff]  ;;  %3492 = vst [vmem:[#allocation4_spill] sm:$0xff] %v2341_v56  ;;  %v2360_v58 = vld [vmem:[%s3464_s1 + $0x8] sm:$0xff]  ;;  %v2372_v60 = vld [vmem:[%s3464_s1 + $0x100] sm:$0xff] }
  0x1f   : > { %410 = vmatpush.msra.mxu1 %v2201_v35  ;;  %451 = vmatpush.msra.mxu3 %v2219_v37  ;;  %3493 = vst [vmem:[#allocation5_spill] sm:$0xff] %v2346_v57  ;;  %v2365_v59 = vld [vmem:[%s3464_s1 + $0x88] sm:$0xff]  ;;  %v2377_v61 = vld [vmem:[%s3464_s1 + $0x180] sm:$0xff]  ;;  %v2382_v62 = vld [vmem:[%s2353_s29 + $0x10] sm:$0xff] }
  0x20   : > { %391 = vmatpush.msra.mxu0 %v2226_v38  ;;  %432 = vmatpush.msra.mxu2 %v2238_v40  ;;  %3494 = vst [vmem:[#allocation6_spill] sm:$0xff] %v2372_v60  ;;  %v2385_v63 = vld [vmem:[%s2353_s29 + $0x18] sm:$0xff] }
  0x21   : > { %411 = vmatpush.msra.mxu1 %v2231_v39  ;;  %452 = vmatpush.msra.mxu3 %v2243_v41  ;;  %3495 = vst [vmem:[#allocation7_spill] sm:$0xff] %v2377_v61 }
  0x22   : > { %392 = vmatpush.msra.mxu0 %v2250_v42  ;;  %433 = vmatpush.msra.mxu2 %v2268_v44  ;;  %3496 = vst [vmem:[#allocation8_spill] sm:$0xff] %v2382_v62 }
  0x23   : > { %412 = vmatpush.msra.mxu1 %v2255_v43  ;;  %453 = vmatpush.msra.mxu3 %v2273_v45  ;;  %3497 = vst [vmem:[#allocation9_spill] sm:$0xff] %v2385_v63 }
  0x24   : > { %393 = vmatpush.msra.mxu0 %v2280_v46  ;;  %434 = vmatpush.msra.mxu2 %v2292_v48 }
  0x25   : > { %413 = vmatpush.msra.mxu1 %v2285_v47  ;;  %454 = vmatpush.msra.mxu3 %v2297_v49 }
  0x26   : > { %394 = vmatpush.msra.mxu0 %v2304_v50  ;;  %435 = vmatpush.msra.mxu2 %v2317_v52  ;;  %v2397_v52 = vld [vmem:[%s3464_s1 + $0x80] sm:$0xff] }
  0x27   : > { %414 = vmatpush.msra.mxu1 %v2309_v51  ;;  %455 = vmatpush.msra.mxu3 %v2322_v53  ;;  %v2392_v53 = vld [vmem:[%s3464_s1] sm:$0xff] }
  0x28   : > { %395 = vmatpush.msra.mxu0 %v2329_v54  ;;  %436 = vmatpush.msra.mxu2 %v2341_v56  ;;  %v2405_v56 = vld [vmem:[%s2353_s29 + $0x8] sm:$0xff] }
  0x29   : > { %415 = vmatpush.msra.mxu1 %v2334_v55  ;;  %456 = vmatpush.msra.mxu3 %v2346_v57  ;;  %v2402_v57 = vld [vmem:[%s2353_s29] sm:$0xff]  ;;  %3499 = vst [vmem:[#allocation11_spill] sm:$0xff] %v2405_v56 }
  0x2a   : > { %396 = vmatpush.msra.mxu0 %v2360_v58  ;;  %437 = vmatpush.msra.mxu2 %v2372_v60  ;;  %3498 = vst [vmem:[#allocation10_spill] sm:$0xff] %v2402_v57  ;;  %v2421_v60 = vld [vmem:[%s3465_s2 + $0x28] sm:$0xff] }
  0x2b   : > { %416 = vmatpush.msra.mxu1 %v2365_v59  ;;  %457 = vmatpush.msra.mxu3 %v2377_v61  ;;  %v2416_v61 = vld [vmem:[%s3465_s2 + $0x20] sm:$0xff]  ;;  %3500 = vst [vmem:[#allocation12_spill] sm:$0xff] %v2421_v60 }
  0x2c   : > { %438 = vmatmul.f32.vlgmr.msra.gmra.mxu2 %v2382_v62  ;;  %458 = vmatmul.f32.vlgmr.msra.gmra.mxu3 %v2385_v63  ;;  %v2426_v63 = vld [vmem:[%s3465_s2 + $0x30] sm:$0xff]  ;;  %v2433_v62 = vld [vmem:[%s3465_s2 + $0x38] sm:$0xff] }
  0x2d   : > { %397 = vmatpush.msra.mxu0 %v2392_v53  ;;  %417 = vmatpush.msra.mxu1 %v2397_v52  ;;  %3501 = vst [vmem:[#allocation13_spill] sm:$0xff] %v2433_v62 }
  0x2e   : > { %398 = vmatmul.f32.vlgmr.msra.gmra.mxu0 %v2402_v57  ;;  %418 = vmatmul.f32.vlgmr.msra.gmra.mxu1 %v2405_v56  ;;  %v2440_v56 = vld [vmem:[%s3465_s2] sm:$0xff]  ;;  %v2445_v57 = vld [vmem:[%s3465_s2 + $0x8] sm:$0xff] }
  0x2f   : > { %480 = vmatpush.msrb.mxu0 %v2416_v61  ;;  %500 = vmatpush.msrb.mxu1 %v2421_v60  ;;  %v2450_v60 = vld [vmem:[%s3465_s2 + $0x10] sm:$0xff] }
  0x30   : > { %520 = vmatpush.msrb.mxu2 %v2426_v63  ;;  %540 = vmatpush.msrb.mxu3 %v2433_v62  ;;  %v2457_v62 = vld [vmem:[%s3465_s2 + $0x18] sm:$0xff] }
  0x31   : > { %481 = vmatpush.msrb.mxu0 %v2440_v56  ;;  %501 = vmatpush.msrb.mxu1 %v2445_v57 }
  0x32   : > { %521 = vmatpush.msrb.mxu2 %v2450_v60  ;;  %541 = vmatpush.msrb.mxu3 %v2457_v62 }
  0x33   : > { %558 = vmatpush.msra.mxu0 %v2013_v3  ;;  %578 = vmatpush.msra.mxu1 %v2018_v4 }
  0x34   : > { %598 = vmatpush.msra.mxu2 %v1996_v0  ;;  %618 = vmatpush.msra.mxu3 %v2006_v2 }
  0x35   : > { %559 = vmatpush.msra.mxu0 %v2035_v7  ;;  %579 = vmatpush.msra.mxu1 %v2040_v8  ;;  %v3503_v7 = vld [vmem:[#allocation3_spill] sm:$0xff] }
  0x36   : > { %599 = vmatpush.msra.mxu2 %v2001_v1  ;;  %619 = vmatpush.msra.mxu3 %v2030_v6  ;;  %v3502_v6 = vld [vmem:[#allocation2_spill] sm:$0xff] }
  0x37   : > { %560 = vmatpush.msra.mxu0 %v2052_v10  ;;  %580 = vmatpush.msra.mxu1 %v2064_v12  ;;  %v3505_v10 = vld [vmem:[#allocation5_spill] sm:$0xff]  ;;  %v3507_v12 = vld [vmem:[#allocation7_spill] sm:$0xff] }
  0x38   : > { %600 = vmatpush.msra.mxu2 %v2023_v5  ;;  %620 = vmatpush.msra.mxu3 %v2047_v9  ;;  %v3504_v9 = vld [vmem:[#allocation4_spill] sm:$0xff] }
  0x39   : > { %561 = vmatpush.msra.mxu0 %v2076_v14  ;;  %581 = vmatpush.msra.mxu1 %v2081_v15  ;;  %v3509_v14 = vld [vmem:[#allocation13_spill] sm:$0xff] }
  0x3a   : > { %601 = vmatpush.msra.mxu2 %v2059_v11  ;;  %621 = vmatpush.msra.mxu3 %v2069_v13  ;;  %v3506_v11 = vld [vmem:[#allocation6_spill] sm:$0xff]  ;;  %v3508_v13 = vld [vmem:[#allocation12_spill] sm:$0xff] }
  0x3b   : > { %562 = vmatpush.msra.mxu0 %v2100_v18  ;;  %582 = vmatpush.msra.mxu1 %v2105_v19  ;;  %v3510_v19 = vld [vmem:[#allocation10_spill] sm:$0xff] }
  0x3c   : > { %602 = vmatpush.msra.mxu2 %v2088_v16  ;;  %622 = vmatpush.msra.mxu3 %v2093_v17 }
  0x3d   : > { %563 = vmatpush.msra.mxu0 %v2124_v22  ;;  %583 = vmatpush.msra.mxu1 %v2129_v23 }
  0x3e   : > { %603 = vmatpush.msra.mxu2 %v2112_v20  ;;  %623 = vmatpush.msra.mxu3 %v2117_v21  ;;  %v3511_v21 = vld [vmem:[#allocation11_spill] sm:$0xff] }
  0x3f   : > { %564 = vmatpush.msra.mxu0 %v2148_v26  ;;  %584 = vmatpush.msra.mxu1 %v2153_v27 }
  0x40   : > { %604 = vmatpush.msra.mxu2 %v2136_v24  ;;  %624 = vmatpush.msra.mxu3 %v2141_v25 }
  0x41   : > { %565 = vmatpush.msra.mxu0 %v2172_v30  ;;  %585 = vmatpush.msra.mxu1 %v2177_v31  ;;  %v3513_v31 = vld [vmem:[#allocation9_spill] sm:$0xff] }
  0x42   : > { %605 = vmatpush.msra.mxu2 %v2160_v28  ;;  %625 = vmatpush.msra.mxu3 %v2165_v29  ;;  %v3512_v29 = vld [vmem:[#allocation8_spill] sm:$0xff] }
  0x43   : > { %566 = vmatpush.msra.mxu0 %v2196_v34  ;;  %586 = vmatpush.msra.mxu1 %v2201_v35 }
  0x44   : > { %606 = vmatpush.msra.mxu2 %v2184_v32  ;;  %626 = vmatpush.msra.mxu3 %v2189_v33 }
  0x45   : > { %567 = vmatpush.msra.mxu0 %v2226_v38  ;;  %587 = vmatpush.msra.mxu1 %v2231_v39 }
  0x46   : > { %607 = vmatpush.msra.mxu2 %v2214_v36  ;;  %627 = vmatpush.msra.mxu3 %v2219_v37 }
  0x47   : > { %568 = vmatpush.msra.mxu0 %v2250_v42  ;;  %588 = vmatpush.msra.mxu1 %v2255_v43  ;;  %v808_v42 = vld [vmem:[%s3468_s5 + $0x8] sm:$0xff] }
  0x48   : > { %608 = vmatpush.msra.mxu2 %v2238_v40  ;;  %628 = vmatpush.msra.mxu3 %v2243_v41 }
  0x49   : > { %569 = vmatpush.msra.mxu0 %v2280_v46  ;;  %589 = vmatpush.msra.mxu1 %v2285_v47 }
  0x4a   : > { %609 = vmatpush.msra.mxu2 %v2268_v44  ;;  %629 = vmatpush.msra.mxu3 %v2273_v45  ;;  %v1939_v45 = vmov 0  }
  0x4b   : > { %570 = vmatpush.msra.mxu0 %v2304_v50  ;;  %590 = vmatpush.msra.mxu1 %v2309_v51 }
  0x4c   : > { %610 = vmatpush.msra.mxu2 %v2292_v48  ;;  %630 = vmatpush.msra.mxu3 %v2297_v49 }
  0x4d   : > { %571 = vmatpush.msra.mxu0 %v2329_v54  ;;  %591 = vmatpush.msra.mxu1 %v2334_v55 }
  0x4e   : > { %611 = vmatpush.msra.mxu2 %v3502_v6  ;;  %631 = vmatpush.msra.mxu3 %v3503_v7 }
  0x4f   : > { %572 = vmatpush.msra.mxu0 %v2360_v58  ;;  %592 = vmatpush.msra.mxu1 %v2365_v59 }
  0x50   : > { %612 = vmatpush.msra.mxu2 %v3504_v9  ;;  %632 = vmatpush.msra.mxu3 %v3505_v10  ;;  %v1834_v10 = vld [vmem:[%s3466_s3 + $0x1] ss:$2 sm:$0xf] }
  0x51   : > { %573 = vmatpush.msra.mxu0 %v2392_v53  ;;  %593 = vmatpush.msra.mxu1 %v2397_v52  ;;  %v807_v52 = vld [vmem:[%s3468_s5] sm:$0xff] }
  0x52   : > { %613 = vmatpush.msra.mxu2 %v3506_v11  ;;  %633 = vmatpush.msra.mxu3 %v3507_v12 }
  0x53   : > { %1885 = vset.pattern.permute.xlu1 %v1939_v45  ;;  %1884 = vset.pattern.permute.xlu0 %v1939_v45 }
  0x54   : > { %819 = vperm.xlu1 %1885, %v808_v42   ;;  %1886 = vset.pattern.permute.xlu2 %v1939_v45 }
  0x5c   : > { %814 = vperm.xlu1 %1885, %v807_v52  }
  0xab   : > { %v399_v0 = vpop.f32.mrf.mxu0  ;;  %v419_v1 = vpop.f32.mrf.mxu1 }
  0xac   : > { %v420_v2 = vadd.f32 %v419_v1, %v399_v0 }
  0xaf   : > { %v439_v3 = vpop.f32.mrf.mxu2  ;;  %v459_v4 = vpop.f32.mrf.mxu3 }
  0xb0   : > { %v440_v5 = vadd.f32 %v439_v3, %v420_v2 }
  0xb2   : > { %v460_v8 = vadd.f32 %v459_v4, %v440_v5  ;;  %v773_v4 = vld [vmem:[%s3466_s3] ss:$2 sm:$0xf] }
  0xb4   : > { %1826 = vmatmul.msk.f32.vlgmr.msrb.gmra.mxu0 %vm462_vm0, %v460_v8  ;;  %1827 = vmatmul.msk.f32.vlgmr.msrb.gmra.mxu1 %vm462_vm0, %v460_v8 }
  0xb5   : > { %1828 = vmatmul.msk.f32.vlgmr.msrb.gmra.mxu2 %vm462_vm0, %v460_v8  ;;  %1829 = vmatmul.msk.f32.vlgmr.msrb.gmra.mxu3 %vm462_vm0, %v460_v8 }
  0xb6   : > { %655 = vmatpush.msrb.mxu0 %v2416_v61  ;;  %675 = vmatpush.msrb.mxu1 %v3508_v13  ;;  %v775_v13 = vperm.slane %v773_v4, 0 }
  0xb7   : > { %695 = vmatpush.msrb.mxu2 %v2426_v63  ;;  %715 = vmatpush.msrb.mxu3 %v3509_v14  ;;  %v810_v63 = vld [vmem:[%s3468_s5 + $0x18] sm:$0xff] }
  0xb8   : > { %656 = vmatpush.msrb.mxu0 %v2440_v56  ;;  %676 = vmatpush.msrb.mxu1 %v2445_v57 }
  0xb9   : > { %696 = vmatpush.msrb.mxu2 %v2450_v60  ;;  %716 = vmatpush.msrb.mxu3 %v2457_v62 }
  0xba   : > { %829 = vperm.xlu0 %1884, %v810_v63  }
 0x131   : > { %v483_v15 = vpop.f32.mrf.mxu0  ;;  %v503_v16 = vpop.f32.mrf.mxu1 }
 0x132   : > { %v546_v17 = vmul.f32 0.03125, %v483_v15  ;;  %v547_v18 = vmul.f32 0.03125, %v503_v16  ;;  %v776_v16 = vperm.slane %v773_v4, 1 }
 0x134   : > { %v2538_v20 = vsub.f32 %v3510_v19, %v546_v17  ;;  %v2541_v22 = vsub.f32 %v3511_v21, %v547_v18  ;;  %v790_v21 = vperm.slane %v1834_v10, 0 }
 0x136   : > { %v554_v23 = vmul.f32 %v2538_v20, %v2538_v20  ;;  %v555_v24 = vmul.f32 %v2541_v22, %v2541_v22 }
 0x138   : > { %v523_v25 = vpop.f32.mrf.mxu2  ;;  %v543_v26 = vpop.f32.mrf.mxu3  ;;  %574 = vmatmul.f32.vlgmr.msra.gmra.mxu0 %v554_v23  ;;  %594 = vmatmul.f32.vlgmr.msra.gmra.mxu1 %v555_v24  ;;  %v809_v23 = vld [vmem:[%s3468_s5 + $0x10] sm:$0xff] }
 0x139   : > { %v548_v27 = vmul.f32 0.03125, %v523_v25  ;;  %v549_v28 = vmul.f32 0.03125, %v543_v26  ;;  %v791_v26 = vperm.slane %v1834_v10, 1  ;;  %824 = vperm.xlu0 %1884, %v809_v23  }
 0x13b   : > { %v2548_v30 = vsub.f32 %v3512_v29, %v548_v27  ;;  %v2551_v32 = vsub.f32 %v3513_v31, %v549_v28 }
 0x13d   : > { %v556_v33 = vmul.f32 %v2548_v30, %v2548_v30  ;;  %v557_v34 = vmul.f32 %v2551_v32, %v2551_v32 }
 0x13f   : > { %614 = vmatmul.f32.vlgmr.msra.gmra.mxu2 %v556_v33  ;;  %634 = vmatmul.f32.vlgmr.msra.gmra.mxu3 %v557_v34  ;;  %v802_v34 = vld [vmem:[%s3467_s4] sm:$0xff] }
 0x1b5   : > { %v575_v35 = vpop.f32.mrf.mxu0  ;;  %v595_v36 = vpop.f32.mrf.mxu1 }
 0x1b6   : > { %v596_v37 = vadd.f32 %v595_v36, %v575_v35  ;;  %v777_v36 = vperm.slane %v773_v4, 2 }
 0x1c2   : > { %v615_v38 = vpop.f32.mrf.mxu2  ;;  %v635_v40 = vpop.f32.mrf.mxu3 }
 0x1c3   : > { %v616_v39 = vadd.f32 %v615_v38, %v596_v37  ;;  %v778_v38 = vperm.slane %v773_v4, 3 }
 0x1c5   : > { %v636_v41 = vadd.f32 %v635_v40, %v616_v39 }
 0x1c7   : > { %1830 = vmatmul.msk.f32.vlgmr.msrb.gmra.mxu0 %vm462_vm0, %v636_v41  ;;  %1831 = vmatmul.msk.f32.vlgmr.msrb.gmra.mxu1 %vm462_vm0, %v636_v41 }
 0x1c8   : > { %1832 = vmatmul.msk.f32.vlgmr.msrb.gmra.mxu2 %vm462_vm0, %v636_v41  ;;  %1833 = vmatmul.msk.f32.vlgmr.msrb.gmra.mxu3 %vm462_vm0, %v636_v41  ;;  %v792_v41 = vperm.slane %v1834_v10, 2 }
 0x244   : > { %v658_v43 = vpop.f32.mrf.mxu0  ;;  %v678_v44 = vpop.f32.mrf.mxu1 }
 0x245   : > { %v721_v46 = vmul.f32 0.03125, %v658_v43  ;;  %v722_v47 = vmul.f32 0.03125, %v678_v44  ;;  %v793_v43 = vperm.slane %v1834_v10, 3 }
 0x247   : > { %v725_v48 = vadd.f32 1e-05, %v721_v46  ;;  %v726_v49 = vadd.f32 1e-05, %v722_v47 }
 0x249   : > { %1887 = vrsqrt.f32 %v725_v48  ;;  %vm735_vm3 = vweird.f32 %v725_v48  ;;  %vm745_vm5 = vweird.f32 %v726_v49 }
 0x24a   : > { %1889 = vrsqrt.f32 %v726_v49 }
 0x24b   : > { %v698_v50 = vpop.f32.mrf.mxu2  ;;  %v718_v51 = vpop.f32.mrf.mxu3 }
 0x24c   : > { %v723_v53 = vmul.f32 0.03125, %v698_v50  ;;  %v724_v54 = vmul.f32 0.03125, %v718_v51 }
 0x24e   : > { %v727_v55 = vadd.f32 1e-05, %v723_v53  ;;  %v728_v56 = vadd.f32 1e-05, %v724_v54 }
 0x24f   : > { %v1888_v57 = vpop.eup %1887 }
 0x250   : > { %v1890_v58 = vpop.eup %1889  ;;  %v730_v59 = vmul.f32 %v1888_v57, %v725_v48  ;;  %1891 = vrsqrt.f32 %v727_v55  ;;  %vm736_vm1 = vweird.f32 %v1888_v57  ;;  %vm755_vm9 = vweird.f32 %v727_v55  ;;  %v803_v48 = vld [vmem:[%s3467_s4 + $0x8] sm:$0xff] }
 0x251   : > { %v740_v60 = vmul.f32 %v1890_v58, %v726_v49  ;;  %1893 = vrsqrt.f32 %v728_v56  ;;  %vm746_vm2 = vweird.f32 %v1890_v58  ;;  %vm737_vm4 = vmor %vm735_vm3, %vm736_vm1  ;;  %vm765_vm12 = vweird.f32 %v728_v56  ;;  %v2611_v49 = vpop.permute.xlu1 %819 }
 0x252   : > { %v731_v61 = vmul.f32 %v1888_v57, %v730_v59  ;;  %vm747_vm6 = vmor %vm745_vm5, %vm746_vm2 }
 0x253   : > { %v741_v62 = vmul.f32 %v1890_v58, %v740_v60 }
 0x254   : > { %v732_v0 = vmul.f32 0.5, %v731_v61 }
 0x255   : > { %v742_v1 = vmul.f32 0.5, %v741_v62 }
 0x256   : > { %v1892_v2 = vpop.eup %1891  ;;  %v733_v3 = vsub.f32 1.5, %v732_v0 }
 0x257   : > { %v1894_v5 = vpop.eup %1893  ;;  %v743_v6 = vsub.f32 1.5, %v742_v1  ;;  %v750_v7 = vmul.f32 %v1892_v2, %v727_v55  ;;  %vm756_vm7 = vweird.f32 %v1892_v2 }
 0x258   : > { %v734_v8 = vmul.f32 %v1888_v57, %v733_v3  ;;  %v760_v9 = vmul.f32 %v1894_v5, %v728_v56  ;;  %vm766_vm8 = vweird.f32 %v1894_v5  ;;  %vm757_vm11 = vmor %vm755_vm9, %vm756_vm7 }
 0x259   : > { %v744_v11 = vmul.f32 %v1890_v58, %v743_v6  ;;  %v751_v12 = vmul.f32 %v1892_v2, %v750_v7  ;;  %vm767_vm13 = vmor %vm765_vm12, %vm766_vm8  ;;  %v2613_v50 = vpop.permute.xlu1 %814 }
 0x25a   : > { %v738_v14 = vsel %vm737_vm4, %v1888_v57, %v734_v8  ;;  %v761_v15 = vmul.f32 %v1894_v5, %v760_v9 }
 0x25b   : > { %v769_v17 = vmul.f32 %v738_v14, %v2538_v20  ;;  %v748_v18 = vsel %vm747_vm6, %v1890_v58, %v744_v11  ;;  %v752_v19 = vmul.f32 0.5, %v751_v12 }
 0x25c   : > { %v770_v24 = vmul.f32 %v748_v18, %v2541_v22  ;;  %v762_v25 = vmul.f32 0.5, %v761_v15 }
 0x25d   : > { %v753_v27 = vsub.f32 1.5, %v752_v19  ;;  %v783_v28 = vmul.f32 %v775_v13, %v769_v17 }
 0x25e   : > { %v763_v29 = vsub.f32 1.5, %v762_v25  ;;  %v784_v31 = vmul.f32 %v776_v16, %v770_v24 }
 0x25f   : > { %v754_v33 = vmul.f32 %v1892_v2, %v753_v27  ;;  %v798_v20 = vadd.f32 %v790_v21, %v783_v28 }
 0x260   : > { %v764_v35 = vmul.f32 %v1894_v5, %v763_v29  ;;  %v799_v22 = vadd.f32 %v791_v26, %v784_v31 }
 0x261   : > { %v758_v37 = vsel %vm757_vm11, %v1892_v2, %v754_v33  ;;  %860 = vmatpush.msra.mxu0 %v798_v20 }
 0x262   : > { %v771_v39 = vmul.f32 %v758_v37, %v2548_v30  ;;  %v768_v40 = vsel %vm767_vm13, %v1894_v5, %v764_v35  ;;  %889 = vmatpush.msra.mxu1 %v799_v22  ;;  %1835 = vmatmul.msk.f32.vlgmr.msra.gmra.mxu0 %vm832_vm10, %v802_v34  ;;  %v804_v30 = vld [vmem:[%s3467_s4 + $0x10] sm:$0xff] }
 0x263   : > { %v772_v42 = vmul.f32 %v768_v40, %v2551_v32  ;;  %1839 = vmatmul.msk.f32.vlgmr.msra.gmra.mxu1 %vm832_vm10, %v802_v34  ;;  %v805_v32 = vld [vmem:[%s3467_s4 + $0x18] sm:$0xff] }
 0x264   : > { %v785_v44 = vmul.f32 %v777_v36, %v771_v39 }
 0x265   : > { %v786_v45 = vmul.f32 %v778_v38, %v772_v42 }
 0x266   : > { %v800_v46 = vadd.f32 %v792_v41, %v785_v44 }
 0x267   : > { %v801_v47 = vadd.f32 %v793_v43, %v786_v45 }
 0x268   : > { %918 = vmatpush.msra.mxu2 %v800_v46 }
 0x269   : > { %947 = vmatpush.msra.mxu3 %v801_v47  ;;  %1843 = vmatmul.msk.f32.vlgmr.msra.gmra.mxu2 %vm832_vm10, %v802_v34 }
 0x26a   : > { %1847 = vmatmul.msk.f32.vlgmr.msra.gmra.mxu3 %vm832_vm10, %v802_v34  ;;  %1836 = vmatmul.msk.f32.gmra.mxu0 %vm832_vm10, %v803_v48 }
 0x26b   : > { %1840 = vmatmul.msk.f32.gmra.mxu1 %vm832_vm10, %v803_v48 }
 0x271   : > { %1844 = vmatmul.msk.f32.gmra.mxu2 %vm832_vm10, %v803_v48 }
 0x272   : > { %1848 = vmatmul.msk.f32.gmra.mxu3 %vm832_vm10, %v803_v48  ;;  %1837 = vmatmul.msk.f32.gmra.mxu0 %vm832_vm10, %v804_v30 }
 0x273   : > { %1841 = vmatmul.msk.f32.gmra.mxu1 %vm832_vm10, %v804_v30 }
 0x279   : > { %1845 = vmatmul.msk.f32.gmra.mxu2 %vm832_vm10, %v804_v30 }
 0x27a   : > { %1849 = vmatmul.msk.f32.gmra.mxu3 %vm832_vm10, %v804_v30  ;;  %1838 = vmatmul.msk.f32.gmra.mxu0 %vm832_vm10, %v805_v32 }
 0x27b   : > { %1842 = vmatmul.msk.f32.gmra.mxu1 %vm832_vm10, %v805_v32 }
 0x281   : > { %1846 = vmatmul.msk.f32.gmra.mxu2 %vm832_vm10, %v805_v32 }
 0x282   : > { %1850 = vmatmul.msk.f32.gmra.mxu3 %vm832_vm10, %v805_v32  ;;  %v2684_v32 = vpop.permute.xlu0 %829 }
 0x2df   : > { %v862_v51 = vpop.f32.mrf.mxu0 }
 0x2e0   : > { %v2616_v52 = vadd.f32 %v862_v51, %v2613_v50  ;;  %v891_v53 = vpop.f32.mrf.mxu1 }
 0x2e1   : > { %v2619_v54 = vadd.f32 %v891_v53, %v2613_v50 }
 0x2e2   : > { %v2622_v55 = vmul.f32 0.70710677, %v2616_v52 }
 0x2e3   : > { %v2625_v56 = vmul.f32 0.70710677, %v2619_v54 }
 0x2e4   : > { %v993_v57 = vmul.f32 %v2622_v55, %v2622_v55 }
 0x2e5   : > { %v1033_v58 = vmul.f32 %v2625_v56, %v2625_v56 }
 0x2e6   : > { %v2631_v59 = vmin.f32 %v993_v57, 16.0 }
 0x2e7   : > { %v2633_v60 = vmin.f32 %v1033_v58, 16.0  ;;  %v865_v61 = vpop.f32.mrf.mxu0 }
 0x2e8   : > { %v1006_v62 = vmul.f32 3.8918573e-05, %v2631_v59  ;;  %v2637_v63 = vadd.f32 %v865_v61, %v2611_v49  ;;  %v894_v0 = vpop.f32.mrf.mxu1  ;;  %v995_v18 = vmul.f32 2.1237322e-06, %v2631_v59 }
 0x2e9   : > { %v1046_v1 = vmul.f32 3.8918573e-05, %v2633_v60  ;;  %v2641_v2 = vadd.f32 %v894_v0, %v2611_v49  ;;  %v1035_v19 = vmul.f32 2.1237322e-06, %v2633_v60 }
 0x2ea   : > { %v1007_v3 = vadd.f32 0.001143296, %v1006_v62  ;;  %v2644_v5 = vmul.f32 0.70710677, %v2637_v63  ;;  %v996_v27 = vadd.f32 0.00028619796, %v995_v18 }
 0x2eb   : > { %v1047_v4 = vadd.f32 0.001143296, %v1046_v1  ;;  %v2648_v7 = vmul.f32 0.70710677, %v2641_v2  ;;  %v1036_v28 = vadd.f32 0.00028619796, %v1035_v19 }
 0x2ec   : > { %v1008_v6 = vmul.f32 %v1007_v3, %v2631_v59  ;;  %v1153_v9 = vmul.f32 %v2644_v5, %v2644_v5  ;;  %v920_v15 = vpop.f32.mrf.mxu2  ;;  %v997_v35 = vmul.f32 %v996_v27, %v2631_v59 }
 0x2ed   : > { %v1048_v8 = vmul.f32 %v1047_v4, %v2633_v60  ;;  %v1193_v11 = vmul.f32 %v2648_v7, %v2648_v7  ;;  %v2664_v21 = vadd.f32 %v920_v15, %v2613_v50  ;;  %v1037_v22 = vmul.f32 %v1036_v28, %v2633_v60  ;;  %v949_v30 = vpop.f32.mrf.mxu3  ;;  %v2711_v28 = vpop.permute.xlu0 %824 }
 0x2ee   : > { %v1009_v10 = vadd.f32 0.014752088, %v1008_v6  ;;  %v2655_v12 = vmin.f32 %v1153_v9, 16.0  ;;  %v998_v42 = vadd.f32 0.0036580483, %v997_v35  ;;  %v2691_v0 = vadd.f32 %v949_v30, %v2613_v50 }
 0x2ef   : > { %v1049_v14 = vadd.f32 0.014752088, %v1048_v8  ;;  %v2659_v17 = vmin.f32 %v1193_v11, 16.0  ;;  %v2669_v29 = vmul.f32 0.70710677, %v2664_v21  ;;  %v2735_v30 = vmul.f32 0.5, %v2619_v54 }
 0x2f0   : > { %v1010_v13 = vmul.f32 %v1009_v10, %v2631_v59  ;;  %v1166_v16 = vmul.f32 3.8918573e-05, %v2655_v12  ;;  %v1155_v39 = vmul.f32 2.1237322e-06, %v2655_v12  ;;  %v1038_v43 = vadd.f32 0.0036580483, %v1037_v22  ;;  %v897_v22 = vpop.f32.mrf.mxu1 }
 0x2f1   : > { %v1050_v24 = vmul.f32 %v1049_v14, %v2633_v60  ;;  %v1206_v26 = vmul.f32 3.8918573e-05, %v2659_v17  ;;  %v1073_v36 = vmul.f32 %v2669_v29, %v2669_v29  ;;  %v1195_v44 = vmul.f32 2.1237322e-06, %v2659_v17  ;;  %3514 = vst [vmem:[#allocation2_spill] sm:$0xff] %v2691_v0 }
 0x2f2   : > { %v1011_v23 = vadd.f32 0.112945676, %v1010_v13  ;;  %v1167_v25 = vadd.f32 0.001143296, %v1166_v16  ;;  %v1156_v48 = vadd.f32 0.00028619796, %v1155_v39  ;;  %v999_v57 = vmul.f32 %v998_v42, %v2631_v59 }
 0x2f3   : > { %v1051_v33 = vadd.f32 0.112945676, %v1050_v24  ;;  %v1207_v34 = vadd.f32 0.001143296, %v1206_v26  ;;  %v2681_v45 = vmin.f32 %v1073_v36, 16.0  ;;  %v1039_v61 = vmul.f32 %v1038_v43, %v2633_v60 }
 0x2f4   : > { %v1012_v31 = vmul.f32 %v1011_v23, %v2631_v59  ;;  %v1168_v20 = vmul.f32 %v1167_v25, %v2655_v12  ;;  %v1196_v62 = vadd.f32 0.00028619796, %v1195_v44  ;;  %v1157_v4 = vmul.f32 %v1156_v48, %v2655_v12 }
 0x2f5   : > { %v1052_v38 = vmul.f32 %v1051_v33, %v2633_v60  ;;  %v1208_v41 = vmul.f32 %v1207_v34, %v2659_v17  ;;  %v1086_v58 = vmul.f32 3.8918573e-05, %v2681_v45  ;;  %v1000_v9 = vadd.f32 0.05243302, %v999_v57 }
 0x2f6   : > { %v1013_v37 = vadd.f32 0.4994258, %v1012_v31  ;;  %v1169_v40 = vadd.f32 0.014752088, %v1168_v20  ;;  %v1040_v11 = vadd.f32 0.05243302, %v1039_v61  ;;  %v1197_v13 = vmul.f32 %v1196_v62, %v2659_v17  ;;  %v868_v31 = vpop.f32.mrf.mxu0 }
 0x2f7   : > { %v1053_v47 = vadd.f32 0.4994258, %v1052_v38  ;;  %v1209_v53 = vadd.f32 0.014752088, %v1208_v41  ;;  %v1087_v10 = vadd.f32 0.001143296, %v1086_v58  ;;  %v1001_v23 = vmul.f32 %v1000_v9, %v2631_v59 }
 0x2f8   : > { %v1014_v46 = vmul.f32 %v1013_v37, %v2631_v59  ;;  %v1170_v51 = vmul.f32 %v1169_v40, %v2655_v12  ;;  %v2700_v14 = vmul.f32 0.70710677, %v2691_v0  ;;  %v1158_v15 = vadd.f32 0.0036580483, %v1157_v4 }
 0x2f9   : > { %v1054_v3 = vmul.f32 %v1053_v47, %v2633_v60  ;;  %v1210_v8 = vmul.f32 %v1209_v53, %v2659_v17  ;;  %v1088_v16 = vmul.f32 %v1087_v10, %v2681_v45  ;;  %v1041_v24 = vmul.f32 %v1040_v11, %v2633_v60 }
 0x2fa   : > { %v2693_v1 = vadd.f32 1.0, %v1014_v46  ;;  %v1171_v6 = vadd.f32 0.112945676, %v1170_v51  ;;  %v1198_v25 = vadd.f32 0.0036580483, %v1197_v13  ;;  %v1113_v27 = vmul.f32 %v2700_v14, %v2700_v14 }
 0x2fb   : > { %v2703_v50 = vadd.f32 1.0, %v1054_v3  ;;  %v1211_v19 = vadd.f32 0.112945676, %v1210_v8  ;;  %v1089_v26 = vadd.f32 0.014752088, %v1088_v16  ;;  %v1159_v33 = vmul.f32 %v1158_v15, %v2655_v12 }
 0x2fc   : > { %1895 = vrcp.f32 %v2693_v1  ;;  %v1172_v18 = vmul.f32 %v1171_v6, %v2655_v12  ;;  %v1002_v37 = vadd.f32 0.18741608, %v1001_v23  ;;  %v1075_v38 = vmul.f32 2.1237322e-06, %v2681_v45 }
 0x2fd   : > { %1897 = vrcp.f32 %v2703_v50  ;;  %v1212_v34 = vmul.f32 %v1211_v19, %v2659_v17  ;;  %v1090_v35 = vmul.f32 %v1089_v26, %v2681_v45  ;;  %v2721_v39 = vadd.f32 %v868_v31, %v2711_v28 }
 0x2fe   : > { %v1173_v20 = vadd.f32 0.4994258, %v1172_v18  ;;  %v1042_v40 = vadd.f32 0.18741608, %v1041_v24  ;;  %v1199_v41 = vmul.f32 %v1198_v25, %v2659_v17  ;;  %v2724_v43 = vmin.f32 %v1113_v27, 16.0 }
 0x2ff   : > { %v1091_v42 = vadd.f32 0.112945676, %v1090_v35  ;;  %v2727_v44 = vmul.f32 0.5, %v2616_v52  ;;  %v1160_v46 = vadd.f32 0.05243302, %v1159_v33  ;;  %v2730_v47 = vadd.f32 %v897_v22, %v2711_v28 }
 0x300   : > { %v1174_v51 = vmul.f32 %v1173_v20, %v2655_v12  ;;  %v1213_v53 = vadd.f32 0.4994258, %v1212_v34  ;;  %v1003_v58 = vmul.f32 %v1002_v37, %v2631_v59  ;;  %v1076_v61 = vadd.f32 0.00028619796, %v1075_v38 }
 0x301   : > { %v1126_v52 = vmul.f32 3.8918573e-05, %v2724_v43  ;;  %v2743_v62 = vmul.f32 0.70710677, %v2721_v39  ;;  %v1043_v3 = vmul.f32 %v1042_v40, %v2633_v60  ;;  %v2747_v4 = vmul.f32 0.5, %v2637_v63 }
 0x302   : > { %v2717_v36 = vpop.eup %1895  ;;  %v1200_v54 = vadd.f32 0.05243302, %v1199_v41  ;;  %v1092_v6 = vmul.f32 %v1091_v42, %v2681_v45  ;;  %v1161_v8 = vmul.f32 %v1160_v46, %v2655_v12  ;;  %v2754_v10 = vmul.f32 0.70710677, %v2730_v47 }
 0x303   : > { %v1017_v48 = vmul.f32 %v2717_v36, %v2693_v1  ;;  %v2738_v57 = vpop.eup %1897  ;;  %v1127_v9 = vadd.f32 0.001143296, %v1126_v52  ;;  %v1313_v59 = vmul.f32 %v2743_v62, %v2743_v62  ;;  %v2758_v60 = vadd.f32 1.0, %v1174_v51  ;;  %v923_v52 = vpop.f32.mrf.mxu2 }
 0x304   : > { %v1057_v13 = vmul.f32 %v2738_v57, %v2703_v50  ;;  %v1214_v63 = vmul.f32 %v1213_v53, %v2659_v17  ;;  %v1004_v15 = vadd.f32 1.1283791, %v1003_v58  ;;  %v2762_v16 = vmul.f32 0.5, %v2641_v2 }
 0x305   : > { %v1018_v11 = vsub.f32 1.0, %v1017_v48  ;;  %v2765_v18 = vmul.f32 0.5, %v2664_v21  ;;  %v1077_v19 = vmul.f32 %v1076_v61, %v2681_v45  ;;  %v1025_v23 = vand.u32 2147483647, %v2693_v1 }
 0x306   : > { %v1044_v24 = vadd.f32 1.1283791, %v1043_v3  ;;  %v1201_v25 = vmul.f32 %v1200_v54, %v2659_v17  ;;  %v1093_v26 = vadd.f32 0.4994258, %v1092_v6  ;;  %v1162_v27 = vadd.f32 0.18741608, %v1161_v8 }
 0x307   : > { %3515 = vst [vmem:[#allocation3_spill] sm:$0xff] %v2765_v18  ;;  %v1128_v31 = vmul.f32 %v1127_v9, %v2724_v43  ;;  %v2771_v33 = vmin.f32 %v1313_v59, 16.0  ;;  %v1353_v2 = vmul.f32 %v2754_v10, %v2754_v10  ;;  %v1019_v20 = vmul.f32 %v2717_v36, %v1018_v11 }
 0x308   : > { %v1058_v21 = vsub.f32 1.0, %v1057_v13  ;;  %1899 = vrcp.f32 %v2758_v60  ;;  %v2777_v34 = vadd.f32 1.0, %v1214_v63  ;;  %v2780_v35 = vmul.f32 %v1004_v15, %v2622_v55 }
 0x309   : > { %vm1021_vm14 = vweird.f32 %v2693_v1  ;;  %v1027_v22 = vand.u32 2147483648, %v2693_v1  ;;  %v1078_v37 = vadd.f32 0.0036580483, %v1077_v19  ;;  %vm1061_vm15 = vweird.f32 %v2703_v50 }
 0x30a   : > { %v1065_v38 = vand.u32 2147483647, %v2703_v50  ;;  %v1067_v40 = vand.u32 2147483648, %v2703_v50  ;;  %v1202_v41 = vadd.f32 0.18741608, %v1201_v25  ;;  %v1094_v42 = vmul.f32 %v1093_v26, %v2681_v45 }
 0x30b   : > { %vm2788_vm0 = vcmp.eq.f32.partialorder %v1025_v23, 8.507059e+37  ;;  %v1163_v55 = vmul.f32 %v1162_v27, %v2655_v12  ;;  %v1129_v48 = vadd.f32 0.014752088, %v1128_v31  ;;  %v1326_v51 = vmul.f32 3.8918573e-05, %v2771_v33 }
 0x30c   : > { %v2794_v53 = vmin.f32 %v1353_v2, 16.0  ;;  %v1020_v58 = vadd.f32 %v2717_v36, %v1019_v20  ;;  %vm1022_vm1 = vweird.f32 %v2717_v36  ;;  %v1059_v61 = vmul.f32 %v2738_v57, %v1058_v21 }
 0x30d   : > { %1901 = vrcp.f32 %v2777_v34  ;;  %v1028_v3 = vor.u32 1.1754944e-38, %v1027_v22  ;;  %v1079_v54 = vmul.f32 %v1078_v37, %v2681_v45  ;;  %v1115_v6 = vmul.f32 2.1237322e-06, %v2724_v43  ;;  %vm2814_vm3 = vmor %vm1021_vm14, %vm1022_vm1 }
 0x30e   : > { %v1327_v12 = vadd.f32 0.001143296, %v1326_v51  ;;  %v2802_v8 = vpop.eup %1899  ;;  %vm2804_vm2 = vcmp.eq.f32.partialorder %v1065_v38, 8.507059e+37  ;;  %v1068_v59 = vor.u32 1.1754944e-38, %v1067_v40  ;;  %v1203_v11 = vmul.f32 %v1202_v41, %v2659_v17 }
 0x30f   : > { %v2809_v13 = vadd.f32 1.0, %v1094_v42  ;;  %v1366_v63 = vmul.f32 3.8918573e-05, %v2794_v53  ;;  %v1130_v19 = vmul.f32 %v1129_v48, %v2724_v43  ;;  %v1315_v23 = vmul.f32 2.1237322e-06, %v2771_v33 }
 0x310   : > { %v1328_v25 = vmul.f32 %v1327_v12, %v2771_v33  ;;  %v2822_v26 = vadd.f32 %v923_v52, %v2611_v49  ;;  %v1024_v17 = vsel %vm2814_vm3, %v2717_v36, %v1020_v58  ;;  %v1060_v27 = vadd.f32 %v2738_v57, %v1059_v61 }
 0x311   : > { %vm1062_vm4 = vweird.f32 %v2738_v57  ;;  %v1164_v1 = vadd.f32 1.1283791, %v1163_v55  ;;  %v1177_v31 = vmul.f32 %v2802_v8, %v2758_v60  ;;  %v1080_v2 = vadd.f32 0.05243302, %v1079_v54 }
 0x312   : > { %v1116_v20 = vadd.f32 0.00028619796, %v1115_v6  ;;  %v1329_v21 = vadd.f32 0.014752088, %v1328_v25  ;;  %v1204_v37 = vadd.f32 1.1283791, %v1203_v11  ;;  %1903 = vrcp.f32 %v2809_v13  ;;  %vm2838_vm5 = vmor %vm1061_vm15, %vm1062_vm4 }
 0x313   : > { %v2831_v22 = vpop.eup %1901  ;;  %v1355_v38 = vmul.f32 2.1237322e-06, %v2794_v53  ;;  %v1367_v40 = vadd.f32 0.001143296, %v1366_v63  ;;  %v1045_v36 = vmul.f32 %v1044_v24, %v2625_v56  ;;  %v1131_v42 = vadd.f32 0.112945676, %v1130_v19 }
 0x314   : > { %v1316_v55 = vadd.f32 0.00028619796, %v1315_v23  ;;  %v2843_v48 = vmul.f32 0.70710677, %v2822_v26  ;;  %v1029_v51 = vsel %vm2788_vm0, %v1028_v3, %v1024_v17  ;;  %v1064_v58 = vsel %vm2838_vm5, %v2738_v57, %v1060_v27 }
 0x315   : > { %v1187_v56 = vand.u32 2147483648, %v2758_v60  ;;  %v1330_v50 = vmul.f32 %v1329_v21, %v2771_v33  ;;  %v1178_v24 = vsub.f32 1.0, %v1177_v31  ;;  %v1217_v61 = vmul.f32 %v2831_v22, %v2777_v34 }
 0x316   : > { %v1081_v52 = vmul.f32 %v1080_v2, %v2681_v45  ;;  %v1117_v54 = vmul.f32 %v1116_v20, %v2724_v43  ;;  %v2857_v6 = vmul.f32 %v1164_v1, %v2644_v5  ;;  %v1356_v46 = vadd.f32 0.00028619796, %v1355_v38 }
 0x317   : > { %v1368_v3 = vmul.f32 %v1367_v40, %v2794_v53  ;;  %v1233_v57 = vmul.f32 %v2843_v48, %v2843_v48  ;;  %v1069_v12 = vsel %vm2804_vm2, %v1068_v59, %v1064_v58  ;;  %vm1181_vm6 = vweird.f32 %v2758_v60 }
 0x318   : > { %v1185_v11 = vand.u32 2147483647, %v2758_v60  ;;  %v1132_v63 = vmul.f32 %v1131_v42, %v2724_v43  ;;  %v1317_v15 = vmul.f32 %v1316_v55, %v2771_v33  ;;  %v2868_v19 = vpop.eup %1903  ;;  %v2871_v5 = vmul.f32 %v1029_v51, %v2780_v35  ;;  %v952_v42 = vpop.f32.mrf.mxu3 }
 0x319   : > { %v1188_v23 = vor.u32 1.1754944e-38, %v1187_v56  ;;  %v2874_v25 = vmul.f32 %v1204_v37, %v2648_v7  ;;  %v1331_v17 = vadd.f32 0.112945676, %v1330_v50  ;;  %v1179_v9 = vmul.f32 %v2802_v8, %v1178_v24  ;;  %v871_v60 = vpop.f32.mrf.mxu0 }
 0x31a   : > { %v1218_v59 = vsub.f32 1.0, %v1217_v61  ;;  %v1082_v27 = vadd.f32 0.18741608, %v1081_v52  ;;  %v1118_v1 = vadd.f32 0.0036580483, %v1117_v54  ;;  %v2877_v31 = vmul.f32 %v1069_v12, %v1045_v36 }
 0x31b   : > { %v1357_v2 = vmul.f32 %v1356_v46, %v2794_v53  ;;  %v1369_v20 = vadd.f32 0.014752088, %v1368_v3  ;;  %v2880_v21 = vmin.f32 %v1233_v57, 16.0  ;;  %vm2882_vm7 = vcmp.eq.f32.partialorder %v1185_v11, 8.507059e+37 }
 0x31c   : > { %vm1221_vm8 = vweird.f32 %v2777_v34  ;;  %v1097_v7 = vmul.f32 %v2868_v19, %v2809_v13  ;;  %v1133_v37 = vadd.f32 0.4994258, %v1132_v63  ;;  %v1318_v38 = vadd.f32 0.0036580483, %v1317_v15 }
 0x31d   : > { %vm1182_vm9 = vweird.f32 %v2802_v8  ;;  %v1227_v40 = vand.u32 2147483648, %v2777_v34  ;;  %v1332_v36 = vmul.f32 %v1331_v17, %v2771_v33  ;;  %v1246_v41 = vmul.f32 3.8918573e-05, %v2880_v21 }
 0x31e   : > { %v1180_v55 = vadd.f32 %v2802_v8, %v1179_v9  ;;  %v1219_v51 = vmul.f32 %v2831_v22, %v1218_v59  ;;  %v1083_v58 = vmul.f32 %v1082_v27, %v2681_v45  ;;  %v1119_v56 = vmul.f32 %v1118_v1, %v2724_v43  ;;  %vm2908_vm10 = vmor %vm1181_vm6, %vm1182_vm9 }
 0x31f   : > { %v1225_v50 = vand.u32 2147483647, %v2777_v34  ;;  %v1358_v24 = vadd.f32 0.0036580483, %v1357_v2  ;;  %v1370_v61 = vmul.f32 %v1369_v20, %v2794_v53  ;;  %v1247_v52 = vadd.f32 0.001143296, %v1246_v41 }
 0x320   : > { %v1098_v54 = vsub.f32 1.0, %v1097_v7  ;;  %v1134_v46 = vmul.f32 %v1133_v37, %v2724_v43  ;;  %v1319_v3 = vmul.f32 %v1318_v38, %v2771_v33  ;;  %v2902_v57 = vadd.f32 %v952_v42, %v2611_v49  ;;  %v900_v42 = vpop.f32.mrf.mxu1 }
 0x321   : > { %vm1222_vm11 = vweird.f32 %v2831_v22  ;;  %v1228_v12 = vor.u32 1.1754944e-38, %v1227_v40  ;;  %v2914_v11 = vmul.f32 0.5, %v2721_v39  ;;  %v1333_v63 = vadd.f32 0.4994258, %v1332_v36 }
 0x322   : > { %3526 = vst [vmem:[#allocation4_spill] sm:$0xff] %v2902_v57  ;;  %v1184_v49 = vsel %vm2908_vm10, %v2802_v8, %v1180_v55  ;;  %v1220_v15 = vadd.f32 %v2831_v22, %v1219_v51  ;;  %v1084_v17 = vadd.f32 1.1283791, %v1083_v58  ;;  %v1120_v9 = vadd.f32 0.05243302, %v1119_v56  ;;  %vm2941_vm13 = vmor %vm1221_vm8, %vm1222_vm11 }
 0x323   : > { %vm2920_vm12 = vcmp.eq.f32.partialorder %v1225_v50, 8.507059e+37  ;;  %v2925_v27 = vmul.f32 0.5, %v2730_v47  ;;  %v1359_v39 = vmul.f32 %v1358_v24, %v2794_v53  ;;  %v1371_v1 = vadd.f32 0.112945676, %v1370_v61 }
 0x324   : > { %v1248_v2 = vmul.f32 %v1247_v52, %v2880_v21  ;;  %v1099_v20 = vmul.f32 %v2868_v19, %v1098_v54  ;;  %v2930_v8 = vadd.f32 1.0, %v1134_v46  ;;  %v1320_v7 = vadd.f32 0.05243302, %v1319_v3 }
 0x325   : > { %v2933_v37 = vmul.f32 0.70710677, %v2902_v57  ;;  %v1189_v38 = vsel %vm2882_vm7, %v1188_v23, %v1184_v49  ;;  %v1334_v40 = vmul.f32 %v1333_v63, %v2771_v33  ;;  %v1235_v36 = vmul.f32 2.1237322e-06, %v2880_v21 }
 0x326   : > { %v2948_v41 = vadd.f32 %v871_v60, %v2684_v32  ;;  %v1224_v23 = vsel %vm2941_vm13, %v2831_v22, %v1220_v15  ;;  %v1085_v35 = vmul.f32 %v1084_v17, %v2669_v29  ;;  %v1121_v34 = vmul.f32 %v1120_v9, %v2724_v43 }
 0x327   : > { %v1273_v55 = vmul.f32 %v2933_v37, %v2933_v37  ;;  %vm1102_vm14 = vweird.f32 %v2868_v19  ;;  %v1360_v51 = vadd.f32 0.05243302, %v1359_v39  ;;  %v1372_v58 = vmul.f32 %v1371_v1, %v2794_v53 }
 0x328   : > { %v1249_v56 = vadd.f32 0.014752088, %v1248_v2  ;;  %v1100_v50 = vadd.f32 %v2868_v19, %v1099_v20  ;;  %1905 = vrcp.f32 %v2930_v8  ;;  %v1321_v24 = vmul.f32 %v1320_v7, %v2771_v33 }
 0x329   : > { %v2963_v22 = vadd.f32 %v900_v42, %v2684_v32  ;;  %v2965_v29 = vadd.f32 1.0, %v1334_v40  ;;  %v1236_v61 = vadd.f32 0.00028619796, %v1235_v36  ;;  %v2967_v52 = vmin.f32 %v1273_v55, 16.0 }
 0x32a   : > { %v2970_v54 = vmul.f32 0.70710677, %v2948_v41  ;;  %vm1101_vm15 = vweird.f32 %v2809_v13  ;;  %v1105_v46 = vand.u32 2147483647, %v2809_v13  ;;  %v1107_v3 = vand.u32 2147483648, %v2809_v13 }
 0x32b   : > { %v1122_v45 = vadd.f32 0.18741608, %v1121_v34  ;;  %vm2977_vm0 = vmor %vm1101_vm15, %vm1102_vm14  ;;  %v1361_v49 = vmul.f32 %v1360_v51, %v2794_v53  ;;  %v1373_v15 = vadd.f32 0.4994258, %v1372_v58  ;;  %v1250_v17 = vmul.f32 %v1249_v56, %v2880_v21 }
 0x32c   : > { %v1473_v9 = vmul.f32 %v2970_v54, %v2970_v54  ;;  %v1229_v60 = vsel %vm2920_vm12, %v1228_v12, %v1224_v23  ;;  %v1104_v13 = vsel %vm2977_vm0, %v2868_v19, %v1100_v50  ;;  %v1322_v39 = vadd.f32 0.18741608, %v1321_v24  ;;  %v926_v50 = vpop.f32.mrf.mxu2 }
 0x32d   : > { %v2991_v1 = vmul.f32 0.70710677, %v2963_v22  ;;  %1907 = vrcp.f32 %v2965_v29  ;;  %v1237_v2 = vmul.f32 %v1236_v61, %v2880_v21  ;;  %v1286_v20 = vmul.f32 3.8918573e-05, %v2967_v52  ;;  %v955_v61 = vpop.f32.mrf.mxu3 }
 0x32e   : > { %v2996_v7 = vmin.f32 %v1473_v9, 16.0  ;;  %v2998_v47 = vpop.eup %1905  ;;  %v3001_v12 = vmul.f32 %v1189_v38, %v2857_v6  ;;  %vm1106_vm1 = vcmp.eq.f32.partialorder %v1105_v46, 8.507059e+37  ;;  %v1108_v59 = vor.u32 1.1754944e-38, %v1107_v3 }
 0x32f   : > { %3535 = vst [vmem:[#allocation5_spill] sm:$0xff] %v2998_v47  ;;  %v1123_v19 = vmul.f32 %v1122_v45, %v2724_v43  ;;  %v1362_v40 = vadd.f32 0.18741608, %v1361_v49  ;;  %v1374_v36 = vmul.f32 %v1373_v15, %v2794_v53  ;;  %v1251_v42 = vadd.f32 0.112945676, %v1250_v17 }
 0x330   : > { %v1475_v23 = vmul.f32 2.1237322e-06, %v2996_v7  ;;  %v3007_v34 = vmul.f32 %v1229_v60, %v2874_v25  ;;  %v1109_v55 = vsel %vm1106_vm1, %v1108_v59, %v1104_v13  ;;  %v1323_v51 = vmul.f32 %v1322_v39, %v2771_v33 }
 0x331   : > { %v1513_v6 = vmul.f32 %v2991_v1, %v2991_v1  ;;  %v1137_v38 = vmul.f32 %v2998_v47, %v2930_v8  ;;  %v1238_v58 = vadd.f32 0.0036580483, %v1237_v2  ;;  %v1287_v43 = vadd.f32 0.001143296, %v1286_v20 }
 0x332   : > { %v1476_v56 = vadd.f32 0.00028619796, %v1475_v23  ;;  %v3014_v24 = vadd.f32 1.1283791, %v1123_v19  ;;  %v3019_v46 = vmul.f32 0.5, %v2822_v26  ;;  %v3023_v3 = vmul.f32 %v1109_v55, %v1085_v35 }
 0x333   : > { %v3021_v33 = vpop.eup %1907  ;;  %v1363_v45 = vmul.f32 %v1362_v40, %v2794_v53  ;;  %v3026_v63 = vadd.f32 1.0, %v1374_v36  ;;  %v1252_v49 = vmul.f32 %v1251_v42, %v2880_v21  ;;  %v1486_v17 = vmul.f32 3.8918573e-05, %v2996_v7 }
 0x334   : > { %3536 = vst [vmem:[#allocation6_spill] sm:$0xff] %v3019_v46  ;;  %v1477_v15 = vmul.f32 %v1476_v56, %v2996_v7  ;;  %v3031_v9 = vmin.f32 %v1513_v6, 16.0  ;;  %v3034_v60 = vadd.f32 %v926_v50, %v2711_v28  ;;  %v1138_v26 = vsub.f32 1.0, %v1137_v38 }
 0x335   : > { %v1324_v13 = vadd.f32 1.1283791, %v1323_v51  ;;  %v1239_v35 = vmul.f32 %v1238_v58, %v2880_v21  ;;  %v1288_v39 = vmul.f32 %v1287_v43, %v2967_v52  ;;  %v1337_v53 = vmul.f32 %v3021_v33, %v2965_v29 }
 0x336   : > { %v1345_v2 = vand.u32 2147483647, %v2965_v29  ;;  %v1347_v20 = vand.u32 2147483648, %v2965_v29  ;;  %v1487_v59 = vadd.f32 0.001143296, %v1486_v17  ;;  %vm1142_vm2 = vweird.f32 %v2998_v47 }
 0x337   : > { %v1364_v19 = vadd.f32 1.1283791, %v1363_v45  ;;  %1909 = vrcp.f32 %v3026_v63  ;;  %v1515_v40 = vmul.f32 2.1237322e-06, %v3031_v9  ;;  %v1526_v36 = vmul.f32 3.8918573e-05, %v3031_v9 }
 0x338   : > { %v1253_v42 = vadd.f32 0.4994258, %v1252_v49  ;;  %v1478_v23 = vadd.f32 0.0036580483, %v1477_v15  ;;  %v1488_v55 = vmul.f32 %v1487_v59, %v2996_v7  ;;  %v3048_v51 = vmul.f32 0.70710677, %v3034_v60 }
 0x339   : > { %vm1141_vm3 = vweird.f32 %v2930_v8  ;;  %v3052_v6 = vmul.f32 %v1324_v13, %v2743_v62  ;;  %v1240_v38 = vadd.f32 0.05243302, %v1239_v35  ;;  %v1289_v58 = vadd.f32 0.014752088, %v1288_v39 }
 0x33a   : > { %v1516_v43 = vadd.f32 0.00028619796, %v1515_v40  ;;  %v1139_v56 = vmul.f32 %v2998_v47, %v1138_v26  ;;  %v1338_v50 = vsub.f32 1.0, %v1337_v53  ;;  %v3055_v45 = vor.u32 1.1754944e-38, %v1347_v20  ;;  %vm3098_vm6 = vmor %vm1141_vm3, %vm1142_vm2 }
 0x33b   : > { %v1489_v49 = vadd.f32 0.014752088, %v1488_v55  ;;  %v3058_v15 = vmul.f32 %v1364_v19, %v2754_v10  ;;  %v1275_v17 = vmul.f32 2.1237322e-06, %v2967_v52  ;;  %v1527_v25 = vadd.f32 0.001143296, %v1526_v36 }
 0x33c   : > { %v1517_v59 = vmul.f32 %v1516_v43, %v3031_v9  ;;  %vm1341_vm4 = vweird.f32 %v2965_v29  ;;  %v1254_v62 = vmul.f32 %v1253_v42, %v2880_v21  ;;  %v1479_v13 = vmul.f32 %v1478_v23, %v2996_v7 }
 0x33d   : > { %v1490_v26 = vmul.f32 %v1489_v49, %v2996_v7  ;;  %v1393_v35 = vmul.f32 %v3048_v51, %v3048_v51  ;;  %v3068_v39 = vpop.eup %1909  ;;  %v1241_v10 = vmul.f32 %v1240_v38, %v2880_v21  ;;  %v1290_v53 = vmul.f32 %v1289_v58, %v2967_v52 }
 0x33e   : > { %v1518_v20 = vadd.f32 0.0036580483, %v1517_v59  ;;  %v1528_v19 = vmul.f32 %v1527_v25, %v3031_v9  ;;  %v3074_v40 = vadd.f32 %v2998_v47, %v1139_v56  ;;  %v1339_v36 = vmul.f32 %v3021_v33, %v1338_v50 }
 0x33f   : > { %v3078_v42 = vmul.f32 0.5, %v2948_v41  ;;  %v1491_v23 = vadd.f32 0.112945676, %v1490_v26  ;;  %v1276_v43 = vadd.f32 0.00028619796, %v1275_v17  ;;  %vm3082_vm5 = vcmp.eq.f32.partialorder %v1345_v2, 8.507059e+37 }
 0x340   : > { %3537 = vst [vmem:[#allocation7_spill] sm:$0xff] %v3074_v40  ;;  %v1519_v49 = vmul.f32 %v1518_v20, %v3031_v9  ;;  %v1529_v38 = vadd.f32 0.014752088, %v1528_v19  ;;  %v1387_v25 = vand.u32 2147483648, %v3026_v63  ;;  %v3087_v56 = vadd.f32 1.0, %v1254_v62 }
 0x341   : > { %v1480_v50 = vadd.f32 0.05243302, %v1479_v13  ;;  %v3089_v59 = vmin.f32 %v1393_v35, 16.0  ;;  %v1377_v41 = vmul.f32 %v3068_v39, %v3026_v63  ;;  %v1242_v26 = vadd.f32 0.18741608, %v1241_v10 }
 0x342   : > { %v1291_v17 = vadd.f32 0.112945676, %v1290_v53  ;;  %v1492_v20 = vmul.f32 %v1491_v23, %v2996_v7  ;;  %v1340_v62 = vadd.f32 %v3021_v33, %v1339_v36  ;;  %vm1342_vm7 = vweird.f32 %v3021_v33 }
 0x343   : > { %v1530_v13 = vmul.f32 %v1529_v38, %v3031_v9  ;;  %v3106_v35 = vadd.f32 %v955_v61, %v2711_v28  ;;  %v1277_v53 = vmul.f32 %v1276_v43, %v2967_v52  ;;  %v1520_v23 = vadd.f32 0.05243302, %v1519_v49  ;;  %vm3118_vm8 = vmor %vm1341_vm4, %vm1342_vm7 }
 0x344   : > { %v1493_v19 = vadd.f32 0.4994258, %v1492_v20  ;;  %1911 = vrcp.f32 %v3087_v56  ;;  %v1481_v36 = vmul.f32 %v1480_v50, %v2996_v7  ;;  %v1406_v0 = vmul.f32 3.8918573e-05, %v3089_v59 }
 0x345   : > { %3542 = vst [vmem:[#allocation12_spill] sm:$0xff] %v3106_v35  ;;  %v1531_v55 = vadd.f32 0.112945676, %v1530_v13  ;;  %v1378_v61 = vsub.f32 1.0, %v1377_v41  ;;  %v1243_v38 = vmul.f32 %v1242_v26, %v2880_v21  ;;  %v1292_v43 = vmul.f32 %v1291_v17, %v2967_v52 }
 0x346   : > { %v1494_v49 = vmul.f32 %v1493_v19, %v2996_v7  ;;  %v1344_v50 = vsel %vm3118_vm8, %v3021_v33, %v1340_v62  ;;  %v1407_v13 = vadd.f32 0.001143296, %v1406_v0  ;;  %v3130_v29 = vmul.f32 0.70710677, %v3106_v35 }
 0x347   : > { %v1532_v20 = vmul.f32 %v1531_v55, %v3031_v9  ;;  %v3132_v10 = vor.u32 1.1754944e-38, %v1387_v25  ;;  %v1278_v57 = vadd.f32 0.0036580483, %v1277_v53  ;;  %v1521_v21 = vmul.f32 %v1520_v23, %v3031_v9 }
 0x348   : > { %v3134_v41 = vadd.f32 1.0, %v1494_v49  ;;  %v1482_v26 = vadd.f32 0.18741608, %v1481_v36  ;;  %v1408_v19 = vmul.f32 %v1407_v13, %v3089_v59  ;;  %v1433_v33 = vmul.f32 %v3130_v29, %v3130_v29 }
 0x349   : > { %v1533_v17 = vadd.f32 0.4994258, %v1532_v20  ;;  %v1349_v0 = vsel %vm3082_vm5, %v3055_v45, %v1344_v50  ;;  %vm1381_vm9 = vweird.f32 %v3026_v63  ;;  %v1293_v55 = vadd.f32 0.4994258, %v1292_v43 }
 0x34a   : > { %1913 = vrcp.f32 %v3134_v41  ;;  %v1395_v25 = vmul.f32 2.1237322e-06, %v3089_v59  ;;  %v3146_v62 = vpop.eup %1911  ;;  %v1379_v53 = vmul.f32 %v3068_v39, %v1378_v61  ;;  %v1244_v23 = vadd.f32 1.1283791, %v1243_v38  ;;  %v929_v38 = vpop.f32.mrf.mxu2 }
 0x34b   : > { %v3150_v36 = vmul.f32 0.5, %v2963_v22  ;;  %v1534_v28 = vmul.f32 %v1533_v17, %v3031_v9  ;;  %vm1382_vm10 = vweird.f32 %v3068_v39  ;;  %v1522_v45 = vadd.f32 0.18741608, %v1521_v21 }
 0x34c   : > { %v1409_v58 = vadd.f32 0.014752088, %v1408_v19  ;;  %v3154_v49 = vmin.f32 %v1433_v33, 16.0  ;;  %v3157_v43 = vmul.f32 %v1349_v0, %v3052_v6  ;;  %v1279_v50 = vmul.f32 %v1278_v57, %v2967_v52  ;;  %vm3195_vm11 = vmor %vm1381_vm9, %vm1382_vm10 }
 0x34d   : > { %v1483_v20 = vmul.f32 %v1482_v26, %v2996_v7  ;;  %v3161_v61 = vadd.f32 1.0, %v1534_v28  ;;  %v3165_v22 = vmul.f32 %v3146_v62, %v3087_v56  ;;  %v1294_v13 = vmul.f32 %v1293_v55, %v2967_v52 }
 0x34e   : > { %v1396_v21 = vadd.f32 0.00028619796, %v1395_v25  ;;  %v1410_v17 = vmul.f32 %v1409_v58, %v3089_v59  ;;  %v3170_v19 = vadd.f32 %v3068_v39, %v1379_v53  ;;  %v3173_v6 = vmul.f32 %v1244_v23, %v2843_v48 }
 0x34f   : > { %1915 = vrcp.f32 %v3161_v61  ;;  %v1446_v57 = vmul.f32 3.8918573e-05, %v3154_v49  ;;  %v1523_v33 = vmul.f32 %v1522_v45, %v3031_v9  ;;  %v3180_v55 = vadd.f32 %v929_v38, %v2684_v32 }
 0x350   : > { %v1914_v7 = vpop.eup %1913  ;;  %v1411_v0 = vadd.f32 0.112945676, %v1410_v17  ;;  %v3183_v53 = vadd.f32 0.05243302, %v1279_v50  ;;  %v1484_v28 = vadd.f32 1.1283791, %v1483_v20  ;;  %v1397_v35 = vmul.f32 %v1396_v21, %v3089_v59 }
 0x351   : > { %v1497_v48 = vmul.f32 %v1914_v7, %v3134_v41  ;;  %v3187_v58 = vadd.f32 1.0, %v1294_v13  ;;  %v1505_v50 = vand.u32 2147483647, %v3134_v41  ;;  %v1507_v20 = vand.u32 2147483648, %v3134_v41 }
 0x352   : > { %v1412_v26 = vmul.f32 %v1411_v0, %v3089_v59  ;;  %v1447_v38 = vadd.f32 0.001143296, %v1446_v57  ;;  %v1384_v13 = vsel %vm3195_vm11, %v3068_v39, %v3170_v19  ;;  %v1524_v21 = vadd.f32 1.1283791, %v1523_v33 }
 0x353   : > { %v1498_v45 = vsub.f32 1.0, %v1497_v48  ;;  %v3206_v0 = vmul.f32 0.70710677, %v3180_v55  ;;  %v1485_v25 = vmul.f32 %v1484_v28, %v2970_v54  ;;  %vm1502_vm12 = vweird.f32 %v1914_v7 }
 0x354   : > { %v1413_v17 = vadd.f32 0.4994258, %v1412_v26  ;;  %v1448_v48 = vmul.f32 %v1447_v38, %v3154_v49  ;;  %vm1501_vm13 = vweird.f32 %v3134_v41  ;;  %v1398_v46 = vadd.f32 0.0036580483, %v1397_v35  ;;  %v958_v38 = vpop.f32.mrf.mxu3 }
 0x355   : > { %v1916_v23 = vpop.eup %1915  ;;  %v1499_v18 = vmul.f32 %v1914_v7, %v1498_v45  ;;  %vm1506_vm14 = vcmp.eq.f32.partialorder %v1505_v50, 8.507059e+37  ;;  %v1553_v26 = vmul.f32 %v3206_v0, %v3206_v0  ;;  %v3547_v33 = vand.u32 2147483647, %v3026_v63  ;;  %vm1503_vm0 = vmor %vm1501_vm13, %vm1502_vm12 }
 0x356   : > { %v1537_v57 = vmul.f32 %v1916_v23, %v3161_v61  ;;  %v1414_v9 = vmul.f32 %v1413_v17, %v3089_v59  ;;  %v1449_v19 = vadd.f32 0.014752088, %v1448_v48  ;;  %v1508_v28 = vor.u32 1.1754944e-38, %v1507_v20 }
 0x357   : > { %v1500_v39 = vadd.f32 %v1914_v7, %v1499_v18  ;;  %vm3217_vm15 = vcmp.eq.f32.partialorder %v3547_v33, 8.507059e+37  ;;  %v1525_v41 = vmul.f32 %v1524_v21, %v2991_v1  ;;  %v1547_v35 = vand.u32 2147483648, %v3161_v61 }
 0x358   : > { %v1538_v45 = vsub.f32 1.0, %v1537_v57  ;;  %v3223_v50 = vadd.f32 1.0, %v1414_v9  ;;  %v1450_v17 = vmul.f32 %v1449_v19, %v3154_v49  ;;  %v3226_v48 = vmin.f32 %v1553_v26, 16.0 }
 0x359   : > { %v1504_v18 = vsel %vm1503_vm0, %v1914_v7, %v1500_v39  ;;  %vm1542_vm1 = vweird.f32 %v1916_v23  ;;  %v1545_v40 = vand.u32 2147483647, %v3161_v61  ;;  %v1399_v20 = vmul.f32 %v1398_v46, %v3089_v59 }
 0x35a   : > { %v1509_v63 = vsel %vm1506_vm14, %v1508_v28, %v1504_v18  ;;  %v1539_v33 = vmul.f32 %v1916_v23, %v1538_v45  ;;  %v1435_v1 = vmul.f32 2.1237322e-06, %v3154_v49  ;;  %v3232_v21 = vadd.f32 %v958_v38, %v2684_v32 }
 0x35b   : > { %v1510_v47 = vmul.f32 %v1509_v63, %v1485_v25  ;;  %vm1541_vm2 = vweird.f32 %v3161_v61  ;;  %v1451_v57 = vadd.f32 0.112945676, %v1450_v17  ;;  %v1555_v9 = vmul.f32 2.1237322e-06, %v3226_v48 }
 0x35c   : > { %v1540_v7 = vadd.f32 %v1916_v23, %v1539_v33  ;;  %vm1543_vm3 = vmor %vm1541_vm2, %vm1542_vm1  ;;  %v1548_v19 = vor.u32 1.1754944e-38, %v1547_v35  ;;  %1917 = vrcp.f32 %v3223_v50  ;;  %v1566_v25 = vmul.f32 3.8918573e-05, %v3226_v48 }
 0x35d   : > { %v1863_v39 = vclamps-f32 %v1510_v47, 1.0  ;;  %vm1546_vm4 = vcmp.eq.f32.partialorder %v1545_v40, 8.507059e+37  ;;  %v1452_v46 = vmul.f32 %v1451_v57, %v3154_v49  ;;  %v1556_v28 = vadd.f32 0.00028619796, %v1555_v9 }
 0x35e   : > { %v1544_v26 = vsel %vm1543_vm3, %v1916_v23, %v1540_v7  ;;  %v1567_v38 = vadd.f32 0.001143296, %v1566_v25  ;;  %v3240_v61 = vmul.f32 0.70710677, %v3232_v21  ;;  %v1436_v17 = vadd.f32 0.00028619796, %v1435_v1 }
 0x35f   : > { %v1645_v32 = vadd.f32 1.0, %v1863_v39  ;;  %v1549_v45 = vsel %vm1546_vm4, %v1548_v19, %v1544_v26  ;;  %v1453_v47 = vadd.f32 0.4994258, %v1452_v46  ;;  %v1557_v35 = vmul.f32 %v1556_v28, %v3226_v48 }
 0x360   : > { %v1550_v18 = vmul.f32 %v1549_v45, %v1525_v41  ;;  %v1389_v63 = vsel %vm3217_vm15, %v3132_v10, %v1384_v13  ;;  %vm1261_vm5 = vweird.f32 %v3087_v56  ;;  %v3550_v40 = vand.u32 2147483648, %v3087_v56 }
 0x361   : > { %v1661_v33 = vmul.f32 %v1645_v32, %v3078_v42  ;;  %v1568_v7 = vmul.f32 %v1567_v38, %v3226_v48  ;;  %v3551_v41 = vsub.f32 1.0, %v3165_v22  ;;  %v1281_v57 = vmul.f32 %v3183_v53, %v2967_v52 }
 0x362   : > { %v3249_v23 = vor.u32 1.1754944e-38, %v3550_v40  ;;  %v1864_v9 = vclamps-f32 %v1550_v18, 1.0  ;;  %v1454_v10 = vmul.f32 %v1453_v47, %v3154_v49  ;;  %v3259_v13 = vpop.eup %1917  ;;  %v1558_v54 = vadd.f32 0.0036580483, %v1557_v35 }
 0x363   : > { %v1259_v1 = vmul.f32 %v3146_v62, %v3551_v41  ;;  %v1569_v39 = vadd.f32 0.014752088, %v1568_v7  ;;  %v1593_v19 = vmul.f32 %v3240_v61, %v3240_v61  ;;  %1686 = vmatpush.msrb.mxu0 %v1661_v33  ;;  %v1859_v42 = vclamps-f32 %v3157_v43, 1.0 }
 0x364   : > { %1919 = vrcp.f32 %v3187_v58  ;;  %v1646_v22 = vadd.f32 1.0, %v1864_v9  ;;  %v1400_v25 = vadd.f32 0.05243302, %v1399_v20  ;;  %v1437_v26 = vmul.f32 %v1436_v17, %v3154_v49 }
 0x365   : > { %v3266_v53 = vadd.f32 1.0, %v1454_v10  ;;  %v1570_v46 = vmul.f32 %v1569_v39, %v3226_v48  ;;  %v3269_v28 = vmin.f32 %v1593_v19, 16.0  ;;  %v1641_v32 = vadd.f32 1.0, %v1859_v42 }
 0x366   : > { %v1390_v45 = vmul.f32 %v1389_v63, %v3058_v15  ;;  %vm1262_vm7 = vweird.f32 %v3146_v62  ;;  %v3552_v38 = vand.u32 2147483647, %v3087_v56  ;;  %v1662_v20 = vmul.f32 %v1646_v22, %v3150_v36 }
 0x367   : > { %v1417_v18 = vmul.f32 %v3259_v13, %v3223_v50  ;;  %v1260_v17 = vadd.f32 %v3146_v62, %v1259_v1  ;;  %v1559_v47 = vmul.f32 %v1558_v54, %v3226_v48  ;;  %v1571_v35 = vadd.f32 0.112945676, %v1570_v46  ;;  %vm3299_vm9 = vmor %vm1261_vm5, %vm1262_vm7 }
 0x368   : > { %vm3275_vm8 = vcmp.eq.f32.partialorder %v3552_v38, 8.507059e+37  ;;  %v1855_v15 = vclamps-f32 %v3001_v12, 1.0  ;;  %v3285_v63 = vadd.f32 0.18741608, %v1281_v57  ;;  %v1595_v40 = vmul.f32 2.1237322e-06, %v3269_v28  ;;  %1706 = vmatpush.msrb.mxu1 %v1662_v20 }
 0x369   : > { %v1606_v33 = vmul.f32 3.8918573e-05, %v3269_v28  ;;  %v1657_v7 = vmul.f32 %v1641_v32, %v2914_v11  ;;  %v1401_v36 = vmul.f32 %v1400_v25, %v3089_v59  ;;  %v1438_v41 = vadd.f32 0.0036580483, %v1437_v26 }
 0x36a   : > { %1921 = vrcp.f32 %v3266_v53  ;;  %v1572_v1 = vmul.f32 %v1571_v35, %v3226_v48  ;;  %v3293_v9 = vpop.eup %1919  ;;  %v1418_v57 = vsub.f32 1.0, %v1417_v18  ;;  %v1596_v10 = vadd.f32 0.00028619796, %v1595_v40 }
 0x36b   : > { %v1607_v11 = vadd.f32 0.001143296, %v1606_v33  ;;  %1687 = vmatpush.msrb.mxu0 %v1657_v7  ;;  %v1860_v54 = vclamps-f32 %v1390_v45, 1.0  ;;  %v1264_v39 = vsel %vm3299_vm9, %v3146_v62, %v1260_v17  ;;  %v1560_v19 = vadd.f32 0.05243302, %v1559_v47 }
 0x36c   : > { %v1573_v42 = vadd.f32 0.4994258, %v1572_v1  ;;  %v1637_v22 = vadd.f32 1.0, %v1855_v15  ;;  %v1597_v25 = vmul.f32 %v1596_v10, %v3269_v28  ;;  %v1856_v46 = vclamps-f32 %v3007_v34, 1.0 }
 0x36d   : > { %v1608_v56 = vmul.f32 %v1607_v11, %v3269_v28  ;;  %v1642_v26 = vadd.f32 1.0, %v1860_v54  ;;  %v1297_v32 = vmul.f32 %v3293_v9, %v3187_v58  ;;  %v1402_v38 = vadd.f32 0.18741608, %v1401_v36 }
 0x36e   : > { %v1439_v45 = vmul.f32 %v1438_v41, %v3154_v49  ;;  %v1574_v20 = vmul.f32 %v1573_v42, %v3226_v48  ;;  %v1419_v62 = vmul.f32 %v3259_v13, %v1418_v57  ;;  %v1653_v47 = vmul.f32 %v1637_v22, %v2747_v4 }
 0x36f   : > { %v1609_v18 = vadd.f32 0.014752088, %v1608_v56  ;;  %v1658_v17 = vmul.f32 %v1642_v26, %v2925_v27  ;;  %v1269_v34 = vsel %vm3275_vm8, %v3249_v23, %v1264_v39  ;;  %v1598_v40 = vadd.f32 0.0036580483, %v1597_v25 }
 0x370   : > { %v3316_v35 = vpop.eup %1921  ;;  %v3321_v15 = vadd.f32 1.0, %v1574_v20  ;;  %v1638_v33 = vadd.f32 1.0, %v1856_v46  ;;  %v1561_v7 = vmul.f32 %v1560_v19, %v3226_v48  ;;  %1688 = vmatpush.msrb.mxu0 %v1653_v47  ;;  %v1851_v27 = vclamps-f32 %v2871_v5, 1.0 }
 0x371   : > { %v1610_v36 = vmul.f32 %v1609_v18, %v3269_v28  ;;  %1707 = vmatpush.msrb.mxu1 %v1658_v17  ;;  %v1852_v4 = vclamps-f32 %v2877_v31, 1.0  ;;  %v1298_v41 = vsub.f32 1.0, %v1297_v32  ;;  %v1403_v1 = vmul.f32 %v1402_v38, %v3089_v59 }
 0x372   : > { %v1440_v12 = vadd.f32 0.05243302, %v1439_v45  ;;  %1923 = vrcp.f32 %v3321_v15  ;;  %v1420_v23 = vadd.f32 %v3259_v13, %v1419_v62  ;;  %vm1422_vm10 = vweird.f32 %v3259_v13 }
 0x373   : > { %v1457_v43 = vmul.f32 %v3316_v35, %v3266_v53  ;;  %v1654_v57 = vmul.f32 %v1638_v33, %v2762_v16  ;;  %v1599_v10 = vmul.f32 %v1598_v40, %v3269_v28  ;;  %v1611_v5 = vadd.f32 0.112945676, %v1610_v36 }
 0x374   : > { %v1633_v11 = vadd.f32 1.0, %v1851_v27  ;;  %v1634_v31 = vadd.f32 1.0, %v1852_v4  ;;  %vm1421_vm11 = vweird.f32 %v3223_v50  ;;  %v1425_v59 = vand.u32 2147483647, %v3223_v50 }
 0x375   : > { %v1427_v54 = vand.u32 2147483648, %v3223_v50  ;;  %v1562_v39 = vadd.f32 0.18741608, %v1561_v7  ;;  %1708 = vmatpush.msrb.mxu1 %v1654_v57  ;;  %v1441_v19 = vmul.f32 %v1440_v12, %v3154_v49  ;;  %v1612_v42 = vmul.f32 %v1611_v5, %v3269_v28  ;;  %vm3347_vm12 = vmor %vm1421_vm11, %vm1422_vm10 }
 0x376   : > { %v1649_v22 = vmul.f32 %v1633_v11, %v2727_v44  ;;  %v1650_v16 = vmul.f32 %v1634_v31, %v2735_v30  ;;  %v1299_v25 = vmul.f32 %v3293_v9, %v1298_v41  ;;  %v1305_v56 = vand.u32 2147483647, %v3187_v58 }
 0x377   : > { %v1307_v26 = vand.u32 2147483648, %v3187_v58  ;;  %v1458_v46 = vsub.f32 1.0, %v1457_v43  ;;  %vm1301_vm13 = vweird.f32 %v3187_v58  ;;  %v1404_v38 = vadd.f32 1.1283791, %v1403_v1 }
 0x378   : > { %v1924_v32 = vpop.eup %1923  ;;  %v1424_v44 = vsel %vm3347_vm12, %v3259_v13, %v1420_v23  ;;  %v1600_v30 = vadd.f32 0.05243302, %v1599_v10  ;;  %v1613_v45 = vadd.f32 0.4994258, %v1612_v42  ;;  %1689 = vmatpush.msrb.mxu0 %v1649_v22  ;;  %1709 = vmatpush.msrb.mxu1 %v1650_v16  ;;  %v3356_v20 = vmul.f32 %v1269_v34, %v3173_v6  ;;  %v3381_v10 = vld [vmem:[%s3469_s6] sm:$0xff] }
 0x379   : > { %v1428_v62 = vor.u32 1.1754944e-38, %v1427_v54  ;;  %v1563_v18 = vmul.f32 %v1562_v39, %v3226_v48  ;;  %v1577_v17 = vmul.f32 %v1924_v32, %v3321_v15  ;;  %vm1302_vm14 = vweird.f32 %v3293_v9 }
 0x37a   : > { %vm1426_vm15 = vcmp.eq.f32.partialorder %v1425_v59, 8.507059e+37  ;;  %v1442_v47 = vadd.f32 0.18741608, %v1441_v19  ;;  %v1614_v40 = vmul.f32 %v1613_v45, %v3269_v28  ;;  %v1300_v13 = vadd.f32 %v3293_v9, %v1299_v25  ;;  %vm3394_vm7 = vmor %vm1301_vm13, %vm1302_vm14 }
 0x37b   : > { %v1429_v33 = vsel %vm1426_vm15, %v1428_v62, %v1424_v44  ;;  %v1459_v7 = vmul.f32 %v3316_v35, %v1458_v46  ;;  %v1578_v36 = vsub.f32 1.0, %v1577_v17  ;;  %v1405_v6 = vmul.f32 %v1404_v38, %v3048_v51  ;;  %v811_v51 = vld [vmem:[%s3470_s7] sm:$0xff] }
 0x37c   : > { %v1587_v34 = vand.u32 2147483648, %v3321_v15  ;;  %v1601_v48 = vmul.f32 %v1600_v30, %v3269_v28  ;;  %v3367_v27 = vadd.f32 1.0, %v1614_v40  ;;  %v1564_v4 = vadd.f32 1.1283791, %v1563_v18  ;;  %1667 = vperm.xlu2 %1886, %v811_v51  }
 0x37d   : > { %v1579_v41 = vmul.f32 %v1924_v32, %v1578_v36  ;;  %vm1582_vm0 = vweird.f32 %v1924_v32  ;;  %v1585_v1 = vand.u32 2147483647, %v3321_v15  ;;  %v1430_v12 = vmul.f32 %v1429_v33, %v1405_v6 }
 0x37e   : > { %v1443_v23 = vmul.f32 %v1442_v47, %v3154_v49  ;;  %vm1462_vm1 = vweird.f32 %v3316_v35  ;;  %1925 = vrcp.f32 %v3367_v27  ;;  %v1460_v43 = vadd.f32 %v3316_v35, %v1459_v7 }
 0x37f   : > { %v1580_v57 = vadd.f32 %v1924_v32, %v1579_v41  ;;  %vm1581_vm2 = vweird.f32 %v3321_v15  ;;  %vm1670_vm3 = vcmask 261120   ;;  %vm1461_vm4 = vweird.f32 %v3266_v53  ;;  %v3566_v41 = vld [vmem:[#allocation7_spill] sm:$0xff] }
 0x380   : > { %v1467_v49 = vand.u32 2147483648, %v3266_v53  ;;  %vm1583_vm5 = vmor %vm1581_vm2, %vm1582_vm0  ;;  %v1588_v5 = vor.u32 1.1754944e-38, %v1587_v34  ;;  %v1602_v11 = vadd.f32 0.18741608, %v1601_v48  ;;  %1867 = vmatmul.msk.f32.vlgmr.msrb.gmra.mxu0 %vm1670_vm3, %v3381_v10  ;;  %1868 = vmatmul.msk.f32.vlgmr.msrb.gmra.mxu1 %vm1670_vm3, %v3381_v10  ;;  %v1465_v31 = vand.u32 2147483647, %v3266_v53 }
 0x381   : > { %v1565_v59 = vmul.f32 %v1564_v4, %v3206_v0  ;;  %v1584_v54 = vsel %vm1583_vm5, %v1924_v32, %v1580_v57  ;;  %vm1586_vm8 = vcmp.eq.f32.partialorder %v1585_v1, 8.507059e+37  ;;  %v1283_v39 = vmul.f32 %v3285_v63, %v2967_v52  ;;  %vm3407_vm9 = vmor %vm1461_vm4, %vm1462_vm1  ;;  %v3565_v4 = vld [vmem:[#allocation5_spill] sm:$0xff] }
 0x382   : > { %v1308_v19 = vor.u32 1.1754944e-38, %v1307_v26  ;;  %v971_v42 = vmul.f32 0.5, %v3034_v60  ;;  %v1589_v16 = vsel %vm1586_vm8, %v1588_v5, %v1584_v54  ;;  %v1304_v0 = vsel %vm3394_vm7, %v3293_v9, %v1300_v13 }
 0x383   : > { %v1464_v52 = vsel %vm3407_vm9, %v3316_v35, %v1460_v43  ;;  %v1590_v63 = vmul.f32 %v1589_v16, %v1565_v59  ;;  %v1861_v25 = vclamps-f32 %v1430_v12, 1.0  ;;  %v1444_v26 = vadd.f32 1.1283791, %v1443_v23  ;;  %v3571_v16 = vld [vmem:[#allocation4_spill] sm:$0xff] }
 0x384   : > { %v1926_v60 = vpop.eup %1925  ;;  %v1468_v50 = vor.u32 1.1754944e-38, %v1467_v49  ;;  %v1603_v53 = vmul.f32 %v1602_v11, %v3269_v28  ;;  %v1857_v46 = vclamps-f32 %v3356_v20, 1.0  ;;  %vm1306_vm10 = vcmp.eq.f32.partialorder %v1305_v56, 8.507059e+37 }
 0x385   : > { %vm1466_vm11 = vcmp.eq.f32.partialorder %v1465_v31, 8.507059e+37  ;;  %v1865_v32 = vclamps-f32 %v1590_v63, 1.0  ;;  %v1617_v9 = vmul.f32 %v1926_v60, %v3367_v27  ;;  %v1284_v38 = vadd.f32 1.1283791, %v1283_v39  ;;  %v3570_v39 = vld [vmem:[#allocation12_spill] sm:$0xff] }
 0x386   : > { %v1309_v44 = vsel %vm1306_vm10, %v1308_v19, %v1304_v0  ;;  %v1469_v30 = vsel %vm1466_vm11, %v1468_v50, %v1464_v52  ;;  %v975_v35 = vmul.f32 0.5, %v3180_v55  ;;  %v1643_v18 = vadd.f32 1.0, %v1861_v25  ;;  %v3572_v25 = vld [vmem:[#allocation2_spill] sm:$0xff] }
 0x387   : > { %v1647_v45 = vadd.f32 1.0, %v1865_v32  ;;  %v1618_v62 = vsub.f32 1.0, %v1617_v9  ;;  %v1853_v17 = vclamps-f32 %v3023_v3, 1.0  ;;  %v1445_v28 = vmul.f32 %v1444_v26, %v3130_v29 }
 0x388   : > { %v1604_v20 = vadd.f32 1.1283791, %v1603_v53  ;;  %v1627_v58 = vand.u32 2147483648, %v3367_v27  ;;  %v1639_v56 = vadd.f32 1.0, %v1857_v46  ;;  %vm1622_vm12 = vweird.f32 %v1926_v60 }
 0x389   : > { %v1663_v47 = vmul.f32 %v1647_v45, %v975_v35  ;;  %v1619_v40 = vmul.f32 %v1926_v60, %v1618_v62  ;;  %v1625_v13 = vand.u32 2147483647, %v3367_v27  ;;  %v3563_v33 = vand.u32 2147483647, %v2930_v8 }
 0x38a   : > { %v3564_v55 = vand.u32 2147483648, %v2930_v8  ;;  %v1285_v36 = vmul.f32 %v1284_v38, %v2933_v37  ;;  %v1470_v3 = vmul.f32 %v1469_v30, %v1445_v28  ;;  %vm1621_vm14 = vweird.f32 %v3367_v27  ;;  %v3568_v27 = vld [vmem:[#allocation6_spill] sm:$0xff]  ;;  %v1928_v30 = vld [vmem:[%s2353_s29 + $0x8] sm:$0xff] }
 0x38b   : > { %vm1146_vm13 = vcmp.eq.f32.partialorder %v3563_v33, 8.507059e+37  ;;  %v1620_v6 = vadd.f32 %v1926_v60, %v1619_v40  ;;  %1726 = vmatpush.msrb.mxu2 %v1663_v47  ;;  %v1659_v29 = vmul.f32 %v1643_v18, %v971_v42  ;;  %v1635_v34 = vadd.f32 1.0, %v1853_v17  ;;  %vm1623_vm15 = vmor %vm1621_vm14, %vm1622_vm12  ;;  %v1927_v38 = vld [vmem:[%s2353_s29] sm:$0xff] }
 0x38c   : > { %v1148_v7 = vor.u32 1.1754944e-38, %v3564_v55  ;;  %v1125_v48 = vmul.f32 %v3014_v24, %v2700_v14  ;;  %v3567_v1 = vsel %vm3098_vm6, %v3565_v4, %v3566_v41  ;;  %v1310_v8 = vmul.f32 %v1309_v44, %v1285_v36  ;;  %v3569_v24 = vld [vmem:[#allocation3_spill] sm:$0xff] }
 0x38d   : > { %v1628_v23 = vor.u32 1.1754944e-38, %v1627_v58  ;;  %v1605_v37 = vmul.f32 %v1604_v20, %v3240_v61  ;;  %v1624_v51 = vsel %vm1623_vm15, %v1926_v60, %v1620_v6  ;;  %vm1626_vm0 = vcmp.eq.f32.partialorder %v1625_v13, 8.507059e+37  ;;  %1727 = vmatpush.msrb.mxu2 %v1659_v29  ;;  %v1930_v20 = vld [vmem:[%s2353_s29 + $0x18] sm:$0xff] }
 0x38e   : > { %v1149_v12 = vsel %vm1146_vm13, %v1148_v7, %v3567_v1  ;;  %v1655_v43 = vmul.f32 %v1639_v56, %v3568_v27  ;;  %v1862_v14 = vclamps-f32 %v1470_v3, 1.0  ;;  %v1651_v2 = vmul.f32 %v1635_v34, %v3569_v24 }
 0x38f   : > { %v1629_v57 = vsel %vm1626_vm0, %v1628_v23, %v1624_v51  ;;  %v1150_v49 = vmul.f32 %v1149_v12, %v1125_v48  ;;  %v1858_v15 = vclamps-f32 %v1310_v8, 1.0  ;;  %v976_v61 = vmul.f32 0.5, %v3232_v21 }
 0x390   : > { %v1630_v5 = vmul.f32 %v1629_v57, %v1605_v37  ;;  %1728 = vmatpush.msrb.mxu2 %v1655_v43  ;;  %v1644_v59 = vadd.f32 1.0, %v1862_v14  ;;  %v972_v19 = vmul.f32 0.5, %v3570_v39  ;;  %v968_v0 = vmul.f32 0.5, %v3571_v16 }
 0x391   : > { %v1854_v54 = vclamps-f32 %v1150_v49, 1.0  ;;  %v1640_v22 = vadd.f32 1.0, %v1858_v15  ;;  %v964_v60 = vmul.f32 0.5, %v3572_v25 }
 0x392   : > { %v1866_v11 = vclamps-f32 %v1630_v5, 1.0  ;;  %1729 = vmatpush.msrb.mxu2 %v1651_v2  ;;  %v1660_v52 = vmul.f32 %v1644_v59, %v972_v19 }
 0x393   : > { %1869 = vmatmul.msk.f32.vlgmr.msrb.gmra.mxu2 %vm1670_vm3, %v3381_v10  ;;  %v1636_v63 = vadd.f32 1.0, %v1854_v54  ;;  %v1656_v26 = vmul.f32 %v1640_v22, %v968_v0 }
 0x394   : > { %v1648_v31 = vadd.f32 1.0, %v1866_v11 }
 0x395   : > { %v1652_v21 = vmul.f32 %v1636_v63, %v964_v60 }
 0x396   : > { %v1664_v42 = vmul.f32 %v1648_v31, %v976_v61 }
 0x398   : > { %1746 = vmatpush.msrb.mxu3 %v1664_v42 }
 0x39a   : > { %1747 = vmatpush.msrb.mxu3 %v1660_v52 }
 0x39c   : > { %1748 = vmatpush.msrb.mxu3 %v1656_v26 }
 0x39e   : > { %1749 = vmatpush.msrb.mxu3 %v1652_v21 }
 0x39f   : > { %1870 = vmatmul.msk.f32.vlgmr.msrb.gmra.mxu3 %vm1670_vm3, %v3381_v10  ;;  %v1929_v10 = vld [vmem:[%s2353_s29 + $0x10] sm:$0xff] }
 0x3d6   : > { %v1668_v50 = vpop.permute.xlu2 %1667 }
 0x3fd   : > { %v1691_v53 = vpop.f32.mrf.mxu0  ;;  %v1711_v46 = vpop.f32.mrf.mxu1 }
 0x3fe   : > { %v1692_v32 = vadd.f32 %v1691_v53, %v1668_v50  ;;  %v1712_v9 = vadd.f32 %v1711_v46, %v1668_v50 }
 0x400   : > { %v1754_v44 = vadd.f32 %v1927_v38, %v1692_v32  ;;  %v1755_v35 = vadd.f32 %v1928_v30, %v1712_v9 }
 0x402   : > { %1758 = vst [vmem:[%s305_s30] sm:$0xff] %v1754_v44 }
 0x403   : > { %1759 = vst [vmem:[%s305_s30 + $0x8] sm:$0xff] %v1755_v35 }
 0x416   : > { %v1731_v45 = vpop.f32.mrf.mxu2 }
 0x417   : > { %v1732_v62 = vadd.f32 %v1731_v45, %v1668_v50 }
 0x419   : > { %v1756_v18 = vadd.f32 %v1929_v10, %v1732_v62 }
 0x41b   : > { %1760 = vst [vmem:[%s305_s30 + $0x10] sm:$0xff] %v1756_v18 }
 0x422   : > { %v1751_v17 = vpop.f32.mrf.mxu3 }
 0x423   : > { %v1752_v28 = vadd.f32 %v1751_v17, %v1668_v50 }
 0x425   : > { %v1757_v58 = vadd.f32 %v1930_v20, %v1752_v28 }
 0x427   : > { %1761 = vst [vmem:[%s305_s30 + $0x18] sm:$0xff] %v1757_v58 }
 0x428 PF: > { %s18_s27 = sadd.s32 1, %s1937_s27  }
 0x429   : > { %p15_p4 = scmp.ge.s32.totalorder %s18_s27, 4  }
 0x42b   :  { %17 = sbr.rel (!%p15_p4) target bundleno = 1 (0x1), region = 83 }

// kernel: md_block_pallas.3
= control target key start
LH: loop header
LB: loop body
LE: loop exit
PB: predicated region body
PF: predicated region fallthrough
CT: control target
= control target key end

     0   :  { %s6133_s30 = smov 0   ;;  %s11094_s0 = inlined_call_operand.vmem [shape: f32[256,32], index: 0, kind: input, shape index: {}, may-alias: {0,9}]   ;;  %s11095_s1 = inlined_call_operand.vmem [shape: f32[64,16], index: 1, kind: input, shape index: {}]   ;;  %s11096_s2 = inlined_call_operand.vmem [shape: f32[64,1], index: 2, kind: input, shape index: {}]   ;;  %s11097_s3 = inlined_call_operand.vmem [shape: f32[16,64], index: 3, kind: input, shape index: {}]   ;;  %s11098_s4 = inlined_call_operand.vmem [shape: f32[16,1], index: 4, kind: input, shape index: {}]   ;;  %s11099_s5 = inlined_call_operand.vmem [shape: f32[32,128], index: 5, kind: input, shape index: {}]   ;;  %s11100_s6 = inlined_call_operand.vmem [shape: f32[1,128], index: 6, kind: input, shape index: {}]   ;;  %s11101_s7 = inlined_call_operand.vmem [shape: f32[128,32], index: 7, kind: input, shape index: {}]   ;;  %s11102_s8 = inlined_call_operand.vmem [shape: f32[5,32], index: 8, kind: input, shape index: {}]   ;;  %s11103_s9 = inlined_call_operand.vmem [shape: f32[256,32], index: 9, kind: output, shape index: {}, may-alias: {0,9}]  }
   0x1 LB: > { %s5578_s10 = sadd.s32 4294967295, %s6079_s30   ;;  %p5582_p0 = scmp.ge.s32.totalorder %s6079_s30, 1  ;;  %s6079_s30 = sphi %s6133_s30, %s19_s30  }
   0x2   : > { %p288_p1 = scmp.lt.s32.totalorder %s6079_s30, 3 }
   0x4   : > { %p289_p2 = pnand %p5582_p0, %p288_p1 }
   0x6   : > { %292 = sbr.rel (%p289_p2) target bundleno = 2381 (0x94d), region = 56 }
   0xb   : > { %s5583_s11 = sshll.u32 %s5578_s10, 4  ;;  %vm11182_vm0 = vcmask 261120   ;;  %v6081_v8 = vmov 0   ;;  %v6082_v9 = vmov 32.0   ;;  %v765_v10 = vld [vmem:[%s11096_s2 + $0x38] sm:$0xff]  ;;  %v758_v39 = vld [vmem:[%s11096_s2] sm:$0xff] }
   0xc   : > { %p325_p3 = scmp.lt.s32.totalorder %s5583_s11, 31  ;;  %5779 = vset.pattern.permute.xlu2 %v6081_v8  ;;  %5781 = vset.pattern.permute.xlu1 %v6081_v8  ;;  %5788 = vrcp.f32 %v6082_v9  ;;  %v763_v40 = vld [vmem:[%s11096_s2 + $0x28] sm:$0xff]  ;;  %v762_v41 = vld [vmem:[%s11096_s2 + $0x20] sm:$0xff]  ;;  %v764_v42 = vld [vmem:[%s11096_s2 + $0x30] sm:$0xff]  ;;  %vm11183_vm14 = vcmask 130048  }
   0xd   : > { %5780 = vset.pattern.permute.xlu0 %v6081_v8  ;;  %v761_v43 = vld [vmem:[%s11096_s2 + $0x18] sm:$0xff]  ;;  %v760_v46 = vld [vmem:[%s11096_s2 + $0x10] sm:$0xff]  ;;  %v759_v49 = vld [vmem:[%s11096_s2 + $0x8] sm:$0xff] }
   0xe   : > { %s11698_s11 = smov (!%p325_p3, %s5583_s11), 31 }
   0xf   : > { %s5584_s12 = sshll.u32 %s11698_s11, 3 }
  0x10   : > { %s6149_s15 = scalar_lea.vmem %s11094_s0, %s5584_s12  ;;  %s10885_s10 = scalar_lea.vmem %s11103_s9, %s5584_s12 }
  0x11   : > { %v339_v0 = vld [vmem:[%s6149_s15 + $0x18] sm:$0xff]  ;;  %v337_v1 = vld [vmem:[%s6149_s15 + $0x8] sm:$0xff]  ;;  %v336_v4 = vld [vmem:[%s6149_s15] sm:$0xff] }
  0x12   : > { %v364_v2 = vsel %vm11182_vm0, %v339_v0, 0.0  ;;  %v358_v3 = vsel %vm11182_vm0, %v337_v1, 0.0  ;;  %v338_v5 = vld [vmem:[%s6149_s15 + $0x10] sm:$0xff]  ;;  %v355_v6 = vsel %vm11182_vm0, %v336_v4, 0.0  ;;  %v5789_v11 = vpop.eup %5788  ;;  %v341_v35 = vld [vmem:[%s6149_s15 + $0x28] sm:$0xff]  ;;  %v6206_v44 = vld [vmem:[%s6149_s15 + $0x38] sm:$0xff] }
  0x13   : > { %365 = vadd.xlane.f32.xlu2 %v364_v2  ;;  %359 = vadd.xlane.f32.xlu0 %v358_v3  ;;  %v361_v7 = vsel %vm11182_vm0, %v338_v5, 0.0  ;;  %v404_v12 = vmul.f32 32.0, %v5789_v11  ;;  %vm408_vm1 = vweird.f32 %v5789_v11  ;;  %v370_v37 = vsel %vm11182_vm0, %v341_v35, 0.0  ;;  %v6214_v47 = vld [vmem:[%s6149_s15 + $0x20] sm:$0xff] }
  0x14   : > { %v376_v45 = vsel %vm11182_vm0, %v6206_v44, 0.0  ;;  %v367_v48 = vsel %vm11182_vm0, %v6214_v47, 0.0 }
  0x15   : > { %v405_v13 = vsub.f32 1.0, %v404_v12 }
  0x17   : > { %v406_v14 = vmul.f32 %v5789_v11, %v405_v13 }
  0x19   : > { %v407_v15 = vadd.f32 %v5789_v11, %v406_v14 }
  0x1b   : > { %356 = vadd.xlane.f32.xlu0 %v355_v6  ;;  %362 = vadd.xlane.f32.xlu2 %v361_v7  ;;  %v6162_v16 = vsel %vm408_vm1, %v5789_v11, %v407_v15 }
  0x1c   : > { %11211 = vst [vmem:[#allocation2_spill] sm:$0xff] %v6162_v16 }
  0x33   : > { %805 = vperm.xlu2 %5779, %v765_v10  }
  0x5c   : > { %371 = vadd.xlane.f32.xlu2 %v370_v37 }
  0x74   : > { %770 = vperm.xlu2 %5779, %v758_v39  }
  0x86   : > { %v366_v17 = vpop.xlane.xlu2 %365  ;;  %v360_v18 = vpop.xlane.xlu0 %359 }
  0x87   : > { %v413_v19 = vmul.f32 %v6162_v16, %v366_v17  ;;  %v411_v20 = vmul.f32 %v6162_v16, %v360_v18 }
  0x89   : > { %v6166_v21 = vsub.f32 %v339_v0, %v413_v19  ;;  %v6168_v22 = vsub.f32 %v337_v1, %v411_v20  ;;  %v5782_v19 = vld [vmem:[%s11102_s8] ss:$0 sm:$0xff] }
  0x8b   : > { %v443_v23 = vmul.f32 %v6168_v22, %v6168_v22  ;;  %v445_v24 = vmul.f32 %v6166_v21, %v6166_v21 }
  0x8d   : > { %v461_v25 = vsel %vm11182_vm0, %v443_v23, 0.0  ;;  %v467_v26 = vsel %vm11182_vm0, %v445_v24, 0.0 }
  0x8e   : > { %462 = vadd.xlane.f32.xlu1 %v461_v25  ;;  %468 = vadd.xlane.f32.xlu0 %v467_v26  ;;  %v357_v27 = vpop.xlane.xlu0 %356  ;;  %v363_v28 = vpop.xlane.xlu2 %362  ;;  %v5783_v25 = vld [vmem:[%s11102_s8 + $0x1] ss:$0 sm:$0xff] }
  0x8f   : > { %v410_v29 = vmul.f32 %v6162_v16, %v357_v27  ;;  %v412_v30 = vmul.f32 %v6162_v16, %v363_v28 }
  0x91   : > { %v6178_v31 = vsub.f32 %v336_v4, %v410_v29  ;;  %v6180_v32 = vsub.f32 %v338_v5, %v412_v30 }
  0x93   : > { %v442_v33 = vmul.f32 %v6178_v31, %v6178_v31  ;;  %v444_v36 = vmul.f32 %v6180_v32, %v6180_v32 }
  0x95   : > { %v458_v34 = vsel %vm11182_vm0, %v442_v33, 0.0  ;;  %v464_v38 = vsel %vm11182_vm0, %v444_v36, 0.0 }
  0x96   : > { %459 = vadd.xlane.f32.xlu1 %v458_v34  ;;  %v6223_v56 = vpop.permute.xlu2 %805 }
  0x97   : > { %11212 = vst [vmem:[#allocation3_spill] sm:$0xff] %v6223_v56 }
  0x9d   : > { %377 = vadd.xlane.f32.xlu2 %v376_v45  ;;  %v748_v45 = vld [vmem:[%s11095_s1] sm:$0xff] }
  0x9e   : > { %465 = vadd.xlane.f32.xlu1 %v464_v38 }
  0xa2   : > { %800 = vperm.xlu0 %5780, %v764_v42  }
  0xaa   : > { %785 = vperm.xlu0 %5780, %v761_v43  }
  0xb2   : > { %780 = vperm.xlu0 %5780, %v760_v46  }
  0xb7   : > { %795 = vperm.xlu1 %5781, %v763_v40  }
  0xba   : > { %775 = vperm.xlu0 %5780, %v759_v49  }
  0xbf   : > { %790 = vperm.xlu1 %5781, %v762_v41  }
  0xcf   : > { %v372_v61 = vpop.xlane.xlu2 %371 }
  0xd0   : > { %v415_v0 = vmul.f32 %v6162_v16, %v372_v61 }
  0xd2   : > { %v6227_v3 = vsub.f32 %v341_v35, %v415_v0 }
  0xd4   : > { %11213 = vst [vmem:[#allocation4_spill] sm:$0xff] %v6227_v3  ;;  %v447_v7 = vmul.f32 %v6227_v3, %v6227_v3 }
  0xd6   : > { %v473_v11 = vsel %vm11182_vm0, %v447_v7, 0.0  ;;  %v6298_v7 = vld [vmem:[%s6149_s15 + $0x68] sm:$0xff] }
  0xe4   : > { %474 = vadd.xlane.f32.xlu0 %v473_v11  ;;  %v6306_v11 = vld [vmem:[%s6149_s15 + $0x30] sm:$0xff] }
  0xe9   : > { %368 = vadd.xlane.f32.xlu1 %v367_v48 }
 0x101   : > { %v463_v50 = vpop.xlane.xlu1 %462  ;;  %v469_v51 = vpop.xlane.xlu0 %468 }
 0x102   : > { %v507_v52 = vmul.f32 %v463_v50, %v6162_v16  ;;  %v509_v53 = vmul.f32 %v469_v51, %v6162_v16  ;;  %v749_v51 = vld [vmem:[%s11095_s1 + $0x8] sm:$0xff] }
 0x104   : > { %v523_v54 = vadd.f32 1e-05, %v507_v52  ;;  %v525_v55 = vadd.f32 1e-05, %v509_v53  ;;  %v753_v52 = vld [vmem:[%s11095_s1 + $0x28] sm:$0xff]  ;;  %v754_v53 = vld [vmem:[%s11095_s1 + $0x30] sm:$0xff] }
 0x106   : > { %5790 = vrsqrt.f32 %v523_v54  ;;  %vm574_vm2 = vweird.f32 %v525_v55  ;;  %vm554_vm5 = vweird.f32 %v523_v54 }
 0x107   : > { %5792 = vrsqrt.f32 %v525_v55 }
 0x109   : > { %v460_v57 = vpop.xlane.xlu1 %459 }
 0x10a   : > { %v506_v58 = vmul.f32 %v460_v57, %v6162_v16  ;;  %v6271_v57 = vpop.permute.xlu2 %770 }
 0x10b   : > { %11214 = vst [vmem:[#allocation5_spill] sm:$0xff] %v6271_v57 }
 0x10c   : > { %v5791_v59 = vpop.eup %5790  ;;  %v522_v60 = vadd.f32 1e-05, %v506_v58  ;;  %v752_v58 = vld [vmem:[%s11095_s1 + $0x20] sm:$0xff] }
 0x10d   : > { %v5793_v62 = vpop.eup %5792  ;;  %v549_v63 = vmul.f32 %v5791_v59, %v523_v54  ;;  %vm555_vm4 = vweird.f32 %v5791_v59  ;;  %v751_v54 = vld [vmem:[%s11095_s1 + $0x18] sm:$0xff] }
 0x10e   : > { %v569_v1 = vmul.f32 %v5793_v62, %v525_v55  ;;  %5794 = vrsqrt.f32 %v522_v60  ;;  %vm575_vm3 = vweird.f32 %v5793_v62  ;;  %vm556_vm7 = vmor %vm554_vm5, %vm555_vm4  ;;  %vm544_vm9 = vweird.f32 %v522_v60  ;;  %v755_v55 = vld [vmem:[%s11095_s1 + $0x38] sm:$0xff] }
 0x10f   : > { %v550_v2 = vmul.f32 %v5791_v59, %v549_v63  ;;  %vm576_vm6 = vmor %vm574_vm2, %vm575_vm3 }
 0x110   : > { %v570_v4 = vmul.f32 %v5793_v62, %v569_v1 }
 0x111   : > { %v551_v5 = vmul.f32 0.5, %v550_v2  ;;  %v466_v6 = vpop.xlane.xlu1 %465  ;;  %v347_v2 = vld [vmem:[%s6149_s15 + $0x58] sm:$0xff] }
 0x112   : > { %v571_v8 = vmul.f32 0.5, %v570_v4  ;;  %v508_v9 = vmul.f32 %v466_v6, %v6162_v16  ;;  %v388_v4 = vsel %vm11182_vm0, %v347_v2, 0.0 }
 0x113   : > { %v552_v10 = vsub.f32 1.5, %v551_v5 }
 0x114   : > { %v5795_v12 = vpop.eup %5794  ;;  %v572_v13 = vsub.f32 1.5, %v571_v8  ;;  %v524_v14 = vadd.f32 1e-05, %v508_v9  ;;  %v394_v9 = vsel %vm11182_vm0, %v6298_v7, 0.0 }
 0x115   : > { %v539_v15 = vmul.f32 %v5795_v12, %v522_v60  ;;  %v553_v17 = vmul.f32 %v5791_v59, %v552_v10  ;;  %vm545_vm8 = vweird.f32 %v5795_v12  ;;  %v378_v60 = vpop.xlane.xlu2 %377 }
 0x116   : > { %v573_v18 = vmul.f32 %v5793_v62, %v572_v13  ;;  %5796 = vrsqrt.f32 %v524_v14  ;;  %vm546_vm10 = vmor %vm544_vm9, %vm545_vm8  ;;  %vm564_vm11 = vweird.f32 %v524_v14  ;;  %v417_v61 = vmul.f32 %v6162_v16, %v378_v60 }
 0x117   : > { %v540_v20 = vmul.f32 %v5795_v12, %v539_v15  ;;  %v557_v23 = vsel %vm556_vm7, %v5791_v59, %v553_v17  ;;  %v6325_v17 = vpop.permute.xlu0 %800 }
 0x118   : > { %v699_v24 = vmul.f32 %v557_v23, %v6168_v22  ;;  %v577_v26 = vsel %vm576_vm6, %v5793_v62, %v573_v18  ;;  %v6282_v62 = vsub.f32 %v6206_v44, %v417_v61  ;;  %11219 = vst [vmem:[#allocation10_spill] sm:$0xff] %v6325_v17 }
 0x119   : > { %v541_v27 = vmul.f32 0.5, %v540_v20  ;;  %v701_v28 = vmul.f32 %v577_v26, %v6166_v21 }
 0x11a   : > { %v716_v29 = vmul.f32 %v5782_v19, %v699_v24  ;;  %11216 = vst [vmem:[#allocation7_spill] sm:$0xff] %v6282_v62  ;;  %v449_v63 = vmul.f32 %v6282_v62, %v6282_v62 }
 0x11b   : > { %v542_v30 = vsub.f32 1.5, %v541_v27  ;;  %v718_v33 = vmul.f32 %v5782_v19, %v701_v28 }
 0x11c   : > { %v5797_v34 = vpop.eup %5796  ;;  %v733_v35 = vadd.f32 %v5783_v25, %v716_v29  ;;  %v479_v1 = vsel %vm11182_vm0, %v449_v63, 0.0 }
 0x11d   : > { %v543_v36 = vmul.f32 %v5795_v12, %v542_v30  ;;  %v559_v37 = vmul.f32 %v5797_v34, %v524_v14  ;;  %v735_v38 = vadd.f32 %v5783_v25, %v718_v33  ;;  %vm565_vm12 = vweird.f32 %v5797_v34  ;;  %480 = vadd.xlane.f32.xlu0 %v479_v1  ;;  %v6318_v14 = vld [vmem:[%s6149_s15 + $0x40] sm:$0xff] }
 0x11e   : > { %847 = vmatpush.msra.mxu0 %v733_v35  ;;  %vm566_vm13 = vmor %vm564_vm11, %vm565_vm12  ;;  %v379_v15 = vsel %vm11182_vm0, %v6318_v14, 0.0 }
 0x11f   : > { %v560_v22 = vmul.f32 %v5797_v34, %v559_v37  ;;  %5765 = vmatpush.msra.mxu2 %v735_v38  ;;  %v547_v39 = vsel %vm546_vm10, %v5795_v12, %v543_v36  ;;  %v6312_v12 = vld [vmem:[%s6149_s15 + $0x48] sm:$0xff]  ;;  %v6327_v18 = vpop.permute.xlu0 %785 }
 0x120   : > { %v698_v40 = vmul.f32 %v547_v39, %v6178_v31  ;;  %v382_v13 = vsel %vm11182_vm0, %v6312_v12, 0.0  ;;  %11220 = vst [vmem:[#allocation11_spill] sm:$0xff] %v6327_v18 }
 0x121   : > { %v561_v41 = vmul.f32 0.5, %v560_v22 }
 0x122   : > { %v715_v21 = vmul.f32 %v5782_v19, %v698_v40 }
 0x123   : > { %v562_v42 = vsub.f32 1.5, %v561_v41 }
 0x124   : > { %v732_v43 = vadd.f32 %v5783_v25, %v715_v21 }
 0x125   : > { %v563_v46 = vmul.f32 %v5797_v34, %v562_v42  ;;  %389 = vadd.xlane.f32.xlu0 %v388_v4 }
 0x126   : > { %848 = vmatpush.msra.mxu0 %v732_v43 }
 0x127   : > { %5587 = vmatmul.msk.f32.vlgmr.msra.gmra.mxu0 %vm11183_vm14, %v748_v45  ;;  %v567_v48 = vsel %vm566_vm13, %v5797_v34, %v563_v46  ;;  %v6329_v23 = vpop.permute.xlu0 %780 }
 0x128   : > { %1280 = vmatpush.msrb.mxu0 %v735_v38  ;;  %v700_v31 = vmul.f32 %v567_v48, %v6180_v32  ;;  %v750_v32 = vld [vmem:[%s11095_s1 + $0x10] sm:$0xff]  ;;  %11221 = vst [vmem:[#allocation12_spill] sm:$0xff] %v6329_v23 }
 0x129   : > { %v6277_v59 = vpop.permute.xlu1 %795 }
 0x12a   : > { %v717_v49 = vmul.f32 %v5782_v19, %v700_v31  ;;  %11215 = vst [vmem:[#allocation6_spill] sm:$0xff] %v6277_v59 }
 0x12c   : > { %v734_v50 = vadd.f32 %v5783_v25, %v717_v49 }
 0x12d   : > { %395 = vadd.xlane.f32.xlu0 %v394_v9 }
 0x12e   : > { %1281 = vmatpush.msrb.mxu0 %v734_v50  ;;  %5766 = vmatpush.msra.mxu2 %v734_v50 }
 0x12f   : > { %5588 = vmatmul.msk.f32.gmra.mxu0 %vm11183_vm14, %v749_v51  ;;  %5610 = vmatmul.msk.f32.vlgmr.msra.gmra.mxu2 %vm11183_vm14, %v753_v52  ;;  %v6334_v27 = vpop.permute.xlu0 %775 }
 0x130   : > { %11223 = vst [vmem:[#allocation14_spill] sm:$0xff] %v6334_v27 }
 0x131   : > { %v6286_v0 = vpop.permute.xlu1 %790 }
 0x132   : > { %11217 = vst [vmem:[#allocation8_spill] sm:$0xff] %v6286_v0 }
 0x137   : > { %5589 = vmatmul.msk.f32.gmra.mxu0 %vm11183_vm14, %v750_v32  ;;  %5611 = vmatmul.msk.f32.gmra.mxu2 %vm11183_vm14, %v754_v53 }
 0x13f   : > { %5590 = vmatmul.msk.f32.gmra.mxu0 %vm11183_vm14, %v751_v54  ;;  %5612 = vmatmul.msk.f32.gmra.mxu2 %vm11183_vm14, %v755_v55 }
 0x147   : > { %5591 = vmatmul.msk.f32.gmra.mxu0 %vm11183_vm14, %v752_v58 }
 0x14f   : > { %5592 = vmatmul.msk.f32.gmra.mxu0 %vm11183_vm14, %v753_v52 }
 0x157   : > { %5593 = vmatmul.msk.f32.gmra.mxu0 %vm11183_vm14, %v754_v53  ;;  %v475_v35 = vpop.xlane.xlu0 %474 }
 0x158   : > { %v511_v22 = vmul.f32 %v475_v35, %v6162_v16 }
 0x15a   : > { %v6368_v48 = vadd.f32 1e-05, %v511_v22 }
 0x15c   : > { %v369_v5 = vpop.xlane.xlu1 %368  ;;  %11226 = vst [vmem:[#allocation17_spill] sm:$0xff] %v6368_v48  ;;  %5798 = vrsqrt.f32 %v6368_v48 }
 0x15d   : > { %v414_v44 = vmul.f32 %v6162_v16, %v369_v5 }
 0x15f   : > { %v6294_v6 = vsub.f32 %v6214_v47, %v414_v44  ;;  %5594 = vmatmul.msk.f32.gmra.mxu0 %vm11183_vm14, %v755_v55  ;;  %v373_v47 = vsel %vm11182_vm0, %v6306_v11, 0.0 }
 0x161   : > { %11218 = vst [vmem:[#allocation9_spill] sm:$0xff] %v6294_v6  ;;  %v446_v8 = vmul.f32 %v6294_v6, %v6294_v6 }
 0x163   : > { %v470_v10 = vsel %vm11182_vm0, %v446_v8, 0.0 }
 0x164   : > { %471 = vadd.xlane.f32.xlu1 %v470_v10 }
 0x167   : > { %5605 = vmatmul.msk.f32.vlgmr.msrb.gmra.mxu0 %vm11183_vm14, %v748_v45 }
 0x16c   : > { %374 = vadd.xlane.f32.xlu1 %v373_v47  ;;  %v6403_v47 = vpop.eup %5798 }
 0x16d   : > { %11227 = vst [vmem:[#allocation18_spill] sm:$0xff] %v6403_v47 }
 0x16f   : > { %5606 = vmatmul.msk.f32.gmra.mxu0 %vm11183_vm14, %v749_v51 }
 0x174   : > { %383 = vadd.xlane.f32.xlu1 %v382_v13 }
 0x177   : > { %5607 = vmatmul.msk.f32.gmra.mxu0 %vm11183_vm14, %v750_v32 }
 0x17c   : > { %380 = vadd.xlane.f32.xlu1 %v379_v15 }
 0x17f   : > { %5608 = vmatmul.msk.f32.gmra.mxu0 %vm11183_vm14, %v751_v54 }
 0x187   : > { %5609 = vmatmul.msk.f32.gmra.mxu0 %vm11183_vm14, %v752_v58 }
 0x190   : > { %v6450_v62 = vpop.xlane.xlu0 %480 }
 0x191   : > { %11233 = vst [vmem:[#allocation24_spill] sm:$0xff] %v6450_v62 }
 0x1a4   : > { %v850_v19 = vpop.f32.mrf.mxu0 }
 0x1a5   : > { %v6332_v26 = vadd.f32 %v850_v19, %v6271_v57 }
 0x1a7   : > { %11222 = vst [vmem:[#allocation13_spill] sm:$0xff] %v6332_v26  ;;  %v6337_v29 = vmul.f32 0.70710677, %v6332_v26 }
 0x1a9   : > { %v890_v33 = vmul.f32 %v6337_v29, %v6337_v29 }
 0x1ab   : > { %v6344_v37 = vmin.f32 %v890_v33, 16.0 }
 0x1ac   : > { %v853_v20 = vpop.f32.mrf.mxu0 }
 0x1ad   : > { %v6342_v34 = vadd.f32 %v853_v20, %v6334_v27  ;;  %v892_v45 = vmul.f32 2.1237322e-06, %v6344_v37 }
 0x1af   : > { %11224 = vst [vmem:[#allocation15_spill] sm:$0xff] %v6342_v34  ;;  %v6351_v39 = vmul.f32 0.70710677, %v6342_v34  ;;  %v893_v32 = vadd.f32 0.00028619796, %v892_v45 }
 0x1b1   : > { %v930_v31 = vmul.f32 %v6351_v39, %v6351_v39  ;;  %v894_v1 = vmul.f32 %v893_v32, %v6344_v37 }
 0x1b2   : > { %v1298_v24 = vpop.f32.mrf.mxu2 }
 0x1b3   : > { %v6354_v40 = vadd.f32 %v1298_v24, %v6277_v59  ;;  %v6385_v54 = vmin.f32 %v930_v31, 16.0  ;;  %v895_v13 = vadd.f32 0.0036580483, %v894_v1 }
 0x1b4   : > { %v856_v25 = vpop.f32.mrf.mxu0 }
 0x1b5   : > { %v6360_v21 = vadd.f32 %v856_v25, %v6329_v23  ;;  %v6373_v49 = vmul.f32 0.70710677, %v6354_v40  ;;  %v932_v4 = vmul.f32 2.1237322e-06, %v6385_v54  ;;  %v589_v25 = vmul.f32 %v6403_v47, %v6368_v48 }
 0x1b7   : > { %11225 = vst [vmem:[#allocation16_spill] sm:$0xff] %v6360_v21  ;;  %v6378_v51 = vmul.f32 0.70710677, %v6360_v21  ;;  %v1523_v55 = vmul.f32 %v6373_v49, %v6373_v49  ;;  %v933_v19 = vadd.f32 0.00028619796, %v932_v4 }
 0x1b9   : > { %v970_v58 = vmul.f32 %v6378_v51, %v6378_v51  ;;  %v6396_v5 = vmin.f32 %v1523_v55, 16.0 }
 0x1ba   : > { %v1301_v28 = vpop.f32.mrf.mxu2 }
 0x1bb   : > { %v6363_v42 = vadd.f32 %v1301_v28, %v6325_v17  ;;  %v6399_v8 = vmin.f32 %v970_v58, 16.0  ;;  %v1525_v20 = vmul.f32 2.1237322e-06, %v6396_v5 }
 0x1bc   : > { %v859_v30 = vpop.f32.mrf.mxu0 }
 0x1bd   : > { %v6381_v52 = vmul.f32 0.70710677, %v6363_v42  ;;  %v972_v28 = vmul.f32 2.1237322e-06, %v6399_v8  ;;  %v6414_v22 = vadd.f32 %v859_v30, %v6327_v18  ;;  %v1526_v31 = vadd.f32 0.00028619796, %v1525_v20 }
 0x1bf   : > { %v1563_v60 = vmul.f32 %v6381_v52, %v6381_v52  ;;  %11228 = vst [vmem:[#allocation19_spill] sm:$0xff] %v6414_v22  ;;  %v973_v55 = vadd.f32 0.00028619796, %v972_v28  ;;  %v6422_v4 = vmul.f32 0.70710677, %v6414_v22 }
 0x1c1   : > { %v6401_v9 = vmin.f32 %v1563_v60, 16.0  ;;  %11229 = vst [vmem:[#allocation20_spill] sm:$0xff] %v6422_v4 }
 0x1c2   : > { %v1304_v36 = vpop.f32.mrf.mxu2 }
 0x1c3   : > { %v6347_v38 = vadd.f32 %v1304_v36, %v6223_v56  ;;  %v1576_v35 = vmul.f32 3.8918573e-05, %v6401_v9  ;;  %v896_v36 = vmul.f32 %v895_v13, %v6344_v37  ;;  %v1565_v1 = vmul.f32 2.1237322e-06, %v6401_v9 }
 0x1c4   : > { %v862_v43 = vpop.f32.mrf.mxu0 }
 0x1c5   : > { %v6357_v41 = vmul.f32 0.70710677, %v6347_v38 }
 0x1c7   : > { %v1603_v46 = vmul.f32 %v6357_v41, %v6357_v41 }
 0x1c9   : > { %v6375_v50 = vmin.f32 %v1603_v46, 16.0  ;;  %v934_v46 = vmul.f32 %v933_v19, %v6385_v54 }
 0x1cb   : > { %v1616_v53 = vmul.f32 3.8918573e-05, %v6375_v50  ;;  %v1605_v61 = vmul.f32 2.1237322e-06, %v6375_v50  ;;  %v935_v13 = vadd.f32 0.0036580483, %v934_v46 }
 0x1cc   : > { %v865_v2 = vpop.f32.mrf.mxu0 }
 0x1cd   : > { %v1617_v63 = vadd.f32 0.001143296, %v1616_v53  ;;  %v1606_v10 = vadd.f32 0.00028619796, %v1605_v61  ;;  %v590_v53 = vmul.f32 %v6403_v47, %v589_v25  ;;  %v1577_v61 = vadd.f32 0.001143296, %v1576_v35 }
 0x1ce   : > { %v1566_v35 = vadd.f32 0.00028619796, %v1565_v1 }
 0x1cf   : > { %v1618_v44 = vmul.f32 %v1617_v63, %v6375_v50  ;;  %v1607_v33 = vmul.f32 %v1606_v10, %v6375_v50  ;;  %v897_v63 = vadd.f32 0.05243302, %v896_v36  ;;  %v1536_v10 = vmul.f32 3.8918573e-05, %v6396_v5 }
 0x1d0   : > { %v591_v20 = vmul.f32 0.5, %v590_v53  ;;  %v1578_v28 = vmul.f32 %v1577_v61, %v6401_v9  ;;  %v6443_v61 = vadd.f32 %v865_v2, %v6277_v59 }
 0x1d1   : > { %v1619_v15 = vadd.f32 0.014752088, %v1618_v44  ;;  %v1608_v60 = vadd.f32 0.0036580483, %v1607_v33  ;;  %v6426_v44 = vadd.f32 %v862_v43, %v6286_v0  ;;  %v898_v33 = vmul.f32 %v897_v63, %v6344_v37 }
 0x1d2   : > { %v1010_v43 = vmul.f32 %v6422_v4, %v6422_v4  ;;  %v1537_v53 = vadd.f32 0.001143296, %v1536_v10  ;;  %v1579_v26 = vadd.f32 0.014752088, %v1578_v28  ;;  %v592_v3 = vsub.f32 1.5, %v591_v20 }
 0x1d3   : > { %v1620_v24 = vmul.f32 %v1619_v15, %v6375_v50  ;;  %11230 = vst [vmem:[#allocation21_spill] sm:$0xff] %v6426_v44  ;;  %v1527_v15 = vmul.f32 %v1526_v31, %v6396_v5  ;;  %v1609_v25 = vmul.f32 %v1608_v60, %v6375_v50  ;;  %v6438_v46 = vmul.f32 0.70710677, %v6426_v44 }
 0x1d4   : > { %v868_v58 = vpop.f32.mrf.mxu0  ;;  %v899_v6 = vadd.f32 0.18741608, %v898_v33  ;;  %v1567_v10 = vmul.f32 %v1566_v35, %v6401_v9  ;;  %v6463_v20 = vmul.f32 0.70710677, %v6443_v61 }
 0x1d5   : > { %v1621_v32 = vadd.f32 0.112945676, %v1620_v24  ;;  %v974_v24 = vmul.f32 %v973_v55, %v6399_v8  ;;  %11231 = vst [vmem:[#allocation22_spill] sm:$0xff] %v6438_v46  ;;  %v936_v55 = vmul.f32 %v935_v13, %v6385_v54  ;;  %v1528_v60 = vadd.f32 0.0036580483, %v1527_v15 }
 0x1d6   : > { %v1050_v2 = vmul.f32 %v6438_v46, %v6438_v46  ;;  %v6466_v28 = vadd.f32 %v868_v58, %v6325_v17  ;;  %v900_v58 = vmul.f32 %v899_v6, %v6344_v37 }
 0x1d7   : > { %v6416_v45 = vpop.xlane.xlu1 %471  ;;  %v1622_v30 = vmul.f32 %v1621_v32, %v6375_v50  ;;  %v975_v1 = vadd.f32 0.0036580483, %v974_v24  ;;  %v937_v24 = vadd.f32 0.05243302, %v936_v55 }
 0x1d8   : > { %v6498_v59 = vadd.f32 1.1283791, %v900_v58 }
 0x1d9   : > { %v1623_v19 = vadd.f32 0.4994258, %v1622_v30  ;;  %v976_v33 = vmul.f32 %v975_v1, %v6399_v8  ;;  %v938_v62 = vmul.f32 %v937_v24, %v6385_v54 }
 0x1db   : > { %v1624_v32 = vmul.f32 %v1623_v19, %v6375_v50  ;;  %v1610_v19 = vadd.f32 0.05243302, %v1609_v25  ;;  %v1529_v25 = vmul.f32 %v1528_v60, %v6396_v5  ;;  %v977_v6 = vadd.f32 0.05243302, %v976_v33  ;;  %v6505_v33 = vpop.xlane.xlu0 %389 }
 0x1dc   : > { %v871_v13 = vpop.f32.mrf.mxu0  ;;  %11236 = vst [vmem:[#allocation27_spill] sm:$0xff] %v6505_v33 }
 0x1dd   : > { %v6445_v63 = vadd.f32 1.0, %v1624_v32  ;;  %v1580_v32 = vmul.f32 %v1579_v26, %v6401_v9  ;;  %v6474_v55 = vadd.f32 %v871_v13, %v6223_v56  ;;  %v1090_v26 = vmul.f32 %v6463_v20, %v6463_v20  ;;  %v346_v13 = vld [vmem:[%s6149_s15 + $0x50] sm:$0xff] }
 0x1df   : > { %v375_v36 = vpop.xlane.xlu1 %374  ;;  %5800 = vrcp.f32 %v6445_v63  ;;  %v1581_v17 = vadd.f32 0.112945676, %v1580_v32  ;;  %v6494_v24 = vmul.f32 0.70710677, %v6474_v55  ;;  %v6507_v32 = vmin.f32 %v1090_v26, 16.0 }
 0x1e0   : > { %v416_v31 = vmul.f32 %v6162_v16, %v375_v36  ;;  %v6453_v36 = vmin.f32 %v1010_v43, 16.0  ;;  %v1611_v43 = vmul.f32 %v1610_v19, %v6375_v50  ;;  %v1530_v19 = vadd.f32 0.05243302, %v1529_v25 }
 0x1e1   : > { %vm1631_vm1 = vweird.f32 %v6445_v63 }
 0x1e2   : > { %v6448_v30 = vsub.f32 %v6306_v11, %v416_v31  ;;  %v1538_v11 = vmul.f32 %v1537_v53, %v6396_v5  ;;  %v1568_v31 = vadd.f32 0.0036580483, %v1567_v10  ;;  %v1012_v53 = vmul.f32 2.1237322e-06, %v6453_v36 }
 0x1e3   : > { %v6484_v10 = vmul.f32 0.70710677, %v6466_v28  ;;  %v1531_v58 = vmul.f32 %v1530_v19, %v6396_v5 }
 0x1e4   : > { %11232 = vst [vmem:[#allocation23_spill] sm:$0xff] %v6448_v30  ;;  %v448_v15 = vmul.f32 %v6448_v30, %v6448_v30  ;;  %v6477_v30 = vmin.f32 %v1050_v2, 16.0  ;;  %v1612_v2 = vadd.f32 0.18741608, %v1611_v43  ;;  %v939_v43 = vadd.f32 0.18741608, %v938_v62 }
 0x1e5   : > { %v6487_v56 = vpop.eup %5800  ;;  %v1170_v62 = vmul.f32 %v6494_v24, %v6494_v24 }
 0x1e6   : > { %v476_v35 = vsel %vm11182_vm0, %v448_v15, 0.0  ;;  %v1539_v15 = vadd.f32 0.014752088, %v1538_v11  ;;  %v1569_v11 = vmul.f32 %v1568_v31, %v6401_v9  ;;  %v1627_v25 = vmul.f32 %v6487_v56, %v6445_v63 }
 0x1e7   : > { %477 = vadd.xlane.f32.xlu1 %v476_v35  ;;  %v384_v60 = vpop.xlane.xlu1 %383  ;;  %v6490_v35 = vmul.f32 %v6403_v47, %v592_v3  ;;  %v1052_v34 = vmul.f32 2.1237322e-06, %v6477_v30  ;;  %v385_v3 = vsel %vm11182_vm0, %v346_v13, 0.0  ;;  %v1130_v31 = vmul.f32 %v6484_v10, %v6484_v10 }
 0x1e8   : > { %v419_v1 = vmul.f32 %v6162_v16, %v384_v60  ;;  %v1013_v60 = vadd.f32 0.00028619796, %v1012_v53  ;;  %v1540_v53 = vmul.f32 %v1539_v15, %v6396_v5  ;;  %v1628_v22 = vsub.f32 1.0, %v1627_v25 }
 0x1e9   : > { %11234 = vst [vmem:[#allocation25_spill] sm:$0xff] %v6490_v35  ;;  %v1613_v35 = vmul.f32 %v1612_v2, %v6375_v50  ;;  %v1570_v13 = vadd.f32 0.05243302, %v1569_v11  ;;  %v1053_v47 = vadd.f32 0.00028619796, %v1052_v34  ;;  %v6524_v2 = vmin.f32 %v1130_v31, 16.0 }
 0x1ea   : > { %v6502_v21 = vsub.f32 %v6312_v12, %v419_v1  ;;  %v1582_v12 = vmul.f32 %v1581_v17, %v6401_v9  ;;  %v978_v1 = vmul.f32 %v977_v6, %v6399_v8  ;;  %v1014_v33 = vmul.f32 %v1013_v60, %v6453_v36 }
 0x1eb   : > { %v1629_v50 = vmul.f32 %v6487_v56, %v1628_v22  ;;  %v1092_v17 = vmul.f32 2.1237322e-06, %v6507_v32  ;;  %vm1632_vm15 = vweird.f32 %v6487_v56  ;;  %v1541_v6 = vadd.f32 0.112945676, %v1540_v53 }
 0x1ec   : > { %11235 = vst [vmem:[#allocation26_spill] sm:$0xff] %v6502_v21  ;;  %v451_v19 = vmul.f32 %v6502_v21, %v6502_v21  ;;  %v1614_v60 = vadd.f32 1.1283791, %v1613_v35  ;;  %v1583_v25 = vadd.f32 0.4994258, %v1582_v12  ;;  %v1571_v31 = vmul.f32 %v1570_v13, %v6401_v9  ;;  %vm6540_vm2 = vmor %vm1631_vm1, %vm1632_vm15  ;;  %v396_v13 = vpop.xlane.xlu0 %395 }
 0x1ed   : > { %v1630_v34 = vadd.f32 %v6487_v56, %v1629_v50  ;;  %v1635_v22 = vand.u32 2147483647, %v6445_v63  ;;  %v1015_v21 = vadd.f32 0.0036580483, %v1014_v33  ;;  %v1054_v12 = vmul.f32 %v1053_v47, %v6477_v30  ;;  %v6554_v47 = vpop.f32.mrf.mxu0 }
 0x1ee   : > { %v485_v53 = vsel %vm11182_vm0, %v451_v19, 0.0  ;;  %v1584_v50 = vmul.f32 %v1583_v25, %v6401_v9  ;;  %v940_v48 = vmul.f32 %v939_v43, %v6385_v54  ;;  %v423_v25 = vmul.f32 %v6162_v16, %v396_v13  ;;  %v348_v13 = vld [vmem:[%s6149_s15 + $0x60] sm:$0xff] }
 0x1ef   : > { %386 = vadd.xlane.f32.xlu1 %v385_v3  ;;  %v381_v26 = vpop.xlane.xlu1 %380  ;;  %v6531_v3 = vmin.f32 %v1170_v62, 16.0  ;;  %v1093_v62 = vadd.f32 0.00028619796, %v1092_v17  ;;  %v1615_v17 = vmul.f32 %v1614_v60, %v6357_v41  ;;  %vm1636_vm3 = vcmp.eq.f32.partialorder %v1635_v22, 8.507059e+37 }
 0x1f0   : > { %v418_v15 = vmul.f32 %v6162_v16, %v381_v26  ;;  %v1637_v26 = vand.u32 2147483648, %v6445_v63  ;;  %v1634_v63 = vsel %vm6540_vm2, %v6487_v56, %v1630_v34  ;;  %v1532_v56 = vadd.f32 0.18741608, %v1531_v58 }
 0x1f1   : > { %v1172_v44 = vmul.f32 2.1237322e-06, %v6531_v3  ;;  %v979_v34 = vadd.f32 0.18741608, %v978_v1  ;;  %v1055_v35 = vadd.f32 0.0036580483, %v1054_v12  ;;  %v1094_v46 = vmul.f32 %v1093_v62, %v6507_v32 }
 0x1f2   : > { %v6528_v11 = vsub.f32 %v6318_v14, %v418_v15  ;;  %v1132_v15 = vmul.f32 2.1237322e-06, %v6524_v2  ;;  %v1638_v19 = vor.u32 1.1754944e-38, %v1637_v26  ;;  %v6559_v18 = vadd.f32 1.0, %v1584_v50 }
 0x1f3   : > { %v1572_v43 = vadd.f32 0.18741608, %v1571_v31  ;;  %v1173_v41 = vadd.f32 0.00028619796, %v1172_v44  ;;  %v980_v58 = vmul.f32 %v979_v34, %v6399_v8  ;;  %v6566_v22 = vmul.f32 0.5, %v6354_v40 }
 0x1f4   : > { %11237 = vst [vmem:[#allocation28_spill] sm:$0xff] %v6528_v11  ;;  %v450_v14 = vmul.f32 %v6528_v11, %v6528_v11  ;;  %v1542_v11 = vmul.f32 %v1541_v6, %v6396_v5  ;;  %v1639_v26 = vsel %vm1636_vm3, %v1638_v19, %v1634_v63  ;;  %v1133_v4 = vadd.f32 0.00028619796, %v1132_v15 }
 0x1f5   : > { %v1640_v6 = vmul.f32 %v1639_v26, %v1615_v17  ;;  %5802 = vrcp.f32 %v6559_v18  ;;  %v1056_v31 = vmul.f32 %v1055_v35, %v6477_v30  ;;  %v6570_v12 = vsub.f32 %v6298_v7, %v423_v25  ;;  %v6590_v34 = vpop.f32.mrf.mxu0 }
 0x1f6   : > { %v482_v33 = vsel %vm11182_vm0, %v450_v14, 0.0  ;;  %v1016_v14 = vmul.f32 %v1015_v21, %v6453_v36  ;;  %v1533_v21 = vmul.f32 %v1532_v56, %v6396_v5  ;;  %v1573_v44 = vmul.f32 %v1572_v43, %v6401_v9 }
 0x1f7   : > { %486 = vadd.xlane.f32.xlu1 %v485_v53  ;;  %483 = vadd.xlane.f32.xlu0 %v482_v33  ;;  %v1543_v53 = vadd.f32 0.4994258, %v1542_v11  ;;  %v941_v33 = vadd.f32 1.1283791, %v940_v48  ;;  %v5620_v60 = vclamps-f32 %v1640_v6, 1.0  ;;  %11240 = vst [vmem:[#allocation29_spill] sm:$0xff] %v6570_v12  ;;  %v1134_v15 = vmul.f32 %v1133_v4, %v6524_v2 }
 0x1f8   : > { %v1017_v1 = vadd.f32 0.05243302, %v1016_v14  ;;  %v1314_v48 = vmul.f32 0.5, %v6347_v38  ;;  %v1095_v62 = vadd.f32 0.0036580483, %v1094_v46  ;;  %v6579_v40 = vmul.f32 %v6498_v59, %v6337_v29 }
 0x1f9   : > { %v1650_v11 = vadd.f32 1.0, %v5620_v60  ;;  %v1544_v63 = vmul.f32 %v1543_v53, %v6396_v5  ;;  %v6582_v19 = vmul.f32 %v941_v33, %v6351_v39  ;;  %v1174_v7 = vmul.f32 %v1173_v41, %v6531_v3 }
 0x1fa   : > { %v1534_v38 = vadd.f32 1.1283791, %v1533_v21  ;;  %v981_v17 = vadd.f32 1.1283791, %v980_v58  ;;  %v1018_v9 = vmul.f32 %v1017_v1, %v6453_v36  ;;  %v1057_v56 = vadd.f32 0.05243302, %v1056_v31 }
 0x1fb   : > { %v1658_v50 = vmul.f32 %v1650_v11, %v1314_v48  ;;  %v6586_v46 = vadd.f32 1.0, %v1544_v63  ;;  %v5803_v4 = vpop.eup %5802  ;;  %v510_v5 = vmul.f32 %v6416_v45, %v6162_v16  ;;  %v455_v59 = vmul.f32 %v6570_v12, %v6570_v12 }
 0x1fc   : > { %v391_v29 = vsel %vm11182_vm0, %v348_v13, 0.0  ;;  %v1574_v39 = vadd.f32 1.1283791, %v1573_v44  ;;  %v1096_v14 = vmul.f32 %v1095_v62, %v6507_v32  ;;  %v1135_v26 = vadd.f32 0.0036580483, %v1134_v15  ;;  %v350_v13 = vld [vmem:[%s6149_s15 + $0x70] sm:$0xff] }
 0x1fd   : > { %1667 = vmatpush.msra.mxu3 %v1658_v50  ;;  %v1587_v35 = vmul.f32 %v5803_v4, %v6559_v18  ;;  %392 = vadd.xlane.f32.xlu2 %v391_v29  ;;  %v1175_v25 = vadd.f32 0.0036580483, %v1174_v7  ;;  %vm1591_vm4 = vweird.f32 %v6559_v18  ;;  %v1597_v45 = vand.u32 2147483648, %v6559_v18 }
 0x1fe   : > { %5804 = vrcp.f32 %v6586_v46  ;;  %vm1592_vm5 = vweird.f32 %v5803_v4  ;;  %v1595_v43 = vand.u32 2147483647, %v6559_v18  ;;  %v1183_v53 = vmul.f32 3.8918573e-05, %v6531_v3 }
 0x1ff   : > { %v1588_v6 = vsub.f32 1.0, %v1587_v35  ;;  %v6603_v33 = vmul.f32 %v1534_v38, %v6373_v49  ;;  %v1058_v41 = vmul.f32 %v1057_v56, %v6477_v30  ;;  %v6606_v60 = vadd.f32 1e-05, %v510_v5  ;;  %vm6620_vm6 = vmor %vm1591_vm4, %vm1592_vm5 }
 0x200   : > { %v497_v21 = vsel %vm11182_vm0, %v455_v59, 0.0  ;;  %v6610_v58 = vmul.f32 0.5, %v6443_v61  ;;  %v1097_v1 = vadd.f32 0.05243302, %v1096_v14  ;;  %v1136_v31 = vmul.f32 %v1135_v26, %v6524_v2  ;;  %v6633_v59 = vpop.f32.mrf.mxu0 }
 0x201   : > { %v1589_v48 = vmul.f32 %v5803_v4, %v1588_v6  ;;  %498 = vadd.xlane.f32.xlu0 %v497_v21  ;;  %v6614_v11 = vmul.f32 %v981_v17, %v6378_v51  ;;  %v1019_v49 = vadd.f32 0.18741608, %v1018_v9  ;;  %v1176_v44 = vmul.f32 %v1175_v25, %v6531_v3 }
 0x202   : > { %v1598_v61 = vor.u32 1.1754944e-38, %v1597_v45  ;;  %v1575_v15 = vmul.f32 %v1574_v39, %v6381_v52  ;;  %vm1596_vm7 = vcmp.eq.f32.partialorder %v1595_v43, 8.507059e+37  ;;  %v1184_v7 = vadd.f32 0.001143296, %v1183_v53 }
 0x203   : > { %v1590_v63 = vadd.f32 %v5803_v4, %v1589_v48  ;;  %v1059_v51 = vadd.f32 0.18741608, %v1058_v41  ;;  %5806 = vrsqrt.f32 %v6606_v60  ;;  %v1143_v38 = vmul.f32 3.8918573e-05, %v6524_v2 }
 0x204   : > { %v5805_v50 = vpop.eup %5804  ;;  %v1103_v17 = vmul.f32 3.8918573e-05, %v6507_v32  ;;  %v1098_v18 = vmul.f32 %v1097_v1, %v6507_v32  ;;  %v1137_v9 = vadd.f32 0.05243302, %v1136_v31  ;;  %v1177_v5 = vadd.f32 0.05243302, %v1176_v44 }
 0x205   : > { %v1594_v56 = vsel %vm6620_vm6, %v5803_v4, %v1590_v63  ;;  %v1547_v52 = vmul.f32 %v5805_v50, %v6586_v46  ;;  %v397_v39 = vsel %vm11182_vm0, %v350_v13, 0.0  ;;  %v1185_v14 = vmul.f32 %v1184_v7, %v6531_v3 }
 0x206   : > { %v1599_v29 = vsel %vm1596_vm7, %v1598_v61, %v1594_v56  ;;  %v1555_v25 = vand.u32 2147483647, %v6586_v46  ;;  %v1144_v45 = vadd.f32 0.001143296, %v1143_v38  ;;  %v1313_v6 = vmul.f32 0.5, %v6363_v42 }
 0x207   : > { %v1600_v26 = vmul.f32 %v1599_v29, %v1575_v15  ;;  %v1548_v35 = vsub.f32 1.0, %v1547_v52  ;;  %v1557_v43 = vand.u32 2147483648, %v6586_v46  ;;  %v1186_v4 = vadd.f32 0.014752088, %v1185_v14 }
 0x208   : > { %v1104_v53 = vadd.f32 0.001143296, %v1103_v17  ;;  %vm1552_vm8 = vweird.f32 %v5805_v50  ;;  %v1145_v1 = vmul.f32 %v1144_v45, %v6524_v2  ;;  %v1099_v48 = vadd.f32 0.18741608, %v1098_v18  ;;  %v6656_v45 = vpop.f32.mrf.mxu0 }
 0x209   : > { %v5619_v41 = vclamps-f32 %v1600_v26, 1.0  ;;  %v1549_v21 = vmul.f32 %v5805_v50, %v1548_v35  ;;  %398 = vadd.xlane.f32.xlu0 %v397_v39  ;;  %v6641_v31 = vpop.eup %5806  ;;  %v1138_v44 = vmul.f32 %v1137_v9, %v6524_v2  ;;  %v1187_v62 = vmul.f32 %v1186_v4, %v6531_v3 }
 0x20a   : > { %v1105_v61 = vmul.f32 %v1104_v53, %v6507_v32  ;;  %vm1551_vm9 = vweird.f32 %v6586_v46  ;;  %v1146_v63 = vadd.f32 0.014752088, %v1145_v1  ;;  %v1178_v13 = vmul.f32 %v1177_v5, %v6531_v3 }
 0x20b   : > { %v1649_v42 = vadd.f32 1.0, %v5619_v41  ;;  %v1550_v15 = vadd.f32 %v5805_v50, %v1549_v21  ;;  %vm1553_vm10 = vmor %vm1551_vm9, %vm1552_vm8  ;;  %v1558_v7 = vor.u32 1.1754944e-38, %v1557_v43  ;;  %v1188_v38 = vadd.f32 0.112945676, %v1187_v62 }
 0x20c   : > { %v1106_v17 = vadd.f32 0.014752088, %v1105_v61  ;;  %vm1556_vm11 = vcmp.eq.f32.partialorder %v1555_v25, 8.507059e+37  ;;  %v1147_v18 = vmul.f32 %v1146_v63, %v6524_v2  ;;  %v1139_v9 = vadd.f32 0.18741608, %v1138_v44 }
 0x20d   : > { %v1657_v56 = vmul.f32 %v1649_v42, %v1313_v6  ;;  %v1554_v52 = vsel %vm1553_vm10, %v5805_v50, %v1550_v15  ;;  %v1189_v39 = vmul.f32 %v1188_v38, %v6531_v3  ;;  %v1020_v46 = vmul.f32 %v1019_v49, %v6453_v36 }
 0x20e   : > { %v1559_v29 = vsel %vm1556_vm11, %v1558_v7, %v1554_v52  ;;  %v1107_v14 = vmul.f32 %v1106_v17, %v6507_v32  ;;  %v579_v5 = vmul.f32 %v6641_v31, %v6606_v60  ;;  %v1148_v35 = vadd.f32 0.112945676, %v1147_v18 }
 0x20f   : > { %1668 = vmatpush.msra.mxu3 %v1657_v56  ;;  %v1560_v26 = vmul.f32 %v1559_v29, %v6603_v33  ;;  %v1100_v50 = vmul.f32 %v1099_v48, %v6507_v32  ;;  %v1179_v25 = vadd.f32 0.18741608, %v1178_v13  ;;  %v1190_v6 = vadd.f32 0.4994258, %v1189_v39 }
 0x210   : > { %v1108_v43 = vadd.f32 0.112945676, %v1107_v14  ;;  %v6660_v4 = vadd.f32 %v6554_v47, %v6271_v57  ;;  %v1149_v49 = vmul.f32 %v1148_v35, %v6524_v2  ;;  %v1063_v41 = vmul.f32 3.8918573e-05, %v6477_v30 }
 0x211   : > { %v5618_v53 = vclamps-f32 %v1560_v26, 1.0  ;;  %v1060_v21 = vmul.f32 %v1059_v51, %v6477_v30  ;;  %v1140_v33 = vmul.f32 %v1139_v9, %v6524_v2  ;;  %v1191_v1 = vmul.f32 %v1190_v6, %v6531_v3 }
 0x212   : > { %v1109_v48 = vmul.f32 %v1108_v43, %v6507_v32  ;;  %v580_v44 = vmul.f32 %v6641_v31, %v579_v5  ;;  %v6671_v62 = vadd.f32 %v6590_v34, %v6334_v27  ;;  %v1150_v61 = vadd.f32 0.4994258, %v1149_v49 }
 0x213   : > { %v1648_v47 = vadd.f32 1.0, %v5618_v53  ;;  %v1101_v42 = vadd.f32 1.1283791, %v1100_v50  ;;  %v1180_v15 = vmul.f32 %v1179_v25, %v6531_v3  ;;  %v6674_v63 = vadd.f32 1.0, %v1191_v1 }
 0x214   : > { %v1110_v51 = vadd.f32 0.4994258, %v1109_v48  ;;  %v6677_v13 = vmul.f32 0.70710677, %v6660_v4  ;;  %v1151_v38 = vmul.f32 %v1150_v61, %v6524_v2  ;;  %v1064_v17 = vadd.f32 0.001143296, %v1063_v41 }
 0x215   : > { %v1656_v7 = vmul.f32 %v1648_v47, %v6566_v22  ;;  %v6681_v56 = vadd.f32 1.1283791, %v1020_v46  ;;  %v6683_v34 = vadd.f32 1.1283791, %v1060_v21  ;;  %v1141_v52 = vadd.f32 1.1283791, %v1140_v33 }
 0x216   : > { %5808 = vrcp.f32 %v6674_v63  ;;  %v6687_v3 = vmul.f32 0.70710677, %v6671_v62  ;;  %v6689_v18 = vadd.f32 1.0, %v1151_v38  ;;  %v1111_v9 = vmul.f32 %v1110_v51, %v6507_v32  ;;  %v766_v48 = vld [vmem:[%s11098_s4] sm:$0xff] }
 0x217   : > { %1669 = vmatpush.msra.mxu3 %v1656_v7  ;;  %v1065_v22 = vmul.f32 %v1064_v17, %v6477_v30  ;;  %v6694_v2 = vmul.f32 0.5, %v6466_v28  ;;  %v6696_v29 = vmul.f32 0.5, %v580_v44  ;;  %v1181_v39 = vadd.f32 1.1283791, %v1180_v15  ;;  %v1295_v28 = vpop.f32.mrf.mxu0 }
 0x218   : > { %v1023_v14 = vmul.f32 3.8918573e-05, %v6453_v36  ;;  %v6700_v46 = vmul.f32 %v1101_v42, %v6463_v20  ;;  %v6704_v5 = vmul.f32 %v6677_v13, %v6677_v13  ;;  %v1202_v26 = vand.u32 2147483647, %v6674_v63 }
 0x219   : > { %5810 = vrcp.f32 %v6689_v18  ;;  %v6709_v32 = vmul.f32 %v1141_v52, %v6484_v10  ;;  %v1204_v35 = vand.u32 2147483648, %v6674_v63  ;;  %v6712_v50 = vadd.f32 1.0, %v1111_v9 }
 0x21a   : > { %v1066_v25 = vadd.f32 0.014752088, %v1065_v22  ;;  %v6716_v20 = vmul.f32 %v6687_v3, %v6687_v3  ;;  %v1164_v6 = vand.u32 2147483648, %v6689_v18  ;;  %v1024_v43 = vadd.f32 0.001143296, %v1023_v14 }
 0x21b   : > { %v983_v53 = vmul.f32 3.8918573e-05, %v6399_v8  ;;  %v1182_v41 = vmul.f32 %v1181_v39, %v6494_v24  ;;  %v6722_v10 = vmul.f32 0.5, %v6474_v55  ;;  %v1162_v21 = vand.u32 2147483647, %v6689_v18 }
 0x21c   : > { %v5809_v49 = vpop.eup %5808  ;;  %5812 = vrcp.f32 %v6712_v50  ;;  %v6727_v33 = vadd.f32 %v1295_v28, %v6286_v0  ;;  %vm1198_vm12 = vweird.f32 %v6674_v63  ;;  %vm6731_vm13 = vcmp.eq.f32.partialorder %v1202_v26, 8.507059e+37 }
 0x21d   : > { %v1194_v1 = vmul.f32 %v5809_v49, %v6674_v63  ;;  %v1205_v44 = vor.u32 1.1754944e-38, %v1204_v35  ;;  %v1067_v24 = vmul.f32 %v1066_v25, %v6477_v30  ;;  %v1025_v55 = vmul.f32 %v1024_v43, %v6453_v36  ;;  %1228 = vperm.xlu0 %5780, %v766_v48  }
 0x21e   : > { %v984_v47 = vadd.f32 0.001143296, %v983_v53  ;;  %vm1158_vm15 = vweird.f32 %v6689_v18  ;;  %v1165_v15 = vor.u32 1.1754944e-38, %v1164_v6  ;;  %v943_v51 = vmul.f32 3.8918573e-05, %v6385_v54 }
 0x21f   : > { %v5811_v61 = vpop.eup %5810  ;;  %v1195_v42 = vsub.f32 1.0, %v1194_v1  ;;  %vm1199_vm1 = vweird.f32 %v5809_v49  ;;  %vm6740_vm2 = vcmp.eq.f32.partialorder %v1162_v21, 8.507059e+37  ;;  %v1068_v17 = vadd.f32 0.112945676, %v1067_v24 }
 0x220   : > { %v1154_v7 = vmul.f32 %v5811_v61, %v6689_v18  ;;  %v1026_v52 = vadd.f32 0.014752088, %v1025_v55  ;;  %vm1118_vm3 = vweird.f32 %v6712_v50  ;;  %v1122_v22 = vand.u32 2147483647, %v6712_v50  ;;  %vm1200_vm5 = vmor %vm1198_vm12, %vm1199_vm1 }
 0x221   : > { %v1196_v9 = vmul.f32 %v5809_v49, %v1195_v42  ;;  %v985_v39 = vmul.f32 %v984_v47, %v6399_v8  ;;  %v944_v14 = vadd.f32 0.001143296, %v943_v51  ;;  %v1124_v35 = vand.u32 2147483648, %v6712_v50 }
 0x222   : > { %v5813_v26 = vpop.eup %5812  ;;  %v1155_v28 = vsub.f32 1.0, %v1154_v7  ;;  %v1069_v25 = vmul.f32 %v1068_v17, %v6477_v30  ;;  %v1027_v6 = vmul.f32 %v1026_v52, %v6453_v36  ;;  %vm1159_vm4 = vweird.f32 %v5811_v61 }
 0x223   : > { %v1197_v43 = vadd.f32 %v5809_v49, %v1196_v9  ;;  %v1114_v53 = vmul.f32 %v5813_v26, %v6712_v50  ;;  %v986_v21 = vadd.f32 0.014752088, %v985_v39  ;;  %v903_v47 = vmul.f32 3.8918573e-05, %v6344_v37  ;;  %vm1160_vm6 = vmor %vm1158_vm15, %vm1159_vm4 }
 0x224   : > { %v1156_v1 = vmul.f32 %v5811_v61, %v1155_v28  ;;  %v1070_v24 = vadd.f32 0.4994258, %v1069_v25  ;;  %v1028_v55 = vadd.f32 0.112945676, %v1027_v6  ;;  %v945_v17 = vmul.f32 %v944_v14, %v6385_v54 }
 0x225   : > { %v1201_v42 = vsel %vm1200_vm5, %v5809_v49, %v1197_v43  ;;  %v1115_v51 = vsub.f32 1.0, %v1114_v53  ;;  %v987_v7 = vmul.f32 %v986_v21, %v6399_v8  ;;  %vm1119_vm7 = vweird.f32 %v5813_v26 }
 0x226   : > { %v1206_v52 = vsel %vm6731_vm13, %v1205_v44, %v1201_v42  ;;  %v1157_v9 = vadd.f32 %v5811_v61, %v1156_v1  ;;  %v1071_v39 = vmul.f32 %v1070_v24, %v6477_v30  ;;  %v1029_v63 = vmul.f32 %v1028_v55, %v6453_v36  ;;  %vm1120_vm8 = vmor %vm1118_vm3, %vm1119_vm7 }
 0x227   : > { %v1207_v12 = vmul.f32 %v1206_v52, %v1182_v41  ;;  %v1116_v28 = vmul.f32 %v5813_v26, %v1115_v51  ;;  %v988_v49 = vadd.f32 0.112945676, %v987_v7  ;;  %v904_v44 = vadd.f32 0.001143296, %v903_v47 }
 0x228   : > { %v1161_v25 = vsel %vm1160_vm6, %v5811_v61, %v1157_v9  ;;  %v6764_v6 = vadd.f32 1.0, %v1071_v39  ;;  %v1030_v14 = vadd.f32 0.4994258, %v1029_v63  ;;  %v1125_v61 = vor.u32 1.1754944e-38, %v1124_v35 }
 0x229   : > { %v5602_v30 = vclamps-f32 %v1207_v12, 1.0  ;;  %v1166_v41 = vsel %vm6740_vm2, %v1165_v15, %v1161_v25  ;;  %v1117_v43 = vadd.f32 %v5813_v26, %v1116_v28  ;;  %v989_v18 = vmul.f32 %v988_v49, %v6399_v8  ;;  %v11248_v49 = vld [vmem:[#allocation22_spill] sm:$0xff] }
 0x22a   : > { %v1167_v53 = vmul.f32 %v1166_v41, %v6709_v32  ;;  %5814 = vrcp.f32 %v6764_v6  ;;  %v946_v21 = vadd.f32 0.014752088, %v945_v17  ;;  %vm1123_vm9 = vcmp.eq.f32.partialorder %v1122_v22, 8.507059e+37 }
 0x22b   : > { %v1217_v1 = vadd.f32 1.0, %v5602_v30  ;;  %v1121_v24 = vsel %vm1120_vm8, %v5813_v26, %v1117_v43  ;;  %v1031_v12 = vmul.f32 %v1030_v14, %v6453_v36  ;;  %v990_v55 = vadd.f32 0.4994258, %v989_v18 }
 0x22c   : > { %v5601_v38 = vclamps-f32 %v1167_v53, 1.0  ;;  %v1126_v15 = vsel %vm1123_vm9, %v1125_v61, %v1121_v24  ;;  %v905_v47 = vmul.f32 %v904_v44, %v6344_v37  ;;  %v6780_v32 = vadd.f32 %v6633_v59, %v6329_v23 }
 0x22d   : > { %v1225_v50 = vmul.f32 %v1217_v1, %v6722_v10  ;;  %v1127_v35 = vmul.f32 %v1126_v15, %v6700_v46  ;;  %v6784_v42 = vadd.f32 1.0, %v1031_v12  ;;  %v6787_v26 = vmul.f32 0.70710677, %v6727_v33  ;;  %v11249_v1 = vld [vmem:[#allocation11_spill] sm:$0xff] }
 0x22e   : > { %v1216_v22 = vadd.f32 1.0, %v5601_v38  ;;  %v991_v36 = vmul.f32 %v990_v55, %v6399_v8  ;;  %v947_v51 = vmul.f32 %v946_v21, %v6385_v54  ;;  %v6792_v7 = vmin.f32 %v6704_v5, 16.0  ;;  %v11247_v8 = vld [vmem:[#allocation20_spill] sm:$0xff] }
 0x22f   : > { %v6795_v59 = vmin.f32 %v6716_v20, 16.0  ;;  %1251 = vmatpush.msra.mxu1 %v1225_v50  ;;  %v5600_v10 = vclamps-f32 %v1127_v35, 1.0  ;;  %5816 = vrcp.f32 %v6784_v42  ;;  %v906_v39 = vadd.f32 0.014752088, %v905_v47 }
 0x230   : > { %v5815_v46 = vpop.eup %5814  ;;  %v1224_v17 = vmul.f32 %v1216_v22, %v6694_v2  ;;  %v6799_v52 = vadd.f32 1.0, %v991_v36  ;;  %v948_v9 = vadd.f32 0.112945676, %v947_v51  ;;  %v6803_v63 = vmul.f32 %v6681_v56, %v11247_v8 }
 0x231   : > { %v6806_v5 = vmul.f32 0.70710677, %v6780_v32  ;;  %v1215_v20 = vadd.f32 1.0, %v5600_v10  ;;  %v1074_v28 = vmul.f32 %v5815_v46, %v6764_v6  ;;  %v1062_v25 = vmul.f32 %v6683_v34, %v11248_v49 }
 0x232   : > { %v582_v14 = vsub.f32 1.5, %v6696_v29  ;;  %v1483_v2 = vmul.f32 %v6787_v26, %v6787_v26  ;;  %1252 = vmatpush.msra.mxu1 %v1224_v17  ;;  %5818 = vrcp.f32 %v6799_v52  ;;  %v1082_v44 = vand.u32 2147483647, %v6764_v6 }
 0x233   : > { %v1223_v56 = vmul.f32 %v1215_v20, %v6610_v58  ;;  %v1075_v48 = vsub.f32 1.0, %v1074_v28  ;;  %v949_v30 = vmul.f32 %v948_v9, %v6385_v54  ;;  %v6819_v41 = vmul.f32 2.1237322e-06, %v6792_v7 }
 0x234   : > { %v6822_v34 = vmul.f32 2.1237322e-06, %v6795_v59  ;;  %v1084_v43 = vand.u32 2147483648, %v6764_v6  ;;  %v907_v18 = vmul.f32 %v906_v39, %v6344_v37  ;;  %v6828_v61 = vmul.f32 %v6806_v5, %v6806_v5 }
 0x235   : > { %v5817_v53 = vpop.eup %5816  ;;  %1253 = vmatpush.msra.mxu1 %v1223_v56  ;;  %v1076_v58 = vmul.f32 %v5815_v46, %v1075_v48  ;;  %vm1079_vm10 = vweird.f32 %v5815_v46  ;;  %v950_v21 = vadd.f32 0.4994258, %v949_v30  ;;  %v6832_v24 = vadd.f32 %v6656_v45, %v11249_v1  ;;  %v11250_v30 = vld [vmem:[#allocation21_spill] sm:$0xff] }
 0x236   : > { %v6834_v12 = vmin.f32 %v1483_v2, 16.0  ;;  %v1034_v38 = vmul.f32 %v5817_v53, %v6784_v42  ;;  %v908_v15 = vadd.f32 0.112945676, %v907_v18  ;;  %vm1078_vm11 = vweird.f32 %v6764_v6 }
 0x237   : > { %v1077_v55 = vadd.f32 %v5815_v46, %v1076_v58  ;;  %vm1083_vm12 = vcmp.eq.f32.partialorder %v1082_v44, 8.507059e+37  ;;  %v951_v47 = vmul.f32 %v950_v21, %v6385_v54  ;;  %vm1080_vm13 = vmor %vm1078_vm11, %vm1079_vm10  ;;  %v1085_v35 = vor.u32 1.1754944e-38, %v1084_v43 }
 0x238   : > { %v5819_v50 = vpop.eup %5818  ;;  %v1035_v22 = vsub.f32 1.0, %v1034_v38  ;;  %v1044_v36 = vand.u32 2147483648, %v6784_v42  ;;  %v909_v45 = vmul.f32 %v908_v15, %v6344_v37  ;;  %v1042_v10 = vand.u32 2147483647, %v6784_v42  ;;  %v11251_v38 = vld [vmem:[#allocation17_spill] sm:$0xff] }
 0x239   : > { %v1081_v51 = vsel %vm1080_vm13, %v5815_v46, %v1077_v55  ;;  %v994_v17 = vmul.f32 %v5819_v50, %v6799_v52  ;;  %v6843_v9 = vadd.f32 1.0, %v951_v47  ;;  %vm1039_vm15 = vweird.f32 %v5817_v53 }
 0x23a   : > { %v1086_v39 = vsel %vm1083_vm12, %v1085_v35, %v1081_v51  ;;  %v1036_v6 = vmul.f32 %v5817_v53, %v1035_v22  ;;  %v910_v8 = vadd.f32 0.4994258, %v909_v45  ;;  %vm1038_vm1 = vweird.f32 %v6784_v42 }
 0x23b   : > { %v1087_v54 = vmul.f32 %v1086_v39, %v1062_v25  ;;  %v995_v20 = vsub.f32 1.0, %v994_v17  ;;  %5820 = vrcp.f32 %v6843_v9  ;;  %v1045_v49 = vor.u32 1.1754944e-38, %v1044_v36  ;;  %vm1040_vm2 = vmor %vm1038_vm1, %vm1039_vm15 }
 0x23c   : > { %v1037_v28 = vadd.f32 %v5817_v53, %v1036_v6  ;;  %v1004_v46 = vand.u32 2147483648, %v6799_v52  ;;  %v911_v2 = vmul.f32 %v910_v8, %v6344_v37  ;;  %vm999_vm3 = vweird.f32 %v5819_v50  ;;  %v11252_v37 = vld [vmem:[#allocation18_spill] sm:$0xff]  ;;  %v11253_v6 = vld [vmem:[#allocation19_spill] sm:$0xff] }
 0x23d   : > { %v5599_v56 = vclamps-f32 %v1087_v54, 1.0  ;;  %v996_v48 = vmul.f32 %v5819_v50, %v995_v20  ;;  %v1002_v44 = vand.u32 2147483647, %v6799_v52  ;;  %v878_v43 = vmul.f32 0.5, %v11250_v30 }
 0x23e   : > { %v1041_v25 = vsel %vm1040_vm2, %v5817_v53, %v1037_v28  ;;  %vm1043_vm4 = vcmp.eq.f32.partialorder %v1042_v10, 8.507059e+37  ;;  %v6851_v42 = vadd.f32 1.0, %v911_v2  ;;  %vm998_vm5 = vweird.f32 %v6799_v52 }
 0x23f   : > { %v1214_v18 = vadd.f32 1.0, %v5599_v56  ;;  %v1046_v58 = vsel %vm1043_vm4, %v1045_v49, %v1041_v25  ;;  %v997_v21 = vadd.f32 %v5819_v50, %v996_v48  ;;  %vm594_vm6 = vweird.f32 %v11251_v38  ;;  %vm1000_vm8 = vmor %vm998_vm5, %vm999_vm3  ;;  %v11254_v56 = vld [vmem:[#allocation16_spill] sm:$0xff] }
 0x240   : > { %vm595_vm7 = vweird.f32 %v11252_v37  ;;  %v6857_v15 = vmul.f32 0.70710677, %v6832_v24  ;;  %v1047_v55 = vmul.f32 %v1046_v58, %v6803_v63  ;;  %v1005_v47 = vor.u32 1.1754944e-38, %v1004_v46 }
 0x241   : > { %5822 = vrcp.f32 %v6851_v42  ;;  %v5821_v53 = vpop.eup %5820  ;;  %vm584_vm9 = vweird.f32 %v6606_v60  ;;  %v1485_v35 = vmul.f32 2.1237322e-06, %v6834_v12  ;;  %v1222_v22 = vmul.f32 %v1214_v18, %v878_v43  ;;  %vm6895_vm2 = vmor %vm594_vm6, %vm595_vm7  ;;  %v11259_v60 = vld [vmem:[#allocation25_spill] sm:$0xff] }
 0x242   : > { %v1001_v52 = vsel %vm1000_vm8, %v5819_v50, %v997_v21  ;;  %vm1003_vm10 = vcmp.eq.f32.partialorder %v1002_v44, 8.507059e+37  ;;  %vm585_vm11 = vweird.f32 %v6641_v31  ;;  %v5598_v36 = vclamps-f32 %v1047_v55, 1.0 }
 0x243   : > { %v1006_v45 = vsel %vm1003_vm10, %v1005_v47, %v1001_v52  ;;  %v954_v51 = vmul.f32 %v5821_v53, %v6843_v9  ;;  %v6868_v63 = vmul.f32 %v6641_v31, %v582_v14  ;;  %v1366_v10 = vadd.f32 0.00028619796, %v6822_v34  ;;  %1254 = vmatpush.msra.mxu1 %v1222_v22  ;;  %vm6904_vm4 = vmor %vm584_vm9, %vm585_vm11 }
 0x244   : > { %v6872_v17 = vmin.f32 %v6828_v61, 16.0  ;;  %v1007_v50 = vmul.f32 %v1006_v45, %v6614_v11  ;;  %v1443_v39 = vmul.f32 %v6857_v15, %v6857_v15  ;;  %v877_v8 = vmul.f32 0.5, %v11253_v6 }
 0x245   : > { %v1213_v54 = vadd.f32 1.0, %v5598_v36  ;;  %v955_v20 = vsub.f32 1.0, %v954_v51  ;;  %v1326_v29 = vadd.f32 0.00028619796, %v6819_v41  ;;  %v1486_v28 = vadd.f32 0.00028619796, %v1485_v35 }
 0x246   : > { %v5597_v14 = vclamps-f32 %v1007_v50, 1.0  ;;  %v964_v49 = vand.u32 2147483648, %v6843_v9  ;;  %vm959_vm12 = vweird.f32 %v5821_v53  ;;  %v962_v2 = vand.u32 2147483647, %v6843_v9 }
 0x247   : > { %v5823_v34 = vpop.eup %5822  ;;  %v1221_v46 = vmul.f32 %v1213_v54, %v877_v8  ;;  %v956_v61 = vmul.f32 %v5821_v53, %v955_v20  ;;  %v1367_v11 = vmul.f32 %v1366_v10, %v6795_v59  ;;  %v876_v48 = vmul.f32 0.5, %v11254_v56 }
 0x248   : > { %v1212_v44 = vadd.f32 1.0, %v5597_v14  ;;  %v914_v30 = vmul.f32 %v5823_v34, %v6851_v42  ;;  %v1405_v43 = vmul.f32 2.1237322e-06, %v6872_v17  ;;  %v6885_v41 = vmin.f32 %v1443_v39, 16.0 }
 0x249   : > { %1255 = vmatpush.msra.mxu1 %v1221_v46  ;;  %v957_v25 = vadd.f32 %v5821_v53, %v956_v61  ;;  %vm958_vm13 = vweird.f32 %v6843_v9  ;;  %v1487_v18 = vmul.f32 %v1486_v28, %v6834_v12  ;;  %v965_v21 = vor.u32 1.1754944e-38, %v964_v49  ;;  %v11260_v46 = vld [vmem:[#allocation15_spill] sm:$0xff] }
 0x24a   : > { %v1220_v58 = vmul.f32 %v1212_v44, %v876_v48  ;;  %vm960_vm15 = vmor %vm958_vm13, %vm959_vm12  ;;  %v915_v55 = vsub.f32 1.0, %v914_v30  ;;  %vm963_vm1 = vcmp.eq.f32.partialorder %v962_v2, 8.507059e+37  ;;  %v924_v35 = vand.u32 2147483648, %v6851_v42  ;;  %v11261_v30 = vld [vmem:[#allocation4_spill] sm:$0xff] }
 0x24b   : > { %v961_v47 = vsel %vm960_vm15, %v5821_v53, %v957_v25  ;;  %v1496_v22 = vmul.f32 3.8918573e-05, %v6834_v12  ;;  %vm919_vm3 = vweird.f32 %v5823_v34  ;;  %v922_v45 = vand.u32 2147483647, %v6851_v42 }
 0x24c   : > { %1256 = vmatpush.msra.mxu1 %v1220_v58  ;;  %v966_v9 = vsel %vm963_vm1, %v965_v21, %v961_v47  ;;  %v916_v36 = vmul.f32 %v5823_v34, %v915_v55  ;;  %v1406_v51 = vadd.f32 0.00028619796, %v1405_v43  ;;  %v1445_v38 = vmul.f32 2.1237322e-06, %v6885_v41 }
 0x24d   : > { %v967_v10 = vmul.f32 %v966_v9, %v6582_v19  ;;  %v1497_v50 = vadd.f32 0.001143296, %v1496_v22  ;;  %v1488_v39 = vadd.f32 0.0036580483, %v1487_v18  ;;  %vm918_vm5 = vweird.f32 %v6851_v42  ;;  %v11262_v18 = vld [vmem:[#allocation9_spill] sm:$0xff] }
 0x24e   : > { %v917_v6 = vadd.f32 %v5823_v34, %v916_v36  ;;  %v1336_v8 = vmul.f32 3.8918573e-05, %v6792_v7  ;;  %vm920_vm6 = vmor %vm918_vm5, %vm919_vm3  ;;  %v925_v20 = vor.u32 1.1754944e-38, %v924_v35  ;;  %v597_v28 = vsel %vm6895_vm2, %v11252_v37, %v11259_v60 }
 0x24f   : > { %v5596_v54 = vclamps-f32 %v967_v10, 1.0  ;;  %v1498_v14 = vmul.f32 %v1497_v50, %v6834_v12  ;;  %vm923_vm7 = vcmp.eq.f32.partialorder %v922_v45, 8.507059e+37  ;;  %v587_v19 = vsel %vm6904_vm4, %v6641_v31, %v6868_v63  ;;  %v6934_v45 = vld [vmem:[%s11102_s8] ss:$0 sm:$0xff] }
 0x250   : > { %v921_v49 = vsel %vm920_vm6, %v5823_v34, %v917_v6  ;;  %v1337_v42 = vadd.f32 0.001143296, %v1336_v8  ;;  %v875_v61 = vmul.f32 0.5, %v11260_v46  ;;  %v703_v43 = vmul.f32 %v597_v28, %v11261_v30 }
 0x251   : > { %v1211_v2 = vadd.f32 1.0, %v5596_v54  ;;  %v926_v56 = vsel %vm923_vm7, %v925_v20, %v921_v49  ;;  %v1499_v48 = vadd.f32 0.014752088, %v1498_v14  ;;  %v1446_v25 = vadd.f32 0.00028619796, %v1445_v38  ;;  %v6943_v38 = vld [vmem:[%s11097_s3] sm:$0xff] }
 0x252   : > { %v927_v44 = vmul.f32 %v926_v56, %v6579_v40  ;;  %v1338_v37 = vmul.f32 %v1337_v42, %v6792_v7  ;;  %v702_v58 = vmul.f32 %v587_v19, %v11262_v18  ;;  %v1327_v31 = vmul.f32 %v1326_v29, %v6792_v7  ;;  %v11263_v40 = vld [vmem:[#allocation13_spill] sm:$0xff]  ;;  %v6951_v14 = vld [vmem:[%s11102_s8 + $0x1] ss:$0 sm:$0xff] }
 0x253   : > { %v1219_v34 = vmul.f32 %v1211_v2, %v875_v61  ;;  %v1500_v21 = vmul.f32 %v1499_v48, %v6834_v12  ;;  %v1368_v63 = vadd.f32 0.0036580483, %v1367_v11  ;;  %v1407_v35 = vmul.f32 %v1406_v51, %v6872_v17 }
 0x254   : > { %v5595_v55 = vclamps-f32 %v927_v44, 1.0  ;;  %v1339_v47 = vadd.f32 0.014752088, %v1338_v37  ;;  %v1489_v22 = vmul.f32 %v1488_v39, %v6834_v12  ;;  %v874_v52 = vmul.f32 0.5, %v11263_v40 }
 0x255   : > { %1257 = vmatpush.msra.mxu1 %v1219_v34  ;;  %v1501_v9 = vadd.f32 0.112945676, %v1500_v21  ;;  %v720_v53 = vmul.f32 %v6934_v45, %v703_v43  ;;  %v1376_v29 = vmul.f32 3.8918573e-05, %v6795_v59  ;;  %v1447_v51 = vmul.f32 %v1446_v25, %v6885_v41 }
 0x256   : > { %v1210_v36 = vadd.f32 1.0, %v5595_v55  ;;  %v1340_v11 = vmul.f32 %v1339_v47, %v6792_v7  ;;  %vm1236_vm8 = vcmask 523264   ;;  %v719_v10 = vmul.f32 %v6934_v45, %v702_v58 }
 0x257   : > { %v1502_v50 = vmul.f32 %v1501_v9, %v6834_v12  ;;  %v1456_v6 = vmul.f32 3.8918573e-05, %v6885_v41  ;;  %v1377_v8 = vadd.f32 0.001143296, %v1376_v29  ;;  %v1328_v20 = vadd.f32 0.0036580483, %v1327_v31 }
 0x258   : > { %v1218_v39 = vmul.f32 %v1210_v36, %v874_v52  ;;  %v1341_v54 = vadd.f32 0.112945676, %v1340_v11  ;;  %v1490_v60 = vadd.f32 0.05243302, %v1489_v22  ;;  %v6954_v49 = vadd.f32 %v6951_v14, %v720_v53  ;;  %v6981_v22 = vld [vmem:[%s11097_s3 + $0x8] sm:$0xff] }
 0x259   : > { %v1503_v28 = vadd.f32 0.4994258, %v1502_v50  ;;  %v1457_v19 = vadd.f32 0.001143296, %v1456_v6  ;;  %v1378_v42 = vmul.f32 %v1377_v8, %v6795_v59  ;;  %v1369_v61 = vmul.f32 %v1368_v63, %v6795_v59 }
 0x25a   : > { %1258 = vmatpush.msra.mxu1 %v1218_v39  ;;  %v1342_v46 = vmul.f32 %v1341_v54, %v6792_v7  ;;  %v1408_v2 = vadd.f32 0.0036580483, %v1407_v35  ;;  %v1448_v56 = vadd.f32 0.0036580483, %v1447_v51  ;;  %v6964_v44 = vadd.f32 %v6951_v14, %v719_v10 }
 0x25b   : > { %5603 = vmatmul.msk.f32.vlgmr.msra.gmra.mxu1 %vm1236_vm8, %v6943_v38  ;;  %v1504_v48 = vmul.f32 %v1503_v28, %v6834_v12  ;;  %v1458_v30 = vmul.f32 %v1457_v19, %v6885_v41  ;;  %v1379_v43 = vadd.f32 0.014752088, %v1378_v42  ;;  %v1329_v25 = vmul.f32 %v1328_v20, %v6792_v7 }
 0x25c   : > { %1696 = vmatpush.msrb.mxu1 %v6954_v49  ;;  %v1343_v37 = vadd.f32 0.4994258, %v1342_v46  ;;  %v1491_v34 = vmul.f32 %v1490_v60, %v6834_v12  ;;  %v1416_v21 = vmul.f32 3.8918573e-05, %v6872_v17  ;;  %v1370_v55 = vadd.f32 0.05243302, %v1369_v61 }
 0x25d   : > { %v6969_v18 = vadd.f32 1.0, %v1504_v48  ;;  %v1459_v58 = vadd.f32 0.014752088, %v1458_v30  ;;  %v1380_v31 = vmul.f32 %v1379_v43, %v6795_v59  ;;  %v1409_v47 = vmul.f32 %v1408_v2, %v6872_v17 }
 0x25e   : > { %1697 = vmatpush.msrb.mxu1 %v6964_v44  ;;  %v1344_v63 = vmul.f32 %v1343_v37, %v6792_v7  ;;  %v1449_v35 = vmul.f32 %v1448_v56, %v6885_v41  ;;  %v1417_v52 = vadd.f32 0.001143296, %v1416_v21  ;;  %v1492_v53 = vadd.f32 0.18741608, %v1491_v34 }
 0x25f   : > { %5824 = vrcp.f32 %v6969_v18  ;;  %v1460_v40 = vmul.f32 %v1459_v58, %v6885_v41  ;;  %v1381_v9 = vadd.f32 0.112945676, %v1380_v31  ;;  %v1330_v10 = vadd.f32 0.05243302, %v1329_v25 }
 0x260   : > { %v6984_v36 = vadd.f32 1.0, %v1344_v63  ;;  %v1418_v11 = vmul.f32 %v1417_v52, %v6872_v17  ;;  %v1371_v50 = vmul.f32 %v1370_v55, %v6795_v59  ;;  %v1410_v39 = vadd.f32 0.05243302, %v1409_v47 }
 0x261   : > { %v1461_v29 = vadd.f32 0.112945676, %v1460_v40  ;;  %v1382_v51 = vmul.f32 %v1381_v9, %v6795_v59  ;;  %v1450_v6 = vadd.f32 0.05243302, %v1449_v35  ;;  %v1493_v28 = vmul.f32 %v1492_v53, %v6834_v12  ;;  %v7014_v9 = vld [vmem:[%s11095_s1] sm:$0xff] }
 0x262   : > { %5826 = vrcp.f32 %v6984_v36  ;;  %v1419_v54 = vadd.f32 0.014752088, %v1418_v11  ;;  %v1331_v61 = vmul.f32 %v1330_v10, %v6792_v7  ;;  %v1372_v2 = vadd.f32 0.18741608, %v1371_v50 }
 0x263   : > { %5604 = vmatmul.msk.f32.gmra.mxu1 %vm1236_vm8, %v6981_v22  ;;  %v1462_v8 = vmul.f32 %v1461_v29, %v6885_v41  ;;  %v1383_v20 = vadd.f32 0.4994258, %v1382_v51  ;;  %v1411_v56 = vmul.f32 %v1410_v39, %v6872_v17  ;;  %v1451_v30 = vmul.f32 %v1450_v6, %v6885_v41 }
 0x264   : > { %v1420_v46 = vmul.f32 %v1419_v54, %v6872_v17  ;;  %v1494_v12 = vadd.f32 1.1283791, %v1493_v28  ;;  %v1515_v58 = vand.u32 2147483647, %v6969_v18  ;;  %v1517_v21 = vand.u32 2147483648, %v6969_v18 }
 0x265   : > { %v5825_v60 = vpop.eup %5824  ;;  %v1463_v42 = vadd.f32 0.4994258, %v1462_v8  ;;  %v1384_v48 = vmul.f32 %v1383_v20, %v6795_v59  ;;  %v1332_v35 = vadd.f32 0.18741608, %v1331_v61  ;;  %v1373_v40 = vmul.f32 %v1372_v2, %v6795_v59 }
 0x266   : > { %v1507_v19 = vmul.f32 %v5825_v60, %v6969_v18  ;;  %v1421_v25 = vadd.f32 0.112945676, %v1420_v46  ;;  %vm1512_vm9 = vweird.f32 %v5825_v60  ;;  %v1412_v52 = vadd.f32 0.18741608, %v1411_v56 }
 0x267   : > { %v1464_v37 = vmul.f32 %v1463_v42, %v6885_v41  ;;  %v7005_v31 = vadd.f32 1.0, %v1384_v48  ;;  %vm1511_vm10 = vweird.f32 %v6969_v18  ;;  %v1452_v59 = vadd.f32 0.18741608, %v1451_v30 }
 0x268   : > { %v1508_v43 = vsub.f32 1.0, %v1507_v19  ;;  %v7001_v34 = vpop.eup %5826  ;;  %v1422_v47 = vmul.f32 %v1421_v25, %v6872_v17  ;;  %vm1513_vm11 = vmor %vm1511_vm10, %vm1512_vm9  ;;  %v1518_v11 = vor.u32 1.1754944e-38, %v1517_v21  ;;  %v1495_v10 = vmul.f32 %v1494_v12, %v6787_v26 }
 0x269   : > { %v7007_v55 = vadd.f32 1.0, %v1464_v37  ;;  %5828 = vrcp.f32 %v7005_v31  ;;  %v1347_v29 = vmul.f32 %v7001_v34, %v6984_v36  ;;  %vm1516_vm12 = vcmp.eq.f32.partialorder %v1515_v58, 8.507059e+37 }
 0x26a   : > { %v1509_v63 = vmul.f32 %v5825_v60, %v1508_v43  ;;  %v1423_v51 = vadd.f32 0.4994258, %v1422_v47  ;;  %v1333_v39 = vmul.f32 %v1332_v35, %v6792_v7  ;;  %v1374_v54 = vadd.f32 1.1283791, %v1373_v40 }
 0x26b   : > { %5623 = vmatmul.msk.f32.vlgmr.msrb.gmra.mxu1 %vm11183_vm14, %v7014_v9  ;;  %5830 = vrcp.f32 %v7007_v55  ;;  %v1348_v20 = vsub.f32 1.0, %v1347_v29  ;;  %v1413_v19 = vmul.f32 %v1412_v52, %v6872_v17  ;;  %v1453_v42 = vmul.f32 %v1452_v59, %v6885_v41  ;;  %v6017_v29 = vld [vmem:[%s6149_s15 + $0x58] sm:$0xff] }
 0x26c   : > { %v1510_v53 = vadd.f32 %v5825_v60, %v1509_v63  ;;  %v1424_v8 = vmul.f32 %v1423_v51, %v6872_v17  ;;  %v1311_v7 = vmul.f32 0.5, %v6727_v33  ;;  %v1375_v48 = vmul.f32 %v1374_v54, %v6687_v3 }
 0x26d   : > { %v1349_v17 = vmul.f32 %v7001_v34, %v1348_v20  ;;  %v1414_v41 = vadd.f32 1.1283791, %v1413_v19  ;;  %v1454_v37 = vadd.f32 1.1283791, %v1453_v42  ;;  %vm1352_vm13 = vweird.f32 %v7001_v34 }
 0x26e   : > { %v1514_v50 = vsel %vm1513_vm11, %v5825_v60, %v1510_v53  ;;  %v7028_v46 = vadd.f32 1.0, %v1424_v8  ;;  %v1334_v60 = vadd.f32 1.1283791, %v1333_v39  ;;  %v1477_v58 = vand.u32 2147483648, %v7007_v55 }
 0x26f   : > { %v1519_v6 = vsel %vm1516_vm12, %v1518_v11, %v1514_v50  ;;  %v5829_v28 = vpop.eup %5828  ;;  %v1475_v63 = vand.u32 2147483647, %v7007_v55  ;;  %v1397_v3 = vand.u32 2147483648, %v7005_v31  ;;  %vm1391_vm2 = vweird.f32 %v7005_v31 }
 0x270   : > { %v1520_v18 = vmul.f32 %v1519_v6, %v1495_v10  ;;  %v1387_v26 = vmul.f32 %v5829_v28, %v7005_v31  ;;  %5832 = vrcp.f32 %v7028_v46  ;;  %vm1392_vm15 = vweird.f32 %v5829_v28 }
 0x271   : > { %v5831_v61 = vpop.eup %5830  ;;  %v1395_v35 = vand.u32 2147483647, %v7005_v31  ;;  %v1350_v40 = vadd.f32 %v7001_v34, %v1349_v17  ;;  %vm1471_vm3 = vweird.f32 %v7007_v55  ;;  %vm7044_vm4 = vmor %vm1391_vm2, %vm1392_vm15  ;;  %vm1351_vm5 = vweird.f32 %v6984_v36 }
 0x272   : > { %v5617_v2 = vclamps-f32 %v1520_v18, 1.0  ;;  %v1467_v56 = vmul.f32 %v5831_v61, %v7007_v55  ;;  %v1388_v43 = vsub.f32 1.0, %v1387_v26  ;;  %vm1472_vm1 = vweird.f32 %v5831_v61  ;;  %vm1353_vm9 = vmor %vm1351_vm5, %vm1352_vm13 }
 0x273   : > { %v1357_v59 = vand.u32 2147483648, %v6984_v36  ;;  %vm1473_vm6 = vmor %vm1471_vm3, %vm1472_vm1  ;;  %v1478_v11 = vor.u32 1.1754944e-38, %v1477_v58  ;;  %v1355_v10 = vand.u32 2147483647, %v6984_v36  ;;  %v1455_v50 = vmul.f32 %v1454_v37, %v6857_v15 }
 0x274   : > { %v1647_v30 = vadd.f32 1.0, %v5617_v2  ;;  %v1468_v25 = vsub.f32 1.0, %v1467_v56  ;;  %v1389_v21 = vmul.f32 %v5829_v28, %v1388_v43  ;;  %vm1476_vm7 = vcmp.eq.f32.partialorder %v1475_v63, 8.507059e+37  ;;  %v7063_v43 = vpop.xlane.xlu1 %477  ;;  %v11266_v63 = vld [vmem:[#allocation27_spill] sm:$0xff] }
 0x275   : > { %v1398_v39 = vor.u32 1.1754944e-38, %v1397_v3  ;;  %vm1396_vm10 = vcmp.eq.f32.partialorder %v1395_v35, 8.507059e+37  ;;  %v1354_v54 = vsel %vm1353_vm9, %v7001_v34, %v1350_v40  ;;  %v1437_v20 = vand.u32 2147483648, %v7028_v46 }
 0x276   : > { %v1655_v12 = vmul.f32 %v1647_v30, %v1311_v7  ;;  %v1469_v33 = vmul.f32 %v5831_v61, %v1468_v25  ;;  %v1390_v47 = vadd.f32 %v5829_v28, %v1389_v21  ;;  %v5833_v52 = vpop.eup %5832  ;;  %v1435_v15 = vand.u32 2147483647, %v7028_v46 }
 0x277   : > { %v1427_v51 = vmul.f32 %v5833_v52, %v7028_v46  ;;  %vm1432_vm11 = vweird.f32 %v5833_v52  ;;  %vm1356_vm12 = vcmp.eq.f32.partialorder %v1355_v10, 8.507059e+37  ;;  %v1335_v2 = vmul.f32 %v1334_v60, %v6677_v13 }
 0x278   : > { %1670 = vmatpush.msra.mxu3 %v1655_v12  ;;  %v1470_v53 = vadd.f32 %v5831_v61, %v1469_v33  ;;  %v1394_v31 = vsel %vm7044_vm4, %v5829_v28, %v1390_v47  ;;  %v1358_v28 = vor.u32 1.1754944e-38, %v1357_v59  ;;  %vm1431_vm13 = vweird.f32 %v7028_v46 }
 0x279   : > { %v1428_v8 = vsub.f32 1.0, %v1427_v51  ;;  %v1399_v19 = vsel %vm1396_vm10, %v1398_v39, %v1394_v31  ;;  %v1310_v34 = vmul.f32 0.5, %v6832_v24  ;;  %vm1433_vm15 = vmor %vm1431_vm13, %vm1432_vm11  ;;  %v1438_v30 = vor.u32 1.1754944e-38, %v1437_v20 }
 0x27a   : > { %v1474_v55 = vsel %vm1473_vm6, %v5831_v61, %v1470_v53  ;;  %v1359_v61 = vsel %vm1356_vm12, %v1358_v28, %v1354_v54  ;;  %v1400_v7 = vmul.f32 %v1399_v19, %v1375_v48  ;;  %v1415_v17 = vmul.f32 %v1414_v41, %v6806_v5  ;;  %v393_v19 = vpop.xlane.xlu2 %392 }
 0x27b   : > { %v1479_v6 = vsel %vm1476_vm7, %v1478_v11, %v1474_v55  ;;  %v1429_v42 = vmul.f32 %v5833_v52, %v1428_v8  ;;  %vm1436_vm1 = vcmp.eq.f32.partialorder %v1435_v15, 8.507059e+37  ;;  %v1360_v25 = vmul.f32 %v1359_v61, %v1335_v2  ;;  %v6020_v61 = vld [vmem:[%s6149_s15 + $0x60] sm:$0xff] }
 0x27c   : > { %v1480_v18 = vmul.f32 %v1479_v6, %v1455_v50  ;;  %v5614_v13 = vclamps-f32 %v1400_v7, 1.0  ;;  %v1309_v24 = vmul.f32 0.5, %v6780_v32  ;;  %v421_v3 = vmul.f32 %v6162_v16, %v11266_v63  ;;  %v387_v5 = vpop.xlane.xlu1 %386  ;;  %v6018_v32 = vld [vmem:[%s6149_s15 + $0x50] sm:$0xff]  ;;  %v7092_v6 = vld [vmem:[%s6149_s15 + $0x78] sm:$0xff] }
 0x27d   : > { %v1430_v26 = vadd.f32 %v5833_v52, %v1429_v42  ;;  %v5613_v60 = vclamps-f32 %v1360_v25, 1.0  ;;  %v1308_v41 = vmul.f32 0.5, %v6671_v62  ;;  %v420_v40 = vmul.f32 %v6162_v16, %v387_v5  ;;  %v7111_v7 = vld [vmem:[%s11095_s1 + $0x10] sm:$0xff] }
 0x27e   : > { %v5616_v36 = vclamps-f32 %v1480_v18, 1.0  ;;  %v1644_v33 = vadd.f32 1.0, %v5614_v13  ;;  %v7073_v59 = vsub.f32 %v6017_v29, %v421_v3  ;;  %v400_v8 = vsel %vm11182_vm0, %v7092_v6, 0.0  ;;  %v11268_v63 = vld [vmem:[#allocation28_spill] sm:$0xff] }
 0x27f   : > { %v1434_v37 = vsel %vm1433_vm15, %v5833_v52, %v1430_v26  ;;  %v1643_v35 = vadd.f32 1.0, %v5613_v60  ;;  %v1307_v52 = vmul.f32 0.5, %v6660_v4  ;;  %v7076_v11 = vsub.f32 %v6018_v32, %v420_v40  ;;  %v6023_v5 = vld [vmem:[%s6149_s15 + $0x70] sm:$0xff]  ;;  %v7143_v32 = vld [vmem:[%s11095_s1 + $0x20] sm:$0xff] }
 0x280   : > { %v1646_v56 = vadd.f32 1.0, %v5616_v36  ;;  %v1439_v58 = vsel %vm1436_vm1, %v1438_v30, %v1434_v37  ;;  %v1652_v53 = vmul.f32 %v1644_v33, %v1308_v41  ;;  %v453_v62 = vmul.f32 %v7073_v59, %v7073_v59 }
 0x281   : > { %v1440_v21 = vmul.f32 %v1439_v58, %v1415_v17  ;;  %v1651_v51 = vmul.f32 %v1643_v35, %v1307_v52  ;;  %v452_v4 = vmul.f32 %v7076_v11, %v7076_v11  ;;  %v422_v28 = vmul.f32 %v6162_v16, %v393_v19 }
 0x282   : > { %v1654_v12 = vmul.f32 %v1646_v56, %v1310_v34  ;;  %v491_v50 = vsel %vm11182_vm0, %v453_v62, 0.0  ;;  %v7161_v62 = vld [vmem:[%s11095_s1 + $0x30] sm:$0xff] }
 0x283   : > { %v5615_v46 = vclamps-f32 %v1440_v21, 1.0  ;;  %v488_v55 = vsel %vm11182_vm0, %v452_v4, 0.0  ;;  %492 = vadd.xlane.f32.xlu2 %v491_v50  ;;  %v7106_v2 = vsub.f32 %v6020_v61, %v422_v28  ;;  %v7123_v21 = vld [vmem:[%s11095_s1 + $0x18] sm:$0xff] }
 0x284   : > { %1671 = vmatpush.msra.mxu3 %v1654_v12  ;;  %v487_v31 = vpop.xlane.xlu1 %486  ;;  %489 = vadd.xlane.f32.xlu1 %v488_v55  ;;  %v7170_v4 = vld [vmem:[%s11095_s1 + $0x38] sm:$0xff]  ;;  %v6028_v55 = vld [vmem:[%s6149_s15] sm:$0xff] }
 0x285   : > { %v1645_v48 = vadd.f32 1.0, %v5615_v46  ;;  %v515_v10 = vmul.f32 %v487_v31, %v6162_v16  ;;  %v454_v30 = vmul.f32 %v7106_v2, %v7106_v2 }
 0x287   : > { %v1653_v47 = vmul.f32 %v1645_v48, %v1309_v24  ;;  %v531_v39 = vadd.f32 1e-05, %v515_v10  ;;  %v494_v25 = vsel %vm11182_vm0, %v454_v30, 0.0  ;;  %v11267_v48 = vld [vmem:[#allocation26_spill] sm:$0xff] }
 0x289   : > { %1672 = vmatpush.msra.mxu3 %v1653_v47  ;;  %5834 = vrsqrt.f32 %v531_v39  ;;  %vm634_vm2 = vweird.f32 %v531_v39 }
 0x28b   : > { %1673 = vmatpush.msra.mxu3 %v1652_v53  ;;  %495 = vadd.xlane.f32.xlu2 %v494_v25 }
 0x28c   : > { %401 = vadd.xlane.f32.xlu1 %v400_v8 }
 0x28d   : > { %1674 = vmatpush.msra.mxu3 %v1651_v51  ;;  %v7152_v51 = vld [vmem:[%s11095_s1 + $0x28] sm:$0xff] }
 0x28e   : > { %5621 = vmatmul.msk.f32.vlgmr.msra.gmra.mxu3 %vm1236_vm8, %v6943_v38  ;;  %v484_v38 = vpop.xlane.xlu0 %483 }
 0x28f   : > { %5767 = vmatpush.msrb.mxu3 %v6954_v49  ;;  %v514_v49 = vmul.f32 %v484_v38, %v6162_v16  ;;  %v5835_v54 = vpop.eup %5834 }
 0x290   : > { %v629_v20 = vmul.f32 %v5835_v54, %v531_v39  ;;  %vm635_vm3 = vweird.f32 %v5835_v54 }
 0x291   : > { %5768 = vmatpush.msrb.mxu3 %v6964_v44  ;;  %v530_v18 = vadd.f32 1e-05, %v514_v49  ;;  %v7100_v44 = vld [vmem:[%s11095_s1 + $0x8] sm:$0xff]  ;;  %vm636_vm6 = vmor %vm634_vm2, %vm635_vm3 }
 0x293   : > { %5836 = vrsqrt.f32 %v530_v18  ;;  %vm624_vm4 = vweird.f32 %v530_v18 }
 0x296   : > { %5622 = vmatmul.msk.f32.gmra.mxu3 %vm1236_vm8, %v6981_v22  ;;  %v630_v22 = vmul.f32 %v5835_v54, %v629_v20  ;;  %v7117_v17 = vpop.xlane.xlu0 %498 }
 0x298   : > { %v631_v15 = vmul.f32 0.5, %v630_v22 }
 0x299   : > { %v5837_v42 = vpop.eup %5836 }
 0x29a   : > { %v619_v36 = vmul.f32 %v5837_v42, %v530_v18  ;;  %v632_v34 = vsub.f32 1.5, %v631_v15  ;;  %vm625_vm5 = vweird.f32 %v5837_v42 }
 0x29b   : > { %vm626_vm7 = vmor %vm624_vm4, %vm625_vm5 }
 0x29c   : > { %v620_v26 = vmul.f32 %v5837_v42, %v619_v36  ;;  %v633_v12 = vmul.f32 %v5835_v54, %v632_v34 }
 0x29e   : > { %5624 = vmatmul.msk.f32.vlgmr.msrb.gmra.mxu3 %vm11183_vm14, %v7100_v44  ;;  %v621_v56 = vmul.f32 0.5, %v620_v26  ;;  %v399_v13 = vpop.xlane.xlu0 %398  ;;  %v637_v46 = vsel %vm636_vm6, %v5835_v54, %v633_v12 }
 0x29f   : > { %v424_v24 = vmul.f32 %v6162_v16, %v399_v13  ;;  %v707_v33 = vmul.f32 %v637_v46, %v11267_v48 }
 0x2a0   : > { %v622_v37 = vsub.f32 1.5, %v621_v56 }
 0x2a1   : > { %v7131_v41 = vsub.f32 %v6023_v5, %v424_v24  ;;  %v724_v47 = vmul.f32 %v6934_v45, %v707_v33 }
 0x2a2   : > { %v623_v58 = vmul.f32 %v5837_v42, %v622_v37 }
 0x2a3   : > { %11269 = vst [vmem:[#allocation20_spill] sm:$0xff] %v7131_v41  ;;  %v741_v40 = vadd.f32 %v6951_v14, %v724_v47  ;;  %v456_v53 = vmul.f32 %v7131_v41, %v7131_v41 }
 0x2a4   : > { %v627_v60 = vsel %vm626_vm7, %v5837_v42, %v623_v58 }
 0x2a5   : > { %v706_v3 = vmul.f32 %v627_v60, %v11268_v63  ;;  %2528 = vmatpush.msrb.mxu2 %v741_v40  ;;  %v500_v29 = vsel %vm11182_vm0, %v456_v53, 0.0 }
 0x2a6   : > { %5625 = vmatmul.msk.f32.gmra.mxu3 %vm11183_vm14, %v7111_v7  ;;  %501 = vadd.xlane.f32.xlu1 %v500_v29  ;;  %v7176_v31 = vpop.permute.xlu0 %1228 }
 0x2a7   : > { %v723_v35 = vmul.f32 %v6934_v45, %v706_v3  ;;  %11270 = vst [vmem:[#allocation22_spill] sm:$0xff] %v7176_v31 }
 0x2a9   : > { %v740_v52 = vadd.f32 %v6951_v14, %v723_v35 }
 0x2ab   : > { %2529 = vmatpush.msrb.mxu2 %v740_v52 }
 0x2ac   : > { %5659 = vmatmul.msk.f32.vlgmr.msrb.gmra.mxu2 %vm11183_vm14, %v7014_v9 }
 0x2ae   : > { %5626 = vmatmul.msk.f32.gmra.mxu3 %vm11183_vm14, %v7123_v21 }
 0x2b4   : > { %5660 = vmatmul.msk.f32.gmra.mxu2 %vm11183_vm14, %v7100_v44 }
 0x2b6   : > { %5627 = vmatmul.msk.f32.gmra.mxu3 %vm11183_vm14, %v7143_v32 }
 0x2bc   : > { %5661 = vmatmul.msk.f32.gmra.mxu2 %vm11183_vm14, %v7111_v7 }
 0x2be   : > { %5628 = vmatmul.msk.f32.gmra.mxu3 %vm11183_vm14, %v7152_v51 }
 0x2c4   : > { %5662 = vmatmul.msk.f32.gmra.mxu2 %vm11183_vm14, %v7123_v21 }
 0x2c6   : > { %5629 = vmatmul.msk.f32.gmra.mxu3 %vm11183_vm14, %v7161_v62 }
 0x2cc   : > { %5663 = vmatmul.msk.f32.gmra.mxu2 %vm11183_vm14, %v7143_v32 }
 0x2ce   : > { %5630 = vmatmul.msk.f32.gmra.mxu3 %vm11183_vm14, %v7170_v4 }
 0x2d4   : > { %5664 = vmatmul.msk.f32.gmra.mxu2 %vm11183_vm14, %v7152_v51 }
 0x2d8   : > { %v1260_v10 = vpop.f32.mrf.mxu1 }
 0x2d9   : > { %v1261_v50 = vadd.f32 %v1260_v10, %v7176_v31 }
 0x2db   : > { %v7180_v39 = vadd.f32 %v6028_v55, %v1261_v50  ;;  %v11273_v55 = vld [vmem:[#allocation6_spill] sm:$0xff] }
 0x2dc   : > { %5665 = vmatmul.msk.f32.gmra.mxu2 %vm11183_vm14, %v7161_v62 }
 0x2dd   : > { %11271 = vst [vmem:[#allocation21_spill] sm:$0xff] %v7180_v39  ;;  %v4196_v38 = vsel %vm11182_vm0, %v7180_v39, 0.0 }
 0x2de   : > { %4197 = vadd.xlane.f32.xlu1 %v4196_v38 }
 0x2e4   : > { %5666 = vmatmul.msk.f32.gmra.mxu2 %vm11183_vm14, %v7170_v4 }
 0x2f6   : > { %v493_v54 = vpop.xlane.xlu2 %492 }
 0x2f7   : > { %v517_v18 = vmul.f32 %v493_v54, %v6162_v16  ;;  %v490_v20 = vpop.xlane.xlu1 %489 }
 0x2f8   : > { %v516_v19 = vmul.f32 %v490_v20, %v6162_v16 }
 0x2f9   : > { %v533_v22 = vadd.f32 1e-05, %v517_v18 }
 0x2fa   : > { %v532_v42 = vadd.f32 1e-05, %v516_v19 }
 0x2fb   : > { %5838 = vrsqrt.f32 %v533_v22  ;;  %vm654_vm9 = vweird.f32 %v533_v22 }
 0x2fc   : > { %5840 = vrsqrt.f32 %v532_v42  ;;  %vm644_vm12 = vweird.f32 %v532_v42 }
 0x2ff   : > { %v402_v30 = vpop.xlane.xlu1 %401 }
 0x300   : > { %v425_v12 = vmul.f32 %v6162_v16, %v402_v30 }
 0x301   : > { %v5839_v15 = vpop.eup %5838 }
 0x302   : > { %v649_v61 = vmul.f32 %v5839_v15, %v533_v22  ;;  %v5841_v26 = vpop.eup %5840  ;;  %v7202_v60 = vsub.f32 %v7092_v6, %v425_v12  ;;  %vm655_vm10 = vweird.f32 %v5839_v15 }
 0x303   : > { %v639_v56 = vmul.f32 %v5841_v26, %v532_v42  ;;  %vm656_vm11 = vmor %vm654_vm9, %vm655_vm10  ;;  %vm645_vm13 = vweird.f32 %v5841_v26  ;;  %v11274_v42 = vld [vmem:[#allocation10_spill] sm:$0xff] }
 0x304   : > { %v650_v34 = vmul.f32 %v5839_v15, %v649_v61  ;;  %11272 = vst [vmem:[#allocation17_spill] sm:$0xff] %v7202_v60  ;;  %v457_v33 = vmul.f32 %v7202_v60, %v7202_v60  ;;  %vm646_vm15 = vmor %vm644_vm12, %vm645_vm13 }
 0x305   : > { %v640_v25 = vmul.f32 %v5841_v26, %v639_v56 }
 0x306   : > { %v651_v37 = vmul.f32 0.5, %v650_v34  ;;  %v503_v63 = vsel %vm11182_vm0, %v457_v33, 0.0  ;;  %v11275_v33 = vld [vmem:[#allocation3_spill] sm:$0xff] }
 0x307   : > { %v641_v46 = vmul.f32 0.5, %v640_v25  ;;  %504 = vadd.xlane.f32.xlu2 %v503_v63 }
 0x308   : > { %v652_v13 = vsub.f32 1.5, %v651_v37  ;;  %v767_v37 = vld [vmem:[%s11098_s4 + $0x8] sm:$0xff] }
 0x309   : > { %v642_v48 = vsub.f32 1.5, %v641_v46 }
 0x30a   : > { %v653_v24 = vmul.f32 %v5839_v15, %v652_v13 }
 0x30b   : > { %v643_v47 = vmul.f32 %v5841_v26, %v642_v48 }
 0x30c   : > { %v657_v5 = vsel %vm656_vm11, %v5839_v15, %v653_v24 }
 0x30d   : > { %v709_v6 = vmul.f32 %v657_v5, %v7073_v59  ;;  %v647_v35 = vsel %vm646_vm15, %v5841_v26, %v643_v47 }
 0x30e   : > { %v708_v52 = vmul.f32 %v647_v35, %v7076_v11 }
 0x30f   : > { %v726_v40 = vmul.f32 %v6934_v45, %v709_v6 }
 0x310   : > { %v725_v10 = vmul.f32 %v6934_v45, %v708_v52 }
 0x311   : > { %v7192_v49 = vpop.f32.mrf.mxu3  ;;  %v743_v29 = vadd.f32 %v6951_v14, %v726_v40 }
 0x312   : > { %v742_v54 = vadd.f32 %v6951_v14, %v725_v10 }
 0x313   : > { %2944 = vmatpush.msra.mxu1 %v743_v29 }
 0x315   : > { %2945 = vmatpush.msra.mxu1 %v742_v54 }
 0x316   : > { %5677 = vmatmul.msk.f32.vlgmr.msra.gmra.mxu1 %vm11183_vm14, %v7014_v9 }
 0x319   : > { %v7194_v8 = vpop.f32.mrf.mxu3 }
 0x31e   : > { %5678 = vmatmul.msk.f32.gmra.mxu1 %vm11183_vm14, %v7100_v44 }
 0x31f   : > { %1233 = vperm.xlu2 %5779, %v767_v37  }
 0x321   : > { %v7198_v28 = vpop.f32.mrf.mxu3 }
 0x326   : > { %5679 = vmatmul.msk.f32.gmra.mxu1 %vm11183_vm14, %v7111_v7 }
 0x329   : > { %v1705_v36 = vpop.f32.mrf.mxu3 }
 0x32a   : > { %v7220_v59 = vadd.f32 %v1705_v36, %v6329_v23 }
 0x32c   : > { %v7236_v22 = vmul.f32 0.70710677, %v7220_v59 }
 0x32e   : > { %v1819_v26 = vmul.f32 %v7236_v22, %v7236_v22  ;;  %5680 = vmatmul.msk.f32.gmra.mxu1 %vm11183_vm14, %v7123_v21 }
 0x331   : > { %v1708_v58 = vpop.f32.mrf.mxu3 }
 0x332   : > { %v7213_v50 = vadd.f32 %v1708_v58, %v11249_v1  ;;  %v7265_v58 = vmin.f32 %v1819_v26, 16.0 }
 0x334   : > { %v7226_v11 = vmul.f32 0.70710677, %v7213_v50 }
 0x336   : > { %v1859_v36 = vmul.f32 %v7226_v11, %v7226_v11  ;;  %5681 = vmatmul.msk.f32.gmra.mxu1 %vm11183_vm14, %v7143_v32 }
 0x338   : > { %v7254_v56 = vmin.f32 %v1859_v36, 16.0 }
 0x339   : > { %v1711_v3 = vpop.f32.mrf.mxu3 }
 0x33a   : > { %v7229_v45 = vadd.f32 %v1711_v3, %v6286_v0  ;;  %v1872_v46 = vmul.f32 3.8918573e-05, %v7254_v56  ;;  %v1832_v3 = vmul.f32 3.8918573e-05, %v7265_v58 }
 0x33c   : > { %v7246_v61 = vmul.f32 0.70710677, %v7229_v45  ;;  %v1873_v47 = vadd.f32 0.001143296, %v1872_v46  ;;  %v1833_v52 = vadd.f32 0.001143296, %v1832_v3 }
 0x33e   : > { %v1899_v30 = vmul.f32 %v7246_v61, %v7246_v61  ;;  %v1874_v54 = vmul.f32 %v1873_v47, %v7254_v56  ;;  %v1834_v26 = vmul.f32 %v1833_v52, %v7265_v58  ;;  %5682 = vmatmul.msk.f32.gmra.mxu1 %vm11183_vm14, %v7152_v51 }
 0x340   : > { %v7268_v24 = vmin.f32 %v1899_v30, 16.0  ;;  %v1875_v37 = vadd.f32 0.014752088, %v1874_v54  ;;  %v1835_v46 = vadd.f32 0.014752088, %v1834_v26 }
 0x341   : > { %v1714_v53 = vpop.f32.mrf.mxu3 }
 0x342   : > { %v7216_v38 = vadd.f32 %v1714_v53, %v11273_v55  ;;  %v1912_v6 = vmul.f32 3.8918573e-05, %v7268_v24 }
 0x344   : > { %v7223_v18 = vmul.f32 0.70710677, %v7216_v38 }
 0x346   : > { %v1939_v20 = vmul.f32 %v7223_v18, %v7223_v18  ;;  %5683 = vmatmul.msk.f32.gmra.mxu1 %vm11183_vm14, %v7161_v62 }
 0x348   : > { %v7238_v19 = vmin.f32 %v1939_v20, 16.0  ;;  %v1913_v20 = vadd.f32 0.001143296, %v1912_v6 }
 0x349   : > { %v1717_v14 = vpop.f32.mrf.mxu3 }
 0x34a   : > { %v7241_v15 = vadd.f32 %v1717_v14, %v11274_v42  ;;  %v1952_v9 = vmul.f32 3.8918573e-05, %v7238_v19  ;;  %v1941_v26 = vmul.f32 2.1237322e-06, %v7238_v19 }
 0x34c   : > { %v7252_v34 = vmul.f32 0.70710677, %v7241_v15  ;;  %v1953_v13 = vadd.f32 0.001143296, %v1952_v9 }
 0x34e   : > { %v1979_v25 = vmul.f32 %v7252_v34, %v7252_v34  ;;  %v1954_v5 = vmul.f32 %v1953_v13, %v7238_v19  ;;  %5684 = vmatmul.msk.f32.gmra.mxu1 %vm11183_vm14, %v7170_v4 }
 0x350   : > { %v7270_v48 = vmin.f32 %v1979_v25, 16.0  ;;  %v1955_v53 = vadd.f32 0.014752088, %v1954_v5  ;;  %v1914_v25 = vmul.f32 %v1913_v20, %v7268_v24 }
 0x351   : > { %v1720_v12 = vpop.f32.mrf.mxu3 }
 0x352   : > { %v7273_v63 = vadd.f32 %v1720_v12, %v11275_v33  ;;  %v1992_v44 = vmul.f32 3.8918573e-05, %v7270_v48  ;;  %v1956_v9 = vmul.f32 %v1955_v53, %v7238_v19  ;;  %v1915_v47 = vadd.f32 0.014752088, %v1914_v25 }
 0x353   : > { %v1836_v53 = vmul.f32 %v1835_v46, %v7265_v58 }
 0x354   : > { %v7280_v35 = vmul.f32 0.70710677, %v7273_v63  ;;  %v1993_v40 = vadd.f32 0.001143296, %v1992_v44  ;;  %v1957_v3 = vadd.f32 0.112945676, %v1956_v9  ;;  %v1876_v44 = vmul.f32 %v1875_v37, %v7254_v56 }
 0x355   : > { %v1916_v21 = vmul.f32 %v1915_v47, %v7268_v24  ;;  %v1981_v9 = vmul.f32 2.1237322e-06, %v7270_v48 }
 0x356   : > { %v1994_v29 = vmul.f32 %v1993_v40, %v7270_v48  ;;  %v2019_v10 = vmul.f32 %v7280_v35, %v7280_v35  ;;  %v1877_v54 = vadd.f32 0.112945676, %v1876_v44 }
 0x357   : > { %v1982_v44 = vadd.f32 0.00028619796, %v1981_v9 }
 0x358   : > { %v1995_v14 = vadd.f32 0.014752088, %v1994_v29  ;;  %v7288_v36 = vmin.f32 %v2019_v10, 16.0  ;;  %v1958_v29 = vmul.f32 %v1957_v3, %v7238_v19 }
 0x35a   : > { %v1996_v30 = vmul.f32 %v1995_v14, %v7270_v48  ;;  %v2021_v7 = vmul.f32 2.1237322e-06, %v7288_v36  ;;  %v2032_v12 = vmul.f32 3.8918573e-05, %v7288_v36  ;;  %v1959_v37 = vadd.f32 0.4994258, %v1958_v29 }
 0x35c   : > { %v1997_v13 = vadd.f32 0.112945676, %v1996_v30  ;;  %v2022_v5 = vadd.f32 0.00028619796, %v2021_v7  ;;  %v2033_v6 = vadd.f32 0.001143296, %v2032_v12  ;;  %v1878_v12 = vmul.f32 %v1877_v54, %v7254_v56 }
 0x35d   : > { %v1837_v7 = vadd.f32 0.112945676, %v1836_v53  ;;  %v1960_v32 = vmul.f32 %v1959_v37, %v7238_v19 }
 0x35e   : > { %v1998_v40 = vmul.f32 %v1997_v13, %v7270_v48  ;;  %v2034_v52 = vmul.f32 %v2033_v6, %v7288_v36  ;;  %v2023_v10 = vmul.f32 %v2022_v5, %v7288_v36  ;;  %v1917_v13 = vadd.f32 0.112945676, %v1916_v21 }
 0x35f   : > { %v1942_v5 = vadd.f32 0.00028619796, %v1941_v26  ;;  %v1838_v47 = vmul.f32 %v1837_v7, %v7265_v58  ;;  %v1879_v53 = vadd.f32 0.4994258, %v1878_v12  ;;  %v7325_v9 = vadd.f32 1.0, %v1960_v32 }
 0x360   : > { %v2035_v20 = vadd.f32 0.014752088, %v2034_v52  ;;  %v1999_v14 = vadd.f32 0.4994258, %v1998_v40  ;;  %v2024_v25 = vadd.f32 0.0036580483, %v2023_v10  ;;  %v1918_v29 = vmul.f32 %v1917_v13, %v7268_v24 }
 0x361   : > { %v1861_v52 = vmul.f32 2.1237322e-06, %v7254_v56  ;;  %v1901_v10 = vmul.f32 2.1237322e-06, %v7268_v24  ;;  %v1839_v26 = vadd.f32 0.4994258, %v1838_v47  ;;  %v1880_v13 = vmul.f32 %v1879_v53, %v7254_v56 }
 0x362   : > { %v2036_v30 = vmul.f32 %v2035_v20, %v7288_v36  ;;  %v2000_v46 = vmul.f32 %v1999_v14, %v7270_v48  ;;  %v2025_v6 = vmul.f32 %v2024_v25, %v7288_v36  ;;  %v1943_v20 = vmul.f32 %v1942_v5, %v7238_v19 }
 0x363   : > { %v1983_v14 = vmul.f32 %v1982_v44, %v7270_v48  ;;  %v1821_v7 = vmul.f32 2.1237322e-06, %v7265_v58  ;;  %v1919_v37 = vadd.f32 0.4994258, %v1918_v29  ;;  %v1862_v12 = vadd.f32 0.00028619796, %v1861_v52 }
 0x364   : > { %v2037_v3 = vadd.f32 0.112945676, %v2036_v30  ;;  %v7319_v54 = vadd.f32 1.0, %v2000_v46  ;;  %v2026_v30 = vadd.f32 0.05243302, %v2025_v6  ;;  %v1840_v44 = vmul.f32 %v1839_v26, %v7265_v58 }
 0x365   : > { %v1902_v46 = vadd.f32 0.00028619796, %v1901_v10  ;;  %v1944_v51 = vadd.f32 0.0036580483, %v1943_v20  ;;  %v1822_v32 = vadd.f32 0.00028619796, %v1821_v7  ;;  %v1920_v6 = vmul.f32 %v1919_v37, %v7268_v24  ;;  %v7348_v20 = vpop.f32.mrf.mxu1 }
 0x366   : > { %v2038_v40 = vmul.f32 %v2037_v3, %v7288_v36  ;;  %5842 = vrcp.f32 %v7319_v54  ;;  %v1984_v3 = vadd.f32 0.0036580483, %v1983_v14  ;;  %v2027_v47 = vmul.f32 %v2026_v30, %v7288_v36 }
 0x367   : > { %5844 = vrcp.f32 %v7325_v9  ;;  %v7339_v52 = vadd.f32 1.0, %v1880_v13  ;;  %v1903_v53 = vmul.f32 %v1902_v46, %v7268_v24  ;;  %v1945_v29 = vmul.f32 %v1944_v51, %v7238_v19 }
 0x368   : > { %v2039_v21 = vadd.f32 0.4994258, %v2038_v40  ;;  %v1863_v40 = vmul.f32 %v1862_v12, %v7254_v56  ;;  %v1985_v10 = vmul.f32 %v1984_v3, %v7270_v48  ;;  %v7350_v14 = vadd.f32 1.0, %v1840_v44 }
 0x369   : > { %v2028_v26 = vadd.f32 0.18741608, %v2027_v47  ;;  %v1823_v30 = vmul.f32 %v1822_v32, %v7265_v58  ;;  %v7353_v7 = vadd.f32 1.0, %v1920_v6  ;;  %v1904_v62 = vadd.f32 0.0036580483, %v1903_v53 }
 0x36a   : > { %v2040_v25 = vmul.f32 %v2039_v21, %v7288_v36  ;;  %v1946_v13 = vadd.f32 0.05243302, %v1945_v29  ;;  %v1986_v46 = vadd.f32 0.05243302, %v1985_v10  ;;  %vm2007_vm7 = vweird.f32 %v7319_v54 }
 0x36b   : > { %v2029_v3 = vmul.f32 %v2028_v26, %v7288_v36  ;;  %v1824_v47 = vadd.f32 0.0036580483, %v1823_v30  ;;  %vm1967_vm10 = vweird.f32 %v7325_v9 }
 0x36c   : > { %v7331_v5 = vadd.f32 1.0, %v2040_v25  ;;  %v7346_v21 = vpop.eup %5842  ;;  %v1864_v25 = vadd.f32 0.0036580483, %v1863_v40  ;;  %v1905_v40 = vmul.f32 %v1904_v62, %v7268_v24  ;;  %v1947_v29 = vmul.f32 %v1946_v13, %v7238_v19 }
 0x36d   : > { %v7355_v37 = vpop.eup %5844  ;;  %v2003_v51 = vmul.f32 %v7346_v21, %v7319_v54  ;;  %v1987_v36 = vmul.f32 %v1986_v46, %v7270_v48  ;;  %v2030_v41 = vadd.f32 1.1283791, %v2029_v3  ;;  %v1825_v62 = vmul.f32 %v1824_v47, %v7265_v58  ;;  %v1699_v4 = vpop.f32.mrf.mxu1 }
 0x36e   : > { %5846 = vrcp.f32 %v7331_v5  ;;  %v1963_v32 = vmul.f32 %v7355_v37, %v7325_v9  ;;  %v1865_v6 = vmul.f32 %v1864_v25, %v7254_v56  ;;  %v2053_v26 = vand.u32 2147483648, %v7331_v5 }
 0x36f   : > { %5848 = vrcp.f32 %v7339_v52  ;;  %v2004_v10 = vsub.f32 1.0, %v2003_v51  ;;  %v2051_v25 = vand.u32 2147483647, %v7331_v5  ;;  %v1906_v13 = vadd.f32 0.05243302, %v1905_v40 }
 0x370   : > { %5850 = vrcp.f32 %v7350_v14  ;;  %v1866_v55 = vadd.f32 0.05243302, %v1865_v6  ;;  %vm2047_vm2 = vweird.f32 %v7331_v5  ;;  %v1988_v3 = vadd.f32 0.18741608, %v1987_v36 }
 0x371   : > { %5852 = vrcp.f32 %v7353_v7  ;;  %v2054_v0 = vor.u32 1.1754944e-38, %v2053_v26  ;;  %v1948_v47 = vadd.f32 0.18741608, %v1947_v29  ;;  %vm2052_vm4 = vcmp.eq.f32.partialorder %v2051_v25, 8.507059e+37 }
 0x372   : > { %v7387_v6 = vadd.f32 %v1699_v4, %v6271_v57  ;;  %v1867_v36 = vmul.f32 %v1866_v55, %v7254_v56  ;;  %vm2008_vm5 = vweird.f32 %v7346_v21  ;;  %vm1968_vm6 = vweird.f32 %v7355_v37 }
 0x373   : > { %v2011_v25 = vand.u32 2147483647, %v7319_v54  ;;  %vm7406_vm9 = vmor %vm2007_vm7, %vm2008_vm5  ;;  %vm1847_vm7 = vweird.f32 %v7350_v14 }
 0x374   : > { %v5847_v12 = vpop.eup %5846  ;;  %vm7417_vm11 = vmor %vm1967_vm10, %vm1968_vm6 }
 0x375   : > { %v2043_v44 = vmul.f32 %v5847_v12, %v7331_v5  ;;  %v7373_v30 = vpop.eup %5848  ;;  %vm2048_vm1 = vweird.f32 %v5847_v12  ;;  %vm2012_vm12 = vcmp.eq.f32.partialorder %v2011_v25, 8.507059e+37 }
 0x376   : > { %v7377_v42 = vpop.eup %5850  ;;  %v1883_v51 = vmul.f32 %v7373_v30, %v7339_v52  ;;  %vm2049_vm3 = vmor %vm2047_vm2, %vm2048_vm1  ;;  %vm1888_vm1 = vweird.f32 %v7373_v30  ;;  %vm1927_vm2 = vweird.f32 %v7353_v7 }
 0x377   : > { %v2044_v53 = vsub.f32 1.0, %v2043_v44  ;;  %v1964_v44 = vsub.f32 1.0, %v1963_v32  ;;  %v7380_v46 = vpop.eup %5852  ;;  %v2031_v32 = vmul.f32 %v2030_v41, %v7280_v35  ;;  %v1843_v23 = vmul.f32 %v7377_v42, %v7350_v14 }
 0x378   : > { %v1907_v41 = vmul.f32 %v1906_v13, %v7268_v24  ;;  %v1971_v13 = vand.u32 2147483647, %v7325_v9  ;;  %vm1928_vm15 = vweird.f32 %v7380_v46  ;;  %vm1848_vm5 = vweird.f32 %v7377_v42 }
 0x379   : > { %v2045_v60 = vmul.f32 %v5847_v12, %v2044_v53  ;;  %v2005_v53 = vmul.f32 %v7346_v21, %v2004_v10  ;;  %v1965_v5 = vmul.f32 %v7355_v37, %v1964_v44  ;;  %v1923_v10 = vmul.f32 %v7380_v46, %v7353_v7 }
 0x37a   : > { %vm1972_vm13 = vcmp.eq.f32.partialorder %v1971_v13, 8.507059e+37  ;;  %v1891_v44 = vand.u32 2147483647, %v7339_v52 }
 0x37b   : > { %v2046_v33 = vadd.f32 %v5847_v12, %v2045_v60  ;;  %v1826_v60 = vadd.f32 0.05243302, %v1825_v62  ;;  %v2006_v35 = vadd.f32 %v7346_v21, %v2005_v53  ;;  %v1966_v55 = vadd.f32 %v7355_v37, %v1965_v5 }
 0x37c   : > { %v1924_v62 = vsub.f32 1.0, %v1923_v10  ;;  %v1844_v53 = vsub.f32 1.0, %v1843_v23  ;;  %v1908_v10 = vadd.f32 0.18741608, %v1907_v41  ;;  %vm1892_vm10 = vcmp.eq.f32.partialorder %v1891_v44, 8.507059e+37 }
 0x37d   : > { %v2050_v1 = vsel %vm2049_vm3, %v5847_v12, %v2046_v33  ;;  %v1989_v33 = vmul.f32 %v1988_v3, %v7270_v48  ;;  %v1884_v12 = vsub.f32 1.0, %v1883_v51  ;;  %v1973_v48 = vand.u32 2147483648, %v7325_v9 }
 0x37e   : > { %v2055_v40 = vsel %vm2052_vm4, %v2054_v0, %v2050_v1  ;;  %v1949_v0 = vmul.f32 %v1948_v47, %v7238_v19  ;;  %v2013_v1 = vand.u32 2147483648, %v7319_v54  ;;  %v1730_v19 = vmul.f32 0.5, %v7273_v63  ;;  %vm7452_vm4 = vmor %vm1927_vm2, %vm1928_vm15 }
 0x37f   : > { %v2056_v29 = vmul.f32 %v2055_v40, %v2031_v32  ;;  %v1990_v51 = vadd.f32 1.1283791, %v1989_v33  ;;  %v2010_v3 = vsel %vm7406_vm9, %v7346_v21, %v2006_v35  ;;  %v1827_v54 = vmul.f32 %v1826_v60, %v7265_v58 }
 0x380   : > { %v2014_v32 = vor.u32 1.1754944e-38, %v2013_v1  ;;  %v1868_v63 = vadd.f32 0.18741608, %v1867_v36  ;;  %v1950_v40 = vadd.f32 1.1283791, %v1949_v0  ;;  %v1970_v9 = vsel %vm7417_vm11, %v7355_v37, %v1966_v55  ;;  %vm7475_vm11 = vmor %vm1847_vm7, %vm1848_vm5 }
 0x381   : > { %v5638_v26 = vclamps-f32 %v2056_v29, 1.0  ;;  %v1925_v29 = vmul.f32 %v7380_v46, %v1924_v62  ;;  %v1974_v21 = vor.u32 1.1754944e-38, %v1973_v48  ;;  %v1885_v23 = vmul.f32 %v7373_v30, %v1884_v12 }
 0x382   : > { %v2015_v33 = vsel %vm2012_vm12, %v2014_v32, %v2010_v3  ;;  %v1991_v60 = vmul.f32 %v1990_v51, %v7252_v34  ;;  %v7428_v35 = vmul.f32 0.70710677, %v7387_v6  ;;  %v7432_v36 = vadd.f32 %v7198_v28, %v6334_v27 }
 0x383   : > { %v2066_v4 = vadd.f32 1.0, %v5638_v26  ;;  %v1975_v37 = vsel %vm1972_vm13, %v1974_v21, %v1970_v9  ;;  %v1828_v0 = vadd.f32 0.18741608, %v1827_v54  ;;  %v1845_v41 = vmul.f32 %v7377_v42, %v1844_v53 }
 0x384   : > { %v1951_v1 = vmul.f32 %v1950_v40, %v7223_v18  ;;  %v2016_v26 = vmul.f32 %v2015_v33, %v1991_v60  ;;  %v1869_v55 = vmul.f32 %v1868_v63, %v7254_v56  ;;  %v1909_v12 = vmul.f32 %v1908_v10, %v7268_v24 }
 0x385   : > { %v2074_v5 = vmul.f32 %v2066_v4, %v1730_v19  ;;  %v1926_v34 = vadd.f32 %v7380_v46, %v1925_v29  ;;  %v1886_v25 = vadd.f32 %v7373_v30, %v1885_v23  ;;  %v1933_v28 = vand.u32 2147483648, %v7353_v7 }
 0x386   : > { %v1976_v62 = vmul.f32 %v1975_v37, %v1951_v1  ;;  %v7444_v48 = vmul.f32 0.70710677, %v7432_v36  ;;  %v1893_v18 = vand.u32 2147483648, %v7339_v52  ;;  %v1931_v56 = vand.u32 2147483647, %v7353_v7 }
 0x387   : > { %2083 = vmatpush.msra.mxu3 %v2074_v5  ;;  %v1829_v24 = vmul.f32 %v1828_v0, %v7265_v58  ;;  %vm1887_vm3 = vweird.f32 %v7339_v52  ;;  %v5637_v4 = vclamps-f32 %v2016_v26, 1.0  ;;  %v1846_v13 = vadd.f32 %v7377_v42, %v1845_v41 }
 0x388   : > { %vm7458_vm6 = vmor %vm1887_vm3, %vm1888_vm1  ;;  %v1910_v7 = vadd.f32 1.1283791, %v1909_v12  ;;  %v1930_v58 = vsel %vm7452_vm4, %v7380_v46, %v1926_v34  ;;  %v1870_v3 = vadd.f32 1.1283791, %v1869_v55  ;;  %v1934_v54 = vor.u32 1.1754944e-38, %v1933_v28 }
 0x389   : > { %v1890_v52 = vsel %vm7458_vm6, %v7373_v30, %v1886_v25  ;;  %v5636_v53 = vclamps-f32 %v1976_v62, 1.0  ;;  %v1853_v47 = vand.u32 2147483648, %v7350_v14  ;;  %v1894_v32 = vor.u32 1.1754944e-38, %v1893_v18  ;;  %v11286_v25 = vld [vmem:[#allocation24_spill] sm:$0xff] }
 0x38a   : > { %vm1932_vm9 = vcmp.eq.f32.partialorder %v1931_v56, 8.507059e+37  ;;  %v1851_v5 = vand.u32 2147483647, %v7350_v14  ;;  %v2065_v40 = vadd.f32 1.0, %v5637_v4  ;;  %v1779_v46 = vmul.f32 %v7444_v48, %v7444_v48 }
 0x38b   : > { %v1935_v63 = vsel %vm1932_vm9, %v1934_v54, %v1930_v58  ;;  %v1895_v9 = vsel %vm1892_vm10, %v1894_v32, %v1890_v52  ;;  %v1911_v10 = vmul.f32 %v1910_v7, %v7246_v61  ;;  %v1729_v29 = vmul.f32 0.5, %v7241_v15 }
 0x38c   : > { %v1830_v21 = vadd.f32 1.1283791, %v1829_v24  ;;  %v1850_v14 = vsel %vm7475_vm11, %v7377_v42, %v1846_v13  ;;  %v1871_v33 = vmul.f32 %v1870_v3, %v7226_v11  ;;  %v2064_v23 = vadd.f32 1.0, %v5636_v53 }
 0x38d   : > { %v1854_v60 = vor.u32 1.1754944e-38, %v1853_v47  ;;  %v1936_v37 = vmul.f32 %v1935_v63, %v1911_v10  ;;  %v2073_v0 = vmul.f32 %v2065_v40, %v1729_v29  ;;  %vm1852_vm12 = vcmp.eq.f32.partialorder %v1851_v5, 8.507059e+37  ;;  %v496_v63 = vpop.xlane.xlu2 %495 }
 0x38e   : > { %v1896_v41 = vmul.f32 %v1895_v9, %v1871_v33  ;;  %v1728_v1 = vmul.f32 0.5, %v7216_v38  ;;  %v1739_v61 = vmul.f32 %v7428_v35, %v7428_v35  ;;  %v7488_v15 = vmin.f32 %v1779_v46, 16.0 }
 0x38f   : > { %v1855_v26 = vsel %vm1852_vm12, %v1854_v60, %v1850_v14  ;;  %2084 = vmatpush.msra.mxu3 %v2073_v0  ;;  %v1831_v55 = vmul.f32 %v1830_v21, %v7236_v22  ;;  %v5635_v12 = vclamps-f32 %v1936_v37, 1.0  ;;  %v513_v28 = vmul.f32 %v11286_v25, %v6162_v16 }
 0x390   : > { %v2072_v42 = vmul.f32 %v2064_v23, %v1728_v1  ;;  %v5634_v34 = vclamps-f32 %v1896_v41, 1.0  ;;  %v7493_v62 = vmin.f32 %v1739_v61, 16.0  ;;  %v1781_v18 = vmul.f32 2.1237322e-06, %v7488_v15 }
 0x391   : > { %v1856_v11 = vmul.f32 %v1855_v26, %v1831_v55  ;;  %v2063_v38 = vadd.f32 1.0, %v5635_v12  ;;  %v1727_v56 = vmul.f32 0.5, %v7229_v45  ;;  %v1792_v19 = vmul.f32 3.8918573e-05, %v7488_v15 }
 0x392   : > { %2085 = vmatpush.msra.mxu3 %v2072_v42  ;;  %v2062_v24 = vadd.f32 1.0, %v5634_v34  ;;  %v7498_v22 = vadd.f32 1e-05, %v513_v28  ;;  %v1741_v4 = vmul.f32 2.1237322e-06, %v7493_v62  ;;  %v1726_v13 = vmul.f32 0.5, %v7213_v50 }
 0x393   : > { %v5633_v44 = vclamps-f32 %v1856_v11, 1.0  ;;  %v2071_v51 = vmul.f32 %v2063_v38, %v1727_v56  ;;  %v1782_v7 = vadd.f32 0.00028619796, %v1781_v18  ;;  %v1725_v3 = vmul.f32 0.5, %v7220_v59 }
 0x394   : > { %v2070_v58 = vmul.f32 %v2062_v24, %v1726_v13  ;;  %v1793_v54 = vadd.f32 0.001143296, %v1792_v19  ;;  %5854 = vrsqrt.f32 %v7498_v22  ;;  %v1742_v45 = vadd.f32 0.00028619796, %v1741_v4 }
 0x395   : > { %2086 = vmatpush.msra.mxu3 %v2071_v51  ;;  %v2061_v52 = vadd.f32 1.0, %v5633_v44  ;;  %v1783_v53 = vmul.f32 %v1782_v7, %v7488_v15  ;;  %v1752_v5 = vmul.f32 3.8918573e-05, %v7493_v62  ;;  %v512_v50 = vmul.f32 %v7063_v43, %v6162_v16 }
 0x396   : > { %v1794_v32 = vmul.f32 %v1793_v54, %v7488_v15  ;;  %v519_v59 = vmul.f32 %v7117_v17, %v6162_v16  ;;  %v1743_v30 = vmul.f32 %v1742_v45, %v7493_v62  ;;  %v518_v10 = vmul.f32 %v496_v63, %v6162_v16 }
 0x397   : > { %2087 = vmatpush.msra.mxu3 %v2070_v58  ;;  %v2069_v47 = vmul.f32 %v2061_v52, %v1725_v3  ;;  %v1753_v46 = vadd.f32 0.001143296, %v1752_v5  ;;  %v1784_v9 = vadd.f32 0.0036580483, %v1783_v53  ;;  %v7517_v33 = vadd.f32 1e-05, %v512_v50 }
 0x398   : > { %v1795_v40 = vadd.f32 0.014752088, %v1794_v32  ;;  %v7519_v43 = vadd.f32 1e-05, %v519_v59  ;;  %v1744_v17 = vadd.f32 0.0036580483, %v1743_v30  ;;  %vm614_vm13 = vweird.f32 %v7498_v22 }
 0x399   : > { %2088 = vmatpush.msra.mxu3 %v2069_v47  ;;  %v1754_v21 = vmul.f32 %v1753_v46, %v7493_v62  ;;  %v1785_v0 = vmul.f32 %v1784_v9, %v7488_v15  ;;  %v7524_v41 = vadd.f32 1e-05, %v518_v10  ;;  %5856 = vrsqrt.f32 %v7517_v33 }
 0x39a   : > { %v1796_v29 = vmul.f32 %v1795_v40, %v7488_v15  ;;  %v7515_v14 = vpop.eup %5854  ;;  %5858 = vrsqrt.f32 %v7519_v43  ;;  %v1745_v26 = vmul.f32 %v1744_v17, %v7493_v62  ;;  %vm604_vm2 = vweird.f32 %v7517_v33 }
 0x39b   : > { %v1755_v60 = vadd.f32 0.014752088, %v1754_v21  ;;  %v609_v37 = vmul.f32 %v7515_v14, %v7498_v22  ;;  %v1786_v12 = vadd.f32 0.05243302, %v1785_v0  ;;  %5860 = vrsqrt.f32 %v7524_v41 }
 0x39c   : > { %v1797_v23 = vadd.f32 0.112945676, %v1796_v29  ;;  %v1746_v38 = vadd.f32 0.05243302, %v1745_v26  ;;  %vm615_vm15 = vweird.f32 %v7515_v14  ;;  %vm674_vm5 = vweird.f32 %v7519_v43 }
 0x39d   : > { %v1756_v61 = vmul.f32 %v1755_v60, %v7493_v62  ;;  %v610_v42 = vmul.f32 %v7515_v14, %v609_v37  ;;  %v1787_v44 = vmul.f32 %v1786_v12, %v7488_v15  ;;  %vm7559_vm1 = vmor %vm614_vm13, %vm615_vm15  ;;  %vm664_vm13 = vweird.f32 %v7524_v41 }
 0x39e   : > { %v1798_v1 = vmul.f32 %v1797_v23, %v7488_v15  ;;  %v1747_v7 = vmul.f32 %v1746_v38, %v7493_v62 }
 0x39f   : > { %v1757_v11 = vadd.f32 0.112945676, %v1756_v61  ;;  %v7535_v28 = vpop.eup %5856  ;;  %v611_v24 = vmul.f32 0.5, %v610_v42  ;;  %v1788_v52 = vadd.f32 0.18741608, %v1787_v44 }
 0x3a0   : > { %v1799_v55 = vadd.f32 0.4994258, %v1798_v1  ;;  %v7537_v56 = vpop.eup %5858  ;;  %v599_v13 = vmul.f32 %v7535_v28, %v7517_v33  ;;  %v1748_v32 = vadd.f32 0.18741608, %v1747_v7  ;;  %vm605_vm3 = vweird.f32 %v7535_v28 }
 0x3a1   : > { %v1758_v25 = vmul.f32 %v1757_v11, %v7493_v62  ;;  %v7540_v4 = vpop.eup %5860  ;;  %v669_v51 = vmul.f32 %v7537_v56, %v7519_v43  ;;  %v612_v3 = vsub.f32 1.5, %v611_v24  ;;  %v1789_v63 = vmul.f32 %v1788_v52, %v7488_v15  ;;  %vm7581_vm12 = vmor %vm604_vm2, %vm605_vm3 }
 0x3a2   : > { %v1800_v34 = vmul.f32 %v1799_v55, %v7488_v15  ;;  %v659_v54 = vmul.f32 %v7540_v4, %v7524_v41  ;;  %v600_v53 = vmul.f32 %v7535_v28, %v599_v13  ;;  %v1749_v9 = vmul.f32 %v1748_v32, %v7493_v62  ;;  %v11296_v41 = vld [vmem:[#allocation23_spill] sm:$0xff] }
 0x3a3   : > { %v1759_v19 = vadd.f32 0.4994258, %v1758_v25  ;;  %v670_v47 = vmul.f32 %v7537_v56, %v669_v51  ;;  %v613_v50 = vmul.f32 %v7515_v14, %v612_v3  ;;  %v1790_v29 = vadd.f32 1.1283791, %v1789_v63  ;;  %v7597_v51 = vpop.xlane.xlu2 %504 }
 0x3a4   : > { %v1801_v18 = vadd.f32 1.0, %v1800_v34  ;;  %v660_v22 = vmul.f32 %v7540_v4, %v659_v54  ;;  %v601_v46 = vmul.f32 0.5, %v600_v53  ;;  %vm675_vm6 = vweird.f32 %v7537_v56  ;;  %v11293_v53 = vld [vmem:[#allocation7_spill] sm:$0xff] }
 0x3a5   : > { %v1760_v58 = vmul.f32 %v1759_v19, %v7493_v62  ;;  %v671_v30 = vmul.f32 0.5, %v670_v47  ;;  %v617_v10 = vsel %vm7559_vm1, %v7515_v14, %v613_v50  ;;  %v1750_v14 = vadd.f32 1.1283791, %v1749_v9  ;;  %vm7591_vm15 = vmor %vm674_vm5, %vm675_vm6 }
 0x3a6   : > { %5862 = vrcp.f32 %v1801_v18  ;;  %v661_v23 = vmul.f32 0.5, %v660_v22  ;;  %v1811_v17 = vand.u32 2147483647, %v1801_v18  ;;  %v1813_v60 = vand.u32 2147483648, %v1801_v18 }
 0x3a7   : > { %v7550_v45 = vadd.f32 1.0, %v1760_v58  ;;  %v602_v37 = vsub.f32 1.5, %v601_v46  ;;  %v672_v62 = vsub.f32 1.5, %v671_v30  ;;  %v1791_v61 = vmul.f32 %v1790_v29, %v7444_v48  ;;  %v7600_v58 = vpop.f32.mrf.mxu2  ;;  %v11297_v30 = vld [vmem:[#allocation29_spill] sm:$0xff] }
 0x3a8   : > { %vm1807_vm7 = vweird.f32 %v1801_v18  ;;  %v662_v42 = vsub.f32 1.5, %v661_v23  ;;  %vm1812_vm10 = vcmp.eq.f32.partialorder %v1811_v17, 8.507059e+37  ;;  %v1814_v12 = vor.u32 1.1754944e-38, %v1813_v60 }
 0x3a9   : > { %5864 = vrcp.f32 %v7550_v45  ;;  %v1773_v11 = vand.u32 2147483648, %v7550_v45  ;;  %v1771_v38 = vand.u32 2147483647, %v7550_v45  ;;  %v603_v24 = vmul.f32 %v7535_v28, %v602_v37 }
 0x3aa   : > { %vm665_vm1 = vweird.f32 %v7540_v4  ;;  %vm1767_vm2 = vweird.f32 %v7550_v45  ;;  %v1751_v7 = vmul.f32 %v1750_v14, %v7428_v35  ;;  %v663_v43 = vmul.f32 %v7540_v4, %v662_v42  ;;  %v7643_v14 = vpop.xlane.xlu1 %501 }
 0x3ab   : > { %v1774_v3 = vor.u32 1.1754944e-38, %v1773_v11  ;;  %v705_v47 = vmul.f32 %v617_v10, %v11293_v53  ;;  %vm7612_vm5 = vmor %vm664_vm13, %vm665_vm1  ;;  %v1724_v50 = vmul.f32 0.5, %v7432_v36  ;;  %v1723_v10 = vmul.f32 0.5, %v7387_v6  ;;  %v6029_v36 = vld [vmem:[%s11102_s8] ss:$0 sm:$0xff]  ;;  %v7690_v53 = vld [vmem:[%s11095_s1 + $0x10] sm:$0xff] }
 0x3ac   : > { %v5863_v5 = vpop.eup %5862  ;;  %v6030_v6 = vld [vmem:[%s11102_s8 + $0x1] ss:$0 sm:$0xff] }
 0x3ad   : > { %v1803_v40 = vmul.f32 %v5863_v5, %v1801_v18  ;;  %vm1808_vm4 = vweird.f32 %v5863_v5  ;;  %v673_v18 = vmul.f32 %v7537_v56, %v672_v62 }
 0x3ae   : > { %vm1809_vm9 = vmor %vm1807_vm7, %vm1808_vm4  ;;  %vm1772_vm4 = vcmp.eq.f32.partialorder %v1771_v38, 8.507059e+37  ;;  %v6034_v38 = vld [vmem:[%s6149_s15 + $0x10] sm:$0xff] }
 0x3af   : > { %v1804_v21 = vsub.f32 1.0, %v1803_v40  ;;  %v5865_v15 = vpop.eup %5864  ;;  %v2534_v17 = vpop.f32.mrf.mxu2 }
 0x3b0   : > { %v1763_v1 = vmul.f32 %v5865_v15, %v7550_v45  ;;  %vm1768_vm11 = vweird.f32 %v5865_v15  ;;  %v607_v45 = vsel %vm7581_vm12, %v7535_v28, %v603_v24  ;;  %v667_v28 = vsel %vm7612_vm5, %v7540_v4, %v663_v43  ;;  %v7630_v4 = vpop.permute.xlu2 %1233  ;;  %v7682_v43 = vld [vmem:[%s11095_s1 + $0x8] sm:$0xff] }
 0x3b1   : > { %v1805_v0 = vmul.f32 %v5863_v5, %v1804_v21  ;;  %vm1769_vm3 = vmor %vm1767_vm2, %vm1768_vm11  ;;  %v704_v46 = vmul.f32 %v607_v45, %v11296_v41  ;;  %v710_v21 = vmul.f32 %v667_v28, %v7106_v2  ;;  %11298 = vst [vmem:[#allocation18_spill] sm:$0xff] %v7630_v4  ;;  %v1264_v62 = vadd.f32 %v7348_v20, %v7630_v4 }
 0x3b2   : > { %v1764_v55 = vsub.f32 1.0, %v1763_v1  ;;  %v1680_v1 = vadd.f32 %v7194_v8, %v7630_v4  ;;  %v7714_v28 = vadd.f32 %v7600_v58, %v6271_v57  ;;  %v7722_v41 = vadd.f32 %v2534_v17, %v6334_v27 }
 0x3b3   : > { %v1806_v26 = vadd.f32 %v5863_v5, %v1805_v0  ;;  %v721_v23 = vmul.f32 %v6029_v36, %v704_v46  ;;  %v6031_v0 = vld [vmem:[%s11097_s3] sm:$0xff]  ;;  %v727_v2 = vmul.f32 %v6029_v36, %v710_v21 }
 0x3b4   : > { %v1765_v25 = vmul.f32 %v5865_v15, %v1764_v55  ;;  %v6032_v55 = vld [vmem:[%s6149_s15 + $0x18] sm:$0xff]  ;;  %v7732_v58 = vmul.f32 0.70710677, %v7714_v28 }
 0x3b5   : > { %v1810_v34 = vsel %vm1809_vm9, %v5863_v5, %v1806_v26  ;;  %v677_v5 = vsel %vm7591_vm15, %v7537_v56, %v673_v18  ;;  %v722_v56 = vmul.f32 %v6029_v36, %v705_v47  ;;  %v7646_v42 = vadd.f32 %v6032_v55, %v1680_v1  ;;  %v6035_v18 = vld [vmem:[%s11097_s3 + $0x8] sm:$0xff]  ;;  %v11303_v47 = vld [vmem:[#allocation12_spill] sm:$0xff] }
 0x3b6   : > { %v1815_v44 = vsel %vm1812_vm10, %v1814_v12, %v1810_v34  ;;  %v1766_v13 = vadd.f32 %v5865_v15, %v1765_v25  ;;  %v711_v9 = vmul.f32 %v677_v5, %v11297_v30  ;;  %v6033_v12 = vld [vmem:[%s6149_s15 + $0x8] sm:$0xff]  ;;  %v1677_v34 = vadd.f32 %v7192_v49, %v7176_v31  ;;  %v4198_v49 = vpop.xlane.xlu1 %4197  ;;  %v7703_v5 = vld [vmem:[%s11095_s1 + $0x18] sm:$0xff]  ;;  %v7727_v30 = vld [vmem:[%s11095_s1 + $0x20] sm:$0xff] }
 0x3b7   : > { %v1816_v33 = vmul.f32 %v1815_v44, %v1791_v61  ;;  %v739_v37 = vadd.f32 %v6030_v6, %v722_v56  ;;  %v738_v61 = vadd.f32 %v6030_v6, %v721_v23  ;;  %11299 = vst [vmem:[#allocation19_spill] sm:$0xff] %v7646_v42  ;;  %v7649_v11 = vadd.f32 %v6033_v12, %v1264_v62  ;;  %v2537_v48 = vpop.f32.mrf.mxu2 }
 0x3b8   : > { %v1770_v54 = vsel %vm1769_vm3, %v5865_v15, %v1766_v13  ;;  %v728_v60 = vmul.f32 %v6029_v36, %v711_v9  ;;  %v744_v8 = vadd.f32 %v6030_v6, %v727_v2  ;;  %v4205_v20 = vsel %vm11182_vm0, %v7646_v42, 0.0  ;;  %v11305_v36 = vld [vmem:[#allocation8_spill] sm:$0xff] }
 0x3b9   : > { %v5632_v52 = vclamps-f32 %v1816_v33, 1.0  ;;  %v1775_v32 = vsel %vm1772_vm4, %v1774_v3, %v1770_v54  ;;  %11300 = vst [vmem:[#allocation16_spill] sm:$0xff] %v7649_v11  ;;  %v4199_v25 = vsel %vm11182_vm0, %v7649_v11, 0.0  ;;  %4206 = vadd.xlane.f32.xlu0 %v4205_v20  ;;  %v7658_v24 = vadd.f32 %v6034_v38, %v1677_v34  ;;  %v7670_v33 = vld [vmem:[%s11095_s1] sm:$0xff] }
 0x3ba   : > { %v1776_v59 = vmul.f32 %v1775_v32, %v1751_v7  ;;  %v745_v26 = vadd.f32 %v6030_v6, %v728_v60  ;;  %4200 = vadd.xlane.f32.xlu1 %v4199_v25  ;;  %v4244_v19 = vmul.f32 %v4198_v49, %v6162_v16  ;;  %v7695_v45 = vadd.f32 %v2537_v48, %v11303_v47  ;;  %v7752_v60 = vld [vmem:[%s11095_s1 + $0x28] sm:$0xff]  ;;  %v7775_v25 = vld [vmem:[%s11095_s1 + $0x30] sm:$0xff]  ;;  %v11308_v48 = vld [vmem:[#allocation6_spill] sm:$0xff] }
 0x3bb   : > { %v2060_v63 = vadd.f32 1.0, %v5632_v52  ;;  %11301 = vst [vmem:[#allocation25_spill] sm:$0xff] %v7658_v24  ;;  %v4202_v44 = vsel %vm11182_vm0, %v7658_v24, 0.0  ;;  %v2571_v21 = vmul.f32 %v7732_v58, %v7732_v58 }
 0x3bc   : > { %v5631_v40 = vclamps-f32 %v1776_v59, 1.0  ;;  %v7675_v13 = vsub.f32 %v7180_v39, %v4244_v19  ;;  %v7698_v32 = vmul.f32 0.70710677, %v7695_v45 }
 0x3bd   : > { %v2068_v22 = vmul.f32 %v2060_v63, %v1724_v50  ;;  %v11304_v63 = vld [vmem:[#allocation11_spill] sm:$0xff] }
 0x3be   : > { %v2059_v29 = vadd.f32 1.0, %v5631_v40  ;;  %11302 = vst [vmem:[#allocation15_spill] sm:$0xff] %v7675_v13  ;;  %v4276_v3 = vmul.f32 %v7675_v13, %v7675_v13  ;;  %v2651_v50 = vmul.f32 %v7698_v32, %v7698_v32 }
 0x3bf   : > { %2089 = vmatpush.msra.mxu3 %v2068_v22  ;;  %v2540_v7 = vpop.f32.mrf.mxu2 }
 0x3c0   : > { %v2067_v15 = vmul.f32 %v2059_v29, %v1723_v10  ;;  %v4292_v52 = vsel %vm11182_vm0, %v4276_v3, 0.0  ;;  %v7710_v59 = vadd.f32 %v2540_v7, %v11304_v63  ;;  %v7716_v22 = vmin.f32 %v2651_v50, 16.0  ;;  %v11309_v7 = vld [vmem:[#allocation10_spill] sm:$0xff] }
 0x3c1   : > { %v7738_v29 = vmul.f32 0.70710677, %v7722_v41 }
 0x3c2   : > { %2090 = vmatpush.msra.mxu3 %v2067_v15  ;;  %4203 = vadd.xlane.f32.xlu1 %v4202_v44  ;;  %v7719_v40 = vmul.f32 0.70710677, %v7710_v59  ;;  %v2664_v9 = vmul.f32 3.8918573e-05, %v7716_v22  ;;  %v2653_v19 = vmul.f32 2.1237322e-06, %v7716_v22 }
 0x3c3   : > { %5639 = vmatmul.msk.f32.vlgmr.msra.gmra.mxu3 %vm1236_vm8, %v6031_v0  ;;  %v2611_v17 = vmul.f32 %v7738_v29, %v7738_v29 }
 0x3c4   : > { %2112 = vmatpush.msrb.mxu3 %v739_v37  ;;  %v2691_v10 = vmul.f32 %v7719_v40, %v7719_v40  ;;  %v2665_v15 = vadd.f32 0.001143296, %v2664_v9  ;;  %v7759_v37 = vmin.f32 %v2571_v21, 16.0 }
 0x3c5   : > { %v7763_v62 = vmin.f32 %v2611_v17, 16.0 }
 0x3c6   : > { %2113 = vmatpush.msrb.mxu3 %v738_v61  ;;  %v7745_v23 = vmin.f32 %v2691_v10, 16.0  ;;  %v2666_v2 = vmul.f32 %v2665_v15, %v7716_v22  ;;  %v2573_v12 = vmul.f32 2.1237322e-06, %v7759_v37  ;;  %v2654_v15 = vadd.f32 0.00028619796, %v2653_v19 }
 0x3c7   : > { %v2543_v54 = vpop.f32.mrf.mxu2  ;;  %v2613_v20 = vmul.f32 2.1237322e-06, %v7763_v62 }
 0x3c8   : > { %3360 = vmatpush.msra.mxu3 %v745_v26  ;;  %v7741_v56 = vadd.f32 %v2543_v54, %v11305_v36  ;;  %v2704_v1 = vmul.f32 3.8918573e-05, %v7745_v23  ;;  %v11306_v26 = vld [vmem:[#allocation3_spill] sm:$0xff]  ;;  %v2667_v34 = vadd.f32 0.014752088, %v2666_v2 }
 0x3c9   : > { %v2574_v44 = vadd.f32 0.00028619796, %v2573_v12  ;;  %v2614_v50 = vadd.f32 0.00028619796, %v2613_v20  ;;  %v2693_v19 = vmul.f32 2.1237322e-06, %v7745_v23 }
 0x3ca   : > { %3361 = vmatpush.msra.mxu3 %v744_v8  ;;  %4293 = vadd.xlane.f32.xlu1 %v4292_v52  ;;  %v7757_v6 = vmul.f32 0.70710677, %v7741_v56  ;;  %v2705_v8 = vadd.f32 0.001143296, %v2704_v1  ;;  %v2668_v52 = vmul.f32 %v2667_v34, %v7716_v22  ;;  %v7807_v1 = vld [vmem:[%s11095_s1 + $0x38] sm:$0xff] }
 0x3cb   : > { %5640 = vmatmul.msk.f32.gmra.mxu3 %vm1236_vm8, %v6035_v18  ;;  %v2575_v21 = vmul.f32 %v2574_v44, %v7759_v37  ;;  %v2615_v2 = vmul.f32 %v2614_v50, %v7763_v62  ;;  %v2655_v44 = vmul.f32 %v2654_v15, %v7716_v22  ;;  %v2694_v24 = vadd.f32 0.00028619796, %v2693_v19 }
 0x3cc   : > { %v2731_v61 = vmul.f32 %v7757_v6, %v7757_v6  ;;  %v2706_v54 = vmul.f32 %v2705_v8, %v7745_v23 }
 0x3cd   : > { %v2576_v20 = vadd.f32 0.0036580483, %v2575_v21  ;;  %v2616_v39 = vadd.f32 0.0036580483, %v2615_v2  ;;  %v2656_v15 = vadd.f32 0.0036580483, %v2655_v44 }
 0x3ce   : > { %v7779_v38 = vmin.f32 %v2731_v61, 16.0  ;;  %v520_v61 = vmul.f32 %v7643_v14, %v6162_v16 }
 0x3cf   : > { %v2546_v35 = vpop.f32.mrf.mxu2  ;;  %v2577_v21 = vmul.f32 %v2576_v20, %v7759_v37  ;;  %v2695_v20 = vmul.f32 %v2694_v24, %v7745_v23 }
 0x3d0   : > { %v7782_v18 = vadd.f32 %v2546_v35, %v11308_v48  ;;  %v2744_v9 = vmul.f32 3.8918573e-05, %v7779_v38  ;;  %v7823_v14 = vadd.f32 1e-05, %v520_v61 }
 0x3d2   : > { %v7795_v10 = vmul.f32 0.70710677, %v7782_v18  ;;  %v2745_v12 = vadd.f32 0.001143296, %v2744_v9  ;;  %11310 = vst [vmem:[#allocation9_spill] sm:$0xff] %v7823_v14  ;;  %5866 = vrsqrt.f32 %v7823_v14 }
 0x3d3   : > { %5641 = vmatmul.msk.f32.vlgmr.msrb.gmra.mxu3 %vm11183_vm14, %v7670_v33 }
 0x3d4   : > { %v2771_v34 = vmul.f32 %v7795_v10, %v7795_v10  ;;  %v2746_v9 = vmul.f32 %v2745_v12, %v7779_v38  ;;  %v2578_v12 = vadd.f32 0.05243302, %v2577_v21 }
 0x3d6   : > { %v7826_v13 = vmin.f32 %v2771_v34, 16.0  ;;  %v2657_v34 = vmul.f32 %v2656_v15, %v7716_v22  ;;  %v2696_v15 = vadd.f32 0.0036580483, %v2695_v20 }
 0x3d7   : > { %v2549_v46 = vpop.f32.mrf.mxu2 }
 0x3d8   : > { %v7789_v3 = vadd.f32 %v2549_v46, %v11309_v7  ;;  %v2669_v46 = vadd.f32 0.112945676, %v2668_v52  ;;  %v2784_v2 = vmul.f32 3.8918573e-05, %v7826_v13  ;;  %v2658_v21 = vadd.f32 0.05243302, %v2657_v34  ;;  %v7846_v24 = vpop.eup %5866 }
 0x3d9   : > { %11311 = vst [vmem:[#allocation13_spill] sm:$0xff] %v7846_v24  ;;  %v2697_v34 = vmul.f32 %v2696_v15, %v7745_v23 }
 0x3da   : > { %v7801_v17 = vmul.f32 0.70710677, %v7789_v3 }
 0x3db   : > { %5642 = vmatmul.msk.f32.gmra.mxu3 %vm11183_vm14, %v7682_v43 }
 0x3dc   : > { %v2811_v52 = vmul.f32 %v7801_v17, %v7801_v17 }
 0x3de   : > { %v7830_v4 = vmin.f32 %v2811_v52, 16.0  ;;  %v2733_v52 = vmul.f32 2.1237322e-06, %v7779_v38 }
 0x3df   : > { %v2552_v0 = vpop.f32.mrf.mxu2 }
 0x3e0   : > { %v7768_v55 = vadd.f32 %v2552_v0, %v11306_v26  ;;  %v2707_v0 = vadd.f32 0.014752088, %v2706_v54  ;;  %v2670_v54 = vmul.f32 %v2669_v46, %v7716_v22  ;;  %v2617_v46 = vmul.f32 %v2616_v39, %v7763_v62 }
 0x3e1   : > { %v2824_v44 = vmul.f32 3.8918573e-05, %v7830_v4  ;;  %v2734_v26 = vadd.f32 0.00028619796, %v2733_v52  ;;  %v2773_v52 = vmul.f32 2.1237322e-06, %v7826_v13 }
 0x3e2   : > { %11307 = vst [vmem:[#allocation4_spill] sm:$0xff] %v7768_v55  ;;  %v7785_v49 = vmul.f32 0.70710677, %v7768_v55  ;;  %v2708_v50 = vmul.f32 %v2707_v0, %v7745_v23  ;;  %v2671_v42 = vadd.f32 0.4994258, %v2670_v54  ;;  %v2947_v55 = vpop.f32.mrf.mxu1 }
 0x3e3   : > { %5643 = vmatmul.msk.f32.gmra.mxu3 %vm11183_vm14, %v7690_v53  ;;  %v2747_v0 = vadd.f32 0.014752088, %v2746_v9  ;;  %v2825_v7 = vadd.f32 0.001143296, %v2824_v44  ;;  %v2659_v44 = vmul.f32 %v2658_v21, %v7716_v22 }
 0x3e4   : > { %v2851_v35 = vmul.f32 %v7785_v49, %v7785_v49  ;;  %v2709_v11 = vadd.f32 0.112945676, %v2708_v50  ;;  %v2672_v19 = vmul.f32 %v2671_v42, %v7716_v22  ;;  %v2785_v50 = vadd.f32 0.001143296, %v2784_v2 }
 0x3e5   : > { %v2748_v54 = vmul.f32 %v2747_v0, %v7779_v38  ;;  %v2826_v20 = vmul.f32 %v2825_v7, %v7830_v4  ;;  %v2660_v15 = vadd.f32 0.18741608, %v2659_v44 }
 0x3e6   : > { %v7815_v8 = vmin.f32 %v2851_v35, 16.0  ;;  %v2710_v39 = vmul.f32 %v2709_v11, %v7745_v23  ;;  %v7848_v48 = vadd.f32 1.0, %v2672_v19  ;;  %v2786_v0 = vmul.f32 %v2785_v50, %v7826_v13 }
 0x3e7   : > { %v2827_v21 = vadd.f32 0.014752088, %v2826_v20 }
 0x3e8   : > { %v2864_v35 = vmul.f32 3.8918573e-05, %v7815_v8  ;;  %v2711_v42 = vadd.f32 0.4994258, %v2710_v39  ;;  %5868 = vrcp.f32 %v7848_v48  ;;  %vm2679_vm6 = vweird.f32 %v7848_v48 }
 0x3ea   : > { %v2865_v61 = vadd.f32 0.001143296, %v2864_v35  ;;  %v2579_v35 = vmul.f32 %v2578_v12, %v7759_v37  ;;  %v679_v12 = vmul.f32 %v7846_v24, %v7823_v14  ;;  %v2712_v19 = vmul.f32 %v2711_v42, %v7745_v23 }
 0x3eb   : > { %5644 = vmatmul.msk.f32.gmra.mxu3 %vm11183_vm14, %v7703_v5 }
 0x3ec   : > { %v2866_v9 = vmul.f32 %v2865_v61, %v7815_v8  ;;  %v2580_v61 = vadd.f32 0.18741608, %v2579_v35  ;;  %v680_v7 = vmul.f32 %v7846_v24, %v679_v12  ;;  %v2698_v35 = vadd.f32 0.05243302, %v2697_v34 }
 0x3ed   : > { %v7867_v14 = vadd.f32 1.0, %v2712_v19  ;;  %v7884_v12 = vmul.f32 0.5, %v7695_v45  ;;  %v2828_v19 = vmul.f32 %v2827_v21, %v7830_v4 }
 0x3ee   : > { %v2867_v2 = vadd.f32 0.014752088, %v2866_v9  ;;  %v2581_v9 = vmul.f32 %v2580_v61, %v7759_v37  ;;  %v7881_v61 = vpop.eup %5868  ;;  %v7887_v44 = vmul.f32 0.5, %v680_v7 }
 0x3ef   : > { %11313 = vst [vmem:[#allocation26_spill] sm:$0xff] %v7884_v12  ;;  %5870 = vrcp.f32 %v7867_v14  ;;  %vm2680_vm9 = vweird.f32 %v7881_v61  ;;  %vm2719_vm11 = vweird.f32 %v7867_v14 }
 0x3f0   : > { %v2868_v50 = vmul.f32 %v2867_v2, %v7815_v8  ;;  %v2774_v2 = vadd.f32 0.00028619796, %v2773_v52  ;;  %11314 = vst [vmem:[#allocation28_spill] sm:$0xff] %v7887_v44  ;;  %vm7982_vm10 = vmor %vm2679_vm6, %vm2680_vm9 }
 0x3f2   : > { %v2869_v20 = vadd.f32 0.112945676, %v2868_v50  ;;  %v2775_v50 = vmul.f32 %v2774_v2, %v7826_v13 }
 0x3f3   : > { %5645 = vmatmul.msk.f32.gmra.mxu3 %vm11183_vm14, %v7727_v30 }
 0x3fb   : > { %5646 = vmatmul.msk.f32.gmra.mxu3 %vm11183_vm14, %v7752_v60 }
 0x403   : > { %5647 = vmatmul.msk.f32.gmra.mxu3 %vm11183_vm14, %v7775_v25 }
 0x40b   : > { %5648 = vmatmul.msk.f32.gmra.mxu3 %vm11183_vm14, %v7807_v1 }
 0x413   : > { %5695 = vmatmul.msk.f32.vlgmr.msra.gmra.mxu3 %vm11183_vm14, %v7670_v33  ;;  %v2618_v33 = vadd.f32 0.05243302, %v2617_v46  ;;  %v2749_v46 = vadd.f32 0.112945676, %v2748_v54  ;;  %v2787_v54 = vadd.f32 0.014752088, %v2786_v0 }
 0x415   : > { %v2619_v11 = vmul.f32 %v2618_v33, %v7763_v62  ;;  %v2750_v33 = vmul.f32 %v2749_v46, %v7779_v38  ;;  %v7876_v46 = vmul.f32 0.5, %v7722_v41  ;;  %v2699_v41 = vmul.f32 %v2698_v35, %v7745_v23 }
 0x416   : > { %v2870_v35 = vmul.f32 %v2869_v20, %v7815_v8  ;;  %v2853_v20 = vmul.f32 2.1237322e-06, %v7815_v8 }
 0x417   : > { %v2620_v39 = vadd.f32 0.18741608, %v2619_v11  ;;  %v7873_v11 = vmul.f32 0.5, %v7714_v28  ;;  %11312 = vst [vmem:[#allocation27_spill] sm:$0xff] %v7876_v46  ;;  %v2751_v34 = vadd.f32 0.4994258, %v2750_v33  ;;  %v2675_v33 = vmul.f32 %v7881_v61, %v7848_v48 }
 0x418   : > { %v2582_v28 = vadd.f32 1.1283791, %v2581_v9  ;;  %v7906_v9 = vmul.f32 0.5, %v7741_v56 }
 0x419   : > { %v2621_v0 = vmul.f32 %v2620_v39, %v7763_v62 }
 0x41a   : > { %11316 = vst [vmem:[#allocation7_spill] sm:$0xff] %v7906_v9  ;;  %v7911_v21 = vmul.f32 %v2582_v28, %v7732_v58  ;;  %v7923_v58 = vpop.eup %5870 }
 0x41b   : > { %5696 = vmatmul.msk.f32.gmra.mxu3 %vm11183_vm14, %v7682_v43  ;;  %v2735_v43 = vmul.f32 %v2734_v26, %v7779_v38  ;;  %v7870_v26 = vadd.f32 %v2947_v55, %v6271_v57  ;;  %v2788_v55 = vmul.f32 %v2787_v54, %v7826_v13  ;;  %v2622_v52 = vadd.f32 1.1283791, %v2621_v0 }
 0x41c   : > { %v7902_v54 = vmul.f32 0.5, %v7710_v59  ;;  %v2829_v0 = vadd.f32 0.112945676, %v2828_v19  ;;  %vm2720_vm13 = vweird.f32 %v7923_v58 }
 0x41d   : > { %v2736_v42 = vadd.f32 0.0036580483, %v2735_v43  ;;  %v7891_v43 = vpop.f32.mrf.mxu1  ;;  %v7897_v39 = vmul.f32 0.70710677, %v7870_v26  ;;  %v2789_v7 = vadd.f32 0.112945676, %v2788_v55  ;;  %v7918_v2 = vmul.f32 %v2622_v52, %v7738_v29  ;;  %vm8037_vm15 = vmor %vm2719_vm11, %vm2720_vm13 }
 0x41e   : > { %11315 = vst [vmem:[#allocation24_spill] sm:$0xff] %v7902_v54  ;;  %v2776_v55 = vadd.f32 0.0036580483, %v2775_v50  ;;  %v2683_v29 = vand.u32 2147483647, %v7848_v48 }
 0x41f   : > { %v2737_v45 = vmul.f32 %v2736_v42, %v7779_v38  ;;  %v2813_v42 = vmul.f32 2.1237322e-06, %v7830_v4  ;;  %v2987_v56 = vmul.f32 %v7897_v39, %v7897_v39  ;;  %v2790_v19 = vmul.f32 %v2789_v7, %v7826_v13 }
 0x420   : > { %v2715_v7 = vmul.f32 %v7923_v58, %v7867_v14  ;;  %vm7950_vm7 = vcmp.eq.f32.partialorder %v2683_v29, 8.507059e+37 }
 0x421   : > { %v2738_v54 = vadd.f32 0.05243302, %v2737_v45  ;;  %v2814_v52 = vadd.f32 0.00028619796, %v2813_v42  ;;  %v7939_v59 = vmin.f32 %v2987_v56, 16.0 }
 0x423   : > { %5697 = vmatmul.msk.f32.gmra.mxu3 %vm11183_vm14, %v7690_v53  ;;  %v2661_v53 = vmul.f32 %v2660_v15, %v7716_v22  ;;  %v2752_v22 = vmul.f32 %v2751_v34, %v7779_v38  ;;  %v2700_v15 = vadd.f32 0.18741608, %v2699_v41  ;;  %v2676_v34 = vsub.f32 1.0, %v2675_v33 }
 0x424   : > { %v7928_v41 = vmul.f32 0.5, %v7782_v18  ;;  %v2830_v33 = vmul.f32 %v2829_v0, %v7830_v4  ;;  %v2815_v0 = vmul.f32 %v2814_v52, %v7830_v4  ;;  %v7966_v52 = vadd.f32 %v7891_v43, %v6334_v27 }
 0x425   : > { %v2662_v24 = vadd.f32 1.1283791, %v2661_v53  ;;  %v7925_v28 = vadd.f32 1.0, %v2752_v22  ;;  %v2871_v53 = vadd.f32 0.4994258, %v2870_v35  ;;  %v2701_v45 = vmul.f32 %v2700_v15, %v7745_v23  ;;  %v7945_v15 = vpop.f32.mrf.mxu1 }
 0x426   : > { %11317 = vst [vmem:[#allocation23_spill] sm:$0xff] %v7928_v41  ;;  %v2739_v22 = vmul.f32 %v2738_v54, %v7779_v38  ;;  %v2677_v18 = vmul.f32 %v7881_v61, %v2676_v34  ;;  %v2777_v35 = vmul.f32 %v2776_v55, %v7826_v13  ;;  %v2854_v23 = vadd.f32 0.00028619796, %v2853_v20 }
 0x427   : > { %v7935_v50 = vmul.f32 %v2662_v24, %v7698_v32  ;;  %5872 = vrcp.f32 %v7925_v28  ;;  %v2791_v32 = vadd.f32 0.4994258, %v2790_v19  ;;  %v2872_v24 = vmul.f32 %v2871_v53, %v7815_v8 }
 0x428   : > { %v2702_v42 = vadd.f32 1.1283791, %v2701_v45  ;;  %v2831_v56 = vadd.f32 0.4994258, %v2830_v33  ;;  %v2740_v55 = vadd.f32 0.18741608, %v2739_v22  ;;  %v2678_v44 = vadd.f32 %v7881_v61, %v2677_v18 }
 0x429   : > { %v3000_v20 = vmul.f32 3.8918573e-05, %v7939_v59  ;;  %v2716_v41 = vsub.f32 1.0, %v2715_v7  ;;  %v2778_v19 = vadd.f32 0.05243302, %v2777_v35  ;;  %v2855_v53 = vmul.f32 %v2854_v23, %v7815_v8 }
 0x42a   : > { %v2792_v29 = vmul.f32 %v2791_v32, %v7826_v13  ;;  %v7962_v45 = vadd.f32 1.0, %v2872_v24  ;;  %v2584_v33 = vmul.f32 3.8918573e-05, %v7759_v37  ;;  %v7973_v22 = vmul.f32 0.5, %v7789_v3 }
 0x42b   : > { %5698 = vmatmul.msk.f32.gmra.mxu3 %vm11183_vm14, %v7703_v5  ;;  %v2685_v5 = vand.u32 2147483648, %v7848_v48  ;;  %v2816_v18 = vadd.f32 0.0036580483, %v2815_v0  ;;  %v2832_v7 = vmul.f32 %v2831_v56, %v7830_v4  ;;  %v2723_v35 = vand.u32 2147483647, %v7867_v14 }
 0x42c   : > { %11320 = vst [vmem:[#allocation29_spill] sm:$0xff] %v7973_v22  ;;  %v2741_v3 = vmul.f32 %v2740_v55, %v7779_v38  ;;  %v3001_v23 = vadd.f32 0.001143296, %v3000_v20  ;;  %v2682_v32 = vsel %vm7982_vm10, %v7881_v61, %v2678_v44  ;;  %v2717_v24 = vmul.f32 %v7923_v58, %v2716_v41 }
 0x42d   : > { %v2686_v34 = vor.u32 1.1754944e-38, %v2685_v5  ;;  %v7970_v5 = vmul.f32 %v2702_v42, %v7719_v40  ;;  %v2725_v40 = vand.u32 2147483648, %v7867_v14  ;;  %v2779_v42 = vmul.f32 %v2778_v19, %v7826_v13  ;;  %v8006_v41 = vpop.f32.mrf.mxu1 }
 0x42e   : > { %v2856_v48 = vadd.f32 0.0036580483, %v2855_v53  ;;  %v7994_v0 = vadd.f32 1.0, %v2792_v29  ;;  %5874 = vrcp.f32 %v7962_v45  ;;  %v7998_v56 = vmul.f32 0.70710677, %v7966_v52 }
 0x42f   : > { %v2585_v22 = vadd.f32 0.001143296, %v2584_v33  ;;  %v2817_v61 = vmul.f32 %v2816_v18, %v7830_v4  ;;  %v8004_v44 = vadd.f32 1.0, %v2832_v7  ;;  %v2687_v55 = vsel %vm7950_vm7, %v2686_v34, %v2682_v32 }
 0x430   : > { %vm8010_vm12 = vcmp.eq.f32.partialorder %v2723_v35, 8.507059e+37  ;;  %v2726_v19 = vor.u32 1.1754944e-38, %v2725_v40  ;;  %v3002_v53 = vmul.f32 %v3001_v23, %v7939_v59  ;;  %v2624_v29 = vmul.f32 3.8918573e-05, %v7763_v62 }
 0x431   : > { %v2742_v33 = vadd.f32 1.1283791, %v2741_v3  ;;  %v2780_v18 = vadd.f32 0.18741608, %v2779_v42  ;;  %v2857_v7 = vmul.f32 %v2856_v48, %v7815_v8  ;;  %v2718_v54 = vadd.f32 %v7923_v58, %v2717_v24 }
 0x432   : > { %5876 = vrcp.f32 %v7994_v0  ;;  %v3027_v34 = vmul.f32 %v7998_v56, %v7998_v56  ;;  %v2586_v43 = vmul.f32 %v2585_v22, %v7759_v37  ;;  %v2765_v40 = vand.u32 2147483648, %v7925_v28 }
 0x433   : > { %5699 = vmatmul.msk.f32.gmra.mxu3 %vm11183_vm14, %v7727_v30  ;;  %v7976_v30 = vpop.eup %5872  ;;  %v2818_v23 = vadd.f32 0.05243302, %v2817_v61  ;;  %5878 = vrcp.f32 %v8004_v44  ;;  %v8030_v32 = vmul.f32 %v2687_v55, %v7935_v50  ;;  %v3003_v24 = vadd.f32 0.014752088, %v3002_v53 }
 0x434   : > { %v2755_v38 = vmul.f32 %v7976_v30, %v7925_v28  ;;  %v8027_v3 = vpop.eup %5874  ;;  %v2625_v42 = vadd.f32 0.001143296, %v2624_v29  ;;  %v8042_v48 = vmul.f32 %v2742_v33, %v7757_v6  ;;  %vm2759_vm1 = vweird.f32 %v7925_v28 }
 0x435   : > { %v8047_v50 = vadd.f32 %v7945_v15, %v11303_v47  ;;  %v2722_v61 = vsel %vm8037_vm15, %v7923_v58, %v2718_v54  ;;  %v2781_v14 = vmul.f32 %v2780_v18, %v7826_v13  ;;  %v8053_v55 = vmin.f32 %v3027_v34, 16.0 }
 0x436   : > { %v2756_v35 = vsub.f32 1.0, %v2755_v38  ;;  %v2858_v38 = vadd.f32 0.05243302, %v2857_v7  ;;  %v2587_v53 = vadd.f32 0.014752088, %v2586_v43  ;;  %v2819_v33 = vmul.f32 %v2818_v23, %v7830_v4 }
 0x437   : > { %v2763_v6 = vand.u32 2147483647, %v7925_v28  ;;  %v2875_v7 = vmul.f32 %v8027_v3, %v7962_v45  ;;  %v8062_v9 = vor.u32 1.1754944e-38, %v2765_v40  ;;  %v3004_v58 = vmul.f32 %v3003_v24, %v7939_v59 }
 0x438   : > { %v2757_v29 = vmul.f32 %v7976_v30, %v2756_v35  ;;  %v8060_v15 = vpop.eup %5876  ;;  %v2626_v13 = vmul.f32 %v2625_v42, %v7763_v62  ;;  %v2727_v54 = vsel %vm8010_vm12, %v2726_v19, %v2722_v61  ;;  %vm2760_vm2 = vweird.f32 %v7976_v30  ;;  %v8075_v35 = vpop.f32.mrf.mxu1 }
 0x439   : > { %v8066_v18 = vpop.eup %5878  ;;  %v2859_v34 = vmul.f32 %v2858_v38, %v7815_v8  ;;  %v8073_v43 = vmul.f32 0.70710677, %v8047_v50  ;;  %v2782_v40 = vadd.f32 1.1283791, %v2781_v14  ;;  %v2805_v23 = vand.u32 2147483648, %v7994_v0  ;;  %vm8100_vm3 = vmor %vm2759_vm1, %vm2760_vm2 }
 0x43a   : > { %v2588_v20 = vmul.f32 %v2587_v53, %v7759_v37  ;;  %v8083_v19 = vadd.f32 %v7976_v30, %v2757_v29  ;;  %v2795_v24 = vmul.f32 %v8060_v15, %v7994_v0  ;;  %v2820_v42 = vadd.f32 0.18741608, %v2819_v33  ;;  %v6044_v33 = vld [vmem:[%s6149_s15 + $0x20] sm:$0xff] }
 0x43b   : > { %5700 = vmatmul.msk.f32.gmra.mxu3 %vm11183_vm14, %v7752_v60  ;;  %v2989_v60 = vmul.f32 2.1237322e-06, %v7939_v59  ;;  %v2876_v38 = vsub.f32 1.0, %v2875_v7  ;;  %v2835_v61 = vmul.f32 %v8066_v18, %v8004_v44  ;;  %v3005_v14 = vadd.f32 0.112945676, %v3004_v58 }
 0x43c   : > { %v2627_v47 = vadd.f32 0.014752088, %v2626_v13  ;;  %v8091_v27 = vmul.f32 %v2727_v54, %v7970_v5  ;;  %v2803_v53 = vand.u32 2147483647, %v7994_v0  ;;  %v2860_v46 = vadd.f32 0.18741608, %v2859_v34 }
 0x43d   : > { %v2990_v22 = vadd.f32 0.00028619796, %v2989_v60  ;;  %v3040_v60 = vmul.f32 3.8918573e-05, %v8053_v55  ;;  %v3067_v29 = vmul.f32 %v8073_v43, %v8073_v43  ;;  %v8105_v7 = vmul.f32 %v2782_v40, %v7795_v10 }
 0x43e   : > { %11327 = vst [vmem:[#allocation30_spill] sm:$0xff] %v8091_v27  ;;  %v2589_v58 = vadd.f32 0.112945676, %v2588_v20  ;;  %v2762_v13 = vsel %vm8100_vm3, %v7976_v30, %v8083_v19  ;;  %v2796_v54 = vsub.f32 1.0, %v2795_v24  ;;  %v8114_v34 = vmul.f32 %v2820_v42, %v7830_v4 }
 0x43f   : > { %v3041_v5 = vadd.f32 0.001143296, %v3040_v60  ;;  %v2877_v28 = vmul.f32 %v8027_v3, %v2876_v38  ;;  %v2836_v27 = vsub.f32 1.0, %v2835_v61  ;;  %v3006_v10 = vmul.f32 %v3005_v14, %v7939_v59 }
 0x440   : > { %v2628_v40 = vmul.f32 %v2627_v47, %v7763_v62  ;;  %v521_v60 = vmul.f32 %v7597_v51, %v6162_v16  ;;  %v3029_v20 = vmul.f32 2.1237322e-06, %v8053_v55  ;;  %v8123_v30 = vmin.f32 %v3067_v29, 16.0 }
 0x441   : > { %vm8127_vm4 = vcmp.eq.f32.partialorder %v2763_v6, 8.507059e+37  ;;  %vm2879_vm5 = vweird.f32 %v7962_v45  ;;  %v3042_v47 = vmul.f32 %v3041_v5, %v8053_v55  ;;  %v8135_v51 = vadd.f32 %v8006_v41, %v11304_v63  ;;  %v8141_v6 = vpop.f32.mrf.mxu1 }
 0x442   : > { %vm2880_vm6 = vweird.f32 %v8027_v3  ;;  %v2885_v42 = vand.u32 2147483648, %v7962_v45  ;;  %v3007_v61 = vadd.f32 0.4994258, %v3006_v10  ;;  %v8146_v41 = vadd.f32 1e-05, %v521_v60 }
 0x443   : > { %5701 = vmatmul.msk.f32.gmra.mxu3 %vm11183_vm14, %v7775_v25  ;;  %v2991_v25 = vmul.f32 %v2990_v22, %v7939_v59  ;;  %v8107_v22 = vor.u32 1.1754944e-38, %v2805_v23  ;;  %v2861_v23 = vmul.f32 %v2860_v46, %v7815_v8  ;;  %v2590_v8 = vmul.f32 %v2589_v58, %v7759_v37  ;;  %vm8158_vm9 = vmor %vm2879_vm5, %vm2880_vm6 }
 0x444   : > { %v2878_v46 = vadd.f32 %v8027_v3, %v2877_v28  ;;  %11332 = vst [vmem:[#allocation31_spill] sm:$0xff] %v8146_v41  ;;  %v3030_v14 = vadd.f32 0.00028619796, %v3029_v20  ;;  %v3080_v29 = vmul.f32 3.8918573e-05, %v8123_v30  ;;  %v2797_v58 = vmul.f32 %v8060_v15, %v2796_v54 }
 0x445   : > { %v2992_v12 = vadd.f32 0.0036580483, %v2991_v25  ;;  %v2629_v25 = vadd.f32 0.112945676, %v2628_v40  ;;  %vm2799_vm7 = vweird.f32 %v7994_v0  ;;  %v3043_v28 = vadd.f32 0.014752088, %v3042_v47 }
 0x446   : > { %v2092_v19 = vpop.f32.mrf.mxu3  ;;  %v8163_v10 = vmul.f32 0.70710677, %v8135_v51  ;;  %v2591_v40 = vadd.f32 0.4994258, %v2590_v8  ;;  %v2837_v60 = vmul.f32 %v8066_v18, %v2836_v27  ;;  %v2862_v20 = vadd.f32 1.1283791, %v2861_v23 }
 0x447   : > { %v2093_v24 = vadd.f32 %v2092_v19, %v7176_v31  ;;  %v2993_v38 = vmul.f32 %v2992_v12, %v7939_v59  ;;  %v2882_v54 = vsel %vm8158_vm9, %v8027_v3, %v2878_v46  ;;  %v2630_v47 = vmul.f32 %v2629_v25, %v7763_v62 }
 0x448   : > { %5880 = vrsqrt.f32 %v8146_v41  ;;  %v3031_v27 = vmul.f32 %v3030_v14, %v8053_v55  ;;  %v3081_v23 = vadd.f32 0.001143296, %v3080_v29  ;;  %vm8175_vm11 = vcmp.eq.f32.partialorder %v2803_v53, 8.507059e+37 }
 0x449   : > { %v8150_v5 = vadd.f32 %v6044_v33, %v2093_v24  ;;  %v2994_v24 = vadd.f32 0.05243302, %v2993_v38  ;;  %v3008_v33 = vmul.f32 %v3007_v61, %v7939_v59  ;;  %v3044_v46 = vmul.f32 %v3043_v28, %v8053_v55 }
 0x44a   : > { %v2592_v38 = vmul.f32 %v2591_v40, %v7759_v37  ;;  %vm2800_vm12 = vweird.f32 %v8060_v15  ;;  %v2863_v61 = vmul.f32 %v2862_v20, %v7785_v49  ;;  %v8190_v53 = vadd.f32 %v8075_v35, %v11305_v36 }
 0x44b   : > { %5702 = vmatmul.msk.f32.gmra.mxu3 %vm11183_vm14, %v7807_v1  ;;  %v2883_v1 = vand.u32 2147483647, %v7962_v45  ;;  %11333 = vst [vmem:[#allocation32_spill] sm:$0xff] %v8150_v5  ;;  %v4208_v19 = vsel %vm11182_vm0, %v8150_v5, 0.0  ;;  %v2886_v45 = vor.u32 1.1754944e-38, %v2885_v42  ;;  %v3107_v42 = vmul.f32 %v8163_v10, %v8163_v10  ;;  %vm8211_vm15 = vmor %vm2799_vm7, %vm2800_vm12 }
 0x44c   : > { %4209 = vadd.xlane.f32.xlu2 %v4208_v19  ;;  %v2798_v25 = vadd.f32 %v8060_v15, %v2797_v58  ;;  %v2995_v14 = vmul.f32 %v2994_v24, %v7939_v59  ;;  %v8194_v29 = vadd.f32 1.0, %v3008_v33  ;;  %v2631_v12 = vadd.f32 0.4994258, %v2630_v47 }
 0x44d   : > { %vm2884_vm10 = vcmp.eq.f32.partialorder %v2883_v1, 8.507059e+37  ;;  %v2767_v1 = vsel %vm8127_vm4, %v8062_v9, %v2762_v13  ;;  %vm2840_vm13 = vweird.f32 %v8066_v18  ;;  %v3032_v4 = vadd.f32 0.0036580483, %v3031_v27  ;;  %v8198_v13 = vpop.f32.mrf.mxu1 }
 0x44e   : > { %v2887_v3 = vsel %vm2884_vm10, %v2886_v45, %v2882_v54  ;;  %v3082_v9 = vmul.f32 %v3081_v23, %v8123_v30  ;;  %v2838_v49 = vadd.f32 %v8066_v18, %v2837_v60  ;;  %v3045_v28 = vadd.f32 0.112945676, %v3044_v46  ;;  %v8205_v58 = vpop.eup %5880 }
 0x44f   : > { %v2888_v37 = vmul.f32 %v2887_v3, %v2863_v61  ;;  %v8201_v35 = vmin.f32 %v3107_v42, 16.0  ;;  %v8203_v40 = vadd.f32 1.0, %v2592_v38  ;;  %11338 = vst [vmem:[#allocation33_spill] sm:$0xff] %v8205_v58  ;;  %vm2839_vm1 = vweird.f32 %v8004_v44 }
 0x450   : > { %v2843_v54 = vand.u32 2147483647, %v8004_v44  ;;  %v2845_v60 = vand.u32 2147483648, %v8004_v44  ;;  %v8219_v19 = vmul.f32 0.70710677, %v8190_v53  ;;  %v2802_v45 = vsel %vm8211_vm15, %v8060_v15, %v2798_v25  ;;  %vm8229_vm2 = vmor %vm2839_vm1, %vm2840_vm13 }
 0x451   : > { %v2996_v24 = vadd.f32 0.18741608, %v2995_v14  ;;  %5882 = vrcp.f32 %v8194_v29  ;;  %v2632_v0 = vmul.f32 %v2631_v12, %v7763_v62  ;;  %v2822_v33 = vadd.f32 1.1283791, %v8114_v34 }
 0x452   : > { %v5674_v44 = vclamps-f32 %v2888_v37, 1.0  ;;  %v3033_v27 = vmul.f32 %v3032_v4, %v8053_v55  ;;  %v3083_v23 = vadd.f32 0.014752088, %v3082_v9  ;;  %v2842_v15 = vsel %vm8229_vm2, %v8066_v18, %v2838_v49  ;;  %v11343_v9 = vld [vmem:[#allocation4_spill] sm:$0xff] }
 0x453   : > { %v3046_v3 = vmul.f32 %v3045_v28, %v8053_v55  ;;  %v3120_v62 = vmul.f32 3.8918573e-05, %v8201_v35  ;;  %5884 = vrcp.f32 %v8203_v40  ;;  %v2807_v34 = vsel %vm8175_vm11, %v8107_v22, %v2802_v45 }
 0x454   : > { %v2846_v46 = vor.u32 1.1754944e-38, %v2845_v60  ;;  %v689_v42 = vmul.f32 %v8205_v58, %v8146_v41  ;;  %v3147_v38 = vmul.f32 %v8219_v19, %v8219_v19  ;;  %vm2844_vm3 = vcmp.eq.f32.partialorder %v2843_v54, 8.507059e+37 }
 0x455   : > { %v2997_v18 = vmul.f32 %v2996_v24, %v7939_v59  ;;  %v3069_v61 = vmul.f32 2.1237322e-06, %v8123_v30  ;;  %v8249_v25 = vadd.f32 1.0, %v2632_v0  ;;  %v2898_v12 = vadd.f32 1.0, %v5674_v44  ;;  %v2968_v24 = vpop.f32.mrf.mxu1 }
 0x456   : > { %v2847_v14 = vsel %vm2844_vm3, %v2846_v46, %v2842_v15  ;;  %v3034_v37 = vadd.f32 0.05243302, %v3033_v27  ;;  %v3084_v8 = vmul.f32 %v3083_v23, %v8123_v30  ;;  %v2823_v4 = vmul.f32 %v2822_v33, %v7801_v17 }
 0x457   : > { %v8252_v22 = vpop.eup %5882  ;;  %v2562_v49 = vmul.f32 0.5, %v11343_v9  ;;  %v3047_v28 = vadd.f32 0.4994258, %v3046_v3  ;;  %v3121_v20 = vadd.f32 0.001143296, %v3120_v62  ;;  %v8257_v54 = vmul.f32 %v2767_v1, %v8042_v48  ;;  %v11345_v3 = vld [vmem:[#allocation3_spill] sm:$0xff] }
 0x458   : > { %v8260_v59 = vmul.f32 %v2807_v34, %v8105_v7  ;;  %v690_v60 = vmul.f32 %v8205_v58, %v689_v42  ;;  %v8263_v45 = vmin.f32 %v3147_v38, 16.0  ;;  %v8267_v47 = vmul.f32 %v2847_v14, %v2823_v4 }
 0x459   : > { %v8265_v0 = vpop.eup %5884  ;;  %v2998_v17 = vadd.f32 1.1283791, %v2997_v18  ;;  %v3070_v33 = vadd.f32 0.00028619796, %v3069_v61  ;;  %5886 = vrcp.f32 %v8249_v25  ;;  %v8270_v44 = vmul.f32 %v2898_v12, %v2562_v49  ;;  %v11350_v12 = vld [vmem:[#allocation6_spill] sm:$0xff] }
 0x45a   : > { %v3011_v48 = vmul.f32 %v8252_v22, %v8194_v29  ;;  %v3035_v7 = vmul.f32 %v3034_v37, %v8053_v55  ;;  %v3085_v1 = vadd.f32 0.112945676, %v3084_v8  ;;  %v3021_v27 = vand.u32 2147483648, %v8194_v29 }
 0x45b   : > { %11344 = vst [vmem:[#allocation4_spill] sm:$0xff] %v8270_v44  ;;  %v3048_v23 = vmul.f32 %v3047_v28, %v8053_v55  ;;  %v3122_v15 = vmul.f32 %v3121_v20, %v8201_v35  ;;  %v8279_v62 = vadd.f32 %v2968_v24, %v11345_v3  ;;  %v8281_v34 = vmul.f32 0.5, %v690_v60  ;;  %v4207_v44 = vpop.xlane.xlu0 %4206 }
 0x45c   : > { %v8284_v46 = vmul.f32 0.5, %v7870_v26  ;;  %v3160_v42 = vmul.f32 3.8918573e-05, %v8263_v45  ;;  %v2595_v38 = vmul.f32 %v8265_v0, %v8203_v40  ;;  %v8290_v18 = vmul.f32 %v2998_v17, %v7897_v39 }
 0x45d   : > { %11346 = vst [vmem:[#allocation34_spill] sm:$0xff] %v8279_v62  ;;  %v8293_v61 = vmul.f32 0.5, %v7966_v52  ;;  %v3071_v14 = vmul.f32 %v3070_v33, %v8123_v30  ;;  %v8298_v37 = vadd.f32 %v8141_v6, %v11350_v12  ;;  %v3012_v8 = vsub.f32 1.0, %v3011_v48 }
 0x45e   : > { %11347 = vst [vmem:[#allocation35_spill] sm:$0xff] %v8281_v34  ;;  %v3019_v26 = vand.u32 2147483647, %v8194_v29  ;;  %v3036_v4 = vadd.f32 0.18741608, %v3035_v7  ;;  %v3086_v9 = vmul.f32 %v3085_v1, %v8123_v30  ;;  %v8304_v28 = vor.u32 1.1754944e-38, %v3021_v27 }
 0x45f   : > { %11348 = vst [vmem:[#allocation36_spill] sm:$0xff] %v8284_v46  ;;  %v8302_v49 = vpop.eup %5886  ;;  %v8306_v39 = vadd.f32 1.0, %v3048_v23  ;;  %v3123_v52 = vadd.f32 0.014752088, %v3122_v15  ;;  %v8309_v20 = vmul.f32 0.70710677, %v8279_v62  ;;  %vm3015_vm4 = vweird.f32 %v8194_v29 }
 0x460   : > { %11349 = vst [vmem:[#allocation37_spill] sm:$0xff] %v8293_v61  ;;  %v8312_v60 = vmul.f32 0.5, %v8047_v50  ;;  %v3161_v6 = vadd.f32 0.001143296, %v3160_v42  ;;  %v2596_v24 = vsub.f32 1.0, %v2595_v38  ;;  %v2605_v17 = vand.u32 2147483648, %v8203_v40 }
 0x461   : > { %v3072_v33 = vadd.f32 0.0036580483, %v3071_v14  ;;  %v8317_v48 = vmul.f32 0.70710677, %v8298_v37  ;;  %v2603_v7 = vand.u32 2147483647, %v8203_v40  ;;  %v3013_v1 = vmul.f32 %v8252_v22, %v3012_v8 }
 0x462   : > { %11351 = vst [vmem:[#allocation6_spill] sm:$0xff] %v8312_v60  ;;  %v3087_v27 = vadd.f32 0.4994258, %v3086_v9  ;;  %v3109_v23 = vmul.f32 2.1237322e-06, %v8201_v35  ;;  %v2635_v50 = vmul.f32 %v8302_v49, %v8249_v25  ;;  %vm2599_vm5 = vweird.f32 %v8203_v40 }
 0x463   : > { %v3037_v15 = vmul.f32 %v3036_v4, %v8053_v55  ;;  %5888 = vrcp.f32 %v8306_v39  ;;  %v3124_v42 = vmul.f32 %v3123_v52, %v8201_v35  ;;  %v3267_v38 = vmul.f32 %v8309_v20, %v8309_v20  ;;  %v11352_v55 = vld [vmem:[#allocation10_spill] sm:$0xff]  ;;  %v4201_v52 = vpop.xlane.xlu1 %4200 }
 0x464   : > { %vm3016_vm6 = vweird.f32 %v8252_v22  ;;  %v3162_v14 = vmul.f32 %v3161_v6, %v8263_v45  ;;  %v2597_v8 = vmul.f32 %v8265_v0, %v2596_v24  ;;  %v2606_v9 = vor.u32 1.1754944e-38, %v2605_v17 }
 0x465   : > { %v3073_v5 = vmul.f32 %v3072_v33, %v8123_v30  ;;  %v3187_v31 = vmul.f32 %v8317_v48, %v8317_v48  ;;  %v8338_v4 = vadd.f32 %v8198_v13, %v11352_v55  ;;  %v2643_v58 = vand.u32 2147483647, %v8249_v25  ;;  %vm8370_vm12 = vmor %vm3015_vm4, %vm3016_vm6 }
 0x466   : > { %v3088_v41 = vmul.f32 %v3087_v27, %v8123_v30  ;;  %v3110_v34 = vadd.f32 0.00028619796, %v3109_v23  ;;  %v2636_v6 = vsub.f32 1.0, %v2635_v50  ;;  %v2645_v24 = vand.u32 2147483648, %v8249_v25 }
 0x467   : > { %vm8343_vm7 = vcmp.eq.f32.partialorder %v2603_v7, 8.507059e+37  ;;  %v3014_v33 = vadd.f32 %v8252_v22, %v3013_v1  ;;  %vm8348_vm9 = vcmp.eq.f32.partialorder %v3019_v26, 8.507059e+37  ;;  %v3038_v13 = vadd.f32 1.1283791, %v3037_v15 }
 0x468   : > { %v3125_v61 = vadd.f32 0.112945676, %v3124_v42  ;;  %v8352_v3 = vmin.f32 %v3267_v38, 16.0  ;;  %v3163_v27 = vadd.f32 0.014752088, %v3162_v14  ;;  %v4245_v23 = vmul.f32 %v4201_v52, %v6162_v16 }
 0x469   : > { %vm2639_vm10 = vweird.f32 %v8249_v25  ;;  %v2598_v7 = vadd.f32 %v8265_v0, %v2597_v8  ;;  %vm2600_vm11 = vweird.f32 %v8265_v0  ;;  %v8358_v50 = vpop.eup %5888  ;;  %v3074_v1 = vadd.f32 0.05243302, %v3073_v5  ;;  %v8377_v5 = vpop.f32.mrf.mxu3 }
 0x46a   : > { %v8360_v26 = vmin.f32 %v3187_v31, 16.0  ;;  %v8363_v46 = vmul.f32 0.70710677, %v8338_v4  ;;  %v4247_v15 = vmul.f32 %v4207_v44, %v6162_v16  ;;  %v8374_v38 = vadd.f32 1.0, %v3088_v41  ;;  %vm8392_vm13 = vmor %vm2599_vm5, %vm2600_vm11 }
 0x46b   : > { %v3111_v14 = vmul.f32 %v3110_v34, %v8201_v35  ;;  %v2637_v31 = vmul.f32 %v8302_v49, %v2636_v6  ;;  %v2646_v8 = vor.u32 1.1754944e-38, %v2645_v24  ;;  %v3018_v44 = vsel %vm8370_vm12, %v8252_v22, %v3014_v33  ;;  %v11362_v6 = vld [vmem:[#allocation16_spill] sm:$0xff] }
 0x46c   : > { %11357 = vst [vmem:[#allocation38_spill] sm:$0xff] %v8363_v46  ;;  %v8384_v52 = vmul.f32 %v3038_v13, %v7998_v56  ;;  %v3126_v29 = vmul.f32 %v3125_v61, %v8201_v35  ;;  %v3280_v62 = vmul.f32 3.8918573e-05, %v8352_v3  ;;  %v3051_v34 = vmul.f32 %v8358_v50, %v8306_v39  ;;  %v11364_v13 = vld [vmem:[#allocation19_spill] sm:$0xff] }
 0x46d   : > { %v3164_v22 = vmul.f32 %v3163_v27, %v8263_v45  ;;  %v8400_v56 = vsub.f32 %v11362_v6, %v4245_v23  ;;  %v2602_v61 = vsel %vm8392_vm13, %v8265_v0, %v2598_v7  ;;  %v3075_v24 = vmul.f32 %v3074_v1, %v8123_v30 }
 0x46e   : > { %v3200_v40 = vmul.f32 3.8918573e-05, %v8360_v26  ;;  %v3227_v33 = vmul.f32 %v8363_v46, %v8363_v46  ;;  %v8410_v42 = vsub.f32 %v11364_v13, %v4247_v15  ;;  %vm8412_vm15 = vcmp.eq.f32.partialorder %v2643_v58, 8.507059e+37 }
 0x46f   : > { %11363 = vst [vmem:[#allocation39_spill] sm:$0xff] %v8400_v56  ;;  %5890 = vrcp.f32 %v8374_v38  ;;  %v3112_v27 = vadd.f32 0.0036580483, %v3111_v14  ;;  %v2638_v23 = vadd.f32 %v8302_v49, %v2637_v31  ;;  %vm2640_vm1 = vweird.f32 %v8302_v49 }
 0x470   : > { %11365 = vst [vmem:[#allocation40_spill] sm:$0xff] %v8410_v42  ;;  %v3127_v0 = vadd.f32 0.4994258, %v3126_v29  ;;  %v3149_v7 = vmul.f32 2.1237322e-06, %v8263_v45  ;;  %v2607_v41 = vsel %vm8343_vm7, %v2606_v9, %v2602_v61  ;;  %v3023_v58 = vsel %vm8348_vm9, %v8304_v28, %v3018_v44  ;;  %vm8433_vm2 = vmor %vm2639_vm10, %vm2640_vm1 }
 0x471   : > { %v3281_v1 = vadd.f32 0.001143296, %v3280_v62  ;;  %v3052_v15 = vsub.f32 1.0, %v3051_v34  ;;  %v3165_v13 = vadd.f32 0.112945676, %v3164_v22  ;;  %v4277_v14 = vmul.f32 %v8400_v56, %v8400_v56 }
 0x472   : > { %v3076_v6 = vadd.f32 0.18741608, %v3075_v24  ;;  %v3201_v31 = vadd.f32 0.001143296, %v3200_v40  ;;  %v8427_v46 = vmin.f32 %v3227_v33, 16.0  ;;  %v4279_v29 = vmul.f32 %v8410_v42, %v8410_v42  ;;  %v2115_v33 = vpop.f32.mrf.mxu3  ;;  %v11383_v42 = vld [vmem:[#allocation26_spill] sm:$0xff] }
 0x473   : > { %v3113_v28 = vmul.f32 %v3112_v27, %v8201_v35  ;;  %v4295_v60 = vsel %vm11182_vm0, %v4277_v14, 0.0  ;;  %v2642_v9 = vsel %vm8433_vm2, %v8302_v49, %v2638_v23  ;;  %v2608_v17 = vmul.f32 %v2607_v41, %v7911_v21 }
 0x474   : > { %v3128_v44 = vmul.f32 %v3127_v0, %v8201_v35  ;;  %v3150_v34 = vadd.f32 0.00028619796, %v3149_v7  ;;  %v3282_v22 = vmul.f32 %v3281_v1, %v8352_v3  ;;  %4296 = vadd.xlane.f32.xlu1 %v4295_v60  ;;  %v4301_v25 = vsel %vm11182_vm0, %v4279_v29, 0.0  ;;  %v4204_v7 = vpop.xlane.xlu1 %4203 }
 0x475   : > { %v8446_v61 = vpop.eup %5890  ;;  %vm3055_vm3 = vweird.f32 %v8306_v39  ;;  %v3059_v24 = vand.u32 2147483647, %v8306_v39  ;;  %v3061_v40 = vand.u32 2147483648, %v8306_v39  ;;  %v3166_v49 = vmul.f32 %v3165_v13, %v8263_v45  ;;  %4302 = vadd.xlane.f32.xlu2 %v4301_v25 }
 0x476   : > { %v8453_v21 = vmul.f32 %v3023_v58, %v8290_v18  ;;  %v3053_v27 = vmul.f32 %v8358_v50, %v3052_v15  ;;  %v3202_v23 = vmul.f32 %v3201_v31, %v8360_v26  ;;  %v3240_v0 = vmul.f32 3.8918573e-05, %v8427_v46 }
 0x477   : > { %v3077_v1 = vmul.f32 %v3076_v6, %v8123_v30  ;;  %v3114_v41 = vadd.f32 0.05243302, %v3113_v28  ;;  %v2647_v14 = vsel %vm8412_vm15, %v2646_v8, %v2642_v9  ;;  %v5667_v29 = vclamps-f32 %v2608_v17, 1.0  ;;  %v11372_v30 = vld [vmem:[#allocation18_spill] sm:$0xff] }
 0x478   : > { %v3091_v13 = vmul.f32 %v8446_v61, %v8374_v38  ;;  %v8463_v62 = vadd.f32 1.0, %v3128_v44  ;;  %v3151_v18 = vmul.f32 %v3150_v34, %v8263_v45  ;;  %v3283_v58 = vadd.f32 0.014752088, %v3282_v22 }
 0x479   : > { %vm8466_vm4 = vcmp.eq.f32.partialorder %v3059_v24, 8.507059e+37  ;;  %v3062_v31 = vor.u32 1.1754944e-38, %v3061_v40  ;;  %v3167_v60 = vadd.f32 0.4994258, %v3166_v49  ;;  %v2096_v6 = vadd.f32 %v8377_v5, %v11372_v30 }
 0x47a   : > { %v4246_v55 = vmul.f32 %v4204_v7, %v6162_v16  ;;  %vm3056_vm5 = vweird.f32 %v8358_v50  ;;  %v3203_v8 = vadd.f32 0.014752088, %v3202_v23  ;;  %v3241_v28 = vadd.f32 0.001143296, %v3240_v0  ;;  %v6045_v23 = vld [vmem:[%s6149_s15 + $0x28] sm:$0xff] }
 0x47b   : > { %v2648_v9 = vmul.f32 %v2647_v14, %v7918_v2  ;;  %v3054_v17 = vadd.f32 %v8358_v50, %v3053_v27  ;;  %v3078_v44 = vadd.f32 1.1283791, %v3077_v1  ;;  %v3115_v34 = vmul.f32 %v3114_v41, %v8201_v35  ;;  %v11374_v2 = vld [vmem:[#allocation25_spill] sm:$0xff]  ;;  %vm8491_vm6 = vmor %vm3055_vm3, %vm3056_vm5 }
 0x47c   : > { %v2891_v22 = vadd.f32 1.0, %v5667_v29  ;;  %v3092_v25 = vsub.f32 1.0, %v3091_v13  ;;  %5892 = vrcp.f32 %v8463_v62  ;;  %v3152_v24 = vadd.f32 0.0036580483, %v3151_v18  ;;  %v8509_v18 = vpop.f32.mrf.mxu3 }
 0x47d   : > { %v3284_v5 = vmul.f32 %v3283_v58, %v8352_v3  ;;  %v3168_v40 = vmul.f32 %v3167_v60, %v8263_v45  ;;  %v3189_v49 = vmul.f32 2.1237322e-06, %v8360_v26  ;;  %v8482_v0 = vadd.f32 %v6045_v23, %v2096_v6 }
 0x47e   : > { %v8485_v7 = vsub.f32 %v11374_v2, %v4246_v55  ;;  %v8496_v1 = vmul.f32 0.5, %v8135_v51  ;;  %v3204_v41 = vmul.f32 %v3203_v8, %v8360_v26  ;;  %v3242_v14 = vmul.f32 %v3241_v28, %v8427_v46 }
 0x47f   : > { %11373 = vst [vmem:[#allocation41_spill] sm:$0xff] %v8482_v0  ;;  %v8501_v29 = vadd.f32 %v2115_v33, %v6271_v57  ;;  %v3058_v13 = vsel %vm8491_vm6, %v8358_v50, %v3054_v17  ;;  %v8507_v39 = vmul.f32 %v3078_v44, %v8073_v43  ;;  %v5668_v58 = vclamps-f32 %v2648_v9, 1.0 }
 0x480   : > { %11375 = vst [vmem:[#allocation42_spill] sm:$0xff] %v8485_v7  ;;  %v8512_v51 = vmul.f32 %v2891_v22, %v7873_v11  ;;  %v3093_v60 = vmul.f32 %v8446_v61, %v3092_v25  ;;  %v3116_v6 = vadd.f32 0.18741608, %v3115_v34  ;;  %v3153_v55 = vmul.f32 %v3152_v24, %v8263_v45 }
 0x481   : > { %v3285_v33 = vadd.f32 0.112945676, %v3284_v5  ;;  %v8516_v8 = vadd.f32 1.0, %v3168_v40  ;;  %v3190_v28 = vadd.f32 0.00028619796, %v3189_v49  ;;  %v4211_v50 = vsel %vm11182_vm0, %v8482_v0, 0.0 }
 0x482   : > { %11378 = vst [vmem:[#allocation43_spill] sm:$0xff] %v8512_v51  ;;  %v4278_v43 = vmul.f32 %v8485_v7, %v8485_v7  ;;  %v8522_v17 = vpop.eup %5892  ;;  %v3063_v11 = vsel %vm8466_vm4, %v3062_v31, %v3058_v13  ;;  %v3205_v9 = vadd.f32 0.112945676, %v3204_v41  ;;  %v3243_v44 = vadd.f32 0.014752088, %v3242_v14  ;;  %4212 = vadd.xlane.f32.xlu1 %v4211_v50  ;;  %v11385_v7 = vld [vmem:[#allocation27_spill] sm:$0xff] }
 0x483   : > { %v8527_v34 = vmul.f32 0.70710677, %v8501_v29  ;;  %vm3095_vm7 = vweird.f32 %v8374_v38  ;;  %v3099_v22 = vand.u32 2147483647, %v8374_v38  ;;  %v5669_v24 = vclamps-f32 %v8030_v32, 1.0 }
 0x484   : > { %v4298_v25 = vsel %vm11182_vm0, %v4278_v43, 0.0  ;;  %vm3096_vm9 = vweird.f32 %v8446_v61  ;;  %v3101_v5 = vand.u32 2147483648, %v8374_v38  ;;  %v3117_v15 = vmul.f32 %v3116_v6, %v8201_v35 }
 0x485   : > { %v3286_v31 = vmul.f32 %v3285_v33, %v8352_v3  ;;  %4299 = vadd.xlane.f32.xlu0 %v4298_v25  ;;  %v3094_v40 = vadd.f32 %v8446_v61, %v3093_v60  ;;  %v3131_v49 = vmul.f32 %v8522_v17, %v8463_v62  ;;  %v3154_v23 = vadd.f32 0.05243302, %v3153_v55  ;;  %vm8558_vm11 = vmor %vm3095_vm7, %vm3096_vm9 }
 0x486   : > { %v3191_v27 = vmul.f32 %v3190_v28, %v8360_v26  ;;  %5894 = vrcp.f32 %v8516_v8  ;;  %v3206_v32 = vmul.f32 %v3205_v9, %v8360_v26  ;;  %v3244_v41 = vmul.f32 %v3243_v44, %v8427_v46  ;;  %v2121_v44 = vpop.f32.mrf.mxu3 }
 0x487   : > { %v2155_v35 = vmul.f32 %v8527_v34, %v8527_v34  ;;  %vm8546_vm10 = vcmp.eq.f32.partialorder %v3099_v22, 8.507059e+37  ;;  %v3229_v13 = vmul.f32 2.1237322e-06, %v8427_v46  ;;  %v2893_v60 = vadd.f32 1.0, %v5669_v24 }
 0x488   : > { %v2892_v6 = vadd.f32 1.0, %v5668_v58  ;;  %v8552_v55 = vmul.f32 %v3063_v11, %v8384_v52  ;;  %v3118_v28 = vadd.f32 1.1283791, %v3117_v15  ;;  %v3269_v50 = vmul.f32 2.1237322e-06, %v8352_v3 }
 0x489   : > { %v3287_v43 = vadd.f32 0.4994258, %v3286_v31  ;;  %v3098_v9 = vsel %vm8558_vm11, %v8446_v61, %v3094_v40  ;;  %v3102_v58 = vor.u32 1.1754944e-38, %v3101_v5  ;;  %v3155_v52 = vmul.f32 %v3154_v23, %v8263_v45  ;;  %v11387_v23 = vld [vmem:[#allocation30_spill] sm:$0xff] }
 0x48a   : > { %v3192_v11 = vadd.f32 0.0036580483, %v3191_v27  ;;  %v3132_v22 = vsub.f32 1.0, %v3131_v49  ;;  %v3207_v25 = vadd.f32 0.4994258, %v3206_v32  ;;  %v8567_v24 = vmin.f32 %v2155_v35, 16.0 }
 0x48b   : > { %v3245_v38 = vadd.f32 0.112945676, %v3244_v41  ;;  %v8570_v2 = vmul.f32 0.5, %v8190_v53  ;;  %v3230_v15 = vadd.f32 0.00028619796, %v3229_v13  ;;  %v8573_v31 = vmul.f32 %v2893_v60, %v11383_v42 }
 0x48c   : > { %v8576_v33 = vmul.f32 %v2892_v6, %v11385_v7  ;;  %v8578_v61 = vpop.eup %5894  ;;  %v8581_v5 = vmul.f32 %v3118_v28, %v8163_v10  ;;  %v3270_v40 = vadd.f32 0.00028619796, %v3269_v50  ;;  %v3288_v49 = vmul.f32 %v3287_v43, %v8352_v3 }
 0x48d   : > { %11384 = vst [vmem:[#allocation26_spill] sm:$0xff] %v8573_v31  ;;  %v5670_v27 = vclamps-f32 %v11387_v23, 1.0  ;;  %v3103_v53 = vsel %vm8546_vm10, %v3102_v58, %v3098_v9  ;;  %vm3135_vm12 = vweird.f32 %v8463_v62  ;;  %v3156_v42 = vadd.f32 0.18741608, %v3155_v52  ;;  %v11388_v9 = vld [vmem:[#allocation14_spill] sm:$0xff] }
 0x48e   : > { %11386 = vst [vmem:[#allocation27_spill] sm:$0xff] %v8576_v33  ;;  %v3193_v32 = vmul.f32 %v3192_v11, %v8360_v26  ;;  %v3133_v7 = vmul.f32 %v8522_v17, %v3132_v22  ;;  %v3208_v41 = vmul.f32 %v3207_v25, %v8360_v26  ;;  %v3246_v10 = vmul.f32 %v3245_v38, %v8427_v46  ;;  %v2124_v23 = vpop.f32.mrf.mxu3 }
 0x48f   : > { %v2168_v35 = vmul.f32 3.8918573e-05, %v8567_v24  ;;  %v3139_v13 = vand.u32 2147483647, %v8463_v62  ;;  %v3171_v60 = vmul.f32 %v8578_v61, %v8516_v8  ;;  %v3231_v14 = vmul.f32 %v3230_v15, %v8427_v46 }
 0x490   : > { %v5671_v6 = vclamps-f32 %v8257_v54, 1.0  ;;  %v3141_v28 = vand.u32 2147483648, %v8463_v62  ;;  %v3271_v50 = vmul.f32 %v3270_v40, %v8352_v3  ;;  %v8600_v43 = vadd.f32 1.0, %v3288_v49 }
 0x491   : > { %v8604_v58 = vadd.f32 %v8509_v18, %v11388_v9  ;;  %v8607_v52 = vmul.f32 %v3103_v53, %v8507_v39  ;;  %vm3136_vm13 = vweird.f32 %v8522_v17  ;;  %v3157_v11 = vmul.f32 %v3156_v42, %v8263_v45  ;;  %v11389_v53 = vld [vmem:[#allocation12_spill] sm:$0xff] }
 0x492   : > { %v3194_v22 = vadd.f32 0.05243302, %v3193_v32  ;;  %v3134_v54 = vadd.f32 %v8522_v17, %v3133_v7  ;;  %v8612_v25 = vadd.f32 1.0, %v3208_v41  ;;  %v3247_v38 = vadd.f32 0.4994258, %v3246_v10  ;;  %vm8625_vm15 = vmor %vm3135_vm12, %vm3136_vm13 }
 0x493   : > { %v2169_v15 = vadd.f32 0.001143296, %v2168_v35  ;;  %v3172_v40 = vsub.f32 1.0, %v3171_v60  ;;  %v3232_v49 = vadd.f32 0.0036580483, %v3231_v14  ;;  %v2895_v56 = vadd.f32 1.0, %v5671_v6 }
 0x494   : > { %v2894_v18 = vadd.f32 1.0, %v5670_v27  ;;  %v3272_v0 = vadd.f32 0.0036580483, %v3271_v50  ;;  %5896 = vrcp.f32 %v8600_v43  ;;  %v8616_v39 = vmul.f32 0.70710677, %v8604_v58  ;;  %v11395_v14 = vld [vmem:[#allocation24_spill] sm:$0xff] }
 0x495   : > { %v8619_v45 = vadd.f32 %v2121_v44, %v11389_v53  ;;  %vm8629_vm1 = vcmp.eq.f32.partialorder %v3139_v13, 8.507059e+37  ;;  %v3142_v27 = vor.u32 1.1754944e-38, %v3141_v28  ;;  %v3158_v7 = vadd.f32 1.1283791, %v3157_v11  ;;  %v11397_v11 = vld [vmem:[#allocation7_spill] sm:$0xff] }
 0x496   : > { %v3195_v41 = vmul.f32 %v3194_v22, %v8360_v26  ;;  %v3138_v44 = vsel %vm8625_vm15, %v8522_v17, %v3134_v54  ;;  %5898 = vrcp.f32 %v8612_v25  ;;  %v3248_v62 = vmul.f32 %v3247_v38, %v8427_v46 }
 0x497   : > { %v2170_v10 = vmul.f32 %v2169_v15, %v8567_v24  ;;  %v3173_v35 = vmul.f32 %v8578_v61, %v3172_v40  ;;  %v8642_v13 = vmul.f32 0.5, %v8298_v37  ;;  %v3233_v60 = vmul.f32 %v3232_v49, %v8427_v46 }
 0x498   : > { %v8646_v6 = vmul.f32 %v2894_v18, %v11395_v14  ;;  %v3273_v28 = vmul.f32 %v3272_v0, %v8352_v3  ;;  %v2195_v17 = vmul.f32 %v8616_v39, %v8616_v39  ;;  %v8652_v50 = vmul.f32 0.70710677, %v8619_v45 }
 0x499   : > { %11394 = vst [vmem:[#allocation30_spill] sm:$0xff] %v8642_v13  ;;  %v8655_v22 = vmul.f32 %v2895_v56, %v11397_v11  ;;  %v3143_v37 = vsel %vm8629_vm1, %v3142_v27, %v3138_v44  ;;  %v3159_v54 = vmul.f32 %v3158_v7, %v8219_v19  ;;  %v3196_v38 = vadd.f32 0.18741608, %v3195_v41 }
 0x49a   : > { %11396 = vst [vmem:[#allocation24_spill] sm:$0xff] %v8646_v6  ;;  %v5672_v15 = vclamps-f32 %v8260_v59, 1.0  ;;  %v8661_v40 = vpop.eup %5896  ;;  %vm3175_vm2 = vweird.f32 %v8516_v8  ;;  %v3179_v0 = vand.u32 2147483647, %v8516_v8  ;;  %v8665_v49 = vadd.f32 1.0, %v3248_v62 }
 0x49b   : > { %11398 = vst [vmem:[#allocation7_spill] sm:$0xff] %v8655_v22  ;;  %v2171_v18 = vadd.f32 0.014752088, %v2170_v10  ;;  %v3174_v56 = vadd.f32 %v8578_v61, %v3173_v35  ;;  %vm3176_vm3 = vweird.f32 %v8578_v61  ;;  %v3234_v42 = vadd.f32 0.05243302, %v3233_v60  ;;  %v2127_v35 = vpop.f32.mrf.mxu3 }
 0x49c   : > { %v2157_v32 = vmul.f32 2.1237322e-06, %v8567_v24  ;;  %v8670_v19 = vpop.eup %5898  ;;  %v3181_v59 = vand.u32 2147483648, %v8516_v8  ;;  %v3274_v27 = vadd.f32 0.05243302, %v3273_v28  ;;  %v8673_v7 = vmin.f32 %v2195_v17, 16.0  ;;  %vm8686_vm4 = vmor %vm3175_vm2, %vm3176_vm3 }
 0x49d   : > { %v2235_v41 = vmul.f32 %v8652_v50, %v8652_v50  ;;  %v3197_v44 = vmul.f32 %v3196_v38, %v8360_v26  ;;  %v3291_v62 = vmul.f32 %v8661_v40, %v8600_v43  ;;  %v8681_v10 = vadd.f32 %v2124_v23, %v11304_v63 }
 0x49e   : > { %v5673_v60 = vclamps-f32 %v8267_v47, 1.0  ;;  %vm8690_vm5 = vcmp.eq.f32.partialorder %v3179_v0, 8.507059e+37  ;;  %5900 = vrcp.f32 %v8665_v49  ;;  %v2172_v26 = vmul.f32 %v2171_v18, %v8567_v24 }
 0x49f   : > { %v2896_v17 = vadd.f32 1.0, %v5672_v15  ;;  %v3178_v23 = vsel %vm8686_vm4, %v8578_v61, %v3174_v56  ;;  %v3211_v47 = vmul.f32 %v8670_v19, %v8612_v25  ;;  %v3235_v8 = vmul.f32 %v3234_v42, %v8427_v46 }
 0x4a0   : > { %v2158_v11 = vadd.f32 0.00028619796, %v2157_v32  ;;  %v3182_v38 = vor.u32 1.1754944e-38, %v3181_v59  ;;  %v3275_v0 = vmul.f32 %v3274_v27, %v8352_v3  ;;  %v2208_v16 = vmul.f32 3.8918573e-05, %v8673_v7 }
 0x4a1   : > { %v8704_v30 = vmin.f32 %v2235_v41, 16.0  ;;  %v3198_v51 = vadd.f32 1.1283791, %v3197_v44  ;;  %v3292_v18 = vsub.f32 1.0, %v3291_v62  ;;  %v8707_v15 = vmul.f32 0.70710677, %v8681_v10 }
 0x4a2   : > { %v2897_v14 = vadd.f32 1.0, %v5673_v60  ;;  %v8710_v61 = vmul.f32 %v3143_v37, %v8581_v5  ;;  %v3183_v56 = vsel %vm8690_vm5, %v3182_v38, %v3178_v23  ;;  %v8715_v42 = vmul.f32 0.5, %v8338_v4  ;;  %v11404_v37 = vld [vmem:[#allocation23_spill] sm:$0xff]  ;;  %v11406_v23 = vld [vmem:[#allocation29_spill] sm:$0xff] }
 0x4a3   : > { %v2173_v32 = vadd.f32 0.112945676, %v2172_v26  ;;  %v3212_v59 = vsub.f32 1.0, %v3211_v47  ;;  %v3221_v27 = vand.u32 2147483648, %v8612_v25  ;;  %v3236_v41 = vadd.f32 0.18741608, %v3235_v8 }
 0x4a4   : > { %11403 = vst [vmem:[#allocation44_spill] sm:$0xff] %v8715_v42  ;;  %v2159_v44 = vmul.f32 %v2158_v11, %v8567_v24  ;;  %v8719_v62 = vpop.eup %5900  ;;  %v3276_v33 = vadd.f32 0.18741608, %v3275_v0  ;;  %v2209_v60 = vadd.f32 0.001143296, %v2208_v16  ;;  %v8723_v31 = vmul.f32 %v2896_v17, %v11404_v37 }
 0x4a5   : > { %v2248_v5 = vmul.f32 3.8918573e-05, %v8704_v30  ;;  %v8726_v28 = vmul.f32 %v3198_v51, %v8317_v48  ;;  %v3293_v4 = vmul.f32 %v8661_v40, %v3292_v18  ;;  %v2275_v26 = vmul.f32 %v8707_v15, %v8707_v15  ;;  %v2130_v18 = vpop.f32.mrf.mxu3 }
 0x4a6   : > { %11405 = vst [vmem:[#allocation23_spill] sm:$0xff] %v8723_v31  ;;  %v8732_v47 = vmul.f32 %v2897_v14, %v11406_v23  ;;  %v8734_v8 = vmul.f32 %v3183_v56, %v3159_v54  ;;  %vm3215_vm6 = vweird.f32 %v8612_v25  ;;  %v3219_v16 = vand.u32 2147483647, %v8612_v25 }
 0x4a7   : > { %v2174_v17 = vmul.f32 %v2173_v32, %v8567_v24  ;;  %v8740_v11 = vadd.f32 %v2127_v35, %v11305_v36  ;;  %v3213_v48 = vmul.f32 %v8670_v19, %v3212_v59  ;;  %v3222_v51 = vor.u32 1.1754944e-38, %v3221_v27 }
 0x4a8   : > { %11407 = vst [vmem:[#allocation29_spill] sm:$0xff] %v8732_v47  ;;  %v3251_v38 = vmul.f32 %v8719_v62, %v8665_v49  ;;  %v2160_v0 = vadd.f32 0.0036580483, %v2159_v44  ;;  %v3237_v54 = vmul.f32 %v3236_v41, %v8427_v46  ;;  %v3277_v14 = vmul.f32 %v3276_v33, %v8352_v3 }
 0x4a9   : > { %v2210_v56 = vmul.f32 %v2209_v60, %v8673_v7  ;;  %v2249_v37 = vadd.f32 0.001143296, %v2248_v5  ;;  %v3294_v32 = vadd.f32 %v8661_v40, %v3293_v4  ;;  %vm3296_vm7 = vweird.f32 %v8661_v40 }
 0x4aa   : > { %v2197_v35 = vmul.f32 2.1237322e-06, %v8673_v7  ;;  %v8751_v59 = vmin.f32 %v2275_v26, 16.0  ;;  %v3301_v27 = vand.u32 2147483648, %v8600_v43  ;;  %v2175_v23 = vadd.f32 0.4994258, %v2174_v17 }
 0x4ab   : > { %v8755_v44 = vmul.f32 0.70710677, %v8740_v11  ;;  %v8758_v46 = vadd.f32 %v2130_v18, %v11350_v12  ;;  %vm8760_vm9 = vcmp.eq.f32.partialorder %v3219_v16, 8.507059e+37  ;;  %v3252_v33 = vsub.f32 1.0, %v3251_v38 }
 0x4ac   : > { %vm3295_vm10 = vweird.f32 %v8600_v43  ;;  %v3299_v41 = vand.u32 2147483647, %v8600_v43  ;;  %v2161_v60 = vmul.f32 %v2160_v0, %v8567_v24  ;;  %v3214_v5 = vadd.f32 %v8670_v19, %v3213_v48 }
 0x4ad   : > { %vm3216_vm11 = vweird.f32 %v8670_v19  ;;  %vm8769_vm12 = vmor %vm3295_vm10, %vm3296_vm7  ;;  %v2211_v26 = vadd.f32 0.014752088, %v2210_v56  ;;  %v2250_v16 = vmul.f32 %v2249_v37, %v8704_v30  ;;  %v3278_v17 = vadd.f32 1.1283791, %v3277_v14 }
 0x4ae   : > { %v3298_v38 = vsel %vm8769_vm12, %v8661_v40, %v3294_v32  ;;  %v2198_v18 = vadd.f32 0.00028619796, %v2197_v35  ;;  %v2288_v43 = vmul.f32 3.8918573e-05, %v8751_v59  ;;  %v3302_v0 = vor.u32 1.1754944e-38, %v3301_v27  ;;  %vm8786_vm13 = vmor %vm3215_vm6, %vm3216_vm11 }
 0x4af   : > { %v2176_v48 = vmul.f32 %v2175_v23, %v8567_v24  ;;  %v2315_v6 = vmul.f32 %v8755_v44, %v8755_v44  ;;  %v8782_v22 = vmul.f32 0.70710677, %v8758_v46  ;;  %v3238_v56 = vadd.f32 1.1283791, %v3237_v54  ;;  %v2133_v54 = vpop.f32.mrf.mxu3 }
 0x4b0   : > { %v3253_v40 = vmul.f32 %v8719_v62, %v3252_v33  ;;  %vm3300_vm15 = vcmp.eq.f32.partialorder %v3299_v41, 8.507059e+37  ;;  %v2162_v37 = vadd.f32 0.05243302, %v2161_v60  ;;  %v3218_v32 = vsel %vm8786_vm13, %v8670_v19, %v3214_v5  ;;  %v11414_v19 = vld [vmem:[#allocation10_spill] sm:$0xff] }
 0x4b1   : > { %v3303_v35 = vsel %vm3300_vm15, %v3302_v0, %v3298_v38  ;;  %v2212_v27 = vmul.f32 %v2211_v26, %v8673_v7  ;;  %v2251_v23 = vadd.f32 0.014752088, %v2250_v16  ;;  %v3261_v4 = vand.u32 2147483648, %v8665_v49 }
 0x4b2   : > { %v3279_v25 = vmul.f32 %v3278_v17, %v8309_v20  ;;  %v2199_v31 = vmul.f32 %v2198_v18, %v8673_v7  ;;  %v2289_v47 = vadd.f32 0.001143296, %v2288_v43  ;;  %v8798_v13 = vadd.f32 1.0, %v2176_v48 }
 0x4b3   : > { %v8800_v33 = vmin.f32 %v2315_v6, 16.0  ;;  %v2355_v41 = vmul.f32 %v8782_v22, %v8782_v22  ;;  %v8805_v60 = vadd.f32 %v2133_v54, %v11414_v19  ;;  %v3254_v5 = vadd.f32 %v8719_v62, %v3253_v40 }
 0x4b4   : > { %vm3256_vm1 = vweird.f32 %v8719_v62  ;;  %v3304_v26 = vmul.f32 %v3303_v35, %v3279_v25  ;;  %v2163_v20 = vmul.f32 %v2162_v37, %v8567_v24  ;;  %v3223_v16 = vsel %vm8760_vm9, %v3222_v51, %v3218_v32 }
 0x4b5   : > { %v2213_v17 = vadd.f32 0.112945676, %v2212_v27  ;;  %v2252_v6 = vmul.f32 %v2251_v23, %v8704_v30  ;;  %v8814_v38 = vmul.f32 0.70710677, %v8805_v60  ;;  %vm3255_vm2 = vweird.f32 %v8665_v49 }
 0x4b6   : > { %v3259_v18 = vand.u32 2147483647, %v8665_v49  ;;  %v2200_v43 = vadd.f32 0.0036580483, %v2199_v31  ;;  %v2290_v0 = vmul.f32 %v2289_v47, %v8751_v59  ;;  %vm8819_vm3 = vmor %vm3255_vm2, %vm3256_vm1  ;;  %5902 = vrcp.f32 %v8798_v13 }
 0x4b7   : > { %v2328_v51 = vmul.f32 3.8918573e-05, %v8800_v33  ;;  %v8825_v3 = vmin.f32 %v2355_v41, 16.0  ;;  %v2395_v14 = vmul.f32 %v8814_v38, %v8814_v38  ;;  %v3258_v49 = vsel %vm8819_vm3, %v8719_v62, %v3254_v5  ;;  %v11417_v5 = vld [vmem:[#allocation38_spill] sm:$0xff] }
 0x4b8   : > { %v3262_v31 = vor.u32 1.1754944e-38, %v3261_v4  ;;  %v5692_v40 = vclamps-f32 %v3304_v26, 1.0  ;;  %v2164_v47 = vadd.f32 0.18741608, %v2163_v20  ;;  %v2214_v37 = vmul.f32 %v2213_v17, %v8673_v7  ;;  %v11418_v20 = vld [vmem:[#allocation34_spill] sm:$0xff] }
 0x4b9   : > { %v2253_v32 = vadd.f32 0.112945676, %v2252_v6  ;;  %v8833_v35 = vmin.f32 %v2395_v14, 16.0  ;;  %v5685_v27 = vclamps-f32 %v8453_v21, 1.0  ;;  %vm3260_vm4 = vcmp.eq.f32.partialorder %v3259_v18, 8.507059e+37 }
 0x4ba   : > { %v2201_v23 = vmul.f32 %v2200_v43, %v8673_v7  ;;  %v2291_v25 = vadd.f32 0.014752088, %v2290_v0  ;;  %v5686_v54 = vclamps-f32 %v8552_v55, 1.0  ;;  %v3263_v41 = vsel %vm3260_vm4, %v3262_v31, %v3258_v49 }
 0x4bb   : > { %v2329_v42 = vadd.f32 0.001143296, %v2328_v51  ;;  %v2368_v62 = vmul.f32 3.8918573e-05, %v8825_v3  ;;  %v2408_v4 = vmul.f32 3.8918573e-05, %v8833_v35  ;;  %v3239_v26 = vmul.f32 %v3238_v56, %v11417_v5 }
 0x4bc   : > { %v2978_v17 = vmul.f32 0.5, %v11418_v20  ;;  %v3314_v6 = vadd.f32 1.0, %v5692_v40  ;;  %v2165_v48 = vmul.f32 %v2164_v47, %v8567_v24  ;;  %v8843_v21 = vpop.eup %5902  ;;  %v2215_v18 = vadd.f32 0.4994258, %v2214_v37 }
 0x4bd   : > { %v2254_v43 = vmul.f32 %v2253_v32, %v8704_v30  ;;  %v2409_v0 = vadd.f32 0.001143296, %v2408_v4  ;;  %v3307_v55 = vadd.f32 1.0, %v5685_v27  ;;  %v8847_v51 = vmul.f32 %v3223_v16, %v8726_v28 }
 0x4be   : > { %v8849_v14 = vmul.f32 %v3263_v41, %v3239_v26  ;;  %v2202_v49 = vadd.f32 0.05243302, %v2201_v23  ;;  %v2292_v56 = vmul.f32 %v2291_v25, %v8751_v59  ;;  %v8853_v31 = vmul.f32 0.5, %v8501_v29  ;;  %v2136_v41 = vpop.f32.mrf.mxu3  ;;  %v11421_v29 = vld [vmem:[#allocation36_spill] sm:$0xff] }
 0x4bf   : > { %v2330_v24 = vmul.f32 %v2329_v42, %v8800_v33  ;;  %v2369_v40 = vadd.f32 0.001143296, %v2368_v62  ;;  %v3308_v47 = vadd.f32 1.0, %v5686_v54  ;;  %v8856_v37 = vmul.f32 %v3314_v6, %v2978_v17  ;;  %v11424_v17 = vld [vmem:[#allocation3_spill] sm:$0xff] }
 0x4c0   : > { %11419 = vst [vmem:[#allocation10_spill] sm:$0xff] %v8853_v31  ;;  %v2166_v32 = vadd.f32 1.1283791, %v2165_v48  ;;  %v2179_v27 = vmul.f32 %v8843_v21, %v8798_v13  ;;  %v2237_v28 = vmul.f32 2.1237322e-06, %v8704_v30  ;;  %v2216_v16 = vmul.f32 %v2215_v18, %v8673_v7  ;;  %v11425_v48 = vld [vmem:[#allocation37_spill] sm:$0xff] }
 0x4c1   : > { %11420 = vst [vmem:[#allocation38_spill] sm:$0xff] %v8856_v37  ;;  %v2255_v23 = vadd.f32 0.4994258, %v2254_v43  ;;  %v2410_v25 = vmul.f32 %v2409_v0, %v8833_v35  ;;  %v8864_v4 = vmul.f32 %v3307_v55, %v11421_v29  ;;  %v8867_v42 = vmul.f32 0.5, %v8604_v58 }
 0x4c2   : > { %v2203_v54 = vmul.f32 %v2202_v49, %v8673_v7  ;;  %v2277_v62 = vmul.f32 2.1237322e-06, %v8751_v59  ;;  %v2293_v5 = vadd.f32 0.112945676, %v2292_v56  ;;  %v2331_v26 = vadd.f32 0.014752088, %v2330_v24 }
 0x4c3   : > { %11422 = vst [vmem:[#allocation34_spill] sm:$0xff] %v8864_v4  ;;  %v2370_v20 = vmul.f32 %v2369_v40, %v8825_v3  ;;  %v8873_v6 = vadd.f32 %v2136_v41, %v11424_v17  ;;  %v8876_v18 = vmul.f32 %v3308_v47, %v11425_v48  ;;  %v8879_v43 = vmul.f32 %v2166_v32, %v8527_v34 }
 0x4c4   : > { %11423 = vst [vmem:[#allocation36_spill] sm:$0xff] %v8867_v42  ;;  %v2180_v0 = vsub.f32 1.0, %v2179_v27  ;;  %v2238_v58 = vadd.f32 0.00028619796, %v2237_v28  ;;  %v5687_v55 = vclamps-f32 %v8607_v52, 1.0  ;;  %v8882_v49 = vadd.f32 1.0, %v2216_v16 }
 0x4c5   : > { %11426 = vst [vmem:[#allocation37_spill] sm:$0xff] %v8876_v18  ;;  %v2256_v56 = vmul.f32 %v2255_v23, %v8704_v30  ;;  %v2411_v24 = vadd.f32 0.014752088, %v2410_v25  ;;  %v8886_v40 = vmul.f32 0.70710677, %v8873_v6  ;;  %v2294_v48 = vmul.f32 %v2293_v5, %v8751_v59 }
 0x4c6   : > { %v2187_v41 = vand.u32 2147483647, %v8798_v13  ;;  %v2204_v29 = vadd.f32 0.18741608, %v2203_v54  ;;  %v2278_v47 = vadd.f32 0.00028619796, %v2277_v62  ;;  %vm2183_vm5 = vweird.f32 %v8798_v13 }
 0x4c7   : > { %v2189_v34 = vand.u32 2147483648, %v8798_v13  ;;  %v2332_v52 = vmul.f32 %v2331_v26, %v8800_v33  ;;  %v2371_v32 = vadd.f32 0.014752088, %v2370_v20  ;;  %v2435_v27 = vmul.f32 %v8886_v40, %v8886_v40 }
 0x4c8   : > { %v2181_v28 = vmul.f32 %v8843_v21, %v2180_v0  ;;  %v2239_v16 = vmul.f32 %v2238_v58, %v8704_v30  ;;  %v5688_v23 = vclamps-f32 %v8710_v61, 1.0  ;;  %v3309_v25 = vadd.f32 1.0, %v5687_v55 }
 0x4c9   : > { %5904 = vrcp.f32 %v8882_v49  ;;  %v8899_v54 = vadd.f32 1.0, %v2256_v56  ;;  %v2412_v62 = vmul.f32 %v2411_v24, %v8833_v35  ;;  %v8902_v5 = vmin.f32 %v2435_v27, 16.0 }
 0x4ca   : > { %vm2184_vm6 = vweird.f32 %v8843_v21  ;;  %v2205_v26 = vmul.f32 %v2204_v29, %v8673_v7  ;;  %v2279_v20 = vmul.f32 %v2278_v47, %v8751_v59  ;;  %v2295_v0 = vadd.f32 0.4994258, %v2294_v48 }
 0x4cb   : > { %v2333_v4 = vadd.f32 0.112945676, %v2332_v52  ;;  %v2372_v58 = vmul.f32 %v2371_v32, %v8825_v3  ;;  %v2437_v61 = vmul.f32 2.1237322e-06, %v8902_v5  ;;  %v2448_v55 = vmul.f32 3.8918573e-05, %v8902_v5  ;;  %vm8927_vm9 = vmor %vm2183_vm5, %vm2184_vm6 }
 0x4cc   : > { %v2182_v56 = vadd.f32 %v8843_v21, %v2181_v28  ;;  %v2240_v18 = vadd.f32 0.0036580483, %v2239_v16  ;;  %v2317_v24 = vmul.f32 2.1237322e-06, %v8800_v33  ;;  %v3310_v27 = vadd.f32 1.0, %v5688_v23 }
 0x4cd   : > { %5906 = vrcp.f32 %v8899_v54  ;;  %v2413_v37 = vadd.f32 0.112945676, %v2412_v62  ;;  %v2438_v7 = vadd.f32 0.00028619796, %v2437_v61  ;;  %v2449_v29 = vadd.f32 0.001143296, %v2448_v55 }
 0x4ce   : > { %vm8913_vm7 = vcmp.eq.f32.partialorder %v2187_v41, 8.507059e+37  ;;  %v2206_v48 = vadd.f32 1.1283791, %v2205_v26  ;;  %v2280_v52 = vadd.f32 0.0036580483, %v2279_v20  ;;  %v2296_v32 = vmul.f32 %v2295_v0, %v8751_v59  ;;  %v11431_v0 = vld [vmem:[#allocation6_spill] sm:$0xff] }
 0x4cf   : > { %v8918_v31 = vpop.eup %5904  ;;  %v2334_v28 = vmul.f32 %v2333_v4, %v8800_v33  ;;  %v2373_v16 = vadd.f32 0.112945676, %v2372_v58  ;;  %v2439_v23 = vmul.f32 %v2438_v7, %v8902_v5  ;;  %v2450_v42 = vmul.f32 %v2449_v29, %v8902_v5 }
 0x4d0   : > { %v2190_v62 = vor.u32 1.1754944e-38, %v2189_v34  ;;  %v8932_v26 = vmul.f32 0.5, %v8619_v45  ;;  %v2318_v20 = vadd.f32 0.00028619796, %v2317_v24  ;;  %v8935_v4 = vmul.f32 %v3309_v25, %v11431_v0  ;;  %v3363_v0 = vpop.f32.mrf.mxu3 }
 0x4d1   : > { %v2186_v58 = vsel %vm8927_vm9, %v8843_v21, %v2182_v56  ;;  %v2241_v61 = vmul.f32 %v2240_v18, %v8704_v30  ;;  %v2414_v13 = vmul.f32 %v2413_v37, %v8833_v35  ;;  %v8943_v55 = vmul.f32 %v3310_v27, %v8496_v1 }
 0x4d2   : > { %11432 = vst [vmem:[#allocation6_spill] sm:$0xff] %v8935_v4  ;;  %v8946_v34 = vmul.f32 %v2206_v48, %v8616_v39  ;;  %v2219_v45 = vmul.f32 %v8918_v31, %v8882_v49  ;;  %v2440_v24 = vadd.f32 0.0036580483, %v2439_v23  ;;  %v2451_v25 = vadd.f32 0.014752088, %v2450_v42 }
 0x4d3   : > { %11433 = vst [vmem:[#allocation45_spill] sm:$0xff] %v8943_v55  ;;  %v8950_v7 = vpop.eup %5906  ;;  %v2281_v29 = vmul.f32 %v2280_v52, %v8751_v59  ;;  %v8953_v21 = vadd.f32 1.0, %v2296_v32  ;;  %v2335_v18 = vadd.f32 0.4994258, %v2334_v28  ;;  %v2374_v37 = vmul.f32 %v2373_v16, %v8825_v3 }
 0x4d4   : > { %v2227_v1 = vand.u32 2147483647, %v8882_v49  ;;  %v2319_v56 = vmul.f32 %v2318_v20, %v8800_v33  ;;  %v2357_v39 = vmul.f32 2.1237322e-06, %v8825_v3  ;;  %v2452_v27 = vmul.f32 %v2451_v25, %v8902_v5 }
 0x4d5   : > { %v2191_v42 = vsel %vm8913_vm7, %v2190_v62, %v2186_v58  ;;  %v2242_v48 = vadd.f32 0.05243302, %v2241_v61  ;;  %v2397_v23 = vmul.f32 2.1237322e-06, %v8833_v35  ;;  %v2415_v52 = vadd.f32 0.4994258, %v2414_v13 }
 0x4d6   : > { %v2220_v32 = vsub.f32 1.0, %v2219_v45  ;;  %v2259_v28 = vmul.f32 %v8950_v7, %v8899_v54  ;;  %v2441_v16 = vmul.f32 %v2440_v24, %v8902_v5  ;;  %v2453_v41 = vadd.f32 0.112945676, %v2452_v27 }
 0x4d7   : > { %v2282_v20 = vadd.f32 0.05243302, %v2281_v29  ;;  %5908 = vrcp.f32 %v8953_v21  ;;  %v2336_v25 = vmul.f32 %v2335_v18, %v8800_v33  ;;  %v2375_v4 = vadd.f32 0.4994258, %v2374_v37 }
 0x4d8   : > { %vm2223_vm10 = vweird.f32 %v8882_v49  ;;  %v2229_v47 = vand.u32 2147483648, %v8882_v49  ;;  %v2320_v62 = vadd.f32 0.0036580483, %v2319_v56  ;;  %v2358_v58 = vadd.f32 0.00028619796, %v2357_v39 }
 0x4d9   : > { %v2454_v61 = vmul.f32 %v2453_v41, %v8902_v5  ;;  %v2243_v13 = vmul.f32 %v2242_v48, %v8704_v30  ;;  %v2398_v45 = vadd.f32 0.00028619796, %v2397_v23  ;;  %v2416_v24 = vmul.f32 %v2415_v52, %v8833_v35 }
 0x4da   : > { %v5689_v29 = vclamps-f32 %v8734_v8, 1.0  ;;  %v8975_v27 = vmul.f32 %v2191_v42, %v8879_v43  ;;  %v2221_v18 = vmul.f32 %v8918_v31, %v2220_v32  ;;  %v2442_v37 = vadd.f32 0.05243302, %v2441_v16 }
 0x4db   : > { %v2455_v55 = vadd.f32 0.4994258, %v2454_v61  ;;  %v2260_v17 = vsub.f32 1.0, %v2259_v28  ;;  %v2283_v56 = vmul.f32 %v2282_v20, %v8751_v59  ;;  %v8979_v39 = vadd.f32 1.0, %v2336_v25 }
 0x4dc   : > { %v2376_v41 = vmul.f32 %v2375_v4, %v8825_v3  ;;  %v2230_v48 = vor.u32 1.1754944e-38, %v2229_v47  ;;  %v2321_v23 = vmul.f32 %v2320_v62, %v8800_v33  ;;  %v2359_v52 = vmul.f32 %v2358_v58, %v8825_v3 }
 0x4dd   : > { %v2456_v8 = vmul.f32 %v2455_v55, %v8902_v5  ;;  %v8985_v43 = vpop.eup %5908  ;;  %vm8987_vm11 = vcmp.eq.f32.partialorder %v2227_v1, 8.507059e+37  ;;  %v2244_v32 = vadd.f32 0.18741608, %v2243_v13  ;;  %v2399_v28 = vmul.f32 %v2398_v45, %v8833_v35  ;;  %v3366_v55 = vpop.f32.mrf.mxu3 }
 0x4de   : > { %v8992_v16 = vadd.f32 1.0, %v2416_v24  ;;  %v3311_v20 = vadd.f32 1.0, %v5689_v29  ;;  %v2222_v4 = vadd.f32 %v8918_v31, %v2221_v18  ;;  %vm2224_vm12 = vweird.f32 %v8918_v31 }
 0x4df   : > { %v2443_v25 = vmul.f32 %v2442_v37, %v8902_v5  ;;  %v8997_v47 = vadd.f32 1.0, %v2456_v8  ;;  %v2261_v1 = vmul.f32 %v8950_v7, %v2260_v17  ;;  %v2284_v62 = vadd.f32 0.18741608, %v2283_v56  ;;  %vm9008_vm13 = vmor %vm2223_vm10, %vm2224_vm12 }
 0x4e0   : > { %5910 = vrcp.f32 %v8979_v39  ;;  %v9001_v58 = vadd.f32 1.0, %v2376_v41  ;;  %v2299_v61 = vmul.f32 %v8985_v43, %v8953_v21  ;;  %v2322_v13 = vadd.f32 0.05243302, %v2321_v23 }
 0x4e1   : > { %v2360_v45 = vadd.f32 0.0036580483, %v2359_v52  ;;  %5912 = vrcp.f32 %v8997_v47  ;;  %v2245_v17 = vmul.f32 %v2244_v32, %v8704_v30  ;;  %v2400_v29 = vadd.f32 0.0036580483, %v2399_v28 }
 0x4e2   : > { %5914 = vrcp.f32 %v8992_v16  ;;  %v5690_v18 = vclamps-f32 %v8847_v51, 1.0  ;;  %v2226_v37 = vsel %vm9008_vm13, %v8918_v31, %v2222_v4  ;;  %v9019_v56 = vmul.f32 0.5, %v8681_v10 }
 0x4e3   : > { %v2444_v41 = vadd.f32 0.18741608, %v2443_v25  ;;  %v9022_v49 = vadd.f32 %v3363_v0, %v6271_v57  ;;  %v9025_v23 = vadd.f32 %v8950_v7, %v2261_v1  ;;  %vm2264_vm15 = vweird.f32 %v8950_v7 }
 0x4e4   : > { %v2285_v30 = vmul.f32 %v2284_v62, %v8751_v59  ;;  %5916 = vrcp.f32 %v9001_v58  ;;  %v2300_v51 = vsub.f32 1.0, %v2299_v61  ;;  %v2323_v52 = vmul.f32 %v2322_v13, %v8800_v33 }
 0x4e5   : > { %11438 = vst [vmem:[#allocation46_spill] sm:$0xff] %v9022_v49  ;;  %v2361_v31 = vmul.f32 %v2360_v45, %v8825_v3  ;;  %v9033_v10 = vmul.f32 %v3311_v20, %v8570_v2  ;;  %v9037_v0 = vadd.f32 1.1283791, %v2245_v17  ;;  %vm2263_vm1 = vweird.f32 %v8899_v54  ;;  %v3369_v62 = vpop.f32.mrf.mxu3 }
 0x4e6   : > { %v9035_v8 = vpop.eup %5910  ;;  %v2401_v32 = vmul.f32 %v2400_v29, %v8833_v35  ;;  %v9041_v28 = vadd.f32 1.0, %v5690_v18  ;;  %v9045_v4 = vsel %vm8987_vm11, %v2230_v48, %v2226_v37  ;;  %vm9047_vm2 = vmor %vm2263_vm1, %vm2264_vm15  ;;  %v2445_v20 = vmul.f32 %v2444_v41, %v8902_v5 }
 0x4e7   : > { %11439 = vst [vmem:[#allocation47_spill] sm:$0xff] %v9033_v10  ;;  %v5913_v59 = vpop.eup %5912  ;;  %v9054_v1 = vmul.f32 0.70710677, %v9022_v49  ;;  %v9063_v13 = vadd.f32 1.1283791, %v2285_v30  ;;  %v2301_v24 = vmul.f32 %v8985_v43, %v2300_v51  ;;  %v2309_v5 = vand.u32 2147483648, %v8953_v21 }
 0x4e8   : > { %11440 = vst [vmem:[#allocation48_spill] sm:$0xff] %v9041_v28  ;;  %v9056_v61 = vpop.eup %5914  ;;  %v2459_v45 = vmul.f32 %v5913_v59, %v8997_v47  ;;  %v2324_v17 = vadd.f32 0.18741608, %v2323_v52  ;;  %v2362_v29 = vadd.f32 0.05243302, %v2361_v31  ;;  %vm2304_vm3 = vweird.f32 %v8985_v43 }
 0x4e9   : > { %11443 = vst [vmem:[#allocation49_spill] sm:$0xff] %v9054_v1  ;;  %v2339_v37 = vmul.f32 %v9035_v8, %v8979_v39  ;;  %v2402_v41 = vadd.f32 0.05243302, %v2401_v32  ;;  %v2419_v30 = vmul.f32 %v9056_v61, %v8992_v16  ;;  %v2446_v42 = vadd.f32 1.1283791, %v2445_v20 }
 0x4ea   : > { %v9068_v18 = vpop.eup %5916  ;;  %v2460_v48 = vsub.f32 1.0, %v2459_v45  ;;  %v2469_v2 = vand.u32 2147483648, %v8997_v47  ;;  %v3403_v51 = vmul.f32 %v9054_v1, %v9054_v1  ;;  %vm2464_vm4 = vweird.f32 %v5913_v59 }
 0x4eb   : > { %v2467_v31 = vand.u32 2147483647, %v8997_v47  ;;  %v9080_v57 = vadd.f32 %v3366_v55, %v11388_v9  ;;  %v9083_v49 = vadd.f32 %v8985_v43, %v2301_v24  ;;  %v2325_v32 = vmul.f32 %v2324_v17, %v8800_v33 }
 0x4ec   : > { %v2461_v52 = vmul.f32 %v5913_v59, %v2460_v48  ;;  %v2363_v45 = vmul.f32 %v2362_v29, %v8825_v3  ;;  %v2379_v20 = vmul.f32 %v9068_v18, %v9001_v58  ;;  %v2340_v10 = vsub.f32 1.0, %v2339_v37 }
 0x4ed   : > { %11444 = vst [vmem:[#allocation50_spill] sm:$0xff] %v9080_v57  ;;  %vm2463_vm5 = vweird.f32 %v8997_v47  ;;  %v9091_v48 = vadd.f32 %v3369_v62, %v11389_v53  ;;  %v2403_v55 = vmul.f32 %v2402_v41, %v8833_v35  ;;  %v2420_v9 = vsub.f32 1.0, %v2419_v30  ;;  %v3372_v33 = vpop.f32.mrf.mxu3 }
 0x4ee   : > { %v2462_v28 = vadd.f32 %v5913_v59, %v2461_v52  ;;  %vm2465_vm6 = vmor %vm2463_vm5, %vm2464_vm4  ;;  %v2470_v24 = vor.u32 1.1754944e-38, %v2469_v2  ;;  %v9094_v1 = vmin.f32 %v3403_v51, 16.0  ;;  %v2447_v17 = vmul.f32 %v2446_v42, %v8886_v40 }
 0x4ef   : > { %11445 = vst [vmem:[#allocation51_spill] sm:$0xff] %v9091_v48  ;;  %vm2468_vm7 = vcmp.eq.f32.partialorder %v2467_v31, 8.507059e+37  ;;  %v9098_v37 = vmul.f32 0.70710677, %v9080_v57  ;;  %vm2303_vm9 = vweird.f32 %v8953_v21  ;;  %v2380_v62 = vsub.f32 1.0, %v2379_v20 }
 0x4f0   : > { %v2466_v29 = vsel %vm2465_vm6, %v5913_v59, %v2462_v28  ;;  %v9102_v41 = vor.u32 1.1754944e-38, %v2309_v5  ;;  %v9104_v30 = vadd.f32 1.1283791, %v2325_v32  ;;  %v9107_v51 = vmul.f32 0.70710677, %v9091_v48  ;;  %vm9111_vm10 = vmor %vm2303_vm9, %vm2304_vm3 }
 0x4f1   : > { %v2471_v52 = vsel %vm2468_vm7, %v2470_v24, %v2466_v29  ;;  %v2341_v28 = vmul.f32 %v9035_v8, %v2340_v10  ;;  %v2364_v59 = vadd.f32 0.18741608, %v2363_v45  ;;  %v2404_v42 = vadd.f32 0.18741608, %v2403_v55 }
 0x4f2   : > { %v2472_v2 = vmul.f32 %v2471_v52, %v2447_v17  ;;  %v3416_v31 = vmul.f32 3.8918573e-05, %v9094_v1  ;;  %v2421_v32 = vmul.f32 %v9056_v61, %v2420_v9  ;;  %v3443_v24 = vmul.f32 %v9098_v37, %v9098_v37 }
 0x4f3   : > { %vm2343_vm11 = vweird.f32 %v8979_v39  ;;  %vm2344_vm12 = vweird.f32 %v9035_v8  ;;  %v2347_v10 = vand.u32 2147483647, %v8979_v39  ;;  %v2381_v45 = vmul.f32 %v9068_v18, %v2380_v62 }
 0x4f4   : > { %v5656_v20 = vclamps-f32 %v2472_v2, 1.0  ;;  %v2146_v55 = vmul.f32 0.5, %v8873_v6  ;;  %v3483_v29 = vmul.f32 %v9107_v51, %v9107_v51  ;;  %v9132_v9 = vadd.f32 %v3372_v33, %v11304_v63  ;;  %vm9149_vm3 = vmor %vm2343_vm11, %vm2344_vm12 }
 0x4f5   : > { %v2342_v52 = vadd.f32 %v9035_v8, %v2341_v28  ;;  %v2365_v2 = vmul.f32 %v2364_v59, %v8825_v3  ;;  %v2405_v5 = vmul.f32 %v2404_v42, %v8833_v35  ;;  %v3417_v47 = vadd.f32 0.001143296, %v3416_v31  ;;  %v3375_v53 = vpop.f32.mrf.mxu3 }
 0x4f6   : > { %v2482_v17 = vadd.f32 1.0, %v5656_v20  ;;  %11448 = vst [vmem:[#allocation52_spill] sm:$0xff] %v9132_v9  ;;  %v2422_v57 = vadd.f32 %v9056_v61, %v2421_v32  ;;  %vm2424_vm13 = vweird.f32 %v9056_v61  ;;  %v9139_v62 = vmin.f32 %v3443_v24, 16.0 }
 0x4f7   : > { %v2382_v20 = vadd.f32 %v9068_v18, %v2381_v45  ;;  %vm2384_vm15 = vweird.f32 %v9068_v18  ;;  %vm2423_vm1 = vweird.f32 %v8992_v16  ;;  %v2429_v33 = vand.u32 2147483648, %v8992_v16 }
 0x4f8   : > { %v2490_v6 = vmul.f32 %v2482_v17, %v2146_v55  ;;  %v2427_v35 = vand.u32 2147483647, %v8992_v16  ;;  %v9154_v28 = vmin.f32 %v3483_v29, 16.0  ;;  %v9157_v59 = vmul.f32 0.70710677, %v9132_v9  ;;  %vm9167_vm5 = vmor %vm2423_vm1, %vm2424_vm13 }
 0x4f9   : > { %v9160_v42 = vadd.f32 %v3375_v53, %v11305_v36  ;;  %v2349_v31 = vand.u32 2147483648, %v8979_v39  ;;  %vm2383_vm4 = vweird.f32 %v9001_v58  ;;  %v2389_v32 = vand.u32 2147483648, %v9001_v58 }
 0x4fa   : > { %2499 = vmatpush.msra.mxu0 %v2490_v6  ;;  %v3418_v16 = vmul.f32 %v3417_v47, %v9094_v1  ;;  %v11454_v45 = vand.u32 2147483647, %v8899_v54  ;;  %vm9180_vm7 = vmor %vm2383_vm4, %vm2384_vm15  ;;  %v2387_v55 = vand.u32 2147483647, %v9001_v58  ;;  %v2406_v17 = vadd.f32 1.1283791, %v2405_v5 }
 0x4fb   : > { %11451 = vst [vmem:[#allocation53_spill] sm:$0xff] %v9160_v42  ;;  %v2426_v29 = vsel %vm9167_vm5, %v9056_v61, %v2422_v57  ;;  %v3456_v47 = vmul.f32 3.8918573e-05, %v9139_v62  ;;  %v2346_v6 = vsel %vm9149_vm3, %v9035_v8, %v2342_v52  ;;  %v2386_v36 = vsel %vm9180_vm7, %v9068_v18, %v2382_v20 }
 0x4fc   : > { %vm9174_vm6 = vcmp.eq.f32.partialorder %v11454_v45, 8.507059e+37  ;;  %v2366_v45 = vadd.f32 1.1283791, %v2365_v2  ;;  %v2430_v63 = vor.u32 1.1754944e-38, %v2429_v33  ;;  %vm2428_vm9 = vcmp.eq.f32.partialorder %v2427_v35, 8.507059e+37 }
 0x4fd   : > { %v3496_v58 = vmul.f32 3.8918573e-05, %v9154_v28  ;;  %v3523_v5 = vmul.f32 %v9157_v59, %v9157_v59  ;;  %v9199_v57 = vmul.f32 0.70710677, %v9160_v42  ;;  %v2350_v61 = vor.u32 1.1754944e-38, %v2349_v31  ;;  %v3378_v18 = vpop.f32.mrf.mxu3 }
 0x4fe   : > { %v2390_v24 = vor.u32 1.1754944e-38, %v2389_v32  ;;  %v2431_v48 = vsel %vm2428_vm9, %v2430_v63, %v2426_v29  ;;  %v3419_v3 = vadd.f32 0.014752088, %v3418_v16  ;;  %vm2348_vm11 = vcmp.eq.f32.partialorder %v2347_v10, 8.507059e+37 }
 0x4ff   : > { %vm2388_vm12 = vcmp.eq.f32.partialorder %v2387_v55, 8.507059e+37  ;;  %v2407_v8 = vmul.f32 %v2406_v17, %v8814_v38  ;;  %v3457_v52 = vadd.f32 0.001143296, %v3456_v47  ;;  %v2351_v2 = vsel %vm2348_vm11, %v2350_v61, %v2346_v6 }
 0x500   : > { %v2367_v20 = vmul.f32 %v2366_v45, %v8782_v22  ;;  %v2391_v33 = vsel %vm2388_vm12, %v2390_v24, %v2386_v36  ;;  %v3405_v35 = vmul.f32 2.1237322e-06, %v9094_v1  ;;  %v3497_v9 = vadd.f32 0.001143296, %v3496_v58 }
 0x501   : > { %v2432_v39 = vmul.f32 %v2431_v48, %v2407_v8  ;;  %v9204_v42 = vmin.f32 %v3523_v5, 16.0  ;;  %v3563_v63 = vmul.f32 %v9199_v57, %v9199_v57  ;;  %v11459_v10 = vand.u32 2147483648, %v8899_v54 }
 0x502   : > { %v11460_v38 = vand.u32 2147483647, %v8953_v21  ;;  %v2327_v32 = vmul.f32 %v9104_v30, %v8755_v44  ;;  %v3420_v36 = vmul.f32 %v3419_v3, %v9094_v1  ;;  %v11461_v22 = vsel %vm9111_vm10, %v8985_v43, %v9083_v49 }
 0x503   : > { %v2270_v31 = vor.u32 1.1754944e-38, %v11459_v10  ;;  %v2392_v16 = vmul.f32 %v2391_v33, %v2367_v20  ;;  %v3458_v55 = vmul.f32 %v3457_v52, %v9139_v62  ;;  %v9222_v54 = vmin.f32 %v3563_v63, 16.0 }
 0x504   : > { %vm2308_vm13 = vcmp.eq.f32.partialorder %v11460_v38, 8.507059e+37  ;;  %v11462_v21 = vsel %vm9047_vm2, %v8950_v7, %v9025_v23  ;;  %v2287_v30 = vmul.f32 %v9063_v13, %v8707_v15  ;;  %v2352_v40 = vmul.f32 %v2351_v2, %v2327_v32 }
 0x505   : > { %v2311_v48 = vsel %vm2308_vm13, %v9102_v41, %v11461_v22  ;;  %v2271_v44 = vsel %vm9174_vm6, %v2270_v31, %v11462_v21  ;;  %v3406_v43 = vadd.f32 0.00028619796, %v3405_v35  ;;  %v3498_v49 = vmul.f32 %v3497_v9, %v9154_v28  ;;  %v3381_v24 = vpop.f32.mrf.mxu3 }
 0x506   : > { %v3536_v41 = vmul.f32 3.8918573e-05, %v9204_v42  ;;  %v3576_v17 = vmul.f32 3.8918573e-05, %v9222_v54  ;;  %v5655_v29 = vclamps-f32 %v2432_v39, 1.0  ;;  %v2247_v25 = vmul.f32 %v9037_v0, %v8652_v50 }
 0x507   : > { %v2312_v47 = vmul.f32 %v2311_v48, %v2287_v30  ;;  %v3421_v7 = vadd.f32 0.112945676, %v3420_v36  ;;  %v3445_v23 = vmul.f32 2.1237322e-06, %v9139_v62  ;;  %v2232_v53 = vmul.f32 %v9045_v4, %v8946_v34 }
 0x508   : > { %v3459_v15 = vadd.f32 0.014752088, %v3458_v55  ;;  %v3577_v13 = vadd.f32 0.001143296, %v3576_v17  ;;  %v5654_v6 = vclamps-f32 %v2392_v16, 1.0  ;;  %v2272_v45 = vmul.f32 %v2271_v44, %v2247_v25 }
 0x509   : > { %v2143_v9 = vmul.f32 0.5, %v8740_v11  ;;  %v3407_v58 = vmul.f32 %v3406_v43, %v9094_v1  ;;  %v9244_v5 = vadd.f32 %v3378_v18, %v11350_v12  ;;  %v3499_v61 = vadd.f32 0.014752088, %v3498_v49 }
 0x50a   : > { %v3537_v50 = vadd.f32 0.001143296, %v3536_v41  ;;  %v2481_v0 = vadd.f32 1.0, %v5655_v29  ;;  %v5653_v3 = vclamps-f32 %v2352_v40, 1.0  ;;  %v2144_v8 = vmul.f32 0.5, %v8758_v46 }
 0x50b   : > { %v3422_v34 = vmul.f32 %v3421_v7, %v9094_v1  ;;  %v3578_v4 = vmul.f32 %v3577_v13, %v9222_v54  ;;  %v5652_v52 = vclamps-f32 %v2312_v47, 1.0  ;;  %v2145_v2 = vmul.f32 0.5, %v8805_v60 }
 0x50c   : > { %v3446_v11 = vadd.f32 0.00028619796, %v3445_v23  ;;  %v3460_v20 = vmul.f32 %v3459_v15, %v9139_v62  ;;  %v2480_v33 = vadd.f32 1.0, %v5654_v6  ;;  %v3408_v18 = vadd.f32 0.0036580483, %v3407_v58 }
 0x50d   : > { %v9252_v35 = vmul.f32 0.70710677, %v9244_v5  ;;  %v5651_v39 = vclamps-f32 %v2272_v45, 1.0  ;;  %v5650_v63 = vclamps-f32 %v2232_v53, 1.0  ;;  %v3500_v10 = vmul.f32 %v3499_v61, %v9154_v28 }
 0x50e   : > { %v3538_v46 = vmul.f32 %v3537_v50, %v9204_v42  ;;  %v2489_v31 = vmul.f32 %v2481_v0, %v2145_v2  ;;  %v2479_v38 = vadd.f32 1.0, %v5653_v3  ;;  %v3423_v32 = vadd.f32 0.4994258, %v3422_v34  ;;  %v11463_v34 = vld [vmem:[#allocation3_spill] sm:$0xff] }
 0x50f   : > { %v3579_v36 = vadd.f32 0.014752088, %v3578_v4  ;;  %v3603_v60 = vmul.f32 %v9252_v35, %v9252_v35  ;;  %v2478_v22 = vadd.f32 1.0, %v5652_v52  ;;  %v3447_v48 = vmul.f32 %v3446_v11, %v9139_v62  ;;  %v11464_v52 = vld [vmem:[#allocation36_spill] sm:$0xff] }
 0x510   : > { %v3461_v16 = vadd.f32 0.112945676, %v3460_v20  ;;  %v3485_v55 = vmul.f32 2.1237322e-06, %v9154_v28  ;;  %2500 = vmatpush.msra.mxu0 %v2489_v31  ;;  %v2488_v21 = vmul.f32 %v2480_v33, %v2144_v8  ;;  %v3409_v44 = vmul.f32 %v3408_v18, %v9094_v1 }
 0x511   : > { %v2477_v30 = vadd.f32 1.0, %v5651_v39  ;;  %v5649_v40 = vclamps-f32 %v8975_v27, 1.0  ;;  %v5691_v43 = vclamps-f32 %v8849_v14, 1.0  ;;  %v3501_v49 = vadd.f32 0.112945676, %v3500_v10  ;;  %v3384_v14 = vpop.f32.mrf.mxu3 }
 0x512   : > { %v3539_v41 = vadd.f32 0.014752088, %v3538_v46  ;;  %v9263_v17 = vmin.f32 %v3603_v60, 16.0  ;;  %2501 = vmatpush.msra.mxu0 %v2488_v21  ;;  %v2487_v29 = vmul.f32 %v2479_v38, %v2143_v9  ;;  %v3424_v25 = vmul.f32 %v3423_v32, %v9094_v1  ;;  %v11465_v38 = vld [vmem:[#allocation10_spill] sm:$0xff] }
 0x513   : > { %v3580_v47 = vmul.f32 %v3579_v36, %v9222_v54  ;;  %v2486_v7 = vmul.f32 %v2478_v22, %v9019_v56  ;;  %v2476_v23 = vadd.f32 1.0, %v5650_v63  ;;  %v3448_v53 = vadd.f32 0.0036580483, %v3447_v48 }
 0x514   : > { %v3462_v15 = vmul.f32 %v3461_v16, %v9139_v62  ;;  %v3486_v13 = vadd.f32 0.00028619796, %v3485_v55  ;;  %v3616_v27 = vmul.f32 3.8918573e-05, %v9263_v17  ;;  %2502 = vmatpush.msra.mxu0 %v2487_v29  ;;  %v3525_v6 = vmul.f32 2.1237322e-06, %v9204_v42 }
 0x515   : > { %v9272_v45 = vadd.f32 %v3381_v24, %v11414_v19  ;;  %v2475_v9 = vadd.f32 1.0, %v5649_v40  ;;  %v3313_v58 = vadd.f32 1.0, %v5691_v43  ;;  %v3410_v61 = vadd.f32 0.05243302, %v3409_v44  ;;  %v11466_v55 = vld [vmem:[#allocation44_spill] sm:$0xff]  ;;  %v11467_v44 = vld [vmem:[#allocation30_spill] sm:$0xff] }
 0x516   : > { %v3502_v50 = vmul.f32 %v3501_v49, %v9154_v28  ;;  %v3540_v56 = vmul.f32 %v3539_v41, %v9204_v42  ;;  %2503 = vmatpush.msra.mxu0 %v2486_v7  ;;  %v2485_v0 = vmul.f32 %v2477_v30, %v8932_v26  ;;  %v3581_v3 = vadd.f32 0.112945676, %v3580_v47  ;;  %v11468_v30 = vld [vmem:[#allocation48_spill] sm:$0xff] }
 0x517   : > { %v3617_v8 = vadd.f32 0.001143296, %v3616_v27  ;;  %v9278_v4 = vadd.f32 %v3384_v14, %v11463_v34  ;;  %v2484_v2 = vmul.f32 %v2476_v23, %v11464_v52  ;;  %v9281_v11 = vadd.f32 1.0, %v3424_v25  ;;  %v9311_v25 = vld [vmem:[%s11097_s3] sm:$0xff] }
 0x518   : > { %v3449_v24 = vmul.f32 %v3448_v53, %v9139_v62  ;;  %v3463_v20 = vadd.f32 0.4994258, %v3462_v15  ;;  %v3487_v33 = vmul.f32 %v3486_v13, %v9154_v28  ;;  %2504 = vmatpush.msra.mxu0 %v2485_v0  ;;  %v3526_v18 = vadd.f32 0.00028619796, %v3525_v6  ;;  %v11469_v15 = vld [vmem:[#allocation4_spill] sm:$0xff] }
 0x519   : > { %v3565_v39 = vmul.f32 2.1237322e-06, %v9222_v54  ;;  %v3618_v26 = vmul.f32 %v3617_v8, %v9263_v17  ;;  %v9288_v63 = vmul.f32 0.70710677, %v9272_v45  ;;  %v3411_v10 = vmul.f32 %v3410_v61, %v9094_v1 }
 0x51a   : > { %v3503_v46 = vadd.f32 0.4994258, %v3502_v50  ;;  %v3541_v31 = vadd.f32 0.112945676, %v3540_v56  ;;  %2505 = vmatpush.msra.mxu0 %v2484_v2  ;;  %v2483_v32 = vmul.f32 %v2475_v9, %v11465_v38  ;;  %v3582_v36 = vmul.f32 %v3581_v3, %v9222_v54  ;;  %v11470_v56 = vld [vmem:[#allocation29_spill] sm:$0xff] }
 0x51b   : > { %v3619_v60 = vadd.f32 0.014752088, %v3618_v26  ;;  %v3643_v22 = vmul.f32 %v9288_v63, %v9288_v63  ;;  %v9296_v48 = vmul.f32 0.70710677, %v9278_v4  ;;  %5918 = vrcp.f32 %v9281_v11 }
 0x51c   : > { %v3450_v16 = vadd.f32 0.05243302, %v3449_v24  ;;  %2506 = vmatpush.msra.mxu0 %v2483_v32  ;;  %v9300_v21 = vmul.f32 %v3313_v58, %v11466_v55  ;;  %v9304_v40 = vmul.f32 %v11468_v30, %v11467_v44  ;;  %v3464_v43 = vmul.f32 %v3463_v20, %v9139_v62  ;;  %v9351_v44 = vld [vmem:[%s11097_s3 + $0x8] sm:$0xff] }
 0x51d   : > { %v3488_v49 = vadd.f32 0.0036580483, %v3487_v33  ;;  %v3527_v41 = vmul.f32 %v3526_v18, %v9204_v42  ;;  %v3566_v29 = vadd.f32 0.00028619796, %v3565_v39  ;;  %5657 = vmatmul.msk.f32.vlgmr.msra.gmra.mxu0 %vm1236_vm8, %v9311_v25  ;;  %v3542_v47 = vmul.f32 %v3541_v31, %v9204_v42  ;;  %v11471_v39 = vld [vmem:[#allocation23_spill] sm:$0xff] }
 0x51e   : > { %v3620_v7 = vmul.f32 %v3619_v60, %v9263_v17  ;;  %v9317_v23 = vmin.f32 %v3643_v22, 16.0  ;;  %v3683_v53 = vmul.f32 %v9296_v48, %v9296_v48  ;;  %2915 = vmatpush.msrb.mxu0 %v11469_v15  ;;  %v3412_v13 = vadd.f32 0.18741608, %v3411_v10  ;;  %v11472_v22 = vld [vmem:[#allocation7_spill] sm:$0xff] }
 0x51f   : > { %v3504_v27 = vmul.f32 %v3503_v46, %v9154_v28  ;;  %v3583_v14 = vadd.f32 0.4994258, %v3582_v36  ;;  %v3605_v6 = vmul.f32 2.1237322e-06, %v9263_v17  ;;  %v3451_v9 = vmul.f32 %v3450_v16, %v9139_v62 }
 0x520   : > { %v3621_v58 = vadd.f32 0.112945676, %v3620_v7  ;;  %v3645_v61 = vmul.f32 2.1237322e-06, %v9317_v23  ;;  %v3656_v50 = vmul.f32 3.8918573e-05, %v9317_v23  ;;  %2916 = vmatpush.msrb.mxu0 %v11470_v56  ;;  %v3489_v3 = vmul.f32 %v3488_v49, %v9154_v28 }
 0x521   : > { %v9328_v0 = vadd.f32 1.0, %v3464_v43  ;;  %v3528_v8 = vadd.f32 0.0036580483, %v3527_v41  ;;  %v9331_v52 = vmin.f32 %v3683_v53, 16.0  ;;  %v9333_v2 = vpop.eup %5918  ;;  %v3543_v24 = vadd.f32 0.4994258, %v3542_v47 }
 0x522   : > { %v3567_v20 = vmul.f32 %v3566_v29, %v9222_v54  ;;  %v3622_v33 = vmul.f32 %v3621_v58, %v9263_v17  ;;  %v3657_v18 = vadd.f32 0.001143296, %v3656_v50  ;;  %2917 = vmatpush.msrb.mxu0 %v11471_v39  ;;  %v3413_v26 = vmul.f32 %v3412_v13, %v9094_v1  ;;  %v11473_v29 = vld [vmem:[#allocation24_spill] sm:$0xff] }
 0x523   : > { %v9339_v10 = vadd.f32 1.0, %v3504_v27  ;;  %v3606_v46 = vadd.f32 0.00028619796, %v3605_v6  ;;  %v3646_v31 = vadd.f32 0.00028619796, %v3645_v61  ;;  %v3584_v38 = vmul.f32 %v3583_v14, %v9222_v54  ;;  %v11474_v6 = vld [vmem:[#allocation26_spill] sm:$0xff] }
 0x524   : > { %v3623_v32 = vadd.f32 0.4994258, %v3622_v33  ;;  %v3658_v36 = vmul.f32 %v3657_v18, %v9317_v23  ;;  %v3685_v60 = vmul.f32 2.1237322e-06, %v9331_v52  ;;  %2918 = vmatpush.msrb.mxu0 %v11472_v22  ;;  %v3427_v16 = vmul.f32 %v9333_v2, %v9281_v11 }
 0x525   : > { %v3452_v55 = vadd.f32 0.18741608, %v3451_v9  ;;  %5920 = vrcp.f32 %v9328_v0  ;;  %v3490_v1 = vadd.f32 0.05243302, %v3489_v3  ;;  %5658 = vmatmul.msk.f32.gmra.mxu0 %vm1236_vm8, %v9351_v44  ;;  %v3544_v30 = vmul.f32 %v3543_v24, %v9204_v42 }
 0x526   : > { %v3568_v43 = vadd.f32 0.0036580483, %v3567_v20  ;;  %v3624_v49 = vmul.f32 %v3623_v32, %v9263_v17  ;;  %v3659_v41 = vadd.f32 0.014752088, %v3658_v36  ;;  %2919 = vmatpush.msrb.mxu0 %v11473_v29  ;;  %5922 = vrcp.f32 %v9339_v10  ;;  %v11475_v20 = vld [vmem:[#allocation27_spill] sm:$0xff] }
 0x527   : > { %v3529_v47 = vmul.f32 %v3528_v8, %v9204_v42  ;;  %v3647_v7 = vmul.f32 %v3646_v31, %v9317_v23  ;;  %v3696_v53 = vmul.f32 3.8918573e-05, %v9331_v52  ;;  %v9362_v15 = vadd.f32 1.0, %v3584_v38  ;;  %v11476_v32 = vld [vmem:[#allocation43_spill] sm:$0xff] }
 0x528   : > { %v3607_v13 = vmul.f32 %v3606_v46, %v9263_v17  ;;  %v3660_v27 = vmul.f32 %v3659_v41, %v9317_v23  ;;  %v3686_v14 = vadd.f32 0.00028619796, %v3685_v60  ;;  %2920 = vmatpush.msrb.mxu0 %v11474_v6  ;;  %v9367_v9 = vadd.f32 1.1283791, %v3413_v26 }
 0x529   : > { %v3428_v58 = vsub.f32 1.0, %v3427_v16  ;;  %v9369_v61 = vadd.f32 1.0, %v3624_v49  ;;  %v3697_v50 = vadd.f32 0.001143296, %v3696_v53  ;;  %v3453_v3 = vmul.f32 %v3452_v55, %v9139_v62  ;;  %v11477_v16 = vld [vmem:[#allocation38_spill] sm:$0xff] }
 0x52a   : > { %v9373_v8 = vadd.f32 1.0, %v3544_v30  ;;  %v3569_v24 = vmul.f32 %v3568_v43, %v9222_v54  ;;  %2921 = vmatpush.msrb.mxu0 %v11475_v20  ;;  %v3491_v18 = vmul.f32 %v3490_v1, %v9154_v28  ;;  %v3530_v39 = vadd.f32 0.05243302, %v3529_v47 }
 0x52b   : > { %v9377_v33 = vpop.eup %5920  ;;  %v3648_v26 = vadd.f32 0.0036580483, %v3647_v7  ;;  %v3661_v46 = vadd.f32 0.112945676, %v3660_v27  ;;  %vm3431_vm2 = vweird.f32 %v9281_v11  ;;  %5924 = vrcp.f32 %v9362_v15 }
 0x52c   : > { %v3608_v31 = vadd.f32 0.0036580483, %v3607_v13  ;;  %v3687_v62 = vmul.f32 %v3686_v14, %v9331_v52  ;;  %v3698_v38 = vmul.f32 %v3697_v50, %v9331_v52  ;;  %2922 = vmatpush.msrb.mxu0 %v11476_v32  ;;  %v9385_v36 = vpop.eup %5922  ;;  %v3429_v60 = vmul.f32 %v9333_v2, %v3428_v58 }
 0x52d   : > { %vm3432_vm10 = vweird.f32 %v9333_v2  ;;  %5926 = vrcp.f32 %v9369_v61  ;;  %v3662_v22 = vmul.f32 %v3661_v46, %v9317_v23  ;;  %v3467_v55 = vmul.f32 %v9377_v33, %v9328_v0  ;;  %5675 = vmatmul.msk.f32.vlgmr.msrb.gmra.mxu0 %vm1236_vm8, %v9311_v25 }
 0x52e   : > { %3331 = vmatpush.msra.mxu0 %v11477_v16  ;;  %5928 = vrcp.f32 %v9373_v8  ;;  %v3570_v1 = vadd.f32 0.05243302, %v3569_v24  ;;  %v3699_v30 = vadd.f32 0.014752088, %v3698_v38  ;;  %v9397_v43 = vadd.f32 1.1283791, %v3453_v3  ;;  %vm9431_vm15 = vmor %vm3431_vm2, %vm3432_vm10 }
 0x52f   : > { %v3531_v49 = vmul.f32 %v3530_v39, %v9204_v42  ;;  %v3649_v41 = vmul.f32 %v3648_v26, %v9317_v23  ;;  %v3663_v29 = vadd.f32 0.4994258, %v3662_v22  ;;  %v3492_v47 = vadd.f32 0.18741608, %v3491_v18  ;;  %v11515_v16 = vld [vmem:[#allocation49_spill] sm:$0xff] }
 0x530   : > { %3332 = vmatpush.msra.mxu0 %v9300_v21  ;;  %v3609_v7 = vmul.f32 %v3608_v31, %v9263_v17  ;;  %v3688_v53 = vadd.f32 0.0036580483, %v3687_v62  ;;  %v3700_v13 = vmul.f32 %v3699_v30, %v9331_v52  ;;  %v3477_v14 = vand.u32 2147483648, %v9328_v0  ;;  %v11478_v62 = vld [vmem:[#allocation47_spill] sm:$0xff] }
 0x531   : > { %v3507_v6 = vmul.f32 %v9385_v36, %v9339_v10  ;;  %v3664_v58 = vmul.f32 %v3663_v29, %v9317_v23  ;;  %v9410_v50 = vpop.eup %5924  ;;  %v9413_v21 = vadd.f32 %v9333_v2, %v3429_v60  ;;  %v3468_v3 = vsub.f32 1.0, %v3467_v55 }
 0x532   : > { %3333 = vmatpush.msra.mxu0 %v9304_v40  ;;  %v3571_v24 = vmul.f32 %v3570_v1, %v9222_v54  ;;  %v3701_v20 = vadd.f32 0.112945676, %v3700_v13  ;;  %v3532_v26 = vadd.f32 0.18741608, %v3531_v49  ;;  %v3650_v46 = vadd.f32 0.05243302, %v3649_v41 }
 0x533   : > { %v9416_v18 = vpop.eup %5926  ;;  %v9419_v31 = vadd.f32 1.0, %v3664_v58  ;;  %v3493_v38 = vmul.f32 %v3492_v47, %v9154_v28  ;;  %v3610_v32 = vadd.f32 0.05243302, %v3609_v7  ;;  %v3689_v60 = vmul.f32 %v3688_v53, %v9331_v52  ;;  %v11481_v28 = vld [vmem:[#allocation45_spill] sm:$0xff] }
 0x534   : > { %3334 = vmatpush.msra.mxu0 %v11478_v62  ;;  %v9422_v40 = vpop.eup %5928  ;;  %v3702_v22 = vmul.f32 %v3701_v20, %v9331_v52  ;;  %v9435_v55 = vor.u32 1.1754944e-38, %v3477_v14  ;;  %v3508_v1 = vsub.f32 1.0, %v3507_v6  ;;  %v3587_v30 = vmul.f32 %v9410_v50, %v9362_v15  ;;  %v11482_v6 = vld [vmem:[#allocation6_spill] sm:$0xff]  ;;  %v11483_v49 = vld [vmem:[#allocation37_spill] sm:$0xff] }
 0x535   : > { %5930 = vrcp.f32 %v9419_v31  ;;  %v3469_v41 = vmul.f32 %v9377_v33, %v3468_v3  ;;  %v3572_v29 = vadd.f32 0.18741608, %v3571_v24  ;;  %v3627_v47 = vmul.f32 %v9416_v18, %v9369_v61  ;;  %5676 = vmatmul.msk.f32.gmra.mxu0 %vm1236_vm8, %v9351_v44 }
 0x536   : > { %3335 = vmatpush.msra.mxu0 %v11481_v28  ;;  %v3533_v7 = vmul.f32 %v3532_v26, %v9204_v42  ;;  %v3547_v53 = vmul.f32 %v9422_v40, %v9373_v8  ;;  %v3651_v13 = vmul.f32 %v3650_v46, %v9317_v23  ;;  %v3703_v14 = vadd.f32 0.4994258, %v3702_v22 }
 0x537   : > { %v9455_v58 = vadd.f32 1.1283791, %v3493_v38  ;;  %v3611_v24 = vmul.f32 %v3610_v32, %v9263_v17  ;;  %v3690_v20 = vadd.f32 0.05243302, %v3689_v60  ;;  %v3509_v62 = vmul.f32 %v9385_v36, %v3508_v1 }
 0x538   : > { %3336 = vmatpush.msra.mxu0 %v11482_v6  ;;  %v3557_v28 = vand.u32 2147483648, %v9373_v8  ;;  %v3588_v42 = vsub.f32 1.0, %v3587_v30  ;;  %v3704_v26 = vmul.f32 %v3703_v14, %v9331_v52  ;;  %v9464_v46 = vadd.f32 %v9377_v33, %v3469_v41  ;;  %v11484_v30 = vld [vmem:[#allocation34_spill] sm:$0xff] }
 0x539   : > { %v3573_v22 = vmul.f32 %v3572_v29, %v9222_v54  ;;  %v3628_v6 = vsub.f32 1.0, %v3627_v47  ;;  %v9470_v32 = vadd.f32 1.1283791, %v3533_v7  ;;  %v3548_v60 = vsub.f32 1.0, %v3547_v53 }
 0x53a   : > { %3337 = vmatpush.msra.mxu0 %v11483_v49  ;;  %v3652_v1 = vadd.f32 0.18741608, %v3651_v13  ;;  %v9472_v39 = vadd.f32 1.0, %v3704_v26  ;;  %v3555_v49 = vand.u32 2147483647, %v9373_v8  ;;  %v3691_v38 = vmul.f32 %v3690_v20, %v9331_v52 }
 0x53b   : > { %v9468_v27 = vpop.eup %5930  ;;  %v3612_v14 = vadd.f32 0.18741608, %v3611_v24  ;;  %v9480_v54 = vadd.f32 %v9385_v36, %v3509_v62  ;;  %v9482_v29 = vor.u32 1.1754944e-38, %v3557_v28  ;;  %v3589_v47 = vmul.f32 %v9410_v50, %v3588_v42 }
 0x53c   : > { %3338 = vmatpush.msra.mxu0 %v11484_v30  ;;  %v3667_v41 = vmul.f32 %v9468_v27, %v9419_v31  ;;  %5932 = vrcp.f32 %v9472_v39  ;;  %vm3552_vm1 = vweird.f32 %v9422_v40  ;;  %v9487_v7 = vadd.f32 1.1283791, %v3573_v22 }
 0x53d   : > { %v3629_v53 = vmul.f32 %v9416_v18, %v3628_v6  ;;  %5693 = vmatmul.msk.f32.vlgmr.msra.gmra.mxu0 %vm1236_vm8, %v9311_v25  ;;  %vm3512_vm3 = vweird.f32 %v9385_v36  ;;  %v3549_v24 = vmul.f32 %v9422_v40, %v3548_v60  ;;  %vm3551_vm4 = vweird.f32 %v9373_v8  ;;  %v11520_v8 = vld [vmem:[#allocation28_spill] sm:$0xff] }
 0x53e   : > { %v3668_v13 = vsub.f32 1.0, %v3667_v41  ;;  %vm3591_vm5 = vweird.f32 %v9362_v15  ;;  %vm3592_vm6 = vweird.f32 %v9410_v50  ;;  %v3653_v20 = vmul.f32 %v3652_v1, %v9317_v23 }
 0x53f   : > { %v3613_v62 = vmul.f32 %v3612_v14, %v9263_v17  ;;  %vm3672_vm7 = vweird.f32 %v9468_v27  ;;  %v3692_v42 = vadd.f32 0.18741608, %v3691_v38  ;;  %vm3472_vm9 = vweird.f32 %v9377_v33  ;;  %vm9529_vm14 = vmor %vm3591_vm5, %vm3592_vm6 }
 0x540   : > { %v3669_v28 = vmul.f32 %v9468_v27, %v3668_v13  ;;  %vm3511_vm11 = vweird.f32 %v9339_v10  ;;  %v3590_v26 = vadd.f32 %v9410_v50, %v3589_v47  ;;  %vm3632_vm12 = vweird.f32 %v9416_v18 }
 0x541   : > { %v3635_v22 = vand.u32 2147483647, %v9369_v61  ;;  %v3677_v6 = vand.u32 2147483648, %v9419_v31  ;;  %v3630_v23 = vadd.f32 %v9416_v18, %v3629_v53  ;;  %vm3671_vm13 = vweird.f32 %v9419_v31 }
 0x542   : > { %v3670_v17 = vadd.f32 %v9468_v27, %v3669_v28  ;;  %v3675_v38 = vand.u32 2147483647, %v9419_v31  ;;  %v5933_v60 = vpop.eup %5932  ;;  %v3595_v1 = vand.u32 2147483647, %v9362_v15  ;;  %v3597_v30 = vand.u32 2147483648, %v9362_v15  ;;  %vm9517_vm10 = vmor %vm3671_vm13, %vm3672_vm7 }
 0x543   : > { %v3637_v14 = vand.u32 2147483648, %v9369_v61  ;;  %v3654_v41 = vadd.f32 1.1283791, %v3653_v20  ;;  %vm9521_vm0 = vcmp.eq.f32.partialorder %v3555_v49, 8.507059e+37  ;;  %vm3631_vm2 = vweird.f32 %v9369_v61  ;;  %vm9576_vm13 = vmor %vm3551_vm4, %vm3552_vm1 }
 0x544   : > { %v3674_v13 = vsel %vm9517_vm10, %v9468_v27, %v3670_v17  ;;  %v3693_v20 = vmul.f32 %v3692_v42, %v9331_v52  ;;  %v3707_v49 = vmul.f32 %v5933_v60, %v9472_v39  ;;  %v3550_v28 = vadd.f32 %v9422_v40, %v3549_v24  ;;  %vm9545_vm5 = vmor %vm3631_vm2, %vm3632_vm12 }
 0x545   : > { %v3594_v15 = vsel %vm9529_vm14, %v9410_v50, %v3590_v26  ;;  %v3614_v56 = vadd.f32 1.1283791, %v3613_v62  ;;  %v3678_v61 = vor.u32 1.1754944e-38, %v3677_v6  ;;  %v11493_v27 = vand.u32 2147483647, %v9339_v10  ;;  %5694 = vmatmul.msk.f32.gmra.mxu0 %vm1236_vm8, %v9351_v44  ;;  %vm9590_vm1 = vmor %vm3511_vm11, %vm3512_vm3 }
 0x546   : > { %v3634_v24 = vsel %vm9545_vm5, %v9416_v18, %v3630_v23  ;;  %vm9558_vm7 = vcmp.eq.f32.partialorder %v3635_v22, 8.507059e+37  ;;  %vm3676_vm14 = vcmp.eq.f32.partialorder %v3675_v38, 8.507059e+37  ;;  %v3708_v62 = vsub.f32 1.0, %v3707_v49 }
 0x547   : > { %vm9551_vm6 = vcmp.eq.f32.partialorder %v11493_v27, 8.507059e+37  ;;  %v3638_v42 = vor.u32 1.1754944e-38, %v3637_v14  ;;  %v3655_v26 = vmul.f32 %v3654_v41, %v9288_v63  ;;  %v3679_v6 = vsel %vm3676_vm14, %v3678_v61, %v3674_v13 }
 0x548   : > { %v3717_v17 = vand.u32 2147483648, %v9472_v39  ;;  %v11498_v47 = vand.u32 2147483647, %v9281_v11  ;;  %v3694_v22 = vadd.f32 1.1283791, %v3693_v20  ;;  %v3709_v23 = vmul.f32 %v5933_v60, %v3708_v62 }
 0x549   : > { %vm3712_vm2 = vweird.f32 %v5933_v60  ;;  %v3715_v63 = vand.u32 2147483647, %v9472_v39  ;;  %v3554_v38 = vsel %vm9576_vm13, %v9422_v40, %v3550_v28  ;;  %vm3596_vm10 = vcmp.eq.f32.partialorder %v3595_v1, 8.507059e+37 }
 0x54a   : > { %vm9568_vm12 = vcmp.eq.f32.partialorder %v11498_v47, 8.507059e+37  ;;  %v3598_v14 = vor.u32 1.1754944e-38, %v3597_v30  ;;  %v3639_v41 = vsel %vm9558_vm7, %v3638_v42, %v3634_v24  ;;  %v3615_v31 = vmul.f32 %v3614_v56, %v9252_v35  ;;  %v11514_v47 = vld [vmem:[#allocation33_spill] sm:$0xff] }
 0x54b   : > { %v3680_v13 = vmul.f32 %v3679_v6, %v3655_v26  ;;  %v3710_v20 = vadd.f32 %v5933_v60, %v3709_v23  ;;  %vm3711_vm4 = vweird.f32 %v9472_v39  ;;  %v3514_v40 = vsel %vm9590_vm1, %v9385_v36, %v9480_v54 }
 0x54c   : > { %v3575_v1 = vmul.f32 %v9487_v7, %v9199_v57  ;;  %v3599_v30 = vsel %vm3596_vm10, %v3598_v14, %v3594_v15  ;;  %vm3713_vm5 = vmor %vm3711_vm4, %vm3712_vm2  ;;  %v3718_v49 = vor.u32 1.1754944e-38, %v3717_v17  ;;  %vm11505_vm3 = vweird.f32 %v9328_v0  ;;  %v11513_v17 = vld [vmem:[#allocation31_spill] sm:$0xff] }
 0x54d   : > { %vm9606_vm11 = vmor %vm11505_vm3, %vm3472_vm9  ;;  %v3640_v56 = vmul.f32 %v3639_v41, %v3615_v31  ;;  %v3695_v39 = vmul.f32 %v3694_v22, %v9296_v48  ;;  %v3714_v28 = vsel %vm3713_vm5, %v5933_v60, %v3710_v20  ;;  %vm3716_vm7 = vcmp.eq.f32.partialorder %v3715_v63, 8.507059e+37  ;;  %v6059_v20 = vld [vmem:[%s11095_s1 + $0x38] sm:$0xff] }
 0x54e   : > { %v3474_v57 = vsel %vm9606_vm11, %v9377_v33, %v9464_v46  ;;  %v11508_v36 = vand.u32 2147483648, %v9339_v10  ;;  %v3559_v7 = vsel %vm9521_vm0, %v9482_v29, %v3554_v38  ;;  %v3719_v15 = vsel %vm3716_vm7, %v3718_v49, %v3714_v28 }
 0x54f   : > { %v3535_v61 = vmul.f32 %v9470_v32, %v9157_v59  ;;  %v3600_v27 = vmul.f32 %v3599_v30, %v3575_v1  ;;  %v3720_v48 = vmul.f32 %v3719_v15, %v3695_v39  ;;  %v5709_v60 = vclamps-f32 %v3680_v13, 1.0  ;;  %v11511_v32 = vld [vmem:[#allocation35_spill] sm:$0xff] }
 0x550   : > { %v3518_v54 = vor.u32 1.1754944e-38, %v11508_v36  ;;  %v11509_v24 = vand.u32 2147483648, %v9281_v11  ;;  %v11510_v62 = vand.u32 2147483647, %v9328_v0  ;;  %v3495_v10 = vmul.f32 %v9455_v58, %v9107_v51 }
 0x551   : > { %v3560_v29 = vmul.f32 %v3559_v7, %v3535_v61  ;;  %v5710_v53 = vclamps-f32 %v3720_v48, 1.0  ;;  %v5708_v59 = vclamps-f32 %v3640_v56, 1.0  ;;  %v692_v42 = vsub.f32 1.5, %v11511_v32  ;;  %v11525_v56 = vld [vmem:[#allocation52_spill] sm:$0xff]  ;;  %v11526_v7 = vld [vmem:[#allocation17_spill] sm:$0xff]  ;;  %v11527_v61 = vld [vmem:[#allocation51_spill] sm:$0xff] }
 0x552   : > { %v3438_v50 = vor.u32 1.1754944e-38, %v11509_v24  ;;  %vm3476_vm9 = vcmp.eq.f32.partialorder %v11510_v62, 8.507059e+37  ;;  %v3519_v33 = vsel %vm9551_vm6, %v3518_v54, %v3514_v40  ;;  %v11512_v11 = vsel %vm9431_vm15, %v9333_v2, %v9413_v21  ;;  %v11524_v40 = vld [vmem:[#allocation53_spill] sm:$0xff]  ;;  %v11528_v24 = vld [vmem:[#allocation50_spill] sm:$0xff] }
 0x553   : > { %v3479_v46 = vsel %vm3476_vm9, %v9435_v55, %v3474_v57  ;;  %v3455_v51 = vmul.f32 %v9397_v43, %v9098_v37  ;;  %v3394_v58 = vmul.f32 0.5, %v9278_v4  ;;  %v3520_v52 = vmul.f32 %v3519_v33, %v3495_v10  ;;  %v11516_v37 = vld [vmem:[#allocation9_spill] sm:$0xff]  ;;  %v11529_v33 = vld [vmem:[#allocation20_spill] sm:$0xff]  ;;  %v6048_v32 = vld [vmem:[%s11102_s8] ss:$0 sm:$0xff] }
 0x554   : > { %v3439_v0 = vsel %vm9568_vm12, %v3438_v50, %v11512_v11  ;;  %v3730_v55 = vadd.f32 1.0, %v5710_v53  ;;  %v3729_v26 = vadd.f32 1.0, %v5709_v60  ;;  %v5707_v6 = vclamps-f32 %v3600_v27, 1.0  ;;  %v11517_v4 = vld [vmem:[#allocation13_spill] sm:$0xff] }
 0x555   : > { %vm694_vm0 = vweird.f32 %v11513_v17  ;;  %vm695_vm6 = vweird.f32 %v11514_v47  ;;  %v3415_v18 = vmul.f32 %v9367_v9, %v11515_v16  ;;  %v3480_v2 = vmul.f32 %v3479_v46, %v3455_v51  ;;  %v6049_v51 = vld [vmem:[%s11102_s8 + $0x1] ss:$0 sm:$0xff] }
 0x556   : > { %v3393_v21 = vmul.f32 0.5, %v9272_v45  ;;  %v3738_v3 = vmul.f32 %v3730_v55, %v3394_v58  ;;  %v3728_v22 = vadd.f32 1.0, %v5708_v59  ;;  %v5706_v23 = vclamps-f32 %v3560_v29, 1.0  ;;  %vm9650_vm12 = vmor %vm694_vm0, %vm695_vm6  ;;  %v11530_v29 = vld [vmem:[#allocation46_spill] sm:$0xff] }
 0x557   : > { %vm684_vm15 = vweird.f32 %v11516_v37  ;;  %vm685_vm14 = vweird.f32 %v11517_v4  ;;  %v693_v43 = vmul.f32 %v11514_v47, %v692_v42  ;;  %v3440_v63 = vmul.f32 %v3439_v0, %v3415_v18  ;;  %v6050_v55 = vld [vmem:[%s11095_s1] sm:$0xff]  ;;  %v6055_v18 = vld [vmem:[%s11095_s1 + $0x28] sm:$0xff] }
 0x558   : > { %v3392_v14 = vmul.f32 0.5, %v9244_v5  ;;  %3747 = vmatpush.msrb.mxu0 %v3738_v3  ;;  %v3737_v9 = vmul.f32 %v3729_v26, %v3393_v21  ;;  %v3727_v41 = vadd.f32 1.0, %v5707_v6  ;;  %v5705_v45 = vclamps-f32 %v3520_v52, 1.0  ;;  %vm9658_vm13 = vmor %vm684_vm15, %vm685_vm14  ;;  %v6051_v26 = vld [vmem:[%s11095_s1 + $0x8] sm:$0xff]  ;;  %v6054_v6 = vld [vmem:[%s11095_s1 + $0x20] sm:$0xff]  ;;  %v9713_v3 = vpop.xlane.xlu1 %4293 }
 0x559   : > { %v11521_v31 = vsub.f32 1.5, %v11520_v8  ;;  %v3391_v1 = vmul.f32 0.5, %v11524_v40  ;;  %v3726_v49 = vadd.f32 1.0, %v5706_v23  ;;  %v5704_v35 = vclamps-f32 %v3480_v2, 1.0  ;;  %v6056_v2 = vld [vmem:[%s6149_s15 + $0x30] sm:$0xff]  ;;  %v11540_v37 = vld [vmem:[#allocation18_spill] sm:$0xff] }
 0x55a   : > { %3748 = vmatpush.msrb.mxu0 %v3737_v9  ;;  %v3736_v30 = vmul.f32 %v3728_v22, %v3392_v14  ;;  %v697_v5 = vsel %vm9650_vm12, %v11514_v47, %v693_v43  ;;  %v3390_v39 = vmul.f32 0.5, %v11525_v56  ;;  %v3725_v57 = vadd.f32 1.0, %v5705_v45  ;;  %v11536_v47 = vld [vmem:[#allocation22_spill] sm:$0xff]  ;;  %v6057_v43 = vld [vmem:[%s11095_s1 + $0x30] sm:$0xff] }
 0x55b   : > { %v683_v13 = vmul.f32 %v11517_v4, %v11521_v31  ;;  %v3735_v28 = vmul.f32 %v3727_v41, %v3391_v1  ;;  %v5703_v36 = vclamps-f32 %v3440_v63, 1.0  ;;  %v713_v15 = vmul.f32 %v697_v5, %v11526_v7  ;;  %v6058_v63 = vld [vmem:[%s6149_s15 + $0x38] sm:$0xff]  ;;  %v4210_v41 = vpop.xlane.xlu2 %4209  ;;  %v11544_v8 = vld [vmem:[#allocation2_spill] sm:$0xff] }
 0x55c   : > { %3749 = vmatpush.msrb.mxu0 %v3736_v30  ;;  %v3389_v27 = vmul.f32 0.5, %v11527_v61  ;;  %v3734_v48 = vmul.f32 %v3726_v49, %v3390_v39  ;;  %v3724_v60 = vadd.f32 1.0, %v5704_v35  ;;  %v3388_v50 = vmul.f32 0.5, %v11528_v24  ;;  %v6060_v40 = vld [vmem:[%s6149_s15 + $0x40] sm:$0xff]  ;;  %v11547_v30 = vld [vmem:[#allocation32_spill] sm:$0xff]  ;;  %v11551_v7 = vld [vmem:[#allocation41_spill] sm:$0xff] }
 0x55d   : > { %v687_v54 = vsel %vm9658_vm13, %v11517_v4, %v683_v13  ;;  %v3723_v10 = vadd.f32 1.0, %v5703_v36  ;;  %v3387_v53 = vmul.f32 0.5, %v11530_v29  ;;  %v730_v42 = vmul.f32 %v6048_v32, %v713_v15  ;;  %v6061_v36 = vld [vmem:[%s6149_s15 + $0x48] sm:$0xff] }
 0x55e   : > { %3750 = vmatpush.msrb.mxu0 %v3735_v28  ;;  %v3733_v62 = vmul.f32 %v3725_v57, %v3389_v27  ;;  %v712_v46 = vmul.f32 %v687_v54, %v11529_v33  ;;  %v3732_v59 = vmul.f32 %v3724_v60, %v3388_v50  ;;  %vm11531_vm2 = vcmask 130048   ;;  %v6062_v50 = vld [vmem:[%s6149_s15 + $0x50] sm:$0xff] }
 0x55f   : > { %v3731_v11 = vmul.f32 %v3723_v10, %v3387_v53  ;;  %v747_v58 = vadd.f32 %v6049_v51, %v730_v42  ;;  %vm11532_vm10 = vmmov %vm11531_vm2  ;;  %vm11539_vm11 = vcmask 261120   ;;  %v4248_v31 = vmul.f32 %v4210_v41, %v11544_v8  ;;  %v6063_v53 = vld [vmem:[%s6149_s15 + $0x58] sm:$0xff] }
 0x560   : > { %3751 = vmatpush.msrb.mxu0 %v3734_v48  ;;  %v729_v0 = vmul.f32 %v6048_v32, %v712_v46  ;;  %vm11533_vm1 = vmmov %vm11531_vm2  ;;  %v9725_v14 = vpop.xlane.xlu1 %4296 }
 0x561   : > { %vm11534_vm4 = vmmov %vm11533_vm1  ;;  %v9739_v49 = vsub.f32 %v11547_v30, %v4248_v31 }
 0x562   : > { %3752 = vmatpush.msrb.mxu0 %v3733_v62  ;;  %v746_v52 = vadd.f32 %v6049_v51, %v729_v0  ;;  %vm11535_vm5 = vmmov %vm11533_vm1  ;;  %v6064_v0 = vld [vmem:[%s6149_s15 + $0x60] sm:$0xff] }
 0x563   : > { %vm11537_vm3 = vmmov %vm11533_vm1  ;;  %11548 = vst [vmem:[#allocation44_spill] sm:$0xff] %v9739_v49  ;;  %v4280_v57 = vmul.f32 %v9739_v49, %v9739_v49 }
 0x564   : > { %3753 = vmatpush.msrb.mxu0 %v3732_v59  ;;  %vm11541_vm7 = vmmov %vm11533_vm1 }
 0x565   : > { %vm11543_vm9 = vmmov %vm11539_vm11 }
 0x566   : > { %3754 = vmatpush.msrb.mxu0 %v3731_v11  ;;  %vm11545_vm0 = vmmov %vm11533_vm1 }
 0x567   : > { %5711 = vmatmul.msk.f32.vlgmr.msrb.gmra.mxu0 %vm1236_vm8, %v9311_v25  ;;  %v6052_v25 = vld [vmem:[%s11095_s1 + $0x10] sm:$0xff]  ;;  %vm11549_vm6 = vmmov %vm11543_vm9 }
 0x568   : > { %3776 = vmatpush.msra.mxu0 %v747_v58  ;;  %v4213_v5 = vpop.xlane.xlu1 %4212  ;;  %vm11553_vm15 = vmmov %vm11549_vm6 }
 0x569   : > { %v4249_v39 = vmul.f32 %v4213_v5, %v11544_v8  ;;  %v4304_v61 = vsel %vm11553_vm15, %v4280_v57, 0.0  ;;  %vm11554_vm14 = vmmov %vm11549_vm6 }
 0x56a   : > { %3777 = vmatpush.msra.mxu0 %v746_v52  ;;  %vm11556_vm12 = vmmov %vm11549_vm6 }
 0x56b   : > { %v9751_v15 = vsub.f32 %v11551_v7, %v4249_v39  ;;  %vm11557_vm13 = vmmov %vm11549_vm6 }
 0x56d   : > { %11552 = vst [vmem:[#allocation48_spill] sm:$0xff] %v9751_v15  ;;  %v4281_v24 = vmul.f32 %v9751_v15, %v9751_v15 }
 0x56f   : > { %5712 = vmatmul.msk.f32.gmra.mxu0 %vm1236_vm8, %v9351_v44  ;;  %v6053_v44 = vld [vmem:[%s11095_s1 + $0x18] sm:$0xff]  ;;  %v4307_v10 = vsel %vm11556_vm12, %v4281_v24, 0.0 }
 0x577   : > { %5713 = vmatmul.msk.f32.vlgmr.msra.gmra.mxu0 %vm11531_vm2, %v6050_v55  ;;  %vm11559_vm2 = vmmov %vm11549_vm6 }
 0x57f   : > { %5714 = vmatmul.msk.f32.gmra.mxu0 %vm11532_vm10, %v6051_v26  ;;  %vm11561_vm10 = vmmov %vm11559_vm2  ;;  %v11562_v26 = vld [vmem:[#allocation5_spill] sm:$0xff] }
 0x587   : > { %5715 = vmatmul.msk.f32.gmra.mxu0 %vm11533_vm1, %v6052_v25  ;;  %vm11578_vm1 = vmmov %vm11559_vm2 }
 0x588   : > { %vm11592_vm12 = vmmov %vm11578_vm1 }
 0x58f   : > { %5716 = vmatmul.msk.f32.gmra.mxu0 %vm11534_vm4, %v6053_v44  ;;  %vm11580_vm4 = vmmov %vm11578_vm1 }
 0x597   : > { %5717 = vmatmul.msk.f32.gmra.mxu0 %vm11535_vm5, %v6054_v6 }
 0x59a   : > { %v2508_v17 = vpop.f32.mrf.mxu0 }
 0x59b   : > { %v2509_v16 = vadd.f32 %v2508_v17, %v11536_v47 }
 0x59d   : > { %v9711_v21 = vadd.f32 %v6056_v2, %v2509_v16  ;;  %v11565_v16 = vld [vmem:[#allocation14_spill] sm:$0xff] }
 0x59f   : > { %5718 = vmatmul.msk.f32.gmra.mxu0 %vm11537_vm3, %v6055_v18  ;;  %11538 = vst [vmem:[#allocation3_spill] sm:$0xff] %v9711_v21  ;;  %v4214_v22 = vsel %vm11539_vm11, %v9711_v21, 0.0  ;;  %vm11582_vm11 = vmmov %vm11578_vm1 }
 0x5a0   : > { %4215 = vadd.xlane.f32.xlu1 %v4214_v22 }
 0x5a2   : > { %v2511_v23 = vpop.f32.mrf.mxu0 }
 0x5a3   : > { %v2512_v4 = vadd.f32 %v2511_v23, %v11540_v37 }
 0x5a5   : > { %v9723_v38 = vadd.f32 %v6058_v63, %v2512_v4 }
 0x5a7   : > { %5719 = vmatmul.msk.f32.gmra.mxu0 %vm11541_vm7, %v6057_v43  ;;  %11542 = vst [vmem:[#allocation36_spill] sm:$0xff] %v9723_v38  ;;  %v4217_v9 = vsel %vm11543_vm9, %v9723_v38, 0.0  ;;  %vm11585_vm9 = vmmov %vm11578_vm1 }
 0x5a8   : > { %4218 = vadd.xlane.f32.xlu1 %v4217_v9 }
 0x5aa   : > { %v2924_v45 = vpop.f32.mrf.mxu0 }
 0x5ab   : > { %v2925_v13 = vadd.f32 %v2924_v45, %v11536_v47 }
 0x5ad   : > { %v9736_v1 = vadd.f32 %v6060_v40, %v2925_v13 }
 0x5af   : > { %5720 = vmatmul.msk.f32.gmra.mxu0 %vm11545_vm0, %v6059_v20  ;;  %11546 = vst [vmem:[#allocation10_spill] sm:$0xff] %v9736_v1  ;;  %v4220_v35 = vsel %vm11549_vm6, %v9736_v1, 0.0  ;;  %v11567_v20 = vld [vmem:[#allocation12_spill] sm:$0xff] }
 0x5b0   : > { %4221 = vadd.xlane.f32.xlu1 %v4220_v35 }
 0x5b2   : > { %v2927_v56 = vpop.f32.mrf.mxu0 }
 0x5b3   : > { %v2928_v28 = vadd.f32 %v2927_v56, %v11540_v37 }
 0x5b5   : > { %v9748_v54 = vadd.f32 %v6061_v36, %v2928_v28 }
 0x5b7   : > { %11550 = vst [vmem:[#allocation30_spill] sm:$0xff] %v9748_v54  ;;  %v4223_v27 = vsel %vm11554_vm14, %v9748_v54, 0.0  ;;  %vm11591_vm14 = vmmov %vm11578_vm1 }
 0x5b8   : > { %4305 = vadd.xlane.f32.xlu1 %v4304_v61  ;;  %4224 = vadd.xlane.f32.xlu0 %v4223_v27  ;;  %v11569_v61 = vld [vmem:[#allocation11_spill] sm:$0xff] }
 0x5ba   : > { %v3340_v48 = vpop.f32.mrf.mxu0 }
 0x5bb   : > { %v3341_v60 = vadd.f32 %v3340_v48, %v11536_v47 }
 0x5bd   : > { %v9760_v62 = vadd.f32 %v6062_v50, %v3341_v60 }
 0x5bf   : > { %11555 = vst [vmem:[#allocation4_spill] sm:$0xff] %v9760_v62  ;;  %v4226_v33 = vsel %vm11557_vm13, %v9760_v62, 0.0 }
 0x5c0   : > { %4308 = vadd.xlane.f32.xlu0 %v4307_v10  ;;  %4227 = vadd.xlane.f32.xlu2 %v4226_v33 }
 0x5c2   : > { %v3343_v46 = vpop.f32.mrf.mxu0 }
 0x5c3   : > { %v3344_v29 = vadd.f32 %v3343_v46, %v11540_v37 }
 0x5c5   : > { %v9767_v59 = vadd.f32 %v6063_v53, %v3344_v29 }
 0x5c7   : > { %11558 = vst [vmem:[#allocation29_spill] sm:$0xff] %v9767_v59  ;;  %v4229_v32 = vsel %vm11559_vm2, %v9767_v59, 0.0 }
 0x5c8   : > { %4230 = vadd.xlane.f32.xlu1 %v4229_v32 }
 0x5e4   : > { %v3756_v42 = vpop.f32.mrf.mxu0 }
 0x5e5   : > { %v3757_v11 = vadd.f32 %v3756_v42, %v11536_v47  ;;  %v11571_v42 = vld [vmem:[#allocation8_spill] sm:$0xff] }
 0x5e7   : > { %v9773_v51 = vadd.f32 %v6064_v0, %v3757_v11 }
 0x5e9   : > { %11560 = vst [vmem:[#allocation23_spill] sm:$0xff] %v9773_v51  ;;  %v4232_v58 = vsel %vm11561_vm10, %v9773_v51, 0.0 }
 0x5ea   : > { %4233 = vadd.xlane.f32.xlu0 %v4232_v58 }
 0x5ec   : > { %v9777_v52 = vpop.f32.mrf.mxu0 }
 0x5f4   : > { %v3779_v55 = vpop.f32.mrf.mxu0 }
 0x5f5   : > { %v9780_v25 = vadd.f32 %v3779_v55, %v11562_v26 }
 0x5f7   : > { %11563 = vst [vmem:[#allocation7_spill] sm:$0xff] %v9780_v25  ;;  %v9783_v44 = vmul.f32 0.70710677, %v9780_v25 }
 0x5f9   : > { %11564 = vst [vmem:[#allocation24_spill] sm:$0xff] %v9783_v44  ;;  %v3819_v6 = vmul.f32 %v9783_v44, %v9783_v44 }
 0x5fb   : > { %v9790_v2 = vmin.f32 %v3819_v6, 16.0 }
 0x5fc   : > { %v3782_v17 = vpop.f32.mrf.mxu0 }
 0x5fd   : > { %v9788_v18 = vadd.f32 %v3782_v17, %v11565_v16  ;;  %v3832_v23 = vmul.f32 3.8918573e-05, %v9790_v2  ;;  %v3821_v56 = vmul.f32 2.1237322e-06, %v9790_v2 }
 0x5ff   : > { %11566 = vst [vmem:[#allocation26_spill] sm:$0xff] %v9788_v18  ;;  %v9793_v22 = vmul.f32 0.70710677, %v9788_v18  ;;  %v3833_v43 = vadd.f32 0.001143296, %v3832_v23 }
 0x600   : > { %v3822_v48 = vadd.f32 0.00028619796, %v3821_v56 }
 0x601   : > { %v3859_v4 = vmul.f32 %v9793_v22, %v9793_v22  ;;  %v3834_v9 = vmul.f32 %v3833_v43, %v9790_v2 }
 0x602   : > { %v3823_v46 = vmul.f32 %v3822_v48, %v9790_v2 }
 0x603   : > { %v9798_v63 = vmin.f32 %v3859_v4, 16.0  ;;  %v3835_v31 = vadd.f32 0.014752088, %v3834_v9 }
 0x604   : > { %v3785_v45 = vpop.f32.mrf.mxu0  ;;  %v3824_v26 = vadd.f32 0.0036580483, %v3823_v46 }
 0x605   : > { %v3872_v41 = vmul.f32 3.8918573e-05, %v9798_v63  ;;  %v9803_v40 = vadd.f32 %v3785_v45, %v11567_v20  ;;  %v3836_v35 = vmul.f32 %v3835_v31, %v9790_v2  ;;  %v3861_v60 = vmul.f32 2.1237322e-06, %v9798_v63 }
 0x607   : > { %v3873_v13 = vadd.f32 0.001143296, %v3872_v41  ;;  %11568 = vst [vmem:[#allocation27_spill] sm:$0xff] %v9803_v40  ;;  %v9809_v28 = vmul.f32 0.70710677, %v9803_v40  ;;  %v3825_v41 = vmul.f32 %v3824_v26, %v9790_v2 }
 0x608   : > { %v3837_v57 = vadd.f32 0.112945676, %v3836_v35  ;;  %v3862_v29 = vadd.f32 0.00028619796, %v3861_v60 }
 0x609   : > { %v3874_v5 = vmul.f32 %v3873_v13, %v9798_v63  ;;  %v3899_v24 = vmul.f32 %v9809_v28, %v9809_v28 }
 0x60a   : > { %v3838_v50 = vmul.f32 %v3837_v57, %v9790_v2  ;;  %v3863_v6 = vmul.f32 %v3862_v29, %v9798_v63 }
 0x60b   : > { %v3875_v36 = vadd.f32 0.014752088, %v3874_v5  ;;  %v9823_v32 = vmin.f32 %v3899_v24, 16.0 }
 0x60c   : > { %v3788_v39 = vpop.f32.mrf.mxu0  ;;  %v3839_v0 = vadd.f32 0.4994258, %v3838_v50  ;;  %v3864_v45 = vadd.f32 0.0036580483, %v3863_v6 }
 0x60d   : > { %v9812_v27 = vadd.f32 %v3788_v39, %v11569_v61  ;;  %v3876_v10 = vmul.f32 %v3875_v36, %v9798_v63  ;;  %v3912_v16 = vmul.f32 3.8918573e-05, %v9823_v32  ;;  %v3901_v20 = vmul.f32 2.1237322e-06, %v9823_v32 }
 0x60e   : > { %v3840_v4 = vmul.f32 %v3839_v0, %v9790_v2  ;;  %v3826_v36 = vadd.f32 0.05243302, %v3825_v41  ;;  %v3865_v61 = vmul.f32 %v3864_v45, %v9798_v63 }
 0x60f   : > { %11570 = vst [vmem:[#allocation43_spill] sm:$0xff] %v9812_v27  ;;  %v9820_v33 = vmul.f32 0.70710677, %v9812_v27  ;;  %v3877_v58 = vadd.f32 0.112945676, %v3876_v10 }
 0x610   : > { %v3913_v35 = vadd.f32 0.001143296, %v3912_v16  ;;  %v9846_v56 = vadd.f32 1.0, %v3840_v4  ;;  %v3902_v48 = vadd.f32 0.00028619796, %v3901_v20  ;;  %v3827_v29 = vmul.f32 %v3826_v36, %v9790_v2 }
 0x611   : > { %v3939_v55 = vmul.f32 %v9820_v33, %v9820_v33  ;;  %v3878_v43 = vmul.f32 %v3877_v58, %v9798_v63  ;;  %v3760_v4 = vadd.f32 %v9777_v52, %v11540_v37  ;;  %v4341_v52 = vmul.f32 %v9725_v14, %v11544_v8 }
 0x612   : > { %v3914_v60 = vmul.f32 %v3913_v35, %v9823_v32  ;;  %5934 = vrcp.f32 %v9846_v56  ;;  %v3903_v58 = vmul.f32 %v3902_v48, %v9823_v32  ;;  %vm3847_vm3 = vweird.f32 %v9846_v56 }
 0x613   : > { %v9839_v9 = vmin.f32 %v3939_v55, 16.0  ;;  %v3879_v39 = vadd.f32 0.4994258, %v3878_v43  ;;  %v3828_v43 = vadd.f32 0.18741608, %v3827_v29 }
 0x614   : > { %v3791_v53 = vpop.f32.mrf.mxu0  ;;  %v3915_v55 = vadd.f32 0.014752088, %v3914_v60  ;;  %v6065_v60 = vld [vmem:[%s6149_s15 + $0x68] sm:$0xff] }
 0x615   : > { %v9826_v11 = vadd.f32 %v3791_v53, %v11571_v42  ;;  %v3952_v57 = vmul.f32 3.8918573e-05, %v9839_v9  ;;  %v3880_v50 = vmul.f32 %v3879_v39, %v9798_v63  ;;  %v3866_v53 = vadd.f32 0.05243302, %v3865_v61  ;;  %v4216_v42 = vpop.xlane.xlu1 %4215 }
 0x616   : > { %v3916_v20 = vmul.f32 %v3915_v55, %v9823_v32  ;;  %v4340_v39 = vmul.f32 %v9713_v3, %v11544_v8 }
 0x617   : > { %11572 = vst [vmem:[#allocation38_spill] sm:$0xff] %v9826_v11  ;;  %v9832_v17 = vmul.f32 0.70710677, %v9826_v11  ;;  %v3953_v10 = vadd.f32 0.001143296, %v3952_v57  ;;  %v9862_v16 = vadd.f32 1.0, %v3880_v50  ;;  %v3867_v41 = vmul.f32 %v3866_v53, %v9798_v63 }
 0x618   : > { %v4250_v57 = vmul.f32 %v4216_v42, %v11544_v8  ;;  %v3829_v50 = vmul.f32 %v3828_v43, %v9790_v2  ;;  %v3917_v29 = vadd.f32 0.112945676, %v3916_v20  ;;  %v9905_v2 = vadd.f32 1e-05, %v4341_v52 }
 0x619   : > { %v3979_v23 = vmul.f32 %v9832_v17, %v9832_v17  ;;  %5936 = vrcp.f32 %v9862_v16  ;;  %vm3887_vm6 = vweird.f32 %v9862_v16 }
 0x61a   : > { %v9909_v43 = vadd.f32 1.1283791, %v3829_v50  ;;  %v3918_v52 = vmul.f32 %v3917_v29, %v9823_v32 }
 0x61b   : > { %v9842_v31 = vmin.f32 %v3979_v23, 16.0  ;;  %v3954_v23 = vmul.f32 %v3953_v10, %v9839_v9  ;;  %v3868_v10 = vadd.f32 0.18741608, %v3867_v41 }
 0x61c   : > { %v3794_v13 = vpop.f32.mrf.mxu0  ;;  %11577 = vst [vmem:[#allocation34_spill] sm:$0xff] %v9909_v43 }
 0x61d   : > { %v3992_v5 = vmul.f32 3.8918573e-05, %v9842_v31  ;;  %v9854_v46 = vadd.f32 %v3794_v13, %v11350_v12  ;;  %v9874_v13 = vpop.eup %5934  ;;  %v3955_v36 = vadd.f32 0.014752088, %v3954_v23  ;;  %v4219_v55 = vpop.xlane.xlu1 %4218  ;;  %v3941_v23 = vmul.f32 2.1237322e-06, %v9839_v9 }
 0x61e   : > { %v3843_v3 = vmul.f32 %v9874_v13, %v9846_v56  ;;  %vm3848_vm5 = vweird.f32 %v9874_v13 }
 0x61f   : > { %v3993_v24 = vadd.f32 0.001143296, %v3992_v5  ;;  %11573 = vst [vmem:[#allocation47_spill] sm:$0xff] %v9854_v46  ;;  %v9866_v12 = vmul.f32 0.70710677, %v9854_v46  ;;  %vm10013_vm0 = vmor %vm3847_vm3, %vm3848_vm5 }
 0x620   : > { %v3844_v41 = vsub.f32 1.0, %v3843_v3  ;;  %v3942_v3 = vadd.f32 0.00028619796, %v3941_v23 }
 0x621   : > { %v3994_v26 = vmul.f32 %v3993_v24, %v9842_v31  ;;  %v4019_v5 = vmul.f32 %v9866_v12, %v9866_v12  ;;  %v9890_v24 = vadd.f32 %v6065_v60, %v3760_v4  ;;  %v3956_v4 = vmul.f32 %v3955_v36, %v9839_v9 }
 0x622   : > { %v4251_v60 = vmul.f32 %v4219_v55, %v11544_v8 }
 0x623   : > { %v3995_v35 = vadd.f32 0.014752088, %v3994_v26  ;;  %v9885_v61 = vmin.f32 %v4019_v5, 16.0  ;;  %11575 = vst [vmem:[#allocation6_spill] sm:$0xff] %v9890_v24  ;;  %v9903_v26 = vadd.f32 1e-05, %v4340_v39  ;;  %v3869_v5 = vmul.f32 %v3868_v10, %v9798_v63 }
 0x624   : > { %v3797_v0 = vpop.f32.mrf.mxu0  ;;  %v9913_v20 = vsel %vm11578_vm1, %v9890_v24, 0.0  ;;  %v3845_v63 = vmul.f32 %v9874_v13, %v3844_v41  ;;  %v9936_v24 = vsub.f32 %v9723_v38, %v4251_v60 }
 0x625   : > { %v9860_v6 = vadd.f32 %v3797_v0, %v11414_v19  ;;  %v3904_v19 = vadd.f32 0.0036580483, %v3903_v58  ;;  %v3996_v53 = vmul.f32 %v3995_v35, %v9842_v31  ;;  %v4032_v42 = vmul.f32 3.8918573e-05, %v9885_v61  ;;  %v9915_v35 = vpop.eup %5936 }
 0x626   : > { %v9899_v0 = vsub.f32 %v9711_v21, %v4250_v57  ;;  %5938 = vrsqrt.f32 %v9903_v26  ;;  %v3981_v21 = vmul.f32 2.1237322e-06, %v9842_v31  ;;  %v3883_v29 = vmul.f32 %v9915_v35, %v9862_v16  ;;  %11579 = vst [vmem:[#allocation35_spill] sm:$0xff] %v9936_v24 }
 0x627   : > { %11574 = vst [vmem:[#allocation45_spill] sm:$0xff] %v9860_v6  ;;  %v9872_v45 = vmul.f32 0.70710677, %v9860_v6  ;;  %v3905_v14 = vmul.f32 %v3904_v19, %v9823_v32  ;;  %v4033_v19 = vadd.f32 0.001143296, %v4032_v42  ;;  %vm3888_vm7 = vweird.f32 %v9915_v35 }
 0x628   : > { %11576 = vst [vmem:[#allocation37_spill] sm:$0xff] %v9899_v0  ;;  %v3997_v57 = vadd.f32 0.112945676, %v3996_v53  ;;  %v4282_v50 = vmul.f32 %v9899_v0, %v9899_v0  ;;  %v3957_v42 = vadd.f32 0.112945676, %v3956_v4  ;;  %vm10036_vm15 = vmor %vm3887_vm6, %vm3888_vm7 }
 0x629   : > { %v4059_v48 = vmul.f32 %v9872_v45, %v9872_v45  ;;  %v3906_v39 = vadd.f32 0.05243302, %v3905_v14  ;;  %v9931_v53 = vadd.f32 1.1283791, %v3869_v5  ;;  %v3919_v4 = vadd.f32 0.4994258, %v3918_v52 }
 0x62a   : > { %v4310_v41 = vsel %vm11580_vm4, %v4282_v50, 0.0  ;;  %v3943_v14 = vmul.f32 %v3942_v3, %v9839_v9  ;;  %v3958_v10 = vmul.f32 %v3957_v42, %v9839_v9  ;;  %v3982_v51 = vadd.f32 0.00028619796, %v3981_v21 }
 0x62b   : > { %v9901_v58 = vmin.f32 %v4059_v48, 16.0  ;;  %v4034_v48 = vmul.f32 %v4033_v19, %v9885_v61  ;;  %v3907_v55 = vmul.f32 %v3906_v39, %v9823_v32  ;;  %v3998_v19 = vmul.f32 %v3997_v57, %v9842_v31  ;;  %4311 = vadd.xlane.f32.xlu2 %v4310_v41 }
 0x62c   : > { %v3800_v23 = vpop.f32.mrf.mxu0  ;;  %v3884_v39 = vsub.f32 1.0, %v3883_v29  ;;  %v9947_v60 = vpop.eup %5938  ;;  %v9950_v50 = vadd.f32 %v9874_v13, %v3845_v63  ;;  %v4021_v21 = vmul.f32 2.1237322e-06, %v9885_v61  ;;  %v3983_v38 = vmul.f32 %v3982_v51, %v9842_v31 }
 0x62d   : > { %v4072_v36 = vmul.f32 3.8918573e-05, %v9901_v58  ;;  %v4035_v7 = vadd.f32 0.014752088, %v4034_v48  ;;  %v4061_v57 = vmul.f32 2.1237322e-06, %v9901_v58  ;;  %v9945_v52 = vadd.f32 %v3800_v23, %v11463_v34 }
 0x62e   : > { %v3999_v3 = vadd.f32 0.4994258, %v3998_v19  ;;  %v4283_v34 = vmul.f32 %v9936_v24, %v9936_v24  ;;  %v3959_v23 = vadd.f32 0.4994258, %v3958_v10  ;;  %v3944_v19 = vadd.f32 0.0036580483, %v3943_v14 }
 0x62f   : > { %v4073_v30 = vadd.f32 0.001143296, %v4072_v36  ;;  %v4036_v5 = vmul.f32 %v4035_v7, %v9885_v61  ;;  %v4222_v36 = vpop.xlane.xlu1 %4221  ;;  %v3920_v7 = vmul.f32 %v3919_v4, %v9823_v32  ;;  %v9955_v41 = vmul.f32 0.70710677, %v9945_v52 }
 0x630   : > { %v4252_v63 = vmul.f32 %v4222_v36, %v11544_v8  ;;  %v4062_v37 = vadd.f32 0.00028619796, %v4061_v57  ;;  %v3885_v62 = vmul.f32 %v9915_v35, %v3884_v39  ;;  %v4000_v47 = vmul.f32 %v3999_v3, %v9842_v31 }
 0x631   : > { %v4074_v48 = vmul.f32 %v4073_v30, %v9901_v58  ;;  %v4037_v42 = vadd.f32 0.112945676, %v4036_v5  ;;  %v3908_v30 = vadd.f32 0.18741608, %v3907_v55  ;;  %v4022_v55 = vadd.f32 0.00028619796, %v4021_v21 }
 0x632   : > { %v4099_v51 = vmul.f32 %v9955_v41, %v9955_v41  ;;  %v9971_v10 = vadd.f32 1.0, %v3920_v7  ;;  %v4313_v57 = vsel %vm11582_vm11, %v4283_v34, 0.0  ;;  %v9978_v39 = vsub.f32 %v9736_v1, %v4252_v63 }
 0x633   : > { %v4075_v29 = vadd.f32 0.014752088, %v4074_v48  ;;  %v4038_v5 = vmul.f32 %v4037_v42, %v9885_v61  ;;  %v9964_v48 = vpop.xlane.xlu0 %4299  ;;  %v3960_v42 = vmul.f32 %v3959_v23, %v9839_v9  ;;  %4314 = vadd.xlane.f32.xlu1 %v4313_v57  ;;  %4236 = vadd.xlane.f32.xlu2 %v9913_v20  ;;  %v3945_v3 = vmul.f32 %v3944_v19, %v9839_v9 }
 0x634   : > { %11581 = vst [vmem:[#allocation31_spill] sm:$0xff] %v9964_v48  ;;  %v9975_v24 = vmin.f32 %v4099_v51, 16.0  ;;  %v4063_v7 = vmul.f32 %v4062_v37, %v9901_v58  ;;  %v9985_v34 = vadd.f32 1.0, %v4000_v47  ;;  %5940 = vrcp.f32 %v9971_v10 }
 0x635   : > { %v4076_v4 = vmul.f32 %v4075_v29, %v9901_v58  ;;  %v4039_v14 = vadd.f32 0.4994258, %v4038_v5  ;;  %v3984_v29 = vadd.f32 0.0036580483, %v3983_v38  ;;  %11583 = vst [vmem:[#allocation33_spill] sm:$0xff] %v9978_v39  ;;  %v4023_v38 = vmul.f32 %v4022_v55, %v9885_v61 }
 0x636   : > { %v4101_v23 = vmul.f32 2.1237322e-06, %v9975_v24  ;;  %v4284_v19 = vmul.f32 %v9978_v39, %v9978_v39  ;;  %v9997_v37 = vadd.f32 1.0, %v3960_v42  ;;  %v3909_v57 = vmul.f32 %v3908_v30, %v9823_v32  ;;  %v11613_v32 = vld [vmem:[#allocation34_spill] sm:$0xff] }
 0x637   : > { %v4077_v36 = vadd.f32 0.112945676, %v4076_v4  ;;  %v4040_v21 = vmul.f32 %v4039_v14, %v9885_v61  ;;  %v4112_v4 = vmul.f32 3.8918573e-05, %v9975_v24  ;;  %v9995_v51 = vpop.xlane.xlu1 %4305  ;;  %v3985_v47 = vmul.f32 %v3984_v29, %v9842_v31 }
 0x638   : > { %11584 = vst [vmem:[#allocation49_spill] sm:$0xff] %v9995_v51  ;;  %v4102_v14 = vadd.f32 0.00028619796, %v4101_v23  ;;  %v3946_v1 = vadd.f32 0.05243302, %v3945_v3  ;;  %5942 = vrcp.f32 %v9985_v34  ;;  %v4316_v23 = vsel %vm11585_vm9, %v4284_v19, 0.0 }
 0x639   : > { %v4078_v5 = vmul.f32 %v4077_v36, %v9901_v58  ;;  %v9991_v63 = vadd.f32 1.0, %v4040_v21  ;;  %v4113_v55 = vadd.f32 0.001143296, %v4112_v4  ;;  %v3893_v36 = vand.u32 2147483648, %v9862_v16  ;;  %4317 = vadd.xlane.f32.xlu0 %v4316_v23 }
 0x63a   : > { %v4064_v21 = vadd.f32 0.0036580483, %v4063_v7  ;;  %v4103_v42 = vmul.f32 %v4102_v14, %v9975_v24  ;;  %v10018_v30 = vadd.f32 %v9915_v35, %v3885_v62  ;;  %v3986_v3 = vadd.f32 0.05243302, %v3985_v47 }
 0x63b   : > { %v4079_v20 = vadd.f32 0.4994258, %v4078_v5  ;;  %v4024_v5 = vadd.f32 0.0036580483, %v4023_v38  ;;  %v4225_v0 = vpop.xlane.xlu0 %4224  ;;  %5944 = vrcp.f32 %v9991_v63  ;;  %v4114_v29 = vmul.f32 %v4113_v55, %v9975_v24  ;;  %v10023_v38 = vpop.eup %5940 }
 0x63c   : > { %5946 = vrcp.f32 %v9997_v37  ;;  %v4253_v14 = vmul.f32 %v4225_v0, %v11544_v8  ;;  %v3947_v62 = vmul.f32 %v3946_v1, %v9839_v9  ;;  %v10041_v23 = vor.u32 1.1754944e-38, %v3893_v36 }
 0x63d   : > { %v4080_v39 = vmul.f32 %v4079_v20, %v9901_v58  ;;  %v4065_v20 = vmul.f32 %v4064_v21, %v9901_v58  ;;  %v4115_v19 = vadd.f32 0.014752088, %v4114_v29  ;;  %v4025_v21 = vmul.f32 %v4024_v5, %v9885_v61 }
 0x63e   : > { %v10045_v4 = vpop.eup %5942  ;;  %v3923_v15 = vmul.f32 %v10023_v38, %v9971_v10  ;;  %v3987_v36 = vmul.f32 %v3986_v3, %v9842_v31  ;;  %v10060_v51 = vsub.f32 %v9748_v54, %v4253_v14  ;;  %v3933_v1 = vand.u32 2147483648, %v9971_v10 }
 0x63f   : > { %v10021_v7 = vadd.f32 1.0, %v4080_v39  ;;  %v4104_v39 = vadd.f32 0.0036580483, %v4103_v42  ;;  %v4116_v0 = vmul.f32 %v4115_v19, %v9975_v24  ;;  %v4231_v29 = vpop.xlane.xlu1 %4230  ;;  %v10051_v42 = vadd.f32 1.1283791, %v3909_v57 }
 0x640   : > { %v4066_v19 = vadd.f32 0.05243302, %v4065_v20  ;;  %11590 = vst [vmem:[#allocation9_spill] sm:$0xff] %v10060_v51  ;;  %v3948_v57 = vadd.f32 0.18741608, %v3947_v62  ;;  %v4255_v40 = vmul.f32 %v4231_v29, %v11544_v8  ;;  %v4003_v3 = vmul.f32 %v10045_v4, %v9985_v34 }
 0x641   : > { %5948 = vrcp.f32 %v10021_v7  ;;  %v10056_v55 = vpop.eup %5944  ;;  %v4117_v49 = vadd.f32 0.112945676, %v4116_v0  ;;  %v4105_v18 = vmul.f32 %v4104_v39, %v9975_v24  ;;  %v4026_v27 = vadd.f32 0.05243302, %v4025_v21 }
 0x642   : > { %v10062_v25 = vpop.eup %5946  ;;  %v4285_v20 = vmul.f32 %v10060_v51, %v10060_v51  ;;  %v3924_v0 = vsub.f32 1.0, %v3923_v15  ;;  %v3988_v54 = vadd.f32 0.18741608, %v3987_v36  ;;  %v4043_v62 = vmul.f32 %v10056_v55, %v9991_v63 }
 0x643   : > { %v4118_v5 = vmul.f32 %v4117_v49, %v9975_v24  ;;  %v10077_v39 = vsub.f32 %v9767_v59, %v4255_v40  ;;  %v3963_v29 = vmul.f32 %v10062_v25, %v9997_v37  ;;  %v4067_v21 = vmul.f32 %v4066_v19, %v9901_v58 }
 0x644   : > { %v3949_v51 = vmul.f32 %v3948_v57, %v9839_v9  ;;  %v3973_v15 = vand.u32 2147483648, %v9997_v37  ;;  %v4106_v36 = vadd.f32 0.05243302, %v4105_v18  ;;  %v4319_v46 = vsel %vm11591_vm14, %v4285_v20, 0.0 }
 0x645   : > { %v4119_v11 = vadd.f32 0.4994258, %v4118_v5  ;;  %v4004_v6 = vsub.f32 1.0, %v4003_v3  ;;  %v4027_v40 = vmul.f32 %v4026_v27, %v9885_v61  ;;  %4320 = vadd.xlane.f32.xlu2 %v4319_v46  ;;  %v3925_v19 = vmul.f32 %v10023_v38, %v3924_v0 }
 0x646   : > { %v3989_v44 = vmul.f32 %v3988_v54, %v9842_v31  ;;  %v4044_v48 = vsub.f32 1.0, %v4043_v62  ;;  %v4287_v9 = vmul.f32 %v10077_v39, %v10077_v39  ;;  %v10093_v5 = vor.u32 1.1754944e-38, %v3933_v1 }
 0x647   : > { %v10072_v14 = vpop.eup %5948  ;;  %v4120_v43 = vmul.f32 %v4119_v11, %v9975_v24  ;;  %v3964_v18 = vsub.f32 1.0, %v3963_v29  ;;  %v4068_v57 = vadd.f32 0.18741608, %v4067_v21  ;;  %v10097_v3 = vadd.f32 1.1283791, %v3949_v51 }
 0x648   : > { %v4083_v49 = vmul.f32 %v10072_v14, %v10021_v7  ;;  %v3971_v27 = vand.u32 2147483647, %v9997_v37  ;;  %v4107_v46 = vmul.f32 %v4106_v36, %v9975_v24  ;;  %v10102_v0 = vor.u32 1.1754944e-38, %v3973_v15 }
 0x649   : > { %v10095_v20 = vadd.f32 1.0, %v4120_v43  ;;  %v4005_v54 = vmul.f32 %v10045_v4, %v4004_v6  ;;  %v4028_v31 = vadd.f32 0.18741608, %v4027_v40  ;;  %v10107_v1 = vadd.f32 %v10023_v38, %v3925_v19 }
 0x64a   : > { %v4084_v59 = vsub.f32 1.0, %v4083_v49  ;;  %v10109_v43 = vadd.f32 1.1283791, %v3989_v44  ;;  %v4045_v51 = vmul.f32 %v10056_v55, %v4044_v48  ;;  %v4325_v62 = vsel %vm11592_vm12, %v4287_v9, 0.0 }
 0x64b   : > { %5950 = vrcp.f32 %v10095_v20  ;;  %vm3928_vm13 = vweird.f32 %v10023_v38  ;;  %vm3967_vm2 = vweird.f32 %v9997_v37  ;;  %vm3968_vm10 = vweird.f32 %v10062_v25 }
 0x64c   : > { %v4085_v11 = vmul.f32 %v10072_v14, %v4084_v59  ;;  %v3965_v59 = vmul.f32 %v10062_v25, %v3964_v18  ;;  %vm4007_vm1 = vweird.f32 %v9985_v34  ;;  %v4069_v6 = vmul.f32 %v4068_v57, %v9901_v58 }
 0x64d   : > { %vm4008_vm4 = vweird.f32 %v10045_v4  ;;  %vm4088_vm5 = vweird.f32 %v10072_v14  ;;  %v4108_v48 = vadd.f32 0.18741608, %v4107_v46  ;;  %vm3927_vm3 = vweird.f32 %v9971_v10  ;;  %4326 = vadd.xlane.f32.xlu2 %v4325_v62  ;;  %v11611_v62 = vld [vmem:[#allocation31_spill] sm:$0xff] }
 0x64e   : > { %v4086_v44 = vadd.f32 %v10072_v14, %v4085_v11  ;;  %v4006_v29 = vadd.f32 %v10045_v4, %v4005_v54  ;;  %v4029_v21 = vmul.f32 %v4028_v31, %v9885_v61  ;;  %v4051_v49 = vand.u32 2147483647, %v9991_v63  ;;  %vm10148_vm14 = vmor %vm4007_vm1, %vm4008_vm4 }
 0x64f   : > { %v4093_v15 = vand.u32 2147483648, %v10021_v7  ;;  %v4046_v58 = vadd.f32 %v10056_v55, %v4045_v51  ;;  %vm4048_vm11 = vweird.f32 %v10056_v55  ;;  %vm4087_vm7 = vweird.f32 %v10021_v7 }
 0x650   : > { %v4091_v36 = vand.u32 2147483647, %v10021_v7  ;;  %v4011_v19 = vand.u32 2147483647, %v9985_v34  ;;  %v4013_v9 = vand.u32 2147483648, %v9985_v34  ;;  %v4053_v61 = vand.u32 2147483648, %v9991_v63  ;;  %vm10136_vm9 = vmor %vm4087_vm7, %vm4088_vm5 }
 0x651   : > { %v5951_v40 = vpop.eup %5950  ;;  %v4070_v18 = vadd.f32 1.1283791, %v4069_v6  ;;  %vm10140_vm6 = vcmp.eq.f32.partialorder %v3971_v27, 8.507059e+37  ;;  %vm4047_vm12 = vweird.f32 %v9991_v63  ;;  %v4090_v46 = vsel %vm10136_vm9, %v10072_v14, %v4086_v44 }
 0x652   : > { %v4109_v54 = vmul.f32 %v4108_v48, %v9975_v24  ;;  %v4123_v27 = vmul.f32 %v5951_v40, %v10095_v20  ;;  %v3966_v31 = vadd.f32 %v10062_v25, %v3965_v59  ;;  %v4010_v34 = vsel %vm10148_vm14, %v10045_v4, %v4006_v29  ;;  %vm10164_vm1 = vmor %vm4047_vm12, %vm4048_vm11 }
 0x653   : > { %v4030_v51 = vadd.f32 1.1283791, %v4029_v21  ;;  %v4094_v63 = vor.u32 1.1754944e-38, %v4093_v15  ;;  %v4050_v24 = vsel %vm10164_vm1, %v10056_v55, %v4046_v58  ;;  %vm4052_vm4 = vcmp.eq.f32.partialorder %v4051_v49, 8.507059e+37  ;;  %vm10177_vm11 = vmor %vm3967_vm2, %vm3968_vm10 }
 0x654   : > { %vm4092_vm5 = vcmp.eq.f32.partialorder %v4091_v36, 8.507059e+37  ;;  %v4124_v14 = vsub.f32 1.0, %v4123_v27  ;;  %v4054_v59 = vor.u32 1.1754944e-38, %v4053_v61  ;;  %v4071_v6 = vmul.f32 %v4070_v18, %v9872_v45  ;;  %vm10189_vm2 = vmor %vm3927_vm3, %vm3928_vm13 }
 0x655   : > { %v4095_v44 = vsel %vm4092_vm5, %v4094_v63, %v4090_v46  ;;  %v4133_v4 = vand.u32 2147483648, %v10095_v20  ;;  %v4110_v29 = vadd.f32 1.1283791, %v4109_v54  ;;  %vm4128_vm7 = vweird.f32 %v5951_v40 }
 0x656   : > { %v4125_v21 = vmul.f32 %v5951_v40, %v4124_v14  ;;  %v4131_v55 = vand.u32 2147483647, %v10095_v20  ;;  %v3970_v45 = vsel %vm10177_vm11, %v10062_v25, %v3966_v31  ;;  %vm4012_vm9 = vcmp.eq.f32.partialorder %v4011_v19, 8.507059e+37 }
 0x657   : > { %v4014_v49 = vor.u32 1.1754944e-38, %v4013_v9  ;;  %v4055_v15 = vsel %vm4052_vm4, %v4054_v59, %v4050_v24  ;;  %v4031_v58 = vmul.f32 %v4030_v51, %v9866_v12  ;;  %v4096_v36 = vmul.f32 %v4095_v44, %v4071_v6  ;;  %v11612_v24 = vld [vmem:[#allocation24_spill] sm:$0xff] }
 0x658   : > { %v4126_v61 = vadd.f32 %v5951_v40, %v4125_v21  ;;  %vm4127_vm10 = vweird.f32 %v10095_v20  ;;  %v3930_v25 = vsel %vm10189_vm2, %v10023_v38, %v10107_v1  ;;  %v3991_v19 = vmul.f32 %v10109_v43, %v9832_v17 }
 0x659   : > { %v4015_v9 = vsel %vm4012_vm9, %v4014_v49, %v4010_v34  ;;  %vm4129_vm14 = vmor %vm4127_vm10, %vm4128_vm7  ;;  %v4134_v18 = vor.u32 1.1754944e-38, %v4133_v4  ;;  %v4056_v57 = vmul.f32 %v4055_v15, %v4031_v58  ;;  %v4111_v7 = vmul.f32 %v4110_v29, %v9955_v41  ;;  %v11615_v4 = vld [vmem:[#allocation47_spill] sm:$0xff]  ;;  %v4303_v49 = vpop.xlane.xlu2 %4302  ;;  %v11616_v15 = vld [vmem:[#allocation38_spill] sm:$0xff] }
 0x65a   : > { %v4130_v46 = vsel %vm4129_vm14, %v5951_v40, %v4126_v61  ;;  %vm4132_vm13 = vcmp.eq.f32.partialorder %v4131_v55, 8.507059e+37  ;;  %v11605_v12 = vand.u32 2147483647, %v9971_v10  ;;  %v3951_v20 = vmul.f32 %v10097_v3, %v9820_v33 }
 0x65b   : > { %v3975_v38 = vsel %vm10140_vm6, %v10102_v0, %v3970_v45  ;;  %v4135_v1 = vsel %vm4132_vm13, %v4134_v18, %v4130_v46  ;;  %v4016_v43 = vmul.f32 %v4015_v9, %v3991_v19  ;;  %v5727_v27 = vclamps-f32 %v4096_v36, 1.0  ;;  %v11617_v19 = vld [vmem:[#allocation43_spill] sm:$0xff] }
 0x65c   : > { %vm3932_vm3 = vcmp.eq.f32.partialorder %v11605_v12, 8.507059e+37  ;;  %v4136_v54 = vmul.f32 %v4135_v1, %v4111_v7  ;;  %v11606_v41 = vand.u32 2147483647, %v9846_v56  ;;  %v11607_v40 = vand.u32 2147483648, %v9846_v56 }
 0x65d   : > { %v3935_v17 = vsel %vm3932_vm3, %v10093_v5, %v3930_v25  ;;  %v11608_v31 = vand.u32 2147483647, %v9862_v16  ;;  %v3911_v33 = vmul.f32 %v10051_v42, %v9809_v28  ;;  %v11609_v5 = vsel %vm10036_vm15, %v9915_v35, %v10018_v30 }
 0x65e   : > { %vm3852_vm12 = vcmp.eq.f32.partialorder %v11606_v41, 8.507059e+37  ;;  %v3854_v10 = vor.u32 1.1754944e-38, %v11607_v40  ;;  %v3976_v0 = vmul.f32 %v3975_v38, %v3951_v20  ;;  %v5728_v11 = vclamps-f32 %v4136_v54, 1.0  ;;  %v11618_v38 = vld [vmem:[#allocation27_spill] sm:$0xff]  ;;  %v11619_v54 = vld [vmem:[#allocation26_spill] sm:$0xff] }
 0x65f   : > { %vm3892_vm1 = vcmp.eq.f32.partialorder %v11608_v31, 8.507059e+37  ;;  %v5726_v34 = vclamps-f32 %v4056_v57, 1.0  ;;  %v4373_v56 = vmul.f32 %v9947_v60, %v9903_v26  ;;  %v11610_v16 = vsel %vm10013_vm0, %v9874_v13, %v9950_v50  ;;  %v11614_v13 = vld [vmem:[#allocation45_spill] sm:$0xff] }
 0x660   : > { %v3895_v3 = vsel %vm3892_vm1, %v10041_v23, %v11609_v5  ;;  %v3855_v51 = vsel %vm3852_vm12, %v3854_v10, %v11610_v16  ;;  %v3871_v28 = vmul.f32 %v9931_v53, %v9793_v22  ;;  %v3936_v47 = vmul.f32 %v3935_v17, %v3911_v33  ;;  %v11620_v5 = vld [vmem:[#allocation7_spill] sm:$0xff] }
 0x661   : > { %v3810_v35 = vmul.f32 0.5, %v9945_v52  ;;  %v4146_v30 = vadd.f32 1.0, %v5728_v11  ;;  %v4145_v23 = vadd.f32 1.0, %v5727_v27  ;;  %v5725_v42 = vclamps-f32 %v4016_v43, 1.0 }
 0x662   : > { %5952 = vrsqrt.f32 %v9905_v2  ;;  %v4342_v63 = vmul.f32 %v11611_v62, %v11544_v8  ;;  %v3831_v14 = vmul.f32 %v11613_v32, %v11612_v24  ;;  %v3896_v59 = vmul.f32 %v3895_v3, %v3871_v28  ;;  %v4583_v62 = vld [vmem:[%s11099_s5 + $0x8] sm:$0xff] }
 0x663   : > { %v3809_v50 = vmul.f32 0.5, %v11614_v13  ;;  %v4154_v6 = vmul.f32 %v4146_v30, %v3810_v35  ;;  %v4144_v44 = vadd.f32 1.0, %v5726_v34  ;;  %v5724_v22 = vclamps-f32 %v3976_v0, 1.0  ;;  %v6066_v30 = vld [vmem:[%s11097_s3] sm:$0xff] }
 0x664   : > { %v3856_v53 = vmul.f32 %v3855_v51, %v3831_v14  ;;  %v3808_v52 = vmul.f32 0.5, %v11615_v4  ;;  %v4143_v29 = vadd.f32 1.0, %v5725_v42  ;;  %v5723_v21 = vclamps-f32 %v3936_v47, 1.0  ;;  %v4585_v51 = vld [vmem:[%s11099_s5 + $0x18] sm:$0xff]  ;;  %v4309_v14 = vpop.xlane.xlu0 %4308  ;;  %v10291_v13 = vld [vmem:[%s11102_s8 + $0x2] ss:$0 sm:$0xff] }
 0x665   : > { %4163 = vmatpush.msra.mxu2 %v4154_v6  ;;  %v4153_v48 = vmul.f32 %v4145_v23, %v3809_v50  ;;  %v4374_v55 = vmul.f32 %v9947_v60, %v4373_v56  ;;  %v10242_v45 = vadd.f32 1e-05, %v4342_v63  ;;  %v3807_v37 = vmul.f32 0.5, %v11616_v15  ;;  %v11621_v56 = vld [vmem:[#allocation49_spill] sm:$0xff]  ;;  %v4584_v23 = vld [vmem:[%s11099_s5 + $0x10] sm:$0xff]  ;;  %v11622_v50 = vld [vmem:[#allocation15_spill] sm:$0xff] }
 0x666   : > { %v4152_v58 = vmul.f32 %v4144_v44, %v3808_v52  ;;  %v4142_v36 = vadd.f32 1.0, %v5724_v22  ;;  %v5722_v61 = vclamps-f32 %v3896_v59, 1.0  ;;  %v3806_v9 = vmul.f32 0.5, %v11617_v19  ;;  %v6067_v4 = vld [vmem:[%s11097_s3 + $0x8] sm:$0xff] }
 0x667   : > { %4164 = vmatpush.msra.mxu2 %v4153_v48  ;;  %v4151_v18 = vmul.f32 %v4143_v29, %v3807_v37  ;;  %v4141_v57 = vadd.f32 1.0, %v5723_v21  ;;  %v5721_v7 = vclamps-f32 %v3856_v53, 1.0  ;;  %v4375_v46 = vmul.f32 0.5, %v4374_v55  ;;  %v10308_v29 = vld [vmem:[%s11102_s8 + $0x3] ss:$0 sm:$0xff] }
 0x668   : > { %v10245_v25 = vpop.eup %5952  ;;  %v4343_v12 = vmul.f32 %v4303_v49, %v11544_v8  ;;  %5954 = vrsqrt.f32 %v10242_v45  ;;  %v3805_v1 = vmul.f32 0.5, %v11618_v38  ;;  %v4150_v17 = vmul.f32 %v4142_v36, %v3806_v9 }
 0x669   : > { %4165 = vmatpush.msra.mxu2 %v4152_v58  ;;  %v4383_v20 = vmul.f32 %v10245_v25, %v9905_v2  ;;  %v4140_v43 = vadd.f32 1.0, %v5722_v61  ;;  %v3804_v27 = vmul.f32 0.5, %v11619_v54  ;;  %v4139_v40 = vadd.f32 1.0, %v5721_v7  ;;  %v11623_v58 = vld [vmem:[#allocation39_spill] sm:$0xff] }
 0x66a   : > { %v4149_v41 = vmul.f32 %v4141_v57, %v3805_v1  ;;  %v10254_v10 = vadd.f32 1e-05, %v4343_v12  ;;  %v4376_v31 = vsub.f32 1.5, %v4375_v46  ;;  %v3803_v3 = vmul.f32 0.5, %v11620_v5  ;;  %v11625_v12 = vld [vmem:[#allocation42_spill] sm:$0xff] }
 0x66b   : > { %4166 = vmatpush.msra.mxu2 %v4151_v18  ;;  %v4384_v33 = vmul.f32 %v10245_v25, %v4383_v20  ;;  %v4148_v0 = vmul.f32 %v4140_v43, %v3804_v27  ;;  %v4344_v16 = vmul.f32 %v11621_v56, %v11544_v8  ;;  %vm4379_vm0 = vweird.f32 %v9947_v60  ;;  %v11629_v56 = vld [vmem:[#allocation44_spill] sm:$0xff] }
 0x66c   : > { %v4147_v34 = vmul.f32 %v4139_v40, %v3803_v3  ;;  %5956 = vrsqrt.f32 %v10254_v10  ;;  %v4377_v28 = vmul.f32 %v9947_v60, %v4376_v31  ;;  %vm4378_vm15 = vweird.f32 %v9903_v26  ;;  %v4582_v26 = vld [vmem:[%s11099_s5] sm:$0xff]  ;;  %v11627_v40 = vld [vmem:[#allocation40_spill] sm:$0xff] }
 0x66d   : > { %4167 = vmatpush.msra.mxu2 %v4150_v17  ;;  %v4385_v47 = vmul.f32 0.5, %v4384_v33  ;;  %vm4380_vm6 = vmor %vm4378_vm15, %vm4379_vm0  ;;  %v10278_v42 = vadd.f32 1e-05, %v4344_v16  ;;  %vm4389_vm4 = vweird.f32 %v10245_v25  ;;  %vm4388_vm5 = vweird.f32 %v9905_v2 }
 0x66e   : > { %v10258_v11 = vpop.eup %5954  ;;  %v4381_v63 = vsel %vm4380_vm6, %v9947_v60, %v4377_v28  ;;  %v4345_v60 = vmul.f32 %v4309_v14, %v11544_v8  ;;  %vm4390_vm11 = vmor %vm4388_vm5, %vm4389_vm4  ;;  %vm11624_vm7 = vcmask 261120   ;;  %vm4398_vm9 = vweird.f32 %v10242_v45 }
 0x66f   : > { %4168 = vmatpush.msra.mxu2 %v4149_v41  ;;  %v4393_v35 = vmul.f32 %v10258_v11, %v10242_v45  ;;  %v4386_v24 = vsub.f32 1.5, %v4385_v47  ;;  %v4532_v6 = vmul.f32 %v4381_v63, %v11622_v50  ;;  %5958 = vrsqrt.f32 %v10278_v42  ;;  %vm11626_vm14 = vmmov %vm11624_vm7 }
 0x670   : > { %v4361_v48 = vadd.f32 1e-05, %v4345_v60  ;;  %vm4408_vm13 = vweird.f32 %v10254_v10  ;;  %vm11628_vm1 = vmmov %vm11624_vm7  ;;  %vm4418_vm0 = vweird.f32 %v10278_v42 }
 0x671   : > { %4169 = vmatpush.msra.mxu2 %v4148_v0  ;;  %v4394_v32 = vmul.f32 %v10258_v11, %v4393_v35  ;;  %v4387_v44 = vmul.f32 %v10245_v25, %v4386_v24  ;;  %v4549_v52 = vmul.f32 %v10291_v13, %v4532_v6  ;;  %vm11630_vm4 = vmmov %vm11628_vm1 }
 0x672   : > { %v5957_v59 = vpop.eup %5956  ;;  %5960 = vrsqrt.f32 %v4361_v48  ;;  %vm4428_vm5 = vweird.f32 %v4361_v48 }
 0x673   : > { %4170 = vmatpush.msra.mxu2 %v4147_v34  ;;  %v4403_v22 = vmul.f32 %v5957_v59, %v10254_v10  ;;  %v4395_v53 = vmul.f32 0.5, %v4394_v32  ;;  %v4391_v21 = vsel %vm4390_vm11, %v10245_v25, %v4387_v44  ;;  %v4566_v37 = vadd.f32 %v10308_v29, %v4549_v52  ;;  %v10341_v32 = vpop.xlane.xlu0 %4233 }
 0x674   : > { %5729 = vmatmul.msk.f32.vlgmr.msra.gmra.mxu2 %vm1236_vm8, %v6066_v30  ;;  %v4533_v36 = vmul.f32 %v4391_v21, %v11623_v58  ;;  %vm4409_vm10 = vweird.f32 %v5957_v59 }
 0x675   : > { %4650 = vmatpush.msrb.mxu2 %v4585_v51  ;;  %v4404_v55 = vmul.f32 %v5957_v59, %v4403_v22  ;;  %v4396_v49 = vsub.f32 1.5, %v4395_v53  ;;  %v5959_v15 = vpop.eup %5958  ;;  %vm4410_vm3 = vmor %vm4408_vm13, %vm4409_vm10 }
 0x676   : > { %v4413_v19 = vmul.f32 %v5959_v15, %v10278_v42  ;;  %v4550_v25 = vmul.f32 %v10291_v13, %v4533_v36  ;;  %vm4419_vm12 = vweird.f32 %v5959_v15  ;;  %v11631_v42 = vld [vmem:[#allocation48_spill] sm:$0xff]  ;;  %v11634_v36 = vld [vmem:[#allocation37_spill] sm:$0xff] }
 0x677   : > { %4651 = vmatpush.msrb.mxu2 %v4584_v23  ;;  %v4405_v2 = vmul.f32 0.5, %v4404_v55  ;;  %v4397_v61 = vmul.f32 %v10258_v11, %v4396_v49  ;;  %vm4420_vm15 = vmor %vm4418_vm0, %vm4419_vm12 }
 0x678   : > { %v4414_v57 = vmul.f32 %v5959_v15, %v4413_v19  ;;  %v5961_v7 = vpop.eup %5960  ;;  %v4567_v46 = vadd.f32 %v10308_v29, %v4550_v25  ;;  %vm11635_vm12 = vmmov %vm11628_vm1 }
 0x679   : > { %4652 = vmatpush.msrb.mxu2 %v4583_v62  ;;  %v4406_v9 = vsub.f32 1.5, %v4405_v2  ;;  %v4423_v17 = vmul.f32 %v5961_v7, %v4361_v48  ;;  %vm4429_vm6 = vweird.f32 %v5961_v7 }
 0x67a   : > { %v4415_v1 = vmul.f32 0.5, %v4414_v57  ;;  %vm4430_vm11 = vmor %vm4428_vm5, %vm4429_vm6 }
 0x67b   : > { %4653 = vmatpush.msrb.mxu2 %v4582_v26  ;;  %v4407_v38 = vmul.f32 %v5957_v59, %v4406_v9  ;;  %v4424_v27 = vmul.f32 %v5961_v7, %v4423_v17  ;;  %v11636_v17 = vld [vmem:[#allocation35_spill] sm:$0xff]  ;;  %vm11637_vm6 = vmmov %vm11630_vm4 }
 0x67c   : > { %5730 = vmatmul.msk.f32.gmra.mxu2 %vm1236_vm8, %v6067_v4  ;;  %vm4399_vm8 = vweird.f32 %v10258_v11  ;;  %v4416_v54 = vsub.f32 1.5, %v4415_v1  ;;  %vm11639_vm5 = vmmov %vm11637_vm6 }
 0x67d   : > { %vm4400_vm2 = vmor %vm4398_vm9, %vm4399_vm8  ;;  %v4411_v43 = vsel %vm4410_vm3, %v5957_v59, %v4407_v38  ;;  %v4425_v5 = vmul.f32 0.5, %v4424_v27 }
 0x67e   : > { %v4401_v18 = vsel %vm4400_vm2, %v10258_v11, %v4397_v61  ;;  %v4535_v31 = vmul.f32 %v4411_v43, %v11627_v40  ;;  %v4417_v33 = vmul.f32 %v5959_v15, %v4416_v54  ;;  %v10330_v11 = vpop.xlane.xlu2 %4227  ;;  %vm11632_vm8 = vmmov %vm11628_vm1 }
 0x67f   : > { %v4534_v20 = vmul.f32 %v4401_v18, %v11625_v12  ;;  %v4426_v0 = vsub.f32 1.5, %v4425_v5 }
 0x680   : > { %v4552_v10 = vmul.f32 %v10291_v13, %v4535_v31  ;;  %v4421_v3 = vsel %vm4420_vm15, %v5959_v15, %v4417_v33 }
 0x681   : > { %v4551_v45 = vmul.f32 %v10291_v13, %v4534_v20  ;;  %v4536_v16 = vmul.f32 %v4421_v3, %v11629_v56  ;;  %v4427_v51 = vmul.f32 %v5961_v7, %v4426_v0 }
 0x682   : > { %v4569_v34 = vadd.f32 %v10308_v29, %v4552_v10  ;;  %v11638_v10 = vld [vmem:[#allocation33_spill] sm:$0xff] }
 0x683   : > { %v4568_v41 = vadd.f32 %v10308_v29, %v4551_v45  ;;  %v4553_v28 = vmul.f32 %v10291_v13, %v4536_v16  ;;  %v4431_v47 = vsel %vm4430_vm11, %v5961_v7, %v4427_v51 }
 0x684   : > { %5731 = vmatmul.msk.f32.vlgmr.msrb.gmra.mxu2 %vm11624_vm7, %v4566_v37  ;;  %v4537_v62 = vmul.f32 %v4431_v47, %v11631_v42  ;;  %vm11633_vm7 = vmmov %vm11628_vm1 }
 0x685   : > { %v4570_v23 = vadd.f32 %v10308_v29, %v4553_v28 }
 0x686   : > { %v4554_v24 = vmul.f32 %v10291_v13, %v4537_v62 }
 0x688   : > { %v4571_v26 = vadd.f32 %v10308_v29, %v4554_v24  ;;  %v11642_v24 = vld [vmem:[#allocation22_spill] sm:$0xff] }
 0x68c   : > { %5732 = vmatmul.msk.f32.gmra.mxu2 %vm11626_vm14, %v4567_v46 }
 0x694   : > { %5733 = vmatmul.msk.f32.gmra.mxu2 %vm11628_vm1, %v4568_v41 }
 0x69c   : > { %5734 = vmatmul.msk.f32.gmra.mxu2 %vm11630_vm4, %v4569_v34 }
 0x69e   : > { %v4312_v35 = vpop.xlane.xlu2 %4311 }
 0x69f   : > { %v4346_v30 = vmul.f32 %v4312_v35, %v11544_v8  ;;  %v11640_v35 = vld [vmem:[#allocation9_spill] sm:$0xff] }
 0x6a1   : > { %v4362_v63 = vadd.f32 1e-05, %v4346_v30 }
 0x6a3   : > { %5962 = vrsqrt.f32 %v4362_v63  ;;  %vm4438_vm2 = vweird.f32 %v4362_v63 }
 0x6a4   : > { %5735 = vmatmul.msk.f32.gmra.mxu2 %vm11632_vm8, %v4570_v23 }
 0x6a6   : > { %v4315_v14 = vpop.xlane.xlu1 %4314  ;;  %v10347_v21 = vpop.xlane.xlu2 %4236 }
 0x6a7   : > { %v4347_v59 = vmul.f32 %v4315_v14, %v11544_v8 }
 0x6a9   : > { %v5963_v50 = vpop.eup %5962  ;;  %v4363_v6 = vadd.f32 1e-05, %v4347_v59  ;;  %v6068_v59 = vld [vmem:[%s6149_s15 + $0x70] sm:$0xff] }
 0x6aa   : > { %v4433_v60 = vmul.f32 %v5963_v50, %v4362_v63  ;;  %vm4439_vm9 = vweird.f32 %v5963_v50  ;;  %v4254_v63 = vmul.f32 %v10330_v11, %v11544_v8  ;;  %v11645_v11 = vld [vmem:[#allocation18_spill] sm:$0xff] }
 0x6ab   : > { %5964 = vrsqrt.f32 %v4363_v6  ;;  %vm4440_vm10 = vmor %vm4438_vm2, %vm4439_vm9  ;;  %vm4448_vm13 = vweird.f32 %v4363_v6 }
 0x6ac   : > { %5736 = vmatmul.msk.f32.gmra.mxu2 %vm11633_vm7, %v4571_v26  ;;  %v4434_v44 = vmul.f32 %v5963_v50, %v4433_v60  ;;  %v4318_v53 = vpop.xlane.xlu0 %4317  ;;  %vm11641_vm7 = vmmov %vm11639_vm5 }
 0x6ad   : > { %v4348_v4 = vmul.f32 %v4318_v53, %v11544_v8  ;;  %vm11644_vm9 = vmmov %vm11639_vm5 }
 0x6ae   : > { %v4435_v22 = vmul.f32 0.5, %v4434_v44  ;;  %v4257_v44 = vmul.f32 %v10347_v21, %v11544_v8  ;;  %vm11648_vm2 = vmmov %vm11639_vm5  ;;  %v10399_v21 = vld [vmem:[%s11100_s6] ss:$0 sm:$0xff] }
 0x6af   : > { %v4364_v55 = vadd.f32 1e-05, %v4348_v4  ;;  %v6069_v4 = vld [vmem:[%s6149_s15 + $0x78] sm:$0xff] }
 0x6b0   : > { %v4436_v52 = vsub.f32 1.5, %v4435_v22 }
 0x6b1   : > { %v5965_v48 = vpop.eup %5964  ;;  %5966 = vrsqrt.f32 %v4364_v55  ;;  %vm4458_vm0 = vweird.f32 %v4364_v55 }
 0x6b2   : > { %v4437_v49 = vmul.f32 %v5963_v50, %v4436_v52  ;;  %v4443_v15 = vmul.f32 %v5965_v48, %v4363_v6  ;;  %vm4449_vm14 = vweird.f32 %v5965_v48 }
 0x6b3   : > { %vm4450_vm3 = vmor %vm4448_vm13, %vm4449_vm14 }
 0x6b4   : > { %v4441_v37 = vsel %vm4440_vm10, %v5963_v50, %v4437_v49  ;;  %v4444_v58 = vmul.f32 %v5965_v48, %v4443_v15  ;;  %v11643_v50 = vld [vmem:[#allocation4_spill] sm:$0xff]  ;;  %v11647_v49 = vld [vmem:[#allocation6_spill] sm:$0xff]  ;;  %vm11649_vm10 = vmmov %vm11648_vm2 }
 0x6b5   : > { %v4538_v2 = vmul.f32 %v4441_v37, %v11634_v36  ;;  %v10373_v6 = vsub.f32 %v11643_v50, %v4254_v63  ;;  %v10391_v15 = vsub.f32 %v11647_v49, %v4257_v44  ;;  %vm11650_vm14 = vmmov %vm11648_vm2 }
 0x6b6   : > { %v4445_v61 = vmul.f32 0.5, %v4444_v58  ;;  %vm11651_vm13 = vmmov %vm11648_vm2 }
 0x6b7   : > { %v4555_v19 = vmul.f32 %v10291_v13, %v4538_v2  ;;  %v5967_v9 = vpop.eup %5966  ;;  %v4286_v53 = vmul.f32 %v10373_v6, %v10373_v6  ;;  %v4289_v2 = vmul.f32 %v10391_v15, %v10391_v15 }
 0x6b8   : > { %v4446_v25 = vsub.f32 1.5, %v4445_v61  ;;  %v4321_v18 = vpop.xlane.xlu2 %4320  ;;  %v4453_v46 = vmul.f32 %v5967_v9, %v4364_v55  ;;  %vm4459_vm1 = vweird.f32 %v5967_v9 }
 0x6b9   : > { %v4572_v57 = vadd.f32 %v10308_v29, %v4555_v19  ;;  %v4349_v12 = vmul.f32 %v4321_v18, %v11544_v8  ;;  %vm4460_vm15 = vmor %vm4458_vm0, %vm4459_vm1  ;;  %v4322_v37 = vsel %vm11649_vm10, %v4286_v53, 0.0  ;;  %v5415_v53 = vld [vmem:[%s11101_s7 + $0x40] sm:$0xff] }
 0x6ba   : > { %v4447_v7 = vmul.f32 %v5965_v48, %v4446_v25  ;;  %v4454_v38 = vmul.f32 %v5967_v9, %v4453_v46 }
 0x6bb   : > { %5737 = vmatmul.msk.f32.gmra.mxu2 %vm11635_vm12, %v4572_v57  ;;  %v4365_v1 = vadd.f32 1e-05, %v4349_v12 }
 0x6bc   : > { %v4451_v20 = vsel %vm4450_vm3, %v5965_v48, %v4447_v7  ;;  %v4455_v43 = vmul.f32 0.5, %v4454_v38  ;;  %v11646_v48 = vld [vmem:[#allocation23_spill] sm:$0xff] }
 0x6bd   : > { %v4539_v45 = vmul.f32 %v4451_v20, %v11636_v17  ;;  %5968 = vrsqrt.f32 %v4365_v1  ;;  %vm4468_vm11 = vweird.f32 %v4365_v1 }
 0x6be   : > { %v4456_v27 = vsub.f32 1.5, %v4455_v43 }
 0x6bf   : > { %v4556_v54 = vmul.f32 %v10291_v13, %v4539_v45 }
 0x6c0   : > { %v4457_v40 = vmul.f32 %v5967_v9, %v4456_v27 }
 0x6c1   : > { %v4573_v41 = vadd.f32 %v10308_v29, %v4556_v54 }
 0x6c2   : > { %v4461_v33 = vsel %vm4460_vm15, %v5967_v9, %v4457_v40  ;;  %v4331_v9 = vsel %vm11650_vm14, %v4289_v2, 0.0 }
 0x6c3   : > { %5738 = vmatmul.msk.f32.gmra.mxu2 %vm11637_vm6, %v4573_v41  ;;  %v5969_v31 = vpop.eup %5968  ;;  %v4540_v3 = vmul.f32 %v4461_v33, %v11638_v10  ;;  %v5422_v10 = vld [vmem:[%s11101_s7 + $0x78] sm:$0xff] }
 0x6c4   : > { %v4463_v5 = vmul.f32 %v5969_v31, %v4365_v1  ;;  %vm4469_vm4 = vweird.f32 %v5969_v31  ;;  %5425 = vmatpush.msrb.mxu1 %v5422_v10 }
 0x6c5   : > { %v4557_v34 = vmul.f32 %v10291_v13, %v4540_v3  ;;  %vm4470_vm8 = vmor %vm4468_vm11, %vm4469_vm4 }
 0x6c6   : > { %v4464_v0 = vmul.f32 %v5969_v31, %v4463_v5 }
 0x6c7   : > { %v4574_v16 = vadd.f32 %v10308_v29, %v4557_v34 }
 0x6c8   : > { %v4465_v56 = vmul.f32 0.5, %v4464_v0 }
 0x6ca   : > { %v4466_v51 = vsub.f32 1.5, %v4465_v56  ;;  %v5421_v56 = vld [vmem:[%s11101_s7 + $0x70] sm:$0xff] }
 0x6cb   : > { %5739 = vmatmul.msk.f32.gmra.mxu2 %vm11639_vm5, %v4574_v16  ;;  %v5420_v16 = vld [vmem:[%s11101_s7 + $0x68] sm:$0xff]  ;;  %5426 = vmatpush.msrb.mxu1 %v5421_v56 }
 0x6cc   : > { %v4467_v28 = vmul.f32 %v5969_v31, %v4466_v51 }
 0x6cd   : > { %5427 = vmatpush.msrb.mxu1 %v5420_v16 }
 0x6ce   : > { %v4471_v47 = vsel %vm4470_vm8, %v5969_v31, %v4467_v28 }
 0x6cf   : > { %v4541_v30 = vmul.f32 %v4471_v47, %v11640_v35  ;;  %v5419_v47 = vld [vmem:[%s11101_s7 + $0x60] sm:$0xff] }
 0x6d0   : > { %5428 = vmatpush.msrb.mxu1 %v5419_v47 }
 0x6d1   : > { %v4558_v23 = vmul.f32 %v10291_v13, %v4541_v30 }
 0x6d3   : > { %v4575_v42 = vadd.f32 %v10308_v29, %v4558_v23  ;;  %v4256_v29 = vmul.f32 %v10341_v32, %v11544_v8  ;;  %v5418_v23 = vld [vmem:[%s11101_s7 + $0x58] sm:$0xff] }
 0x6d4   : > { %5429 = vmatpush.msrb.mxu1 %v5418_v23 }
 0x6d5   : > { %5740 = vmatmul.msk.f32.gmra.mxu2 %vm11641_vm7, %v4575_v42  ;;  %v10388_v55 = vsub.f32 %v11646_v48, %v4256_v29  ;;  %v5416_v29 = vld [vmem:[%s11101_s7 + $0x48] sm:$0xff] }
 0x6d7   : > { %v4288_v61 = vmul.f32 %v10388_v55, %v10388_v55 }
 0x6d9   : > { %v4328_v18 = vsel %vm11651_vm13, %v4288_v61, 0.0 }
 0x6f7   : > { %v4172_v62 = vpop.f32.mrf.mxu2 }
 0x6f8   : > { %v4173_v14 = vadd.f32 %v4172_v62, %v11642_v24 }
 0x6fa   : > { %v10370_v26 = vadd.f32 %v6068_v59, %v4173_v14 }
 0x6fc   : > { %v4238_v13 = vsel %vm11644_vm9, %v10370_v26, 0.0 }
 0x6fd   : > { %4239 = vadd.xlane.f32.xlu1 %v4238_v13 }
 0x6ff   : > { %v4175_v60 = vpop.f32.mrf.mxu2 }
 0x700   : > { %v4176_v22 = vadd.f32 %v4175_v60, %v11645_v11  ;;  %v5417_v60 = vld [vmem:[%s11101_s7 + $0x50] sm:$0xff] }
 0x701   : > { %5430 = vmatpush.msrb.mxu1 %v5417_v60 }
 0x702   : > { %v10385_v52 = vadd.f32 %v6069_v4, %v4176_v22 }
 0x703   : > { %5431 = vmatpush.msrb.mxu1 %v5416_v29 }
 0x704   : > { %v4241_v32 = vsel %vm11648_vm2, %v10385_v52, 0.0 }
 0x705   : > { %4242 = vadd.xlane.f32.xlu0 %v4241_v32  ;;  %4323 = vadd.xlane.f32.xlu1 %v4322_v37 }
 0x706   : > { %5432 = vmatpush.msrb.mxu1 %v5415_v53 }
 0x707   : > { %v4655_v58 = vpop.f32.mrf.mxu2 }
 0x708   : > { %v10402_v36 = vadd.f32 %v10399_v21, %v4655_v58  ;;  %v5414_v58 = vld [vmem:[%s11101_s7 + $0x38] sm:$0xff] }
 0x709   : > { %5433 = vmatpush.msrb.mxu1 %v5414_v58 }
 0x70a   : > { %v10409_v19 = vmul.f32 0.70710677, %v10402_v36 }
 0x70c   : > { %v4735_v25 = vmul.f32 %v10409_v19, %v10409_v19 }
 0x70d   : > { %4332 = vadd.xlane.f32.xlu1 %v4331_v9  ;;  %4329 = vadd.xlane.f32.xlu0 %v4328_v18 }
 0x70e   : > { %v4736_v57 = vmin.f32 %v4735_v25, 16.0 }
 0x70f   : > { %v4658_v27 = vpop.f32.mrf.mxu2 }
 0x710   : > { %v4737_v7 = vmul.f32 2.1237322e-06, %v4736_v57  ;;  %v4748_v46 = vmul.f32 3.8918573e-05, %v4736_v57  ;;  %v10428_v30 = vadd.f32 %v10399_v21, %v4658_v27  ;;  %v4327_v27 = vpop.xlane.xlu2 %4326 }
 0x712   : > { %v4738_v12 = vadd.f32 0.00028619796, %v4737_v7  ;;  %v4749_v20 = vadd.f32 0.001143296, %v4748_v46  ;;  %v10434_v13 = vmul.f32 0.70710677, %v10428_v30 }
 0x713   : > { %v5413_v7 = vld [vmem:[%s11101_s7 + $0x30] sm:$0xff] }
 0x714   : > { %v4750_v38 = vmul.f32 %v4749_v20, %v4736_v57  ;;  %v4739_v1 = vmul.f32 %v4738_v12, %v4736_v57  ;;  %v4775_v37 = vmul.f32 %v10434_v13, %v10434_v13  ;;  %5434 = vmatpush.msrb.mxu1 %v5413_v7  ;;  %v5411_v12 = vld [vmem:[%s11101_s7 + $0x20] sm:$0xff] }
 0x716   : > { %v4751_v17 = vadd.f32 0.014752088, %v4750_v38  ;;  %v4740_v43 = vadd.f32 0.0036580483, %v4739_v1  ;;  %v10454_v9 = vmin.f32 %v4775_v37, 16.0  ;;  %v5410_v1 = vld [vmem:[%s11101_s7 + $0x18] sm:$0xff] }
 0x717   : > { %v4661_v0 = vpop.f32.mrf.mxu2 }
 0x718   : > { %v4752_v45 = vmul.f32 %v4751_v17, %v4736_v57  ;;  %v4741_v40 = vmul.f32 %v4740_v43, %v4736_v57  ;;  %v10452_v61 = vadd.f32 %v10399_v21, %v4661_v0  ;;  %v4777_v20 = vmul.f32 2.1237322e-06, %v10454_v9 }
 0x719   : > { %v4351_v0 = vmul.f32 %v4327_v27, %v11544_v8 }
 0x71a   : > { %v4753_v54 = vadd.f32 0.112945676, %v4752_v45  ;;  %v4742_v5 = vadd.f32 0.05243302, %v4741_v40  ;;  %v4703_v40 = vmul.f32 0.5, %v10402_v36  ;;  %v5407_v36 = vld [vmem:[%s11101_s7] sm:$0xff] }
 0x71c   : > { %v4754_v41 = vmul.f32 %v4753_v54, %v4736_v57  ;;  %v4743_v34 = vmul.f32 %v4742_v5, %v4736_v57  ;;  %v5409_v54 = vld [vmem:[%s11101_s7 + $0x10] sm:$0xff] }
 0x71e   : > { %v4755_v31 = vadd.f32 0.4994258, %v4754_v41  ;;  %v4744_v51 = vadd.f32 0.18741608, %v4743_v34  ;;  %v4778_v41 = vadd.f32 0.00028619796, %v4777_v20 }
 0x71f   : > { %v4664_v24 = vpop.f32.mrf.mxu2 }
 0x720   : > { %v4756_v33 = vmul.f32 %v4755_v31, %v4736_v57  ;;  %v4745_v42 = vmul.f32 %v4744_v51, %v4736_v57  ;;  %v10457_v57 = vmul.f32 0.70710677, %v10452_v61  ;;  %v10475_v17 = vadd.f32 %v10399_v21, %v4664_v24 }
 0x721   : > { %v4779_v56 = vmul.f32 %v4778_v41, %v10454_v9 }
 0x722   : > { %v4757_v3 = vadd.f32 1.0, %v4756_v33  ;;  %v4746_v44 = vadd.f32 1.1283791, %v4745_v42  ;;  %v4815_v38 = vmul.f32 %v10457_v57, %v10457_v57  ;;  %v5408_v33 = vld [vmem:[%s11101_s7 + $0x8] sm:$0xff]  ;;  %v10490_v5 = vmul.f32 0.70710677, %v10475_v17 }
 0x723   : > { %v4780_v23 = vadd.f32 0.0036580483, %v4779_v56  ;;  %v4788_v42 = vmul.f32 3.8918573e-05, %v10454_v9 }
 0x724   : > { %5970 = vrcp.f32 %v4757_v3  ;;  %v4769_v63 = vand.u32 2147483648, %v4757_v3  ;;  %v4767_v59 = vand.u32 2147483647, %v4757_v3  ;;  %vm4763_vm12 = vweird.f32 %v4757_v3 }
 0x725   : > { %v4747_v2 = vmul.f32 %v4746_v44, %v10409_v19  ;;  %v5412_v19 = vld [vmem:[%s11101_s7 + $0x28] sm:$0xff]  ;;  %v10484_v31 = vmin.f32 %v4815_v38, 16.0  ;;  %v4781_v60 = vmul.f32 %v4780_v23, %v10454_v9 }
 0x726   : > { %v4770_v22 = vor.u32 1.1754944e-38, %v4769_v63  ;;  %vm4768_vm0 = vcmp.eq.f32.partialorder %v4767_v59, 8.507059e+37  ;;  %5435 = vmatpush.msrb.mxu1 %v5412_v19  ;;  %v4789_v59 = vadd.f32 0.001143296, %v4788_v42 }
 0x727   : > { %v4667_v18 = vpop.f32.mrf.mxu2  ;;  %v4817_v16 = vmul.f32 2.1237322e-06, %v10484_v31  ;;  %v4782_v37 = vadd.f32 0.05243302, %v4781_v60 }
 0x728   : > { %v10478_v45 = vadd.f32 %v10399_v21, %v4667_v18  ;;  %5436 = vmatpush.msrb.mxu1 %v5411_v12  ;;  %v4790_v29 = vmul.f32 %v4789_v59, %v10454_v9 }
 0x729   : > { %v4783_v38 = vmul.f32 %v4782_v37, %v10454_v9 }
 0x72a   : > { %v5971_v28 = vpop.eup %5970  ;;  %5437 = vmatpush.msrb.mxu1 %v5410_v1  ;;  %v10493_v10 = vmul.f32 0.70710677, %v10478_v45 }
 0x72b   : > { %v4759_v35 = vmul.f32 %v5971_v28, %v4757_v3  ;;  %vm4764_vm3 = vweird.f32 %v5971_v28 }
 0x72c   : > { %vm4765_vm1 = vmor %vm4763_vm12, %vm4764_vm3  ;;  %5438 = vmatpush.msrb.mxu1 %v5409_v54  ;;  %v4895_v47 = vmul.f32 %v10493_v10, %v10493_v10 }
 0x72d   : > { %v4760_v62 = vsub.f32 1.0, %v4759_v35  ;;  %v10508_v35 = vadd.f32 1e-05, %v4351_v0 }
 0x72e   : > { %5439 = vmatpush.msrb.mxu1 %v5408_v33  ;;  %v4828_v33 = vmul.f32 3.8918573e-05, %v10484_v31 }
 0x72f   : > { %v4761_v14 = vmul.f32 %v5971_v28, %v4760_v62  ;;  %v4670_v3 = vpop.f32.mrf.mxu2  ;;  %v4818_v62 = vadd.f32 0.00028619796, %v4817_v16  ;;  %5972 = vrsqrt.f32 %v10508_v35 }
 0x730   : > { %v10502_v51 = vadd.f32 %v10399_v21, %v4670_v3  ;;  %5440 = vmatpush.msrb.mxu1 %v5407_v36  ;;  %v4829_v36 = vadd.f32 0.001143296, %v4828_v33 }
 0x731   : > { %v4762_v11 = vadd.f32 %v5971_v28, %v4761_v14  ;;  %v10516_v14 = vmin.f32 %v4895_v47, 16.0  ;;  %v4819_v44 = vmul.f32 %v4818_v62, %v10484_v31 }
 0x732   : > { %v10512_v63 = vmul.f32 0.70710677, %v10502_v51  ;;  %v4830_v62 = vmul.f32 %v4829_v36, %v10484_v31 }
 0x733   : > { %v4766_v4 = vsel %vm4765_vm1, %v5971_v28, %v4762_v11  ;;  %v4855_v28 = vmul.f32 %v10490_v5, %v10490_v5  ;;  %v4897_v53 = vmul.f32 2.1237322e-06, %v10516_v14 }
 0x734   : > { %v4771_v32 = vsel %vm4768_vm0, %v4770_v22, %v4766_v4  ;;  %v4935_v11 = vmul.f32 %v10512_v63, %v10512_v63 }
 0x735   : > { %v4772_v25 = vmul.f32 %v4771_v32, %v4747_v2  ;;  %v10514_v24 = vmin.f32 %v4855_v28, 16.0  ;;  %v4791_v32 = vadd.f32 0.014752088, %v4790_v29  ;;  %v10526_v58 = vpop.eup %5972  ;;  %v4820_v2 = vadd.f32 0.0036580483, %v4819_v44 }
 0x736   : > { %v4898_v19 = vadd.f32 0.00028619796, %v4897_v53  ;;  %v4483_v20 = vmul.f32 %v10526_v58, %v10508_v35 }
 0x737   : > { %v5747_v46 = vclamps-f32 %v4772_v25, 1.0  ;;  %v4857_v22 = vmul.f32 2.1237322e-06, %v10514_v24  ;;  %v10528_v25 = vmin.f32 %v4935_v11, 16.0  ;;  %v4792_v18 = vmul.f32 %v4791_v32, %v10454_v9 }
 0x738   : > { %v4821_v1 = vmul.f32 %v4820_v2, %v10484_v31  ;;  %v4899_v41 = vmul.f32 %v4898_v19, %v10516_v14  ;;  %v4484_v0 = vmul.f32 %v10526_v58, %v4483_v20  ;;  %v4831_v11 = vadd.f32 0.014752088, %v4830_v62 }
 0x739   : > { %v5375_v43 = vadd.f32 1.0, %v5747_v46  ;;  %v4858_v7 = vadd.f32 0.00028619796, %v4857_v22  ;;  %v4793_v12 = vadd.f32 0.112945676, %v4792_v18 }
 0x73a   : > { %v4822_v56 = vadd.f32 0.05243302, %v4821_v1  ;;  %v4900_v23 = vadd.f32 0.0036580483, %v4899_v41  ;;  %v10553_v60 = vmul.f32 0.5, %v4484_v0  ;;  %v4832_v2 = vmul.f32 %v4831_v11, %v10484_v31 }
 0x73b   : > { %v5391_v34 = vmul.f32 %v5375_v43, %v4703_v40  ;;  %v4937_v43 = vmul.f32 2.1237322e-06, %v10528_v25  ;;  %v4794_v54 = vmul.f32 %v4793_v12, %v10454_v9  ;;  %v4859_v27 = vmul.f32 %v4858_v7, %v10514_v24 }
 0x73c   : > { %v4823_v22 = vmul.f32 %v4822_v56, %v10484_v31  ;;  %v4901_v32 = vmul.f32 %v4900_v23, %v10516_v14  ;;  %v4486_v7 = vsub.f32 1.5, %v10553_v60  ;;  %v4833_v12 = vadd.f32 0.112945676, %v4832_v2 }
 0x73d   : > { %5441 = vmatmul.f32.vlgmr.msrb.gmra.mxu1 %v5391_v34  ;;  %v4795_v3 = vadd.f32 0.4994258, %v4794_v54  ;;  %v4784_v34 = vadd.f32 0.18741608, %v4783_v38  ;;  %v4938_v16 = vadd.f32 0.00028619796, %v4937_v43 }
 0x73e   : > { %v4673_v4 = vpop.f32.mrf.mxu2  ;;  %v4860_v47 = vadd.f32 0.0036580483, %v4859_v27  ;;  %v4824_v20 = vadd.f32 0.18741608, %v4823_v22  ;;  %v4902_v54 = vadd.f32 0.05243302, %v4901_v32  ;;  %v4834_v41 = vmul.f32 %v4833_v12, %v10484_v31 }
 0x73f   : > { %v10532_v46 = vadd.f32 %v10399_v21, %v4673_v4  ;;  %v4796_v28 = vmul.f32 %v4795_v3, %v10454_v9  ;;  %v4785_v29 = vmul.f32 %v4784_v34, %v10454_v9  ;;  %v4939_v53 = vmul.f32 %v4938_v16, %v10528_v25 }
 0x740   : > { %v4861_v4 = vmul.f32 %v4860_v47, %v10514_v24  ;;  %v4868_v9 = vmul.f32 3.8918573e-05, %v10514_v24  ;;  %v10572_v3 = vmul.f32 0.5, %v10428_v30  ;;  %v10575_v0 = vmul.f32 0.5, %v10452_v61 }
 0x741   : > { %v10543_v40 = vmul.f32 0.70710677, %v10532_v46  ;;  %v10551_v59 = vadd.f32 1.0, %v4796_v28  ;;  %v4786_v19 = vadd.f32 1.1283791, %v4785_v29  ;;  %v10583_v16 = vmul.f32 0.5, %v10475_v17 }
 0x742   : > { %v4940_v38 = vadd.f32 0.0036580483, %v4939_v53  ;;  %v4869_v1 = vadd.f32 0.001143296, %v4868_v9  ;;  %v4862_v43 = vadd.f32 0.05243302, %v4861_v4  ;;  %v4825_v30 = vmul.f32 %v4824_v20, %v10484_v31 }
 0x743   : > { %v4975_v42 = vmul.f32 %v10543_v40, %v10543_v40  ;;  %5974 = vrcp.f32 %v10551_v59  ;;  %v4787_v56 = vmul.f32 %v4786_v19, %v10434_v13  ;;  %v10586_v28 = vmul.f32 0.5, %v10478_v45 }
 0x744   : > { %v4870_v36 = vmul.f32 %v4869_v1, %v10514_v24  ;;  %v4941_v61 = vmul.f32 %v4940_v38, %v10528_v25  ;;  %v4835_v23 = vadd.f32 0.4994258, %v4834_v41  ;;  %v4863_v62 = vmul.f32 %v4862_v43, %v10514_v24 }
 0x745   : > { %v10561_v37 = vmin.f32 %v4975_v42, 16.0  ;;  %v4903_v60 = vmul.f32 %v4902_v54, %v10516_v14  ;;  %v4809_v45 = vand.u32 2147483648, %v10551_v59  ;;  %v4807_v4 = vand.u32 2147483647, %v10551_v59 }
 0x746   : > { %v4676_v44 = vpop.f32.mrf.mxu2  ;;  %v4871_v42 = vadd.f32 0.014752088, %v4870_v36  ;;  %v4836_v11 = vmul.f32 %v4835_v23, %v10484_v31  ;;  %v4908_v32 = vmul.f32 3.8918573e-05, %v10516_v14  ;;  %v4942_v2 = vadd.f32 0.05243302, %v4941_v61 }
 0x747   : > { %v10565_v18 = vadd.f32 %v10399_v21, %v4676_v44  ;;  %v4977_v27 = vmul.f32 2.1237322e-06, %v10561_v37  ;;  %vm4803_vm6 = vweird.f32 %v10551_v59  ;;  %v10608_v1 = vmul.f32 0.5, %v10502_v51 }
 0x748   : > { %v4872_v22 = vmul.f32 %v4871_v42, %v10514_v24  ;;  %v10603_v19 = vadd.f32 1.0, %v4836_v11  ;;  %v4909_v31 = vadd.f32 0.001143296, %v4908_v32  ;;  %v4810_v54 = vor.u32 1.1754944e-38, %v4809_v45 }
 0x749   : > { %v5975_v33 = vpop.eup %5974  ;;  %v10578_v34 = vmul.f32 0.70710677, %v10565_v18  ;;  %v4978_v29 = vadd.f32 0.00028619796, %v4977_v27  ;;  %v4864_v27 = vadd.f32 0.18741608, %v4863_v62  ;;  %v4943_v51 = vmul.f32 %v4942_v2, %v10528_v25 }
 0x74a   : > { %v4799_v47 = vmul.f32 %v5975_v33, %v10551_v59  ;;  %vm4804_vm15 = vweird.f32 %v5975_v33  ;;  %v4873_v12 = vadd.f32 0.112945676, %v4872_v22  ;;  %5976 = vrcp.f32 %v10603_v19 }
 0x74b   : > { %v5015_v17 = vmul.f32 %v10578_v34, %v10578_v34  ;;  %v4979_v20 = vmul.f32 %v4978_v29, %v10561_v37  ;;  %vm4805_vm4 = vmor %vm4803_vm6, %vm4804_vm15  ;;  %vm4808_vm5 = vcmp.eq.f32.partialorder %v4807_v4, 8.507059e+37  ;;  %v4910_v59 = vmul.f32 %v4909_v31, %v10516_v14 }
 0x74c   : > { %v4800_v13 = vsub.f32 1.0, %v4799_v47  ;;  %v4874_v36 = vmul.f32 %v4873_v12, %v10514_v24  ;;  %v4904_v47 = vadd.f32 0.18741608, %v4903_v60  ;;  %v4826_v60 = vadd.f32 1.1283791, %v4825_v30 }
 0x74d   : > { %v10610_v43 = vmin.f32 %v5015_v17, 16.0  ;;  %v4980_v42 = vadd.f32 0.0036580483, %v4979_v20  ;;  %v4911_v62 = vadd.f32 0.014752088, %v4910_v59  ;;  %v4865_v45 = vmul.f32 %v4864_v27, %v10514_v24 }
 0x74e   : > { %v4679_v44 = vpop.f32.mrf.mxu2  ;;  %v4801_v53 = vmul.f32 %v5975_v33, %v4800_v13  ;;  %v4875_v13 = vadd.f32 0.4994258, %v4874_v36  ;;  %v4948_v17 = vmul.f32 3.8918573e-05, %v10528_v25  ;;  %v4905_v4 = vmul.f32 %v4904_v47, %v10516_v14 }
 0x74f   : > { %v10601_v9 = vadd.f32 %v10399_v21, %v4679_v44  ;;  %v10620_v44 = vmul.f32 %v10526_v58, %v4486_v7  ;;  %v4912_v7 = vmul.f32 %v4911_v62, %v10516_v14  ;;  %v4944_v2 = vadd.f32 0.18741608, %v4943_v51 }
 0x750   : > { %v4802_v38 = vadd.f32 %v5975_v33, %v4801_v53  ;;  %v4876_v22 = vmul.f32 %v4875_v13, %v10514_v24  ;;  %v5977_v53 = vpop.eup %5976  ;;  %v4949_v32 = vadd.f32 0.001143296, %v4948_v17  ;;  %v4981_v12 = vmul.f32 %v4980_v42, %v10561_v37 }
 0x751   : > { %v10615_v23 = vmul.f32 0.70710677, %v10601_v9  ;;  %v4839_v30 = vmul.f32 %v5977_v53, %v10603_v19  ;;  %v4827_v27 = vmul.f32 %v4826_v60, %v10457_v57  ;;  %v4847_v59 = vand.u32 2147483647, %v10603_v19 }
 0x752   : > { %v4806_v41 = vsel %vm4805_vm4, %v5975_v33, %v4802_v38  ;;  %v5017_v33 = vmul.f32 2.1237322e-06, %v10610_v43  ;;  %v10632_v31 = vadd.f32 1.0, %v4876_v22  ;;  %v4950_v24 = vmul.f32 %v4949_v32, %v10528_v25 }
 0x753   : > { %v4811_v61 = vsel %vm4808_vm5, %v4810_v54, %v4806_v41  ;;  %v4913_v54 = vadd.f32 0.112945676, %v4912_v7  ;;  %v4866_v41 = vadd.f32 1.1283791, %v4865_v45  ;;  %v4840_v47 = vsub.f32 1.0, %v4839_v30 }
 0x754   : > { %v4812_v29 = vmul.f32 %v4811_v61, %v4787_v56  ;;  %v5055_v56 = vmul.f32 %v10615_v23, %v10615_v23  ;;  %v5018_v38 = vadd.f32 0.00028619796, %v5017_v33  ;;  %v4849_v51 = vand.u32 2147483648, %v10603_v19 }
 0x755   : > { %5978 = vrcp.f32 %v10632_v31  ;;  %v4841_v42 = vmul.f32 %v5977_v53, %v4840_v47  ;;  %vm4844_vm11 = vweird.f32 %v5977_v53  ;;  %v4914_v13 = vmul.f32 %v4913_v54, %v10516_v14 }
 0x756   : > { %v5748_v11 = vclamps-f32 %v4812_v29, 1.0  ;;  %v10637_v61 = vmin.f32 %v5055_v56, 16.0  ;;  %v4951_v33 = vadd.f32 0.014752088, %v4950_v24  ;;  %v4906_v57 = vadd.f32 1.1283791, %v4905_v4 }
 0x757   : > { %v4945_v62 = vmul.f32 %v4944_v2, %v10528_v25  ;;  %v5019_v17 = vmul.f32 %v5018_v38, %v10610_v43  ;;  %v4842_v60 = vadd.f32 %v5977_v53, %v4841_v42  ;;  %vm4843_vm8 = vweird.f32 %v10603_v19 }
 0x758   : > { %v5376_v20 = vadd.f32 1.0, %v5748_v11  ;;  %v4682_v29 = vpop.f32.mrf.mxu2  ;;  %v4915_v45 = vadd.f32 0.4994258, %v4914_v13  ;;  %v4952_v11 = vmul.f32 %v4951_v33, %v10528_v25  ;;  %v5057_v22 = vmul.f32 2.1237322e-06, %v10637_v61  ;;  %vm4845_vm7 = vmor %vm4843_vm8, %vm4844_vm11 }
 0x759   : > { %vm4848_vm9 = vcmp.eq.f32.partialorder %v4847_v59, 8.507059e+37  ;;  %v4850_v56 = vor.u32 1.1754944e-38, %v4849_v51  ;;  %v10649_v7 = vadd.f32 %v10399_v21, %v4682_v29  ;;  %v4846_v4 = vsel %vm4845_vm7, %v5977_v53, %v4842_v60 }
 0x75a   : > { %v5392_v36 = vmul.f32 %v5376_v20, %v10572_v3  ;;  %v4982_v3 = vadd.f32 0.05243302, %v4981_v12  ;;  %v4916_v32 = vmul.f32 %v4915_v45, %v10516_v14  ;;  %v4953_v2 = vadd.f32 0.112945676, %v4952_v11 }
 0x75b   : > { %v4988_v12 = vmul.f32 3.8918573e-05, %v10561_v37  ;;  %v5979_v20 = vpop.eup %5978  ;;  %v4867_v19 = vmul.f32 %v4866_v41, %v10490_v5  ;;  %v10655_v30 = vmul.f32 %v4906_v57, %v10493_v10  ;;  %v4946_v38 = vadd.f32 1.1283791, %v4945_v62 }
 0x75c   : > { %5444 = vmatmul.f32.gmra.mxu1 %v5392_v36  ;;  %v4851_v54 = vsel %vm4848_vm9, %v4850_v56, %v4846_v4  ;;  %v4983_v24 = vmul.f32 %v4982_v3, %v10561_v37  ;;  %v4879_v21 = vmul.f32 %v5979_v20, %v10632_v31  ;;  %v10659_v47 = vadd.f32 1.0, %v4916_v32 }
 0x75d   : > { %v4852_v36 = vmul.f32 %v4851_v54, %v4827_v27  ;;  %v5020_v53 = vadd.f32 0.0036580483, %v5019_v17  ;;  %v5058_v14 = vadd.f32 0.00028619796, %v5057_v22  ;;  %v4954_v59 = vmul.f32 %v4953_v2, %v10528_v25 }
 0x75e   : > { %v4989_v51 = vadd.f32 0.001143296, %v4988_v12  ;;  %v10663_v5 = vmul.f32 0.70710677, %v10649_v7  ;;  %v4880_v10 = vsub.f32 1.0, %v4879_v21  ;;  %5980 = vrcp.f32 %v10659_v47 }
 0x75f   : > { %v5749_v42 = vclamps-f32 %v4852_v36, 1.0  ;;  %v10667_v41 = vmul.f32 %v4946_v38, %v10512_v63  ;;  %v4887_v27 = vand.u32 2147483647, %v10632_v31  ;;  %v4889_v29 = vand.u32 2147483648, %v10632_v31 }
 0x760   : > { %v4955_v13 = vadd.f32 0.4994258, %v4954_v59  ;;  %v4881_v62 = vmul.f32 %v5979_v20, %v4880_v10  ;;  %vm4884_vm2 = vweird.f32 %v5979_v20  ;;  %v4990_v3 = vmul.f32 %v4989_v51, %v10561_v37 }
 0x761   : > { %v5377_v57 = vadd.f32 1.0, %v5749_v42  ;;  %v4984_v17 = vadd.f32 0.18741608, %v4983_v24  ;;  %v5021_v60 = vmul.f32 %v5020_v53, %v10610_v43  ;;  %vm4883_vm10 = vweird.f32 %v10632_v31 }
 0x762   : > { %v4956_v45 = vmul.f32 %v4955_v13, %v10528_v25  ;;  %v4882_v11 = vadd.f32 %v5979_v20, %v4881_v62  ;;  %v4991_v56 = vadd.f32 0.014752088, %v4990_v3  ;;  %v5059_v4 = vmul.f32 %v5058_v14, %v10637_v61  ;;  %vm4885_vm14 = vmor %vm4883_vm10, %vm4884_vm2 }
 0x763   : > { %v5393_v63 = vmul.f32 %v5377_v57, %v10575_v0  ;;  %v4890_v32 = vor.u32 1.1754944e-38, %v4889_v29  ;;  %v5028_v12 = vmul.f32 3.8918573e-05, %v10610_v43  ;;  %v5095_v31 = vmul.f32 %v10663_v5, %v10663_v5 }
 0x764   : > { %v10678_v2 = vadd.f32 1.0, %v4956_v45  ;;  %v5981_v38 = vpop.eup %5980  ;;  %v4886_v25 = vsel %vm4885_vm14, %v5979_v20, %v4882_v11  ;;  %vm4888_vm13 = vcmp.eq.f32.partialorder %v4887_v27, 8.507059e+37  ;;  %v4992_v0 = vmul.f32 %v4991_v56, %v10561_v37 }
 0x765   : > { %5447 = vmatmul.f32.gmra.mxu1 %v5393_v63  ;;  %v4891_v54 = vsel %vm4888_vm13, %v4890_v32, %v4886_v25  ;;  %v4919_v24 = vmul.f32 %v5981_v38, %v10659_v47  ;;  %v4927_v36 = vand.u32 2147483647, %v10659_v47  ;;  %v4985_v21 = vmul.f32 %v4984_v17, %v10561_v37 }
 0x766   : > { %5982 = vrcp.f32 %v10678_v2  ;;  %v10688_v53 = vadd.f32 0.05243302, %v5021_v60  ;;  %v4892_v14 = vmul.f32 %v4891_v54, %v4867_v19  ;;  %v4929_v20 = vand.u32 2147483648, %v10659_v47 }
 0x767   : > { %v4920_v51 = vsub.f32 1.0, %v4919_v24  ;;  %v4993_v42 = vadd.f32 0.112945676, %v4992_v0  ;;  %v5029_v10 = vadd.f32 0.001143296, %v5028_v12  ;;  %v10694_v29 = vmin.f32 %v5095_v31, 16.0 }
 0x768   : > { %v5060_v27 = vadd.f32 0.0036580483, %v5059_v4  ;;  %v5750_v13 = vclamps-f32 %v4892_v14, 1.0  ;;  %vm4923_vm3 = vweird.f32 %v10659_v47  ;;  %vm4924_vm12 = vweird.f32 %v5981_v38 }
 0x769   : > { %vm10697_vm1 = vcmp.eq.f32.partialorder %v4927_v36, 8.507059e+37  ;;  %v4994_v19 = vmul.f32 %v4993_v42, %v10561_v37  ;;  %v5030_v60 = vmul.f32 %v5029_v10, %v10610_v43  ;;  %v5068_v45 = vmul.f32 3.8918573e-05, %v10637_v61  ;;  %vm4925_vm0 = vmor %vm4923_vm3, %vm4924_vm12 }
 0x76a   : > { %v5378_v62 = vadd.f32 1.0, %v5750_v13  ;;  %v4967_v31 = vand.u32 2147483647, %v10678_v2  ;;  %vm11654_vm15 = vcmask 261120   ;;  %v4969_v24 = vand.u32 2147483648, %v10678_v2 }
 0x76b   : > { %v4995_v56 = vadd.f32 0.4994258, %v4994_v19  ;;  %v10726_v19 = vadd.f32 1.1283791, %v4985_v21  ;;  %v5061_v57 = vmul.f32 %v5060_v27, %v10637_v61  ;;  %vm4963_vm4 = vweird.f32 %v10678_v2  ;;  %vm11655_vm7 = vmmov %vm11654_vm15 }
 0x76c   : > { %v5983_v63 = vpop.eup %5982  ;;  %v5394_v32 = vmul.f32 %v5378_v62, %v10583_v16  ;;  %vm4968_vm11 = vcmp.eq.f32.partialorder %v4967_v31, 8.507059e+37  ;;  %vm4489_vm8 = vweird.f32 %v10526_v58  ;;  %vm4488_vm13 = vweird.f32 %v10508_v35 }
 0x76d   : > { %v4959_v12 = vmul.f32 %v5983_v63, %v10678_v2  ;;  %v4996_v36 = vmul.f32 %v4995_v56, %v10561_v37  ;;  %vm4964_vm6 = vweird.f32 %v5983_v63  ;;  %v5023_v2 = vmul.f32 %v10688_v53, %v10610_v43  ;;  %vm10784_vm3 = vmor %vm4488_vm13, %vm4489_vm8 }
 0x76e   : > { %5450 = vmatmul.f32.gmra.mxu1 %v5394_v32  ;;  %vm4965_vm5 = vmor %vm4963_vm4, %vm4964_vm6  ;;  %v5062_v32 = vadd.f32 0.05243302, %v5061_v57 }
 0x76f   : > { %v4960_v47 = vsub.f32 1.0, %v4959_v12  ;;  %v10720_v10 = vadd.f32 1.0, %v4996_v36  ;;  %v5108_v36 = vmul.f32 3.8918573e-05, %v10694_v29 }
 0x770   : > { %v4240_v33 = vpop.xlane.xlu1 %4239 }
 0x771   : > { %v4258_v22 = vmul.f32 %v4240_v33, %v11544_v8  ;;  %v4921_v33 = vmul.f32 %v5981_v38, %v4920_v51  ;;  %v5031_v51 = vadd.f32 0.014752088, %v5030_v60  ;;  %v4961_v13 = vmul.f32 %v5983_v63, %v4960_v47 }
 0x772   : > { %v5097_v60 = vmul.f32 2.1237322e-06, %v10694_v29  ;;  %vm5003_vm2 = vweird.f32 %v10720_v10 }
 0x773   : > { %v10691_v59 = vsub.f32 %v10370_v26, %v4258_v22  ;;  %v4922_v11 = vadd.f32 %v5981_v38, %v4921_v33  ;;  %v4930_v22 = vor.u32 1.1754944e-38, %v4929_v20  ;;  %v5069_v20 = vadd.f32 0.001143296, %v5068_v45 }
 0x774   : > { %v5032_v37 = vmul.f32 %v5031_v51, %v10610_v43  ;;  %v5098_v47 = vadd.f32 0.00028619796, %v5097_v60  ;;  %v5009_v60 = vand.u32 2147483648, %v10720_v10 }
 0x775   : > { %v4290_v17 = vmul.f32 %v10691_v59, %v10691_v59  ;;  %v4926_v54 = vsel %vm4925_vm0, %v5981_v38, %v4922_v11  ;;  %v5070_v33 = vmul.f32 %v5069_v20, %v10637_v61  ;;  %v4970_v11 = vor.u32 1.1754944e-38, %v4969_v24 }
 0x776   : > { %v4931_v16 = vsel %vm10697_vm1, %v4930_v22, %v4926_v54 }
 0x777   : > { %v4334_v25 = vsel %vm11654_vm15, %v4290_v17, 0.0  ;;  %v4932_v42 = vmul.f32 %v4931_v16, %v10655_v30  ;;  %v4962_v30 = vadd.f32 %v5983_v63, %v4961_v13  ;;  %v5071_v17 = vadd.f32 0.014752088, %v5070_v33 }
 0x778   : > { %v4324_v3 = vpop.xlane.xlu1 %4323  ;;  %v4243_v0 = vpop.xlane.xlu0 %4242  ;;  %4335 = vadd.xlane.f32.xlu2 %v4334_v25  ;;  %v5007_v13 = vand.u32 2147483647, %v10720_v10 }
 0x779   : > { %v4350_v4 = vmul.f32 %v4324_v3, %v11544_v8  ;;  %v4259_v38 = vmul.f32 %v4243_v0, %v11544_v8  ;;  %v5751_v62 = vclamps-f32 %v4932_v42, 1.0  ;;  %v5033_v3 = vadd.f32 0.112945676, %v5032_v37 }
 0x77a   : > { %v4966_v21 = vsel %vm4965_vm5, %v5983_v63, %v4962_v30  ;;  %v5072_v56 = vmul.f32 %v5071_v17, %v10637_v61  ;;  %v5109_v17 = vadd.f32 0.001143296, %v5108_v36  ;;  %vm5008_vm14 = vcmp.eq.f32.partialorder %v5007_v13, 8.507059e+37 }
 0x77b   : > { %v10715_v14 = vadd.f32 1e-05, %v4350_v4  ;;  %v5379_v45 = vadd.f32 1.0, %v5751_v62  ;;  %v10733_v22 = vsub.f32 %v10385_v52, %v4259_v38  ;;  %v5034_v27 = vmul.f32 %v5033_v3, %v10610_v43 }
 0x77c   : > { %v4971_v25 = vsel %vm4968_vm11, %v4970_v11, %v4966_v21  ;;  %v4709_v13 = vmul.f32 0.5, %v10532_v46 }
 0x77d   : > { %5984 = vrsqrt.f32 %v10715_v14  ;;  %v5395_v12 = vmul.f32 %v5379_v45, %v10586_v28  ;;  %v4972_v0 = vmul.f32 %v4971_v25, %v10667_v41  ;;  %v5035_v63 = vadd.f32 0.4994258, %v5034_v27 }
 0x77e   : > { %5986 = vrcp.f32 %v10720_v10  ;;  %v4291_v53 = vmul.f32 %v10733_v22, %v10733_v22  ;;  %v5073_v28 = vadd.f32 0.112945676, %v5072_v56  ;;  %v5063_v25 = vmul.f32 %v5062_v32, %v10637_v61 }
 0x77f   : > { %5453 = vmatmul.f32.gmra.mxu1 %v5395_v12  ;;  %v5752_v41 = vclamps-f32 %v4972_v0, 1.0  ;;  %v5036_v37 = vmul.f32 %v5035_v63, %v10610_v43  ;;  %v5024_v12 = vadd.f32 0.18741608, %v5023_v2  ;;  %v5099_v0 = vmul.f32 %v5098_v47, %v10694_v29 }
 0x780   : > { %v4333_v31 = vpop.xlane.xlu1 %4332  ;;  %v4330_v24 = vpop.xlane.xlu0 %4329  ;;  %v4337_v33 = vsel %vm11655_vm7, %v4291_v53, 0.0  ;;  %v5074_v3 = vmul.f32 %v5073_v28, %v10637_v61  ;;  %v5010_v2 = vor.u32 1.1754944e-38, %v5009_v60  ;;  %vm4478_vm1 = vweird.f32 %v10715_v14 }
 0x781   : > { %v4352_v51 = vmul.f32 %v4330_v24, %v11544_v8  ;;  %v4353_v38 = vmul.f32 %v4333_v31, %v11544_v8  ;;  %v5380_v62 = vadd.f32 1.0, %v5752_v41  ;;  %4338 = vadd.xlane.f32.xlu0 %v4337_v33  ;;  %v10760_v11 = vadd.f32 1.0, %v5036_v37 }
 0x782   : > { %v5075_v63 = vadd.f32 0.4994258, %v5074_v3  ;;  %v5110_v31 = vmul.f32 %v5109_v17, %v10694_v29 }
 0x783   : > { %v10737_v4 = vpop.eup %5984  ;;  %v10756_v57 = vadd.f32 1e-05, %v4352_v51  ;;  %v5396_v21 = vmul.f32 %v5380_v62, %v10608_v1  ;;  %v10763_v56 = vadd.f32 1e-05, %v4353_v38  ;;  %v4987_v1 = vmul.f32 %v10726_v19, %v10543_v40 }
 0x784   : > { %v4473_v54 = vmul.f32 %v10737_v4, %v10715_v14  ;;  %v5987_v16 = vpop.eup %5986  ;;  %v5076_v36 = vmul.f32 %v5075_v63, %v10637_v61  ;;  %v5111_v47 = vadd.f32 0.014752088, %v5110_v31  ;;  %v5025_v40 = vmul.f32 %v5024_v12, %v10610_v43 }
 0x785   : > { %v4999_v20 = vmul.f32 %v5987_v16, %v10720_v10  ;;  %vm5004_vm9 = vweird.f32 %v5987_v16  ;;  %5988 = vrsqrt.f32 %v10756_v57  ;;  %v5100_v10 = vadd.f32 0.0036580483, %v5099_v0 }
 0x786   : > { %v4474_v42 = vmul.f32 %v10737_v4, %v4473_v54  ;;  %5990 = vrcp.f32 %v10760_v11  ;;  %vm5005_vm10 = vmor %vm5003_vm2, %vm5004_vm9  ;;  %v5064_v19 = vadd.f32 0.18741608, %v5063_v25  ;;  %v10780_v41 = vadd.f32 1.0, %v5076_v36 }
 0x787   : > { %v5000_v30 = vsub.f32 1.0, %v4999_v20  ;;  %5456 = vmatmul.f32.gmra.mxu1 %v5396_v21  ;;  %5992 = vrsqrt.f32 %v10763_v56  ;;  %vm4479_vm12 = vweird.f32 %v10737_v4  ;;  %v5112_v43 = vmul.f32 %v5111_v47, %v10694_v29 }
 0x788   : > { %v4475_v45 = vmul.f32 0.5, %v4474_v42  ;;  %v4491_v38 = vsel %vm10784_vm3, %v10526_v58, %v10620_v44  ;;  %v5101_v62 = vmul.f32 %v5100_v10, %v10694_v29  ;;  %5994 = vrcp.f32 %v10780_v41  ;;  %vm10808_vm0 = vmor %vm4478_vm1, %vm4479_vm12 }
 0x789   : > { %v5001_v27 = vmul.f32 %v5987_v16, %v5000_v30  ;;  %v5026_v17 = vadd.f32 1.1283791, %v5025_v40  ;;  %v5065_v60 = vmul.f32 %v5064_v19, %v10637_v61  ;;  %v5049_v14 = vand.u32 2147483648, %v10760_v11 }
 0x78a   : > { %v4476_v24 = vsub.f32 1.5, %v4475_v45  ;;  %v5047_v61 = vand.u32 2147483647, %v10760_v11  ;;  %v5102_v0 = vadd.f32 0.05243302, %v5101_v62  ;;  %v4543_v31 = vmul.f32 %v4491_v38, %v10077_v39 }
 0x78b   : > { %v5002_v54 = vadd.f32 %v5987_v16, %v5001_v27  ;;  %v10777_v51 = vpop.eup %5988  ;;  %v5113_v27 = vadd.f32 0.112945676, %v5112_v43  ;;  %vm5043_vm6 = vweird.f32 %v10760_v11  ;;  %v5066_v10 = vadd.f32 1.1283791, %v5065_v60 }
 0x78c   : > { %v5991_v20 = vpop.eup %5990  ;;  %v4477_v42 = vmul.f32 %v10737_v4, %v4476_v24  ;;  %v4493_v35 = vmul.f32 %v10777_v51, %v10756_v57  ;;  %v5027_v24 = vmul.f32 %v5026_v17, %v10578_v34  ;;  %vm5048_vm5 = vcmp.eq.f32.partialorder %v5047_v61, 8.507059e+37 }
 0x78d   : > { %v5006_v32 = vsel %vm5005_vm10, %v5987_v16, %v5002_v54  ;;  %v5039_v33 = vmul.f32 %v5991_v20, %v10760_v11  ;;  %v10803_v3 = vpop.eup %5992  ;;  %vm5044_vm15 = vweird.f32 %v5991_v20  ;;  %v5114_v63 = vmul.f32 %v5113_v27, %v10694_v29  ;;  %v10832_v16 = vld [vmem:[%s11102_s8 + $0x2] ss:$0 sm:$0xff] }
 0x78e   : > { %v5011_v53 = vsel %vm5008_vm14, %v5010_v2, %v5006_v32  ;;  %v4494_v30 = vmul.f32 %v10777_v51, %v4493_v35  ;;  %v4481_v44 = vsel %vm10808_vm0, %v10737_v4, %v4477_v42  ;;  %v4503_v54 = vmul.f32 %v10803_v3, %v10763_v56  ;;  %v5995_v2 = vpop.eup %5994  ;;  %vm5045_vm4 = vmor %vm5043_vm6, %vm5044_vm15 }
 0x78f   : > { %v5012_v28 = vmul.f32 %v5011_v53, %v4987_v1  ;;  %v5040_v46 = vsub.f32 1.0, %v5039_v33  ;;  %v4542_v4 = vmul.f32 %v4481_v44, %v10373_v6  ;;  %v5050_v32 = vor.u32 1.1754944e-38, %v5049_v14  ;;  %v10841_v33 = vld [vmem:[%s11102_s8 + $0x3] ss:$0 sm:$0xff] }
 0x790   : > { %v4495_v21 = vmul.f32 0.5, %v4494_v30  ;;  %v5115_v47 = vadd.f32 0.4994258, %v5114_v63  ;;  %v5079_v40 = vmul.f32 %v5995_v2, %v10780_v41  ;;  %v5103_v39 = vmul.f32 %v5102_v0, %v10694_v29 }
 0x791   : > { %v5753_v37 = vclamps-f32 %v5012_v28, 1.0  ;;  %v5041_v25 = vmul.f32 %v5991_v20, %v5040_v46  ;;  %v4504_v28 = vmul.f32 %v10803_v3, %v4503_v54  ;;  %vm4499_vm11 = vweird.f32 %v10777_v51 }
 0x792   : > { %v4496_v36 = vsub.f32 1.5, %v4495_v21  ;;  %v5116_v11 = vmul.f32 %v5115_v47, %v10694_v29  ;;  %v5080_v34 = vsub.f32 1.0, %v5079_v40  ;;  %v5087_v35 = vand.u32 2147483647, %v10780_v41 }
 0x793   : > { %v5381_v45 = vadd.f32 1.0, %v5753_v37  ;;  %v5042_v1 = vadd.f32 %v5991_v20, %v5041_v25  ;;  %v5089_v43 = vand.u32 2147483648, %v10780_v41  ;;  %vm5084_vm8 = vweird.f32 %v5995_v2 }
 0x794   : > { %v4497_v42 = vmul.f32 %v10777_v51, %v4496_v36  ;;  %v5117_v38 = vadd.f32 1.0, %v5116_v11  ;;  %v5081_v37 = vmul.f32 %v5995_v2, %v5080_v34  ;;  %v4505_v30 = vmul.f32 0.5, %v4504_v28  ;;  %v10875_v11 = vld [vmem:[%s11102_s8 + $0x4] ss:$0 sm:$0xff] }
 0x795   : > { %v5397_v12 = vmul.f32 %v5381_v45, %v4709_v13  ;;  %v5046_v53 = vsel %vm5045_vm4, %v5991_v20, %v5042_v1  ;;  %v4559_v20 = vmul.f32 %v10832_v16, %v4542_v4  ;;  %vm4498_vm7 = vweird.f32 %v10756_v57 }
 0x796   : > { %v5051_v19 = vsel %vm5048_vm5, %v5050_v32, %v5046_v53  ;;  %5996 = vrcp.f32 %v5117_v38  ;;  %v4710_v17 = vmul.f32 0.5, %v10565_v18  ;;  %vm10848_vm9 = vmor %vm4498_vm7, %vm4499_vm11  ;;  %v5082_v58 = vadd.f32 %v5995_v2, %v5081_v37 }
 0x797   : > { %5459 = vmatmul.f32.gmra.mxu1 %v5397_v12  ;;  %v5052_v6 = vmul.f32 %v5051_v19, %v5027_v24  ;;  %v4576_v62 = vadd.f32 %v10841_v33, %v4559_v20  ;;  %vm5083_vm2 = vweird.f32 %v10780_v41  ;;  %vm11662_vm10 = vcmask 261120  }
 0x798   : > { %v5067_v46 = vmul.f32 %v5066_v10, %v10615_v23  ;;  %v5104_v44 = vadd.f32 0.18741608, %v5103_v39  ;;  %vm5085_vm14 = vmor %vm5083_vm2, %vm5084_vm8  ;;  %v5090_v57 = vor.u32 1.1754944e-38, %v5089_v43  ;;  %v4560_v14 = vmul.f32 %v10832_v16, %v4543_v31 }
 0x799   : > { %v5754_v13 = vclamps-f32 %v5052_v6, 1.0  ;;  %5741 = vmatmul.msk.f32.gmra.mxu2 %vm11662_vm10, %v4576_v62  ;;  %v4501_v21 = vsel %vm10848_vm9, %v10777_v51, %v4497_v42  ;;  %v5086_v27 = vsel %vm5085_vm14, %v5995_v2, %v5082_v58  ;;  %vm5088_vm13 = vcmp.eq.f32.partialorder %v5087_v35, 8.507059e+37  ;;  %vm11663_vm12 = vmmov %vm11662_vm10  ;;  %v11665_v35 = vld [vmem:[#allocation21_spill] sm:$0xff] }
 0x79a   : > { %v4506_v12 = vsub.f32 1.5, %v4505_v30  ;;  %v5091_v25 = vsel %vm5088_vm13, %v5090_v57, %v5086_v27  ;;  %v5105_v0 = vmul.f32 %v5104_v44, %v10694_v29  ;;  %v4544_v23 = vmul.f32 %v4501_v21, %v10388_v55  ;;  %vm11664_vm11 = vmmov %vm11662_vm10  ;;  %v11668_v30 = vld [vmem:[#allocation16_spill] sm:$0xff] }
 0x79b   : > { %v5382_v60 = vadd.f32 1.0, %v5754_v13  ;;  %v5092_v41 = vmul.f32 %v5091_v25, %v5067_v46  ;;  %v4577_v31 = vadd.f32 %v10841_v33, %v4560_v14  ;;  %vm4509_vm3 = vweird.f32 %v10803_v3  ;;  %vm11666_vm8 = vmmov %vm11662_vm10  ;;  %v11670_v46 = vld [vmem:[#allocation25_spill] sm:$0xff] }
 0x79c   : > { %v5997_v61 = vpop.eup %5996  ;;  %v4507_v1 = vmul.f32 %v10803_v3, %v4506_v12  ;;  %v4711_v51 = vmul.f32 0.5, %v10601_v9  ;;  %v5106_v24 = vadd.f32 1.1283791, %v5105_v0  ;;  %vm4508_vm1 = vweird.f32 %v10763_v56  ;;  %vm11667_vm7 = vmmov %vm11666_vm8  ;;  %v11672_v12 = vld [vmem:[#allocation19_spill] sm:$0xff] }
 0x79d   : > { %v5398_v18 = vmul.f32 %v5382_v60, %v4710_v17  ;;  %v5755_v54 = vclamps-f32 %v5092_v41, 1.0  ;;  %v5119_v63 = vmul.f32 %v5997_v61, %v5117_v38  ;;  %v5129_v29 = vand.u32 2147483648, %v5117_v38  ;;  %vm4510_vm0 = vmor %vm4508_vm1, %vm4509_vm3 }
 0x79e   : > { %v4561_v55 = vmul.f32 %v10832_v16, %v4544_v23  ;;  %vm5124_vm15 = vweird.f32 %v5997_v61  ;;  %v5127_v47 = vand.u32 2147483647, %v5117_v38  ;;  %v4511_v10 = vsel %vm4510_vm0, %v10803_v3, %v4507_v1  ;;  %vm11669_vm9 = vmmov %vm11667_vm7 }
 0x79f   : > { %5462 = vmatmul.f32.gmra.mxu1 %v5398_v18  ;;  %v5383_v4 = vadd.f32 1.0, %v5755_v54  ;;  %v5120_v2 = vsub.f32 1.0, %v5119_v63  ;;  %vm5123_vm6 = vweird.f32 %v5117_v38  ;;  %v5107_v9 = vmul.f32 %v5106_v24, %v10663_v5  ;;  %vm11671_vm2 = vmmov %vm11667_vm7 }
 0x7a0   : > { %vm5125_vm4 = vmor %vm5123_vm6, %vm5124_vm15  ;;  %v5130_v40 = vor.u32 1.1754944e-38, %v5129_v29  ;;  %v4545_v56 = vmul.f32 %v4511_v10, %v10391_v15  ;;  %vm5128_vm5 = vcmp.eq.f32.partialorder %v5127_v47, 8.507059e+37  ;;  %v4578_v19 = vadd.f32 %v10841_v33, %v4561_v55 }
 0x7a1   : > { %5742 = vmatmul.msk.f32.gmra.mxu2 %vm11663_vm12, %v4577_v31  ;;  %v5399_v32 = vmul.f32 %v5383_v4, %v4711_v51  ;;  %v5121_v36 = vmul.f32 %v5997_v61, %v5120_v2  ;;  %v4712_v15 = vmul.f32 0.5, %v10649_v7  ;;  %vm11673_vm10 = vmmov %vm11671_vm2  ;;  %v11674_v31 = vld [vmem:[#allocation32_spill] sm:$0xff] }
 0x7a2   : > { %v4562_v5 = vmul.f32 %v10832_v16, %v4545_v56  ;;  %vm11675_vm14 = vmmov %vm11671_vm2 }
 0x7a3   : > { %v5122_v53 = vadd.f32 %v5997_v61, %v5121_v36  ;;  %v11676_v36 = vld [vmem:[#allocation41_spill] sm:$0xff]  ;;  %vm11677_vm13 = vmmov %vm11671_vm2 }
 0x7a4   : > { %v4579_v13 = vadd.f32 %v10841_v33, %v4562_v5 }
 0x7a5   : > { %v5126_v39 = vsel %vm5125_vm4, %v5997_v61, %v5122_v53  ;;  %vm11679_vm4 = vmmov %vm11671_vm2 }
 0x7a6   : > { %v5131_v28 = vsel %vm5128_vm5, %v5130_v40, %v5126_v39  ;;  %vm11680_vm5 = vmmov %vm11671_vm2 }
 0x7a7   : > { %5465 = vmatmul.f32.gmra.mxu1 %v5399_v32  ;;  %v5132_v3 = vmul.f32 %v5131_v28, %v5107_v9 }
 0x7a9   : > { %5743 = vmatmul.msk.f32.gmra.mxu2 %vm11664_vm11, %v4578_v19  ;;  %v5756_v6 = vclamps-f32 %v5132_v3, 1.0  ;;  %v11678_v3 = vld [vmem:[#allocation3_spill] sm:$0xff]  ;;  %vm11682_vm11 = vmmov %vm11671_vm2 }
 0x7ab   : > { %v5384_v42 = vadd.f32 1.0, %v5756_v6 }
 0x7ad   : > { %v5400_v38 = vmul.f32 %v5384_v42, %v4712_v15 }
 0x7af   : > { %5468 = vmatmul.f32.gmra.mxu1 %v5400_v38  ;;  %v11681_v38 = vld [vmem:[#allocation36_spill] sm:$0xff] }
 0x7b1   : > { %5744 = vmatmul.msk.f32.gmra.mxu2 %vm11667_vm7, %v4579_v13  ;;  %vm11685_vm7 = vmmov %vm11671_vm2 }
 0x7ba   : > { %v5442_v34 = vpop.f32.mrf.mxu1 }
 0x7bb   : > { %v5443_v20 = vadd.f32 %v10875_v11, %v5442_v34 }
 0x7bd   : > { %v5490_v43 = vadd.f32 %v5443_v20, %v11665_v35 }
 0x7bf   : > { %5506 = vst.msk [vmem:[%s10885_s10] sm:$0xff] %vm11666_vm8, %v5490_v43  ;;  %vm11683_vm8 = vmmov %vm11671_vm2 }
 0x7d9   : > { %v5445_v37 = vpop.f32.mrf.mxu1 }
 0x7da   : > { %v5446_v62 = vadd.f32 %v10875_v11, %v5445_v37 }
 0x7dc   : > { %v5491_v17 = vadd.f32 %v5446_v62, %v11668_v30  ;;  %v11684_v30 = vld [vmem:[#allocation10_spill] sm:$0xff] }
 0x7de   : > { %5507 = vst.msk [vmem:[%s10885_s10 + $0x8] sm:$0xff] %vm11669_vm9, %v5491_v17  ;;  %vm11687_vm9 = vmmov %vm11671_vm2 }
 0x7e2   : > { %v5448_v7 = vpop.f32.mrf.mxu1 }
 0x7e3   : > { %v5449_v45 = vadd.f32 %v10875_v11, %v5448_v7 }
 0x7e5   : > { %v5492_v44 = vadd.f32 %v5449_v45, %v11670_v46  ;;  %v11686_v46 = vld [vmem:[#allocation30_spill] sm:$0xff] }
 0x7e7   : > { %5508 = vst.msk [vmem:[%s10885_s10 + $0x10] sm:$0xff] %vm11671_vm2, %v5492_v44 }
 0x7eb   : > { %v4336_v60 = vpop.xlane.xlu2 %4335  ;;  %v5451_v14 = vpop.f32.mrf.mxu1 }
 0x7ec   : > { %v4354_v58 = vmul.f32 %v4336_v60, %v11544_v8  ;;  %v5452_v18 = vadd.f32 %v10875_v11, %v5451_v14 }
 0x7ee   : > { %v4370_v57 = vadd.f32 1e-05, %v4354_v58  ;;  %v5493_v25 = vadd.f32 %v5452_v18, %v11672_v12 }
 0x7f0   : > { %5998 = vrsqrt.f32 %v4370_v57  ;;  %5509 = vst.msk [vmem:[%s10885_s10 + $0x18] sm:$0xff] %vm11673_vm10, %v5493_v25  ;;  %vm4518_vm12 = vweird.f32 %v4370_v57 }
 0x7f4   : > { %v4339_v21 = vpop.xlane.xlu0 %4338 }
 0x7f5   : > { %v4355_v41 = vmul.f32 %v4339_v21, %v11544_v8 }
 0x7f6   : > { %v5999_v27 = vpop.eup %5998 }
 0x7f7   : > { %v4371_v61 = vadd.f32 1e-05, %v4355_v41  ;;  %v4513_v0 = vmul.f32 %v5999_v27, %v4370_v57  ;;  %vm4519_vm3 = vweird.f32 %v5999_v27 }
 0x7f8   : > { %vm4520_vm1 = vmor %vm4518_vm12, %vm4519_vm3 }
 0x7f9   : > { %6000 = vrsqrt.f32 %v4371_v61  ;;  %v4514_v63 = vmul.f32 %v5999_v27, %v4513_v0  ;;  %vm4528_vm15 = vweird.f32 %v4371_v61 }
 0x7fb   : > { %v4515_v4 = vmul.f32 0.5, %v4514_v63 }
 0x7fc   : > { %v5454_v23 = vpop.f32.mrf.mxu1 }
 0x7fd   : > { %v5455_v54 = vadd.f32 %v10875_v11, %v5454_v23  ;;  %v4516_v55 = vsub.f32 1.5, %v4515_v4 }
 0x7ff   : > { %v5494_v1 = vadd.f32 %v5455_v54, %v11674_v31  ;;  %v6001_v51 = vpop.eup %6000  ;;  %v4517_v10 = vmul.f32 %v5999_v27, %v4516_v55 }
 0x800   : > { %v4523_v2 = vmul.f32 %v6001_v51, %v4371_v61  ;;  %vm4529_vm0 = vweird.f32 %v6001_v51 }
 0x801   : > { %5510 = vst.msk [vmem:[%s10885_s10 + $0x20] sm:$0xff] %vm11675_vm14, %v5494_v1  ;;  %v4521_v9 = vsel %vm4520_vm1, %v5999_v27, %v4517_v10  ;;  %vm4530_vm6 = vmor %vm4528_vm15, %vm4529_vm0 }
 0x802   : > { %v4524_v24 = vmul.f32 %v6001_v51, %v4523_v2  ;;  %v4546_v39 = vmul.f32 %v4521_v9, %v10691_v59 }
 0x804   : > { %v5457_v29 = vpop.f32.mrf.mxu1  ;;  %v4525_v32 = vmul.f32 0.5, %v4524_v24  ;;  %v4563_v34 = vmul.f32 %v10832_v16, %v4546_v39 }
 0x805   : > { %v5458_v8 = vadd.f32 %v10875_v11, %v5457_v29 }
 0x806   : > { %v4526_v53 = vsub.f32 1.5, %v4525_v32  ;;  %v4580_v20 = vadd.f32 %v10841_v33, %v4563_v34 }
 0x807   : > { %v5495_v47 = vadd.f32 %v5458_v8, %v11676_v36 }
 0x808   : > { %v4527_v40 = vmul.f32 %v6001_v51, %v4526_v53  ;;  %5745 = vmatmul.msk.f32.gmra.mxu2 %vm11680_vm5, %v4580_v20 }
 0x809   : > { %5511 = vst.msk [vmem:[%s10885_s10 + $0x28] sm:$0xff] %vm11677_vm13, %v5495_v47 }
 0x80a   : > { %v4531_v28 = vsel %vm4530_vm6, %v6001_v51, %v4527_v40 }
 0x80b   : > { %v4547_v5 = vmul.f32 %v4531_v28, %v10733_v22 }
 0x80d   : > { %v4564_v59 = vmul.f32 %v10832_v16, %v4547_v5  ;;  %v10938_v16 = vld [vmem:[%s11100_s6] ss:$0 sm:$0xff] }
 0x80f   : > { %v4581_v35 = vadd.f32 %v10841_v33, %v4564_v59 }
 0x811   : > { %5746 = vmatmul.msk.f32.gmra.mxu2 %vm11683_vm8, %v4581_v35 }
 0x814   : > { %v5460_v56 = vpop.f32.mrf.mxu1 }
 0x815   : > { %v5461_v19 = vadd.f32 %v10875_v11, %v5460_v56 }
 0x817   : > { %v5496_v6 = vadd.f32 %v5461_v19, %v11678_v3 }
 0x819   : > { %5512 = vst.msk [vmem:[%s10885_s10 + $0x30] sm:$0xff] %vm11679_vm4, %v5496_v6 }
 0x81c   : > { %v5463_v15 = vpop.f32.mrf.mxu1  ;;  %v4685_v43 = vpop.f32.mrf.mxu2 }
 0x81d   : > { %v5464_v42 = vadd.f32 %v10875_v11, %v5463_v15  ;;  %v10941_v33 = vadd.f32 %v10938_v16, %v4685_v43 }
 0x81f   : > { %v5497_v13 = vadd.f32 %v5464_v42, %v11681_v38  ;;  %v10944_v60 = vmul.f32 0.70710677, %v10941_v33 }
 0x821   : > { %5513 = vst.msk [vmem:[%s10885_s10 + $0x38] sm:$0xff] %vm11682_vm11, %v5497_v13  ;;  %v5135_v57 = vmul.f32 %v10944_v60, %v10944_v60 }
 0x823   : > { %v10955_v21 = vmin.f32 %v5135_v57, 16.0 }
 0x824   : > { %v5466_v22 = vpop.f32.mrf.mxu1  ;;  %v4688_v62 = vpop.f32.mrf.mxu2 }
 0x825   : > { %v5467_v37 = vadd.f32 %v10875_v11, %v5466_v22  ;;  %v10951_v14 = vadd.f32 %v10938_v16, %v4688_v62  ;;  %v5137_v41 = vmul.f32 2.1237322e-06, %v10955_v21  ;;  %v5148_v51 = vmul.f32 3.8918573e-05, %v10955_v21 }
 0x827   : > { %v5498_v17 = vadd.f32 %v5467_v37, %v11684_v30  ;;  %v10961_v12 = vmul.f32 0.70710677, %v10951_v14  ;;  %v5138_v63 = vadd.f32 0.00028619796, %v5137_v41  ;;  %v5149_v29 = vadd.f32 0.001143296, %v5148_v51 }
 0x829   : > { %5514 = vst.msk [vmem:[%s10885_s10 + $0x40] sm:$0xff] %vm11685_vm7, %v5498_v17  ;;  %v5175_v61 = vmul.f32 %v10961_v12, %v10961_v12  ;;  %v5139_v24 = vmul.f32 %v5138_v63, %v10955_v21  ;;  %v5150_v36 = vmul.f32 %v5149_v29, %v10955_v21 }
 0x82b   : > { %v10976_v31 = vmin.f32 %v5175_v61, 16.0  ;;  %v5140_v10 = vadd.f32 0.0036580483, %v5139_v24  ;;  %v5151_v53 = vadd.f32 0.014752088, %v5150_v36 }
 0x82c   : > { %v4691_v7 = vpop.f32.mrf.mxu2  ;;  %v5469_v45 = vpop.f32.mrf.mxu1 }
 0x82d   : > { %v5470_v58 = vadd.f32 %v10875_v11, %v5469_v45  ;;  %v10972_v23 = vadd.f32 %v10938_v16, %v4691_v7  ;;  %v5177_v8 = vmul.f32 2.1237322e-06, %v10976_v31  ;;  %v5188_v56 = vmul.f32 3.8918573e-05, %v10976_v31 }
 0x82e   : > { %v5152_v19 = vmul.f32 %v5151_v53, %v10955_v21  ;;  %v5141_v3 = vmul.f32 %v5140_v10, %v10955_v21 }
 0x82f   : > { %v5499_v44 = vadd.f32 %v5470_v58, %v11686_v46  ;;  %v10981_v4 = vmul.f32 0.70710677, %v10972_v23  ;;  %v5178_v9 = vadd.f32 0.00028619796, %v5177_v8  ;;  %v5189_v5 = vadd.f32 0.001143296, %v5188_v56 }
 0x830   : > { %v5153_v6 = vadd.f32 0.112945676, %v5152_v19  ;;  %v5142_v38 = vadd.f32 0.05243302, %v5141_v3 }
 0x831   : > { %5515 = vst.msk [vmem:[%s10885_s10 + $0x48] sm:$0xff] %vm11687_vm9, %v5499_v44  ;;  %v5215_v32 = vmul.f32 %v10981_v4, %v10981_v4  ;;  %v5179_v34 = vmul.f32 %v5178_v9, %v10976_v31  ;;  %v5190_v42 = vmul.f32 %v5189_v5, %v10976_v31 }
 0x832   : > { %v5154_v15 = vmul.f32 %v5153_v6, %v10955_v21  ;;  %v5143_v44 = vmul.f32 %v5142_v38, %v10955_v21 }
 0x833   : > { %v10991_v39 = vmin.f32 %v5215_v32, 16.0  ;;  %v5191_v22 = vadd.f32 0.014752088, %v5190_v42  ;;  %v5180_v37 = vadd.f32 0.0036580483, %v5179_v34 }
 0x834   : > { %v4694_v18 = vpop.f32.mrf.mxu2  ;;  %v5155_v13 = vadd.f32 0.4994258, %v5154_v15 }
 0x835   : > { %v10958_v27 = vadd.f32 %v10938_v16, %v4694_v18  ;;  %v5217_v59 = vmul.f32 2.1237322e-06, %v10991_v39  ;;  %v5228_v62 = vmul.f32 3.8918573e-05, %v10991_v39  ;;  %v5192_v45 = vmul.f32 %v5191_v22, %v10976_v31 }
 0x836   : > { %v5156_v7 = vmul.f32 %v5155_v13, %v10955_v21  ;;  %v5181_v41 = vmul.f32 %v5180_v37, %v10976_v31 }
 0x837   : > { %v10964_v25 = vmul.f32 0.70710677, %v10958_v27  ;;  %v5218_v30 = vadd.f32 0.00028619796, %v5217_v59  ;;  %v5229_v46 = vadd.f32 0.001143296, %v5228_v62 }
 0x838   : > { %v5157_v57 = vadd.f32 1.0, %v5156_v7  ;;  %v5193_v18 = vadd.f32 0.112945676, %v5192_v45  ;;  %v5182_v24 = vadd.f32 0.05243302, %v5181_v41 }
 0x839   : > { %v5255_v0 = vmul.f32 %v10964_v25, %v10964_v25  ;;  %v5219_v61 = vmul.f32 %v5218_v30, %v10991_v39  ;;  %v5230_v51 = vmul.f32 %v5229_v46, %v10991_v39 }
 0x83a   : > { %6002 = vrcp.f32 %v5157_v57  ;;  %v5183_v9 = vmul.f32 %v5182_v24, %v10976_v31  ;;  %vm5163_vm10 = vweird.f32 %v5157_v57 }
 0x83b   : > { %v10974_v54 = vmin.f32 %v5255_v0, 16.0  ;;  %v5231_v8 = vadd.f32 0.014752088, %v5230_v51 }
 0x83c   : > { %v5184_v15 = vadd.f32 0.18741608, %v5183_v9 }
 0x83d   : > { %v5268_v1 = vmul.f32 3.8918573e-05, %v10974_v54  ;;  %v5257_v35 = vmul.f32 2.1237322e-06, %v10974_v54 }
 0x83e   : > { %v5185_v7 = vmul.f32 %v5184_v15, %v10976_v31 }
 0x83f   : > { %v5269_v2 = vadd.f32 0.001143296, %v5268_v1  ;;  %v5258_v58 = vadd.f32 0.00028619796, %v5257_v35  ;;  %v5194_v1 = vmul.f32 %v5193_v18, %v10976_v31 }
 0x840   : > { %v6003_v10 = vpop.eup %6002 }
 0x841   : > { %v5270_v55 = vmul.f32 %v5269_v2, %v10974_v54  ;;  %v5259_v63 = vmul.f32 %v5258_v58, %v10974_v54  ;;  %v5144_v2 = vadd.f32 0.18741608, %v5143_v44  ;;  %v5195_v29 = vadd.f32 0.4994258, %v5194_v1 }
 0x842   : > { %vm5164_vm2 = vweird.f32 %v6003_v10  ;;  %v5186_v1 = vadd.f32 1.1283791, %v5185_v7 }
 0x843   : > { %v5271_v47 = vadd.f32 0.014752088, %v5270_v55  ;;  %v5220_v55 = vadd.f32 0.0036580483, %v5219_v61  ;;  %v5260_v32 = vadd.f32 0.0036580483, %v5259_v63  ;;  %v5196_v36 = vmul.f32 %v5195_v29, %v10976_v31  ;;  %vm5165_vm14 = vmor %vm5163_vm10, %vm5164_vm2 }
 0x844   : > { %v5145_v53 = vmul.f32 %v5144_v2, %v10955_v21  ;;  %v5167_v21 = vand.u32 2147483647, %v5157_v57  ;;  %v4713_v29 = vmul.f32 0.5, %v10941_v33 }
 0x845   : > { %v5272_v40 = vmul.f32 %v5271_v47, %v10974_v54  ;;  %v5232_v47 = vmul.f32 %v5231_v8, %v10991_v39  ;;  %v5197_v56 = vadd.f32 1.0, %v5196_v36  ;;  %v5261_v3 = vmul.f32 %v5260_v32, %v10974_v54 }
 0x846   : > { %v5146_v34 = vadd.f32 1.1283791, %v5145_v53  ;;  %vm5168_vm13 = vcmp.eq.f32.partialorder %v5167_v21, 8.507059e+37  ;;  %v5187_v53 = vmul.f32 %v5186_v1, %v10961_v12  ;;  %v4714_v12 = vmul.f32 0.5, %v10951_v14 }
 0x847   : > { %v5273_v28 = vadd.f32 0.112945676, %v5272_v40  ;;  %v5159_v40 = vmul.f32 %v6003_v10, %v5157_v57  ;;  %v5233_v19 = vadd.f32 0.112945676, %v5232_v47  ;;  %v5262_v38 = vadd.f32 0.05243302, %v5261_v3 }
 0x848   : > { %v5209_v2 = vand.u32 2147483648, %v5197_v56  ;;  %v5207_v31 = vand.u32 2147483647, %v5197_v56  ;;  %vm5203_vm12 = vweird.f32 %v5197_v56 }
 0x849   : > { %v5274_v20 = vmul.f32 %v5273_v28, %v10974_v54  ;;  %v5221_v28 = vmul.f32 %v5220_v55, %v10991_v39  ;;  %v5160_v6 = vsub.f32 1.0, %v5159_v40  ;;  %v5234_v59 = vmul.f32 %v5233_v19, %v10991_v39 }
 0x84a   : > { %v5263_v18 = vmul.f32 %v5262_v38, %v10974_v54  ;;  %vm5208_vm0 = vcmp.eq.f32.partialorder %v5207_v31, 8.507059e+37 }
 0x84b   : > { %v5275_v43 = vadd.f32 0.4994258, %v5274_v20  ;;  %v5169_v20 = vand.u32 2147483648, %v5157_v57  ;;  %v5161_v42 = vmul.f32 %v6003_v10, %v5160_v6  ;;  %v5222_v35 = vadd.f32 0.05243302, %v5221_v28 }
 0x84c   : > { %v5264_v8 = vadd.f32 0.18741608, %v5263_v18 }
 0x84d   : > { %v5276_v17 = vmul.f32 %v5275_v43, %v10974_v54  ;;  %v5235_v43 = vadd.f32 0.4994258, %v5234_v59  ;;  %v5162_v22 = vadd.f32 %v6003_v10, %v5161_v42  ;;  %v5170_v37 = vor.u32 1.1754944e-38, %v5169_v20 }
 0x84e   : > { %v5223_v58 = vmul.f32 %v5222_v35, %v10991_v39  ;;  %v5265_v28 = vmul.f32 %v5264_v8, %v10974_v54 }
 0x84f   : > { %v11008_v0 = vadd.f32 1.0, %v5276_v17  ;;  %v5236_v62 = vmul.f32 %v5235_v43, %v10991_v39  ;;  %v5147_v17 = vmul.f32 %v5146_v34, %v10944_v60  ;;  %v5166_v45 = vsel %vm5165_vm14, %v6003_v10, %v5162_v22 }
 0x850   : > { %v5171_v46 = vsel %vm5168_vm13, %v5170_v37, %v5166_v45  ;;  %v5224_v24 = vadd.f32 0.18741608, %v5223_v58  ;;  %v5210_v10 = vor.u32 1.1754944e-38, %v5209_v2  ;;  %v5266_v42 = vadd.f32 1.1283791, %v5265_v28 }
 0x851   : > { %6004 = vrcp.f32 %v11008_v0  ;;  %v5172_v61 = vmul.f32 %v5171_v46, %v5147_v17  ;;  %v5237_v57 = vadd.f32 1.0, %v5236_v62  ;;  %vm5283_vm6 = vweird.f32 %v11008_v0 }
 0x852   : > { %6006 = vrcp.f32 %v5197_v56  ;;  %v5225_v9 = vmul.f32 %v5224_v24, %v10991_v39  ;;  %v5289_v34 = vand.u32 2147483648, %v11008_v0  ;;  %v5287_v54 = vand.u32 2147483647, %v11008_v0 }
 0x853   : > { %v5757_v51 = vclamps-f32 %v5172_v61, 1.0  ;;  %6008 = vrcp.f32 %v5237_v57  ;;  %v5249_v35 = vand.u32 2147483648, %v5237_v57  ;;  %vm5243_vm8 = vweird.f32 %v5237_v57 }
 0x854   : > { %v5226_v15 = vadd.f32 1.1283791, %v5225_v9  ;;  %v5290_v14 = vor.u32 1.1754944e-38, %v5289_v34  ;;  %vm5288_vm11 = vcmp.eq.f32.partialorder %v5287_v54, 8.507059e+37  ;;  %v5267_v17 = vmul.f32 %v5266_v42, %v10964_v25 }
 0x855   : > { %v5385_v32 = vadd.f32 1.0, %v5757_v51 }
 0x857   : > { %v11020_v5 = vpop.eup %6004  ;;  %v5401_v47 = vmul.f32 %v5385_v32, %v4713_v29 }
 0x858   : > { %v5279_v13 = vmul.f32 %v11020_v5, %v11008_v0  ;;  %v6007_v30 = vpop.eup %6006  ;;  %vm5284_vm15 = vweird.f32 %v11020_v5  ;;  %v5250_v0 = vor.u32 1.1754944e-38, %v5249_v35 }
 0x859   : > { %v5199_v44 = vmul.f32 %v6007_v30, %v5197_v56  ;;  %vm5204_vm3 = vweird.f32 %v6007_v30  ;;  %v6009_v19 = vpop.eup %6008  ;;  %5471 = vmatmul.f32.gmra.mxu1 %v5401_v47  ;;  %vm11040_vm4 = vmor %vm5283_vm6, %vm5284_vm15  ;;  %vm11690_vm15 = vcmask 261120  }
 0x85a   : > { %v5280_v41 = vsub.f32 1.0, %v5279_v13  ;;  %vm5205_vm1 = vmor %vm5203_vm12, %vm5204_vm3  ;;  %v5239_v56 = vmul.f32 %v6009_v19, %v5237_v57  ;;  %vm5244_vm5 = vweird.f32 %v6009_v19  ;;  %v5247_v13 = vand.u32 2147483647, %v5237_v57 }
 0x85b   : > { %v5200_v63 = vsub.f32 1.0, %v5199_v44  ;;  %vm5245_vm7 = vmor %vm5243_vm8, %vm5244_vm5  ;;  %v4715_v44 = vmul.f32 0.5, %v10972_v23 }
 0x85c   : > { %v5281_v55 = vmul.f32 %v11020_v5, %v5280_v41  ;;  %v5240_v59 = vsub.f32 1.0, %v5239_v56  ;;  %vm5248_vm9 = vcmp.eq.f32.partialorder %v5247_v13, 8.507059e+37  ;;  %vm11692_vm6 = vmmov %vm11690_vm15 }
 0x85d   : > { %v5201_v60 = vmul.f32 %v6007_v30, %v5200_v63  ;;  %v4716_v63 = vmul.f32 0.5, %v10958_v27 }
 0x85e   : > { %v5282_v33 = vadd.f32 %v11020_v5, %v5281_v55  ;;  %v5241_v38 = vmul.f32 %v6009_v19, %v5240_v59 }
 0x85f   : > { %v5202_v36 = vadd.f32 %v6007_v30, %v5201_v60 }
 0x860   : > { %v5286_v21 = vsel %vm11040_vm4, %v11020_v5, %v5282_v33  ;;  %v5242_v37 = vadd.f32 %v6009_v19, %v5241_v38  ;;  %vm11693_vm4 = vmmov %vm11692_vm6 }
 0x861   : > { %v5206_v40 = vsel %vm5205_vm1, %v6007_v30, %v5202_v36  ;;  %v5291_v62 = vsel %vm5288_vm11, %v5290_v14, %v5286_v21  ;;  %v5227_v30 = vmul.f32 %v5226_v15, %v10981_v4  ;;  %vm11694_vm5 = vmmov %vm11693_vm4 }
 0x862   : > { %v5211_v3 = vsel %vm5208_vm0, %v5210_v10, %v5206_v40  ;;  %v5246_v7 = vsel %vm5245_vm7, %v6009_v19, %v5242_v37  ;;  %v5292_v45 = vmul.f32 %v5291_v62, %v5267_v17  ;;  %vm11695_vm11 = vmmov %vm11693_vm4 }
 0x863   : > { %v5212_v6 = vmul.f32 %v5211_v3, %v5187_v53  ;;  %v5251_v5 = vsel %vm5248_vm9, %v5250_v0, %v5246_v7  ;;  %vm11696_vm8 = vmmov %vm11693_vm4 }
 0x864   : > { %v5252_v58 = vmul.f32 %v5251_v5, %v5227_v30  ;;  %v5760_v41 = vclamps-f32 %v5292_v45, 1.0 }
 0x865   : > { %v5758_v20 = vclamps-f32 %v5212_v6, 1.0 }
 0x866   : > { %v5759_v46 = vclamps-f32 %v5252_v58, 1.0  ;;  %v5388_v57 = vadd.f32 1.0, %v5760_v41 }
 0x867   : > { %v5386_v43 = vadd.f32 1.0, %v5758_v20 }
 0x868   : > { %v5387_v18 = vadd.f32 1.0, %v5759_v46  ;;  %v5404_v1 = vmul.f32 %v5388_v57, %v4716_v63 }
 0x869   : > { %v5402_v22 = vmul.f32 %v5386_v43, %v4714_v12 }
 0x86a   : > { %v5403_v61 = vmul.f32 %v5387_v18, %v4715_v44 }
 0x86b   : > { %5474 = vmatmul.f32.gmra.mxu1 %v5402_v22 }
 0x873   : > { %5477 = vmatmul.f32.gmra.mxu1 %v5403_v61 }
 0x87b   : > { %5480 = vmatmul.f32.gmra.mxu1 %v5404_v1 }
 0x88b   : > { %v4697_v4 = vpop.f32.mrf.mxu2 }
 0x88c   : > { %v11053_v25 = vadd.f32 %v10938_v16, %v4697_v4 }
 0x88e   : > { %v4733_v51 = vmul.f32 0.70710677, %v11053_v25 }
 0x890   : > { %v5295_v2 = vmul.f32 %v4733_v51, %v4733_v51 }
 0x892   : > { %v5296_v24 = vmin.f32 %v5295_v2, 16.0 }
 0x894   : > { %v5297_v60 = vmul.f32 2.1237322e-06, %v5296_v24  ;;  %v5308_v31 = vmul.f32 3.8918573e-05, %v5296_v24  ;;  %v4700_v32 = vpop.f32.mrf.mxu2 }
 0x895   : > { %v11057_v27 = vadd.f32 %v10938_v16, %v4700_v32 }
 0x896   : > { %v5298_v23 = vadd.f32 0.00028619796, %v5297_v60  ;;  %v5309_v29 = vadd.f32 0.001143296, %v5308_v31  ;;  %v4717_v31 = vmul.f32 0.5, %v11053_v25 }
 0x897   : > { %v11060_v53 = vmul.f32 0.70710677, %v11057_v27 }
 0x898   : > { %v5299_v8 = vmul.f32 %v5298_v23, %v5296_v24  ;;  %v5310_v55 = vmul.f32 %v5309_v29, %v5296_v24 }
 0x899   : > { %v5335_v19 = vmul.f32 %v11060_v53, %v11060_v53 }
 0x89a   : > { %v5300_v36 = vadd.f32 0.0036580483, %v5299_v8  ;;  %v5311_v47 = vadd.f32 0.014752088, %v5310_v55 }
 0x89b   : > { %v5336_v33 = vmin.f32 %v5335_v19, 16.0 }
 0x89c   : > { %v5312_v10 = vmul.f32 %v5311_v47, %v5296_v24  ;;  %v5301_v9 = vmul.f32 %v5300_v36, %v5296_v24 }
 0x89d   : > { %v5337_v56 = vmul.f32 2.1237322e-06, %v5336_v33  ;;  %v5348_v34 = vmul.f32 3.8918573e-05, %v5336_v33 }
 0x89e   : > { %v5313_v40 = vadd.f32 0.112945676, %v5312_v10  ;;  %v5302_v3 = vadd.f32 0.05243302, %v5301_v9 }
 0x89f   : > { %v5338_v39 = vadd.f32 0.00028619796, %v5337_v56  ;;  %v5349_v54 = vadd.f32 0.001143296, %v5348_v34 }
 0x8a0   : > { %v5314_v28 = vmul.f32 %v5313_v40, %v5296_v24  ;;  %v5303_v16 = vmul.f32 %v5302_v3, %v5296_v24 }
 0x8a1   : > { %v5339_v59 = vmul.f32 %v5338_v39, %v5336_v33  ;;  %v5350_v15 = vmul.f32 %v5349_v54, %v5336_v33 }
 0x8a2   : > { %v5315_v6 = vadd.f32 0.4994258, %v5314_v28  ;;  %v5304_v21 = vadd.f32 0.18741608, %v5303_v16 }
 0x8a3   : > { %v5351_v42 = vadd.f32 0.014752088, %v5350_v15  ;;  %v5340_v35 = vadd.f32 0.0036580483, %v5339_v59 }
 0x8a4   : > { %v5316_v12 = vmul.f32 %v5315_v6, %v5296_v24  ;;  %v5305_v14 = vmul.f32 %v5304_v21, %v5296_v24  ;;  %v4718_v6 = vmul.f32 0.5, %v11057_v27 }
 0x8a5   : > { %v5352_v43 = vmul.f32 %v5351_v42, %v5336_v33  ;;  %v5341_v22 = vmul.f32 %v5340_v35, %v5336_v33 }
 0x8a6   : > { %v5317_v20 = vadd.f32 1.0, %v5316_v12  ;;  %v5306_v17 = vadd.f32 1.1283791, %v5305_v14 }
 0x8a7   : > { %v5353_v38 = vadd.f32 0.112945676, %v5352_v43  ;;  %v5342_v5 = vadd.f32 0.05243302, %v5341_v22 }
 0x8a8   : > { %6010 = vrcp.f32 %v5317_v20  ;;  %v5329_v7 = vand.u32 2147483648, %v5317_v20  ;;  %v5327_v58 = vand.u32 2147483647, %v5317_v20  ;;  %vm5323_vm10 = vweird.f32 %v5317_v20 }
 0x8a9   : > { %v5354_v62 = vmul.f32 %v5353_v38, %v5336_v33  ;;  %v5343_v61 = vmul.f32 %v5342_v5, %v5336_v33  ;;  %v5307_v57 = vmul.f32 %v5306_v17, %v4733_v51 }
 0x8aa   : > { %v5330_v41 = vor.u32 1.1754944e-38, %v5329_v7  ;;  %vm5328_vm13 = vcmp.eq.f32.partialorder %v5327_v58, 8.507059e+37 }
 0x8ab   : > { %v5355_v30 = vadd.f32 0.4994258, %v5354_v62  ;;  %v5344_v2 = vadd.f32 0.18741608, %v5343_v61 }
 0x8ad   : > { %v5356_v46 = vmul.f32 %v5355_v30, %v5336_v33  ;;  %v5345_v29 = vmul.f32 %v5344_v2, %v5336_v33 }
 0x8ae   : > { %v6011_v13 = vpop.eup %6010 }
 0x8af   : > { %v5319_v37 = vmul.f32 %v6011_v13, %v5317_v20  ;;  %vm5324_vm2 = vweird.f32 %v6011_v13  ;;  %v5357_v18 = vadd.f32 1.0, %v5356_v46  ;;  %v5346_v47 = vadd.f32 1.1283791, %v5345_v29  ;;  %v11691_v20 = vld [vmem:[#allocation29_spill] sm:$0xff] }
 0x8b0   : > { %vm5325_vm14 = vmor %vm5323_vm10, %vm5324_vm2 }
 0x8b1   : > { %v5320_v0 = vsub.f32 1.0, %v5319_v37  ;;  %6012 = vrcp.f32 %v5357_v18  ;;  %v5369_v36 = vand.u32 2147483648, %v5357_v18  ;;  %v5367_v51 = vand.u32 2147483647, %v5357_v18 }
 0x8b2   : > { %vm5363_vm12 = vweird.f32 %v5357_v18  ;;  %v5347_v19 = vmul.f32 %v5346_v47, %v11060_v53 }
 0x8b3   : > { %v5321_v45 = vmul.f32 %v6011_v13, %v5320_v0  ;;  %v5370_v40 = vor.u32 1.1754944e-38, %v5369_v36  ;;  %vm5368_vm0 = vcmp.eq.f32.partialorder %v5367_v51, 8.507059e+37 }
 0x8b5   : > { %v5322_v44 = vadd.f32 %v6011_v13, %v5321_v45 }
 0x8b7   : > { %v5326_v63 = vsel %vm5325_vm14, %v6011_v13, %v5322_v44  ;;  %v6013_v60 = vpop.eup %6012 }
 0x8b8   : > { %v5331_v1 = vsel %vm5328_vm13, %v5330_v41, %v5326_v63  ;;  %v5359_v8 = vmul.f32 %v6013_v60, %v5357_v18  ;;  %vm5364_vm3 = vweird.f32 %v6013_v60 }
 0x8b9   : > { %v5332_v4 = vmul.f32 %v5331_v1, %v5307_v57  ;;  %vm5365_vm1 = vmor %vm5363_vm12, %vm5364_vm3 }
 0x8ba   : > { %v5360_v32 = vsub.f32 1.0, %v5359_v8 }
 0x8bb   : > { %v5761_v24 = vclamps-f32 %v5332_v4, 1.0 }
 0x8bc   : > { %v5361_v10 = vmul.f32 %v6013_v60, %v5360_v32 }
 0x8bd   : > { %v5389_v23 = vadd.f32 1.0, %v5761_v24 }
 0x8be   : > { %v5362_v9 = vadd.f32 %v6013_v60, %v5361_v10 }
 0x8bf   : > { %v5405_v55 = vmul.f32 %v5389_v23, %v4717_v31 }
 0x8c0   : > { %v5366_v28 = vsel %vm5365_vm1, %v6013_v60, %v5362_v9 }
 0x8c1   : > { %5483 = vmatmul.f32.gmra.mxu1 %v5405_v55  ;;  %v5371_v25 = vsel %vm5368_vm0, %v5370_v40, %v5366_v28 }
 0x8c2   : > { %v5372_v33 = vmul.f32 %v5371_v25, %v5347_v19 }
 0x8c4   : > { %v5762_v3 = vclamps-f32 %v5372_v33, 1.0 }
 0x8c6   : > { %v5390_v56 = vadd.f32 1.0, %v5762_v3 }
 0x8c8   : > { %v5406_v34 = vmul.f32 %v5390_v56, %v4718_v6 }
 0x8ca   : > { %5486 = vmatmul.f32.gmra.mxu1 %v5406_v34 }
 0x8d6   : > { %v5472_v12 = vpop.f32.mrf.mxu1 }
 0x8d7   : > { %v5473_v39 = vadd.f32 %v10875_v11, %v5472_v12 }
 0x8d9   : > { %v5500_v54 = vadd.f32 %v5473_v39, %v11643_v50 }
 0x8db   : > { %5516 = vst.msk [vmem:[%s10885_s10 + $0x50] sm:$0xff] %vm11690_vm15, %v5500_v54 }
 0x8e8   : > { %v5475_v53 = vpop.f32.mrf.mxu1 }
 0x8e9   : > { %v5476_v16 = vadd.f32 %v10875_v11, %v5475_v53 }
 0x8eb   : > { %v5501_v59 = vadd.f32 %v5476_v16, %v11691_v20 }
 0x8ed   : > { %5517 = vst.msk [vmem:[%s10885_s10 + $0x58] sm:$0xff] %vm11692_vm6, %v5501_v59 }
 0x8f0   : > { %v5478_v27 = vpop.f32.mrf.mxu1 }
 0x8f1   : > { %v5479_v15 = vadd.f32 %v10875_v11, %v5478_v27 }
 0x8f3   : > { %v5502_v42 = vadd.f32 %v5479_v15, %v11646_v48 }
 0x8f5   : > { %5518 = vst.msk [vmem:[%s10885_s10 + $0x60] sm:$0xff] %vm11693_vm4, %v5502_v42 }
 0x8f8   : > { %v5481_v21 = vpop.f32.mrf.mxu1 }
 0x8f9   : > { %v5482_v50 = vadd.f32 %v10875_v11, %v5481_v21 }
 0x8fb   : > { %v5503_v35 = vadd.f32 %v5482_v50, %v11647_v49 }
 0x8fd   : > { %5519 = vst.msk [vmem:[%s10885_s10 + $0x68] sm:$0xff] %vm11694_vm5, %v5503_v35 }
 0x93e   : > { %v5484_v43 = vpop.f32.mrf.mxu1 }
 0x93f   : > { %v5485_v38 = vadd.f32 %v10875_v11, %v5484_v43 }
 0x941   : > { %v5504_v13 = vadd.f32 %v5485_v38, %v10370_v26 }
 0x943   : > { %5520 = vst.msk [vmem:[%s10885_s10 + $0x70] sm:$0xff] %vm11695_vm11, %v5504_v13 }
 0x947   : > { %v5487_v14 = vpop.f32.mrf.mxu1 }
 0x948   : > { %v5488_v22 = vadd.f32 %v10875_v11, %v5487_v14 }
 0x94a   : > { %v5505_v48 = vadd.f32 %v5488_v22, %v10385_v52 }
 0x94c   : > { %5521 = vst.msk [vmem:[%s10885_s10 + $0x78] sm:$0xff] %vm11696_vm8, %v5505_v48 }
 0x94d PF: > { %s19_s30 = sadd.s32 1, %s6079_s30  }
 0x94e   : > { %p16_p4 = scmp.ge.s32.totalorder %s19_s30, 4  }
 0x950   :  { %18 = sbr.rel (!%p16_p4) target bundleno = 1 (0x1), region = 86 }

</bundles_post_ra>
